<compile_context>
chip_gen: v7x
topology: tpu7x:2x2x1
jax: 0.10.0
libtpu: 0.0.40
codegen_flags: <defaults>
</compile_context>

<pallas_src>
import functools

import jax
import jax.numpy as jnp
from jax.experimental import pallas as pl
from jax.experimental.pallas import tpu as pltpu


# ----------------------------------------------------------------------------
# Kernel 1: hoisted x-contribution (all timesteps, gates + candidate fused)
#           grid = (B*T,), fully parallel, no im2col materialization
# ----------------------------------------------------------------------------

def _xconv_kernel(xpad_ref, wx_ref, b_ref, xg_ref, xc_ref, *, H, W, Cin, Ch):
    """xpad: (H+2, W+2, Cin) zero-padded x tile for one (b, t).
    Writes the x-side contribution (bias included) of the gate conv (Nb, 2*Ch)
    and the candidate conv (Nb, Ch)."""
    Nb = H * W
    xpad = xpad_ref[...]                                       # (Hp, Wp, Cin)
    acc = jnp.zeros((Nb, 3 * Ch), jnp.float32)
    k = 0
    for dy in range(3):
        for dx in range(3):
            tap = xpad[dy:dy + H, dx:dx + W, :].reshape(Nb, Cin)
            acc = acc + jnp.dot(tap, wx_ref[k],
                                preferred_element_type=jnp.float32)
            k += 1
    res = acc + b_ref[...]                                     # bias broadcast (1, 3*Ch)
    xg_ref[...] = res[:, :2 * Ch]
    xc_ref[...] = res[:, 2 * Ch:]


def _xconv_call(xpad_bt, wx, b, *, H, W, Cin, Ch):
    BT, Hp, Wp, _ = xpad_bt.shape
    Nb = H * W
    kernel = functools.partial(_xconv_kernel, H=H, W=W, Cin=Cin, Ch=Ch)
    return pl.pallas_call(
        kernel,
        out_shape=(jax.ShapeDtypeStruct((BT, Nb, 2 * Ch), jnp.float32),
                   jax.ShapeDtypeStruct((BT, Nb, Ch), jnp.float32)),
        grid_spec=pltpu.PrefetchScalarGridSpec(
            num_scalar_prefetch=0,
            grid=(BT,),
            in_specs=[
                pl.BlockSpec((None, Hp, Wp, Cin), lambda i: (i, 0, 0, 0)),
                pl.BlockSpec((9, Cin, 3 * Ch), lambda i: (0, 0, 0)),
                pl.BlockSpec((1, 3 * Ch), lambda i: (0, 0)),
            ],
            out_specs=(
                pl.BlockSpec((None, Nb, 2 * Ch), lambda i: (i, 0, 0)),
                pl.BlockSpec((None, Nb, Ch), lambda i: (i, 0, 0)),
            ),
        ),
        compiler_params=pltpu.CompilerParams(
            dimension_semantics=("parallel",)),
    )(xpad_bt, wx, b)


# ----------------------------------------------------------------------------
# Kernel 2: full ConvGRU recurrence for one layer in a single pallas_call
#           grid = (B, T); h carried in VMEM scratch; h-side conv in-kernel;
#           output written in padded layout so the next layer consumes it as-is
# ----------------------------------------------------------------------------

def _convgru_seq_kernel(xg_ref, xc_ref, h0pad_ref, whg_ref, whc_ref,
                        outpad_ref, hpad_scr, rhpad_scr, h_scr, *, H, W, Ch):
    t = pl.program_id(1)
    Nb = H * W

    @pl.when(t == 0)
    def _init():
        h0p = h0pad_ref[...]                                   # (Hp, Wp, Ch), zero border
        hpad_scr[...] = h0p
        rhpad_scr[...] = jnp.zeros_like(h0p)
        h_scr[...] = h0p[1:H + 1, 1:W + 1, :].reshape(Nb, Ch)

    def conv3x3_acc(pad_vals, w9_ref, acc):
        """acc + 3x3 'same' conv of the zero-padded state, as 9 tap matmuls."""
        k = 0
        for dy in range(3):
            for dx in range(3):
                tap = pad_vals[dy:dy + H, dx:dx + W, :].reshape(Nb, Ch)
                acc = acc + jnp.dot(tap, w9_ref[k],
                                    preferred_element_type=jnp.float32)
                k += 1
        return acc

    h = h_scr[...]                                             # (Nb, Ch)

    # Gate conv: x-contribution (bias included) streamed in, h-contribution in-kernel.
    g = conv3x3_acc(hpad_scr[...], whg_ref, xg_ref[...])       # (Nb, 2*Ch)
    r = jax.nn.sigmoid(g[:, :Ch])
    u = jax.nn.sigmoid(g[:, Ch:])

    # Candidate conv over [x, r*h]: write r*h into the padded scratch interior.
    rhpad_scr[1:H + 1, 1:W + 1, :] = (r * h).reshape(H, W, Ch)
    c = jnp.tanh(conv3x3_acc(rhpad_scr[...], whc_ref, xc_ref[...]))  # (Nb, Ch)

    h_next = (1.0 - u) * h + u * c
    h_scr[...] = h_next
    hpad_scr[1:H + 1, 1:W + 1, :] = h_next.reshape(H, W, Ch)
    outpad_ref[...] = hpad_scr[...]                            # padded output (zero border)


def _convgru_seq_call(xg, xc, h0pad, wh_g, wh_c, *, B, T, H, W, Ch):
    Nb = H * W
    Hp, Wp = H + 2, W + 2
    kernel = functools.partial(_convgru_seq_kernel, H=H, W=W, Ch=Ch)
    return pl.pallas_call(
        kernel,
        out_shape=jax.ShapeDtypeStruct((B * T, Hp, Wp, Ch), jnp.float32),
        grid_spec=pltpu.PrefetchScalarGridSpec(
            num_scalar_prefetch=0,
            grid=(B, T),
            in_specs=[
                pl.BlockSpec((None, Nb, 2 * Ch), lambda b, t: (b * T + t, 0, 0)),
                pl.BlockSpec((None, Nb, Ch), lambda b, t: (b * T + t, 0, 0)),
                pl.BlockSpec((None, Hp, Wp, Ch), lambda b, t: (b, 0, 0, 0)),
                pl.BlockSpec((9, Ch, 2 * Ch), lambda b, t: (0, 0, 0)),
                pl.BlockSpec((9, Ch, Ch), lambda b, t: (0, 0, 0)),
            ],
            out_specs=pl.BlockSpec((None, Hp, Wp, Ch),
                                   lambda b, t: (b * T + t, 0, 0, 0)),
            scratch_shapes=[
                pltpu.VMEM((Hp, Wp, Ch), jnp.float32),   # padded h (zero border)
                pltpu.VMEM((Hp, Wp, Ch), jnp.float32),   # padded r*h
                pltpu.VMEM((Nb, Ch), jnp.float32),       # flat h
            ],
        ),
        compiler_params=pltpu.CompilerParams(
            dimension_semantics=("parallel", "arbitrary")),
    )(xg, xc, h0pad, wh_g, wh_c)


# ----------------------------------------------------------------------------
# Per-layer glue (both passes); everything between layers stays padded NHWC
# ----------------------------------------------------------------------------

def _run_convgru_layer(xpad_bt, h0pad, p, *, B, T, H, W, Ch):
    """xpad_bt: (B*T, H+2, W+2, Cin) zero-padded inputs; h0pad: (B, H+2, W+2, Ch)
    zero-padded initial hidden.  Returns padded outputs (B*T, H+2, W+2, Ch)."""
    Cin = xpad_bt.shape[-1]
    xg, xc = _xconv_call(xpad_bt, p['wx'], p['b'], H=H, W=W, Cin=Cin, Ch=Ch)
    return _convgru_seq_call(xg, xc, h0pad, p['wh_ru'], p['wh_c'],
                             B=B, T=T, H=H, W=W, Ch=Ch)


def temporal_encdec_g7_forward(x, params):
    """x: (B, T, 32, H, W) float32 (PyTorch layout).
    Returns (gru2 output sequence (B, T, 32, H, W), flatten(gru1 last hidden))."""
    B, T, C, H, W = x.shape
    Ch = 32
    Hp, Wp = H + 2, W + 2

    x_nhwc = jnp.transpose(x, (0, 1, 3, 4, 2)).astype(jnp.float32)
    xpad = jnp.pad(x_nhwc, ((0, 0), (0, 0), (1, 1), (1, 1), (0, 0)))
    xpad_bt = xpad.reshape(B * T, Hp, Wp, C)

    h0pad = jnp.zeros((B, Hp, Wp, Ch), jnp.float32)
    out1p = _run_convgru_layer(xpad_bt, h0pad, params['gru1'],
                               B=B, T=T, H=H, W=W, Ch=Ch)

    out1p_bt = out1p.reshape(B, T, Hp, Wp, Ch)
    h1pad = out1p_bt[:, -1]                                    # (B, Hp, Wp, Ch)

    out2p = _run_convgru_layer(out1p, h1pad, params['gru2'],
                               B=B, T=T, H=H, W=W, Ch=Ch)
    out2p_bt = out2p.reshape(B, T, Hp, Wp, Ch)

    seq_out = jnp.transpose(out2p_bt[:, :, 1:H + 1, 1:W + 1, :],
                            (0, 1, 4, 2, 3))                   # (B, T, Ch, H, W)
    # torch.flatten(h1, start_dim=1) on NCHW -> (B, Ch*H*W) channel-major
    h1_flat = jnp.transpose(h1pad[:, 1:H + 1, 1:W + 1, :],
                            (0, 3, 1, 2)).reshape(B, Ch * H * W)
    return seq_out, h1_flat


# ----------------------------------------------------------------------------
# Deterministic synthetic parameters (conv weights split into x-part / h-part)
# ----------------------------------------------------------------------------

def init_params(key, cin=32, ch=32):
    # Both layers have input_dim == hidden_dim == 32 in Temporal_EncDec_G7.
    k1, k2 = jax.random.split(key)
    scale = 0.05

    def layer(k):
        ks = jax.random.split(k, 4)
        return dict(
            # x-side conv weights, fused: columns [0:2*ch] gates (r,u), [2*ch:] candidate
            wx=scale * jax.random.normal(ks[0], (9, cin, 3 * ch), jnp.float32),
            b=scale * jax.random.normal(ks[1], (1, 3 * ch), jnp.float32),
            # h-side conv weights
            wh_ru=scale * jax.random.normal(ks[2], (9, ch, 2 * ch), jnp.float32),
            wh_c=scale * jax.random.normal(ks[3], (9, ch, ch), jnp.float32),
        )

    return dict(gru1=layer(k1), gru2=layer(k2))


# ----------------------------------------------------------------------------
# Pure-JAX reference (same math, same synthetic weights) for validation
# ----------------------------------------------------------------------------

def _ref_convgru_layer(x_seq, h0, p):
    B, T, H, W, Cin = x_seq.shape
    Ch = h0.shape[-1]
    hp = jax.lax.Precision.HIGHEST
    wx = p['wx'].reshape(9 * Cin, 3 * Ch)
    whg = p['wh_ru'].reshape(9 * Ch, 2 * Ch)
    whc = p['wh_c'].reshape(9 * Ch, Ch)

    def im2col(a):
        ap = jnp.pad(a, ((0, 0), (1, 1), (1, 1), (0, 0)))
        taps = [ap[:, dy:dy + H, dx:dx + W, :]
                for dy in range(3) for dx in range(3)]
        return jnp.concatenate(taps, axis=-1).reshape(B * H * W, -1)

    h = h0
    outs = []
    for t in range(T):
        xt = x_seq[:, t]
        xall = jnp.dot(im2col(xt), wx, precision=hp) + p['b']      # (B*N, 3*Ch)
        g = xall[:, :2 * Ch] + jnp.dot(im2col(h), whg, precision=hp)
        r = jax.nn.sigmoid(g[:, :Ch]).reshape(B, H, W, Ch)
        u = jax.nn.sigmoid(g[:, Ch:]).reshape(B, H, W, Ch)
        cp = xall[:, 2 * Ch:] + jnp.dot(im2col(r * h), whc, precision=hp)
        c = jnp.tanh(cp).reshape(B, H, W, Ch)
        h = (1.0 - u) * h + u * c
        outs.append(h)
    return jnp.stack(outs, axis=1), h


def _ref_forward(x, params):
    B, T, C, H, W = x.shape
    xs = jnp.transpose(x, (0, 1, 3, 4, 2)).astype(jnp.float32)
    h0 = jnp.zeros((B, H, W, 32), jnp.float32)
    o1, h1 = _ref_convgru_layer(xs, h0, params['gru1'])
    o2, _ = _ref_convgru_layer(o1, h1, params['gru2'])
    return (jnp.transpose(o2, (0, 1, 4, 2, 3)),
            jnp.transpose(h1, (0, 3, 1, 2)).reshape(B, -1))


if __name__ == "__main__":
    B, T, C, H, W = 2, 4, 32, 16, 16   # input_dim=32 fixed by the module; spatial/T free
    Ch = 32

    key = jax.random.PRNGKey(0)
    k_x, k_p = jax.random.split(key)
    x = jax.random.normal(k_x, (B, T, C, H, W), jnp.float32)
    params = init_params(k_p, cin=C, ch=Ch)

    fwd = jax.jit(temporal_encdec_g7_forward)
    seq_out, h1_flat = fwd(x, params)
    jax.block_until_ready((seq_out, h1_flat))

    assert seq_out.shape == (B, T, Ch, H, W), seq_out.shape
    assert h1_flat.shape == (B, Ch * H * W), h1_flat.shape
    assert bool(jnp.all(jnp.isfinite(seq_out))) and bool(jnp.all(jnp.isfinite(h1_flat)))

    # Validate the fused Pallas pipeline against the pure-JAX reference.
    ref_seq, ref_flat = jax.jit(_ref_forward)(x, params)
    err_seq = float(jnp.max(jnp.abs(seq_out - ref_seq)))
    err_flat = float(jnp.max(jnp.abs(h1_flat - ref_flat)))
    assert err_seq < 2e-3 and err_flat < 2e-3, (err_seq, err_flat)

    print("KERNEL_OK")
</pallas_src>

<mosaic_0001>
module attributes {stable_mosaic.version = 11 : i64} {
  func.func @_xconv_kernel(%arg0: i32, %arg1: memref<1x18x18x32xf32, #tpu.memory_space<vmem>>, %arg2: memref<9x32x96xf32, #tpu.memory_space<vmem>>, %arg3: memref<1x96xf32, #tpu.memory_space<vmem>>, %arg4: memref<1x256x64xf32, #tpu.memory_space<vmem>>, %arg5: memref<1x256x32xf32, #tpu.memory_space<vmem>>) attributes {dimension_semantics = [#tpu.dimension_semantics<parallel>], iteration_bounds = array<i64: 8>, scalar_prefetch = 0 : i64, scratch_operands = 0 : i64, tpu.core_type = #tpu.core_type<tc>, window_params = [{transform_indices = @transform_0, window_bounds = array<i64: 1, 18, 18, 32>}, {pipeline_mode = #tpu.pipeline_mode<synchronous>, transform_indices = @transform_1, window_bounds = array<i64: 9, 32, 96>}, {pipeline_mode = #tpu.pipeline_mode<synchronous>, transform_indices = @transform_2, window_bounds = array<i64: 1, 96>}, {transform_indices = @transform_3, window_bounds = array<i64: 1, 256, 64>}, {transform_indices = @transform_4, window_bounds = array<i64: 1, 256, 32>}]} {
    %c0 = arith.constant 0 : index
    %c0_0 = arith.constant 0 : index
    %c0_1 = arith.constant 0 : index
    %c0_2 = arith.constant 0 : index
    %0 = vector.load %arg1[%c0, %c0_0, %c0_1, %c0_2] : memref<1x18x18x32xf32, #tpu.memory_space<vmem>>, vector<1x18x18x32xf32>
    %1 = vector.shape_cast %0 : vector<1x18x18x32xf32> to vector<18x18x32xf32>
    %cst = arith.constant 0.000000e+00 : f32
    %2 = vector.broadcast %cst : f32 to vector<256x96xf32>
    %3 = vector.extract_strided_slice %1 {offsets = [0, 0, 0], sizes = [16, 16, 32], strides = [1, 1, 1]} : vector<18x18x32xf32> to vector<16x16x32xf32>
    %4 = vector.shape_cast %3 : vector<16x16x32xf32> to vector<256x32xf32>
    %c0_3 = arith.constant 0 : index
    %c0_4 = arith.constant 0 : index
    %c0_5 = arith.constant 0 : index
    %5 = vector.load %arg2[%c0_3, %c0_4, %c0_5] : memref<9x32x96xf32, #tpu.memory_space<vmem>>, vector<1x32x96xf32>
    %6 = vector.shape_cast %5 : vector<1x32x96xf32> to vector<32x96xf32>
    %cst_6 = arith.constant dense<0.000000e+00> : vector<256x96xf32>
    %7 = tpu.matmul %4, %6, %cst_6 {dimension_numbers = #tpu.dot_dimension_numbers<[1], [0], [0], [1], [0, 0, 1, 1], [], []>} : vector<256x32xf32>, vector<32x96xf32>, vector<256x96xf32> -> vector<256x96xf32>
    %8 = arith.addf %2, %7 : vector<256x96xf32>
    %9 = vector.extract_strided_slice %1 {offsets = [0, 1, 0], sizes = [16, 16, 32], strides = [1, 1, 1]} : vector<18x18x32xf32> to vector<16x16x32xf32>
    %10 = vector.shape_cast %9 : vector<16x16x32xf32> to vector<256x32xf32>
    %c1 = arith.constant 1 : index
    %c0_7 = arith.constant 0 : index
    %c0_8 = arith.constant 0 : index
    %11 = vector.load %arg2[%c1, %c0_7, %c0_8] : memref<9x32x96xf32, #tpu.memory_space<vmem>>, vector<1x32x96xf32>
    %12 = vector.shape_cast %11 : vector<1x32x96xf32> to vector<32x96xf32>
    %cst_9 = arith.constant dense<0.000000e+00> : vector<256x96xf32>
    %13 = tpu.matmul %10, %12, %cst_9 {dimension_numbers = #tpu.dot_dimension_numbers<[1], [0], [0], [1], [0, 0, 1, 1], [], []>} : vector<256x32xf32>, vector<32x96xf32>, vector<256x96xf32> -> vector<256x96xf32>
    %14 = arith.addf %8, %13 : vector<256x96xf32>
    %15 = vector.extract_strided_slice %1 {offsets = [0, 2, 0], sizes = [16, 16, 32], strides = [1, 1, 1]} : vector<18x18x32xf32> to vector<16x16x32xf32>
    %16 = vector.shape_cast %15 : vector<16x16x32xf32> to vector<256x32xf32>
    %c2 = arith.constant 2 : index
    %c0_10 = arith.constant 0 : index
    %c0_11 = arith.constant 0 : index
    %17 = vector.load %arg2[%c2, %c0_10, %c0_11] : memref<9x32x96xf32, #tpu.memory_space<vmem>>, vector<1x32x96xf32>
    %18 = vector.shape_cast %17 : vector<1x32x96xf32> to vector<32x96xf32>
    %cst_12 = arith.constant dense<0.000000e+00> : vector<256x96xf32>
    %19 = tpu.matmul %16, %18, %cst_12 {dimension_numbers = #tpu.dot_dimension_numbers<[1], [0], [0], [1], [0, 0, 1, 1], [], []>} : vector<256x32xf32>, vector<32x96xf32>, vector<256x96xf32> -> vector<256x96xf32>
    %20 = arith.addf %14, %19 : vector<256x96xf32>
    %21 = vector.extract_strided_slice %1 {offsets = [1, 0, 0], sizes = [16, 16, 32], strides = [1, 1, 1]} : vector<18x18x32xf32> to vector<16x16x32xf32>
    %22 = vector.shape_cast %21 : vector<16x16x32xf32> to vector<256x32xf32>
    %c3 = arith.constant 3 : index
    %c0_13 = arith.constant 0 : index
    %c0_14 = arith.constant 0 : index
    %23 = vector.load %arg2[%c3, %c0_13, %c0_14] : memref<9x32x96xf32, #tpu.memory_space<vmem>>, vector<1x32x96xf32>
    %24 = vector.shape_cast %23 : vector<1x32x96xf32> to vector<32x96xf32>
    %cst_15 = arith.constant dense<0.000000e+00> : vector<256x96xf32>
    %25 = tpu.matmul %22, %24, %cst_15 {dimension_numbers = #tpu.dot_dimension_numbers<[1], [0], [0], [1], [0, 0, 1, 1], [], []>} : vector<256x32xf32>, vector<32x96xf32>, vector<256x96xf32> -> vector<256x96xf32>
    %26 = arith.addf %20, %25 : vector<256x96xf32>
    %27 = vector.extract_strided_slice %1 {offsets = [1, 1, 0], sizes = [16, 16, 32], strides = [1, 1, 1]} : vector<18x18x32xf32> to vector<16x16x32xf32>
    %28 = vector.shape_cast %27 : vector<16x16x32xf32> to vector<256x32xf32>
    %c4 = arith.constant 4 : index
    %c0_16 = arith.constant 0 : index
    %c0_17 = arith.constant 0 : index
    %29 = vector.load %arg2[%c4, %c0_16, %c0_17] : memref<9x32x96xf32, #tpu.memory_space<vmem>>, vector<1x32x96xf32>
    %30 = vector.shape_cast %29 : vector<1x32x96xf32> to vector<32x96xf32>
    %cst_18 = arith.constant dense<0.000000e+00> : vector<256x96xf32>
    %31 = tpu.matmul %28, %30, %cst_18 {dimension_numbers = #tpu.dot_dimension_numbers<[1], [0], [0], [1], [0, 0, 1, 1], [], []>} : vector<256x32xf32>, vector<32x96xf32>, vector<256x96xf32> -> vector<256x96xf32>
    %32 = arith.addf %26, %31 : vector<256x96xf32>
    %33 = vector.extract_strided_slice %1 {offsets = [1, 2, 0], sizes = [16, 16, 32], strides = [1, 1, 1]} : vector<18x18x32xf32> to vector<16x16x32xf32>
    %34 = vector.shape_cast %33 : vector<16x16x32xf32> to vector<256x32xf32>
    %c5 = arith.constant 5 : index
    %c0_19 = arith.constant 0 : index
    %c0_20 = arith.constant 0 : index
    %35 = vector.load %arg2[%c5, %c0_19, %c0_20] : memref<9x32x96xf32, #tpu.memory_space<vmem>>, vector<1x32x96xf32>
    %36 = vector.shape_cast %35 : vector<1x32x96xf32> to vector<32x96xf32>
    %cst_21 = arith.constant dense<0.000000e+00> : vector<256x96xf32>
    %37 = tpu.matmul %34, %36, %cst_21 {dimension_numbers = #tpu.dot_dimension_numbers<[1], [0], [0], [1], [0, 0, 1, 1], [], []>} : vector<256x32xf32>, vector<32x96xf32>, vector<256x96xf32> -> vector<256x96xf32>
    %38 = arith.addf %32, %37 : vector<256x96xf32>
    %39 = vector.extract_strided_slice %1 {offsets = [2, 0, 0], sizes = [16, 16, 32], strides = [1, 1, 1]} : vector<18x18x32xf32> to vector<16x16x32xf32>
    %40 = vector.shape_cast %39 : vector<16x16x32xf32> to vector<256x32xf32>
    %c6 = arith.constant 6 : index
    %c0_22 = arith.constant 0 : index
    %c0_23 = arith.constant 0 : index
    %41 = vector.load %arg2[%c6, %c0_22, %c0_23] : memref<9x32x96xf32, #tpu.memory_space<vmem>>, vector<1x32x96xf32>
    %42 = vector.shape_cast %41 : vector<1x32x96xf32> to vector<32x96xf32>
    %cst_24 = arith.constant dense<0.000000e+00> : vector<256x96xf32>
    %43 = tpu.matmul %40, %42, %cst_24 {dimension_numbers = #tpu.dot_dimension_numbers<[1], [0], [0], [1], [0, 0, 1, 1], [], []>} : vector<256x32xf32>, vector<32x96xf32>, vector<256x96xf32> -> vector<256x96xf32>
    %44 = arith.addf %38, %43 : vector<256x96xf32>
    %45 = vector.extract_strided_slice %1 {offsets = [2, 1, 0], sizes = [16, 16, 32], strides = [1, 1, 1]} : vector<18x18x32xf32> to vector<16x16x32xf32>
    %46 = vector.shape_cast %45 : vector<16x16x32xf32> to vector<256x32xf32>
    %c7 = arith.constant 7 : index
    %c0_25 = arith.constant 0 : index
    %c0_26 = arith.constant 0 : index
    %47 = vector.load %arg2[%c7, %c0_25, %c0_26] : memref<9x32x96xf32, #tpu.memory_space<vmem>>, vector<1x32x96xf32>
    %48 = vector.shape_cast %47 : vector<1x32x96xf32> to vector<32x96xf32>
    %cst_27 = arith.constant dense<0.000000e+00> : vector<256x96xf32>
    %49 = tpu.matmul %46, %48, %cst_27 {dimension_numbers = #tpu.dot_dimension_numbers<[1], [0], [0], [1], [0, 0, 1, 1], [], []>} : vector<256x32xf32>, vector<32x96xf32>, vector<256x96xf32> -> vector<256x96xf32>
    %50 = arith.addf %44, %49 : vector<256x96xf32>
    %51 = vector.extract_strided_slice %1 {offsets = [2, 2, 0], sizes = [16, 16, 32], strides = [1, 1, 1]} : vector<18x18x32xf32> to vector<16x16x32xf32>
    %52 = vector.shape_cast %51 : vector<16x16x32xf32> to vector<256x32xf32>
    %c8 = arith.constant 8 : index
    %c0_28 = arith.constant 0 : index
    %c0_29 = arith.constant 0 : index
    %53 = vector.load %arg2[%c8, %c0_28, %c0_29] : memref<9x32x96xf32, #tpu.memory_space<vmem>>, vector<1x32x96xf32>
    %54 = vector.shape_cast %53 : vector<1x32x96xf32> to vector<32x96xf32>
    %cst_30 = arith.constant dense<0.000000e+00> : vector<256x96xf32>
    %55 = tpu.matmul %52, %54, %cst_30 {dimension_numbers = #tpu.dot_dimension_numbers<[1], [0], [0], [1], [0, 0, 1, 1], [], []>} : vector<256x32xf32>, vector<32x96xf32>, vector<256x96xf32> -> vector<256x96xf32>
    %56 = arith.addf %50, %55 : vector<256x96xf32>
    %c0_31 = arith.constant 0 : index
    %c0_32 = arith.constant 0 : index
    %57 = vector.load %arg3[%c0_31, %c0_32] : memref<1x96xf32, #tpu.memory_space<vmem>>, vector<1x96xf32>
    %58 = vector.broadcast %57 : vector<1x96xf32> to vector<256x96xf32>
    %59 = arith.addf %56, %58 : vector<256x96xf32>
    %60 = vector.extract_strided_slice %59 {offsets = [0, 0], sizes = [256, 64], strides = [1, 1]} : vector<256x96xf32> to vector<256x64xf32>
    %c0_33 = arith.constant 0 : index
    %c0_34 = arith.constant 0 : index
    %c0_35 = arith.constant 0 : index
    %61 = vector.load %arg4[%c0_33, %c0_34, %c0_35] : memref<1x256x64xf32, #tpu.memory_space<vmem>>, vector<1x256x64xf32>
    %62 = vector.shape_cast %61 : vector<1x256x64xf32> to vector<256x64xf32>
    %63 = vector.shape_cast %60 : vector<256x64xf32> to vector<1x256x64xf32>
    tpu.vector_store %arg4[%c0_33, %c0_34, %c0_35], %63 {strides = array<i32>} : memref<1x256x64xf32, #tpu.memory_space<vmem>>, vector<1x256x64xf32>,
    %64 = vector.extract_strided_slice %59 {offsets = [0, 64], sizes = [256, 32], strides = [1, 1]} : vector<256x96xf32> to vector<256x32xf32>
    %c0_36 = arith.constant 0 : index
    %c0_37 = arith.constant 0 : index
    %c0_38 = arith.constant 0 : index
    %65 = vector.load %arg5[%c0_36, %c0_37, %c0_38] : memref<1x256x32xf32, #tpu.memory_space<vmem>>, vector<1x256x32xf32>
    %66 = vector.shape_cast %65 : vector<1x256x32xf32> to vector<256x32xf32>
    %67 = vector.shape_cast %64 : vector<256x32xf32> to vector<1x256x32xf32>
    tpu.vector_store %arg5[%c0_36, %c0_37, %c0_38], %67 {strides = array<i32>} : memref<1x256x32xf32, #tpu.memory_space<vmem>>, vector<1x256x32xf32>,
    return
  }
  func.func @transform_0(%arg0: i32) -> (i32, i32, i32, i32) {
    %c0_i32 = arith.constant 0 : i32
    %c0_i32_0 = arith.constant 0 : i32
    %c0_i32_1 = arith.constant 0 : i32
    %c0_i32_2 = arith.constant 0 : i32
    return %arg0, %c0_i32, %c0_i32_0, %c0_i32_1 : i32, i32, i32, i32
  }
  func.func @transform_1(%arg0: i32) -> (i32, i32, i32) {
    %c0_i32 = arith.constant 0 : i32
    %c0_i32_0 = arith.constant 0 : i32
    %c0_i32_1 = arith.constant 0 : i32
    %c0_i32_2 = arith.constant 0 : i32
    return %c0_i32, %c0_i32_0, %c0_i32_1 : i32, i32, i32
  }
  func.func @transform_2(%arg0: i32) -> (i32, i32) {
    %c0_i32 = arith.constant 0 : i32
    %c0_i32_0 = arith.constant 0 : i32
    %c0_i32_1 = arith.constant 0 : i32
    return %c0_i32, %c0_i32_0 : i32, i32
  }
  func.func @transform_3(%arg0: i32) -> (i32, i32, i32) {
    %c0_i32 = arith.constant 0 : i32
    %c0_i32_0 = arith.constant 0 : i32
    %c0_i32_1 = arith.constant 0 : i32
    return %arg0, %c0_i32, %c0_i32_0 : i32, i32, i32
  }
  func.func @transform_4(%arg0: i32) -> (i32, i32, i32) {
    %c0_i32 = arith.constant 0 : i32
    %c0_i32_0 = arith.constant 0 : i32
    %c0_i32_1 = arith.constant 0 : i32
    return %arg0, %c0_i32, %c0_i32_0 : i32, i32, i32
  }
}

module attributes {stable_mosaic.version = 11 : i64} {
  func.func @_convgru_seq_kernel(%arg0: i32, %arg1: i32, %arg2: memref<1x256x64xf32, #tpu.memory_space<vmem>>, %arg3: memref<1x256x32xf32, #tpu.memory_space<vmem>>, %arg4: memref<1x18x18x32xf32, #tpu.memory_space<vmem>>, %arg5: memref<9x32x64xf32, #tpu.memory_space<vmem>>, %arg6: memref<9x32x32xf32, #tpu.memory_space<vmem>>, %arg7: memref<1x18x18x32xf32, #tpu.memory_space<vmem>>, %arg8: memref<18x18x32xf32, #tpu.memory_space<vmem>>, %arg9: memref<18x18x32xf32, #tpu.memory_space<vmem>>, %arg10: memref<256x32xf32, #tpu.memory_space<vmem>>) attributes {dimension_semantics = [#tpu.dimension_semantics<parallel>, #tpu.dimension_semantics<arbitrary>], iteration_bounds = array<i64: 2, 4>, scalar_prefetch = 0 : i64, scratch_operands = 3 : i64, tpu.core_type = #tpu.core_type<tc>, window_params = [{transform_indices = @transform_0, window_bounds = array<i64: 1, 256, 64>}, {transform_indices = @transform_1, window_bounds = array<i64: 1, 256, 32>}, {transform_indices = @transform_2, window_bounds = array<i64: 1, 18, 18, 32>}, {pipeline_mode = #tpu.pipeline_mode<synchronous>, transform_indices = @transform_3, window_bounds = array<i64: 9, 32, 64>}, {pipeline_mode = #tpu.pipeline_mode<synchronous>, transform_indices = @transform_4, window_bounds = array<i64: 9, 32, 32>}, {transform_indices = @transform_5, window_bounds = array<i64: 1, 18, 18, 32>}]} {
    %c0_i32 = arith.constant 0 : i32
    %0 = arith.cmpi eq, %arg1, %c0_i32 : i32
    %1 = arith.extui %0 : i1 to i32
    %c0_i32_0 = arith.constant 0 : i32
    %2 = arith.cmpi ne, %1, %c0_i32_0 : i32
    scf.if %2 {
      %c0_95 = arith.constant 0 : index
      %c0_96 = arith.constant 0 : index
      %c0_97 = arith.constant 0 : index
      %c0_98 = arith.constant 0 : index
      %146 = vector.load %arg4[%c0_95, %c0_96, %c0_97, %c0_98] : memref<1x18x18x32xf32, #tpu.memory_space<vmem>>, vector<1x18x18x32xf32>
      %147 = vector.shape_cast %146 : vector<1x18x18x32xf32> to vector<18x18x32xf32>
      %c0_99 = arith.constant 0 : index
      %c0_100 = arith.constant 0 : index
      %c0_101 = arith.constant 0 : index
      %148 = vector.load %arg8[%c0_99, %c0_100, %c0_101] : memref<18x18x32xf32, #tpu.memory_space<vmem>>, vector<18x18x32xf32>
      tpu.vector_store %arg8[%c0_99, %c0_100, %c0_101], %147 {strides = array<i32>} : memref<18x18x32xf32, #tpu.memory_space<vmem>>, vector<18x18x32xf32>,
      %cst_102 = arith.constant 0.000000e+00 : f32
      %149 = vector.broadcast %cst_102 : f32 to vector<18x18x32xf32>
      %c0_103 = arith.constant 0 : index
      %c0_104 = arith.constant 0 : index
      %c0_105 = arith.constant 0 : index
      %150 = vector.load %arg9[%c0_103, %c0_104, %c0_105] : memref<18x18x32xf32, #tpu.memory_space<vmem>>, vector<18x18x32xf32>
      tpu.vector_store %arg9[%c0_103, %c0_104, %c0_105], %149 {strides = array<i32>} : memref<18x18x32xf32, #tpu.memory_space<vmem>>, vector<18x18x32xf32>,
      %151 = vector.extract_strided_slice %147 {offsets = [1, 1, 0], sizes = [16, 16, 32], strides = [1, 1, 1]} : vector<18x18x32xf32> to vector<16x16x32xf32>
      %152 = vector.shape_cast %151 : vector<16x16x32xf32> to vector<256x32xf32>
      %c0_106 = arith.constant 0 : index
      %c0_107 = arith.constant 0 : index
      %153 = vector.load %arg10[%c0_106, %c0_107] : memref<256x32xf32, #tpu.memory_space<vmem>>, vector<256x32xf32>
      tpu.vector_store %arg10[%c0_106, %c0_107], %152 {strides = array<i32>} : memref<256x32xf32, #tpu.memory_space<vmem>>, vector<256x32xf32>,
    } else {
    }
    %c0 = arith.constant 0 : index
    %c0_1 = arith.constant 0 : index
    %3 = vector.load %arg10[%c0, %c0_1] : memref<256x32xf32, #tpu.memory_space<vmem>>, vector<256x32xf32>
    %c0_2 = arith.constant 0 : index
    %c0_3 = arith.constant 0 : index
    %c0_4 = arith.constant 0 : index
    %4 = vector.load %arg8[%c0_2, %c0_3, %c0_4] : memref<18x18x32xf32, #tpu.memory_space<vmem>>, vector<18x18x32xf32>
    %c0_5 = arith.constant 0 : index
    %c0_6 = arith.constant 0 : index
    %c0_7 = arith.constant 0 : index
    %5 = vector.load %arg2[%c0_5, %c0_6, %c0_7] : memref<1x256x64xf32, #tpu.memory_space<vmem>>, vector<1x256x64xf32>
    %6 = vector.shape_cast %5 : vector<1x256x64xf32> to vector<256x64xf32>
    %7 = vector.extract_strided_slice %4 {offsets = [0, 0, 0], sizes = [16, 16, 32], strides = [1, 1, 1]} : vector<18x18x32xf32> to vector<16x16x32xf32>
    %8 = vector.shape_cast %7 : vector<16x16x32xf32> to vector<256x32xf32>
    %c0_8 = arith.constant 0 : index
    %c0_9 = arith.constant 0 : index
    %c0_10 = arith.constant 0 : index
    %9 = vector.load %arg5[%c0_8, %c0_9, %c0_10] : memref<9x32x64xf32, #tpu.memory_space<vmem>>, vector<1x32x64xf32>
    %10 = vector.shape_cast %9 : vector<1x32x64xf32> to vector<32x64xf32>
    %cst = arith.constant dense<0.000000e+00> : vector<256x64xf32>
    %11 = tpu.matmul %8, %10, %cst {dimension_numbers = #tpu.dot_dimension_numbers<[1], [0], [0], [1], [0, 0, 1, 1], [], []>} : vector<256x32xf32>, vector<32x64xf32>, vector<256x64xf32> -> vector<256x64xf32>
    %12 = arith.addf %6, %11 : vector<256x64xf32>
    %13 = vector.extract_strided_slice %4 {offsets = [0, 1, 0], sizes = [16, 16, 32], strides = [1, 1, 1]} : vector<18x18x32xf32> to vector<16x16x32xf32>
    %14 = vector.shape_cast %13 : vector<16x16x32xf32> to vector<256x32xf32>
    %c1 = arith.constant 1 : index
    %c0_11 = arith.constant 0 : index
    %c0_12 = arith.constant 0 : index
    %15 = vector.load %arg5[%c1, %c0_11, %c0_12] : memref<9x32x64xf32, #tpu.memory_space<vmem>>, vector<1x32x64xf32>
    %16 = vector.shape_cast %15 : vector<1x32x64xf32> to vector<32x64xf32>
    %cst_13 = arith.constant dense<0.000000e+00> : vector<256x64xf32>
    %17 = tpu.matmul %14, %16, %cst_13 {dimension_numbers = #tpu.dot_dimension_numbers<[1], [0], [0], [1], [0, 0, 1, 1], [], []>} : vector<256x32xf32>, vector<32x64xf32>, vector<256x64xf32> -> vector<256x64xf32>
    %18 = arith.addf %12, %17 : vector<256x64xf32>
    %19 = vector.extract_strided_slice %4 {offsets = [0, 2, 0], sizes = [16, 16, 32], strides = [1, 1, 1]} : vector<18x18x32xf32> to vector<16x16x32xf32>
    %20 = vector.shape_cast %19 : vector<16x16x32xf32> to vector<256x32xf32>
    %c2 = arith.constant 2 : index
    %c0_14 = arith.constant 0 : index
    %c0_15 = arith.constant 0 : index
    %21 = vector.load %arg5[%c2, %c0_14, %c0_15] : memref<9x32x64xf32, #tpu.memory_space<vmem>>, vector<1x32x64xf32>
    %22 = vector.shape_cast %21 : vector<1x32x64xf32> to vector<32x64xf32>
    %cst_16 = arith.constant dense<0.000000e+00> : vector<256x64xf32>
    %23 = tpu.matmul %20, %22, %cst_16 {dimension_numbers = #tpu.dot_dimension_numbers<[1], [0], [0], [1], [0, 0, 1, 1], [], []>} : vector<256x32xf32>, vector<32x64xf32>, vector<256x64xf32> -> vector<256x64xf32>
    %24 = arith.addf %18, %23 : vector<256x64xf32>
    %25 = vector.extract_strided_slice %4 {offsets = [1, 0, 0], sizes = [16, 16, 32], strides = [1, 1, 1]} : vector<18x18x32xf32> to vector<16x16x32xf32>
    %26 = vector.shape_cast %25 : vector<16x16x32xf32> to vector<256x32xf32>
    %c3 = arith.constant 3 : index
    %c0_17 = arith.constant 0 : index
    %c0_18 = arith.constant 0 : index
    %27 = vector.load %arg5[%c3, %c0_17, %c0_18] : memref<9x32x64xf32, #tpu.memory_space<vmem>>, vector<1x32x64xf32>
    %28 = vector.shape_cast %27 : vector<1x32x64xf32> to vector<32x64xf32>
    %cst_19 = arith.constant dense<0.000000e+00> : vector<256x64xf32>
    %29 = tpu.matmul %26, %28, %cst_19 {dimension_numbers = #tpu.dot_dimension_numbers<[1], [0], [0], [1], [0, 0, 1, 1], [], []>} : vector<256x32xf32>, vector<32x64xf32>, vector<256x64xf32> -> vector<256x64xf32>
    %30 = arith.addf %24, %29 : vector<256x64xf32>
    %31 = vector.extract_strided_slice %4 {offsets = [1, 1, 0], sizes = [16, 16, 32], strides = [1, 1, 1]} : vector<18x18x32xf32> to vector<16x16x32xf32>
    %32 = vector.shape_cast %31 : vector<16x16x32xf32> to vector<256x32xf32>
    %c4 = arith.constant 4 : index
    %c0_20 = arith.constant 0 : index
    %c0_21 = arith.constant 0 : index
    %33 = vector.load %arg5[%c4, %c0_20, %c0_21] : memref<9x32x64xf32, #tpu.memory_space<vmem>>, vector<1x32x64xf32>
    %34 = vector.shape_cast %33 : vector<1x32x64xf32> to vector<32x64xf32>
    %cst_22 = arith.constant dense<0.000000e+00> : vector<256x64xf32>
    %35 = tpu.matmul %32, %34, %cst_22 {dimension_numbers = #tpu.dot_dimension_numbers<[1], [0], [0], [1], [0, 0, 1, 1], [], []>} : vector<256x32xf32>, vector<32x64xf32>, vector<256x64xf32> -> vector<256x64xf32>
    %36 = arith.addf %30, %35 : vector<256x64xf32>
    %37 = vector.extract_strided_slice %4 {offsets = [1, 2, 0], sizes = [16, 16, 32], strides = [1, 1, 1]} : vector<18x18x32xf32> to vector<16x16x32xf32>
    %38 = vector.shape_cast %37 : vector<16x16x32xf32> to vector<256x32xf32>
    %c5 = arith.constant 5 : index
    %c0_23 = arith.constant 0 : index
    %c0_24 = arith.constant 0 : index
    %39 = vector.load %arg5[%c5, %c0_23, %c0_24] : memref<9x32x64xf32, #tpu.memory_space<vmem>>, vector<1x32x64xf32>
    %40 = vector.shape_cast %39 : vector<1x32x64xf32> to vector<32x64xf32>
    %cst_25 = arith.constant dense<0.000000e+00> : vector<256x64xf32>
    %41 = tpu.matmul %38, %40, %cst_25 {dimension_numbers = #tpu.dot_dimension_numbers<[1], [0], [0], [1], [0, 0, 1, 1], [], []>} : vector<256x32xf32>, vector<32x64xf32>, vector<256x64xf32> -> vector<256x64xf32>
    %42 = arith.addf %36, %41 : vector<256x64xf32>
    %43 = vector.extract_strided_slice %4 {offsets = [2, 0, 0], sizes = [16, 16, 32], strides = [1, 1, 1]} : vector<18x18x32xf32> to vector<16x16x32xf32>
    %44 = vector.shape_cast %43 : vector<16x16x32xf32> to vector<256x32xf32>
    %c6 = arith.constant 6 : index
    %c0_26 = arith.constant 0 : index
    %c0_27 = arith.constant 0 : index
    %45 = vector.load %arg5[%c6, %c0_26, %c0_27] : memref<9x32x64xf32, #tpu.memory_space<vmem>>, vector<1x32x64xf32>
    %46 = vector.shape_cast %45 : vector<1x32x64xf32> to vector<32x64xf32>
    %cst_28 = arith.constant dense<0.000000e+00> : vector<256x64xf32>
    %47 = tpu.matmul %44, %46, %cst_28 {dimension_numbers = #tpu.dot_dimension_numbers<[1], [0], [0], [1], [0, 0, 1, 1], [], []>} : vector<256x32xf32>, vector<32x64xf32>, vector<256x64xf32> -> vector<256x64xf32>
    %48 = arith.addf %42, %47 : vector<256x64xf32>
    %49 = vector.extract_strided_slice %4 {offsets = [2, 1, 0], sizes = [16, 16, 32], strides = [1, 1, 1]} : vector<18x18x32xf32> to vector<16x16x32xf32>
    %50 = vector.shape_cast %49 : vector<16x16x32xf32> to vector<256x32xf32>
    %c7 = arith.constant 7 : index
    %c0_29 = arith.constant 0 : index
    %c0_30 = arith.constant 0 : index
    %51 = vector.load %arg5[%c7, %c0_29, %c0_30] : memref<9x32x64xf32, #tpu.memory_space<vmem>>, vector<1x32x64xf32>
    %52 = vector.shape_cast %51 : vector<1x32x64xf32> to vector<32x64xf32>
    %cst_31 = arith.constant dense<0.000000e+00> : vector<256x64xf32>
    %53 = tpu.matmul %50, %52, %cst_31 {dimension_numbers = #tpu.dot_dimension_numbers<[1], [0], [0], [1], [0, 0, 1, 1], [], []>} : vector<256x32xf32>, vector<32x64xf32>, vector<256x64xf32> -> vector<256x64xf32>
    %54 = arith.addf %48, %53 : vector<256x64xf32>
    %55 = vector.extract_strided_slice %4 {offsets = [2, 2, 0], sizes = [16, 16, 32], strides = [1, 1, 1]} : vector<18x18x32xf32> to vector<16x16x32xf32>
    %56 = vector.shape_cast %55 : vector<16x16x32xf32> to vector<256x32xf32>
    %c8 = arith.constant 8 : index
    %c0_32 = arith.constant 0 : index
    %c0_33 = arith.constant 0 : index
    %57 = vector.load %arg5[%c8, %c0_32, %c0_33] : memref<9x32x64xf32, #tpu.memory_space<vmem>>, vector<1x32x64xf32>
    %58 = vector.shape_cast %57 : vector<1x32x64xf32> to vector<32x64xf32>
    %cst_34 = arith.constant dense<0.000000e+00> : vector<256x64xf32>
    %59 = tpu.matmul %56, %58, %cst_34 {dimension_numbers = #tpu.dot_dimension_numbers<[1], [0], [0], [1], [0, 0, 1, 1], [], []>} : vector<256x32xf32>, vector<32x64xf32>, vector<256x64xf32> -> vector<256x64xf32>
    %60 = arith.addf %54, %59 : vector<256x64xf32>
    %61 = vector.extract_strided_slice %60 {offsets = [0, 0], sizes = [256, 32], strides = [1, 1]} : vector<256x64xf32> to vector<256x32xf32>
    %62 = arith.negf %61 : vector<256x32xf32>
    %63 = math.exp %62 : vector<256x32xf32>
    %cst_35 = arith.constant 1.000000e+00 : f32
    %64 = vector.broadcast %cst_35 : f32 to vector<256x32xf32>
    %65 = arith.addf %64, %63 : vector<256x32xf32>
    %66 = arith.divf %64, %65 : vector<256x32xf32>
    %67 = vector.extract_strided_slice %60 {offsets = [0, 32], sizes = [256, 32], strides = [1, 1]} : vector<256x64xf32> to vector<256x32xf32>
    %68 = arith.negf %67 : vector<256x32xf32>
    %69 = math.exp %68 : vector<256x32xf32>
    %cst_36 = arith.constant 1.000000e+00 : f32
    %70 = vector.broadcast %cst_36 : f32 to vector<256x32xf32>
    %71 = arith.addf %70, %69 : vector<256x32xf32>
    %72 = arith.divf %70, %71 : vector<256x32xf32>
    %73 = arith.mulf %66, %3 : vector<256x32xf32>
    %74 = vector.shape_cast %73 : vector<256x32xf32> to vector<16x16x32xf32>
    %c1_37 = arith.constant 1 : index
    %c1_38 = arith.constant 1 : index
    %c0_39 = arith.constant 0 : index
    %75 = vector.load %arg9[%c1_37, %c1_38, %c0_39] : memref<18x18x32xf32, #tpu.memory_space<vmem>>, vector<16x16x32xf32>
    tpu.vector_store %arg9[%c1_37, %c1_38, %c0_39], %74 {strides = array<i32>} : memref<18x18x32xf32, #tpu.memory_space<vmem>>, vector<16x16x32xf32>,
    %c0_40 = arith.constant 0 : index
    %c0_41 = arith.constant 0 : index
    %c0_42 = arith.constant 0 : index
    %76 = vector.load %arg9[%c0_40, %c0_41, %c0_42] : memref<18x18x32xf32, #tpu.memory_space<vmem>>, vector<18x18x32xf32>
    %c0_43 = arith.constant 0 : index
    %c0_44 = arith.constant 0 : index
    %c0_45 = arith.constant 0 : index
    %77 = vector.load %arg3[%c0_43, %c0_44, %c0_45] : memref<1x256x32xf32, #tpu.memory_space<vmem>>, vector<1x256x32xf32>
    %78 = vector.shape_cast %77 : vector<1x256x32xf32> to vector<256x32xf32>
    %79 = vector.extract_strided_slice %76 {offsets = [0, 0, 0], sizes = [16, 16, 32], strides = [1, 1, 1]} : vector<18x18x32xf32> to vector<16x16x32xf32>
    %80 = vector.shape_cast %79 : vector<16x16x32xf32> to vector<256x32xf32>
    %c0_46 = arith.constant 0 : index
    %c0_47 = arith.constant 0 : index
    %c0_48 = arith.constant 0 : index
    %81 = vector.load %arg6[%c0_46, %c0_47, %c0_48] : memref<9x32x32xf32, #tpu.memory_space<vmem>>, vector<1x32x32xf32>
    %82 = vector.shape_cast %81 : vector<1x32x32xf32> to vector<32x32xf32>
    %cst_49 = arith.constant dense<0.000000e+00> : vector<256x32xf32>
    %83 = tpu.matmul %80, %82, %cst_49 {dimension_numbers = #tpu.dot_dimension_numbers<[1], [0], [0], [1], [0, 0, 1, 1], [], []>} : vector<256x32xf32>, vector<32x32xf32>, vector<256x32xf32> -> vector<256x32xf32>
    %84 = arith.addf %78, %83 : vector<256x32xf32>
    %85 = vector.extract_strided_slice %76 {offsets = [0, 1, 0], sizes = [16, 16, 32], strides = [1, 1, 1]} : vector<18x18x32xf32> to vector<16x16x32xf32>
    %86 = vector.shape_cast %85 : vector<16x16x32xf32> to vector<256x32xf32>
    %c1_50 = arith.constant 1 : index
    %c0_51 = arith.constant 0 : index
    %c0_52 = arith.constant 0 : index
    %87 = vector.load %arg6[%c1_50, %c0_51, %c0_52] : memref<9x32x32xf32, #tpu.memory_space<vmem>>, vector<1x32x32xf32>
    %88 = vector.shape_cast %87 : vector<1x32x32xf32> to vector<32x32xf32>
    %cst_53 = arith.constant dense<0.000000e+00> : vector<256x32xf32>
    %89 = tpu.matmul %86, %88, %cst_53 {dimension_numbers = #tpu.dot_dimension_numbers<[1], [0], [0], [1], [0, 0, 1, 1], [], []>} : vector<256x32xf32>, vector<32x32xf32>, vector<256x32xf32> -> vector<256x32xf32>
    %90 = arith.addf %84, %89 : vector<256x32xf32>
    %91 = vector.extract_strided_slice %76 {offsets = [0, 2, 0], sizes = [16, 16, 32], strides = [1, 1, 1]} : vector<18x18x32xf32> to vector<16x16x32xf32>
    %92 = vector.shape_cast %91 : vector<16x16x32xf32> to vector<256x32xf32>
    %c2_54 = arith.constant 2 : index
    %c0_55 = arith.constant 0 : index
    %c0_56 = arith.constant 0 : index
    %93 = vector.load %arg6[%c2_54, %c0_55, %c0_56] : memref<9x32x32xf32, #tpu.memory_space<vmem>>, vector<1x32x32xf32>
    %94 = vector.shape_cast %93 : vector<1x32x32xf32> to vector<32x32xf32>
    %cst_57 = arith.constant dense<0.000000e+00> : vector<256x32xf32>
    %95 = tpu.matmul %92, %94, %cst_57 {dimension_numbers = #tpu.dot_dimension_numbers<[1], [0], [0], [1], [0, 0, 1, 1], [], []>} : vector<256x32xf32>, vector<32x32xf32>, vector<256x32xf32> -> vector<256x32xf32>
    %96 = arith.addf %90, %95 : vector<256x32xf32>
    %97 = vector.extract_strided_slice %76 {offsets = [1, 0, 0], sizes = [16, 16, 32], strides = [1, 1, 1]} : vector<18x18x32xf32> to vector<16x16x32xf32>
    %98 = vector.shape_cast %97 : vector<16x16x32xf32> to vector<256x32xf32>
    %c3_58 = arith.constant 3 : index
    %c0_59 = arith.constant 0 : index
    %c0_60 = arith.constant 0 : index
    %99 = vector.load %arg6[%c3_58, %c0_59, %c0_60] : memref<9x32x32xf32, #tpu.memory_space<vmem>>, vector<1x32x32xf32>
    %100 = vector.shape_cast %99 : vector<1x32x32xf32> to vector<32x32xf32>
    %cst_61 = arith.constant dense<0.000000e+00> : vector<256x32xf32>
    %101 = tpu.matmul %98, %100, %cst_61 {dimension_numbers = #tpu.dot_dimension_numbers<[1], [0], [0], [1], [0, 0, 1, 1], [], []>} : vector<256x32xf32>, vector<32x32xf32>, vector<256x32xf32> -> vector<256x32xf32>
    %102 = arith.addf %96, %101 : vector<256x32xf32>
    %103 = vector.extract_strided_slice %76 {offsets = [1, 1, 0], sizes = [16, 16, 32], strides = [1, 1, 1]} : vector<18x18x32xf32> to vector<16x16x32xf32>
    %104 = vector.shape_cast %103 : vector<16x16x32xf32> to vector<256x32xf32>
    %c4_62 = arith.constant 4 : index
    %c0_63 = arith.constant 0 : index
    %c0_64 = arith.constant 0 : index
    %105 = vector.load %arg6[%c4_62, %c0_63, %c0_64] : memref<9x32x32xf32, #tpu.memory_space<vmem>>, vector<1x32x32xf32>
    %106 = vector.shape_cast %105 : vector<1x32x32xf32> to vector<32x32xf32>
    %cst_65 = arith.constant dense<0.000000e+00> : vector<256x32xf32>
    %107 = tpu.matmul %104, %106, %cst_65 {dimension_numbers = #tpu.dot_dimension_numbers<[1], [0], [0], [1], [0, 0, 1, 1], [], []>} : vector<256x32xf32>, vector<32x32xf32>, vector<256x32xf32> -> vector<256x32xf32>
    %108 = arith.addf %102, %107 : vector<256x32xf32>
    %109 = vector.extract_strided_slice %76 {offsets = [1, 2, 0], sizes = [16, 16, 32], strides = [1, 1, 1]} : vector<18x18x32xf32> to vector<16x16x32xf32>
    %110 = vector.shape_cast %109 : vector<16x16x32xf32> to vector<256x32xf32>
    %c5_66 = arith.constant 5 : index
    %c0_67 = arith.constant 0 : index
    %c0_68 = arith.constant 0 : index
    %111 = vector.load %arg6[%c5_66, %c0_67, %c0_68] : memref<9x32x32xf32, #tpu.memory_space<vmem>>, vector<1x32x32xf32>
    %112 = vector.shape_cast %111 : vector<1x32x32xf32> to vector<32x32xf32>
    %cst_69 = arith.constant dense<0.000000e+00> : vector<256x32xf32>
    %113 = tpu.matmul %110, %112, %cst_69 {dimension_numbers = #tpu.dot_dimension_numbers<[1], [0], [0], [1], [0, 0, 1, 1], [], []>} : vector<256x32xf32>, vector<32x32xf32>, vector<256x32xf32> -> vector<256x32xf32>
    %114 = arith.addf %108, %113 : vector<256x32xf32>
    %115 = vector.extract_strided_slice %76 {offsets = [2, 0, 0], sizes = [16, 16, 32], strides = [1, 1, 1]} : vector<18x18x32xf32> to vector<16x16x32xf32>
    %116 = vector.shape_cast %115 : vector<16x16x32xf32> to vector<256x32xf32>
    %c6_70 = arith.constant 6 : index
    %c0_71 = arith.constant 0 : index
    %c0_72 = arith.constant 0 : index
    %117 = vector.load %arg6[%c6_70, %c0_71, %c0_72] : memref<9x32x32xf32, #tpu.memory_space<vmem>>, vector<1x32x32xf32>
    %118 = vector.shape_cast %117 : vector<1x32x32xf32> to vector<32x32xf32>
    %cst_73 = arith.constant dense<0.000000e+00> : vector<256x32xf32>
    %119 = tpu.matmul %116, %118, %cst_73 {dimension_numbers = #tpu.dot_dimension_numbers<[1], [0], [0], [1], [0, 0, 1, 1], [], []>} : vector<256x32xf32>, vector<32x32xf32>, vector<256x32xf32> -> vector<256x32xf32>
    %120 = arith.addf %114, %119 : vector<256x32xf32>
    %121 = vector.extract_strided_slice %76 {offsets = [2, 1, 0], sizes = [16, 16, 32], strides = [1, 1, 1]} : vector<18x18x32xf32> to vector<16x16x32xf32>
    %122 = vector.shape_cast %121 : vector<16x16x32xf32> to vector<256x32xf32>
    %c7_74 = arith.constant 7 : index
    %c0_75 = arith.constant 0 : index
    %c0_76 = arith.constant 0 : index
    %123 = vector.load %arg6[%c7_74, %c0_75, %c0_76] : memref<9x32x32xf32, #tpu.memory_space<vmem>>, vector<1x32x32xf32>
    %124 = vector.shape_cast %123 : vector<1x32x32xf32> to vector<32x32xf32>
    %cst_77 = arith.constant dense<0.000000e+00> : vector<256x32xf32>
    %125 = tpu.matmul %122, %124, %cst_77 {dimension_numbers = #tpu.dot_dimension_numbers<[1], [0], [0], [1], [0, 0, 1, 1], [], []>} : vector<256x32xf32>, vector<32x32xf32>, vector<256x32xf32> -> vector<256x32xf32>
    %126 = arith.addf %120, %125 : vector<256x32xf32>
    %127 = vector.extract_strided_slice %76 {offsets = [2, 2, 0], sizes = [16, 16, 32], strides = [1, 1, 1]} : vector<18x18x32xf32> to vector<16x16x32xf32>
    %128 = vector.shape_cast %127 : vector<16x16x32xf32> to vector<256x32xf32>
    %c8_78 = arith.constant 8 : index
    %c0_79 = arith.constant 0 : index
    %c0_80 = arith.constant 0 : index
    %129 = vector.load %arg6[%c8_78, %c0_79, %c0_80] : memref<9x32x32xf32, #tpu.memory_space<vmem>>, vector<1x32x32xf32>
    %130 = vector.shape_cast %129 : vector<1x32x32xf32> to vector<32x32xf32>
    %cst_81 = arith.constant dense<0.000000e+00> : vector<256x32xf32>
    %131 = tpu.matmul %128, %130, %cst_81 {dimension_numbers = #tpu.dot_dimension_numbers<[1], [0], [0], [1], [0, 0, 1, 1], [], []>} : vector<256x32xf32>, vector<32x32xf32>, vector<256x32xf32> -> vector<256x32xf32>
    %132 = arith.addf %126, %131 : vector<256x32xf32>
    %133 = math.tanh %132 : vector<256x32xf32>
    %cst_82 = arith.constant 1.000000e+00 : f32
    %134 = vector.broadcast %cst_82 : f32 to vector<256x32xf32>
    %135 = arith.subf %134, %72 : vector<256x32xf32>
    %136 = arith.mulf %135, %3 : vector<256x32xf32>
    %137 = arith.mulf %72, %133 : vector<256x32xf32>
    %138 = arith.addf %136, %137 : vector<256x32xf32>
    %c0_83 = arith.constant 0 : index
    %c0_84 = arith.constant 0 : index
    %139 = vector.load %arg10[%c0_83, %c0_84] : memref<256x32xf32, #tpu.memory_space<vmem>>, vector<256x32xf32>
    tpu.vector_store %arg10[%c0_83, %c0_84], %138 {strides = array<i32>} : memref<256x32xf32, #tpu.memory_space<vmem>>, vector<256x32xf32>,
    %140 = vector.shape_cast %138 : vector<256x32xf32> to vector<16x16x32xf32>
    %c1_85 = arith.constant 1 : index
    %c1_86 = arith.constant 1 : index
    %c0_87 = arith.constant 0 : index
    %141 = vector.load %arg8[%c1_85, %c1_86, %c0_87] : memref<18x18x32xf32, #tpu.memory_space<vmem>>, vector<16x16x32xf32>
    tpu.vector_store %arg8[%c1_85, %c1_86, %c0_87], %140 {strides = array<i32>} : memref<18x18x32xf32, #tpu.memory_space<vmem>>, vector<16x16x32xf32>,
    %c0_88 = arith.constant 0 : index
    %c0_89 = arith.constant 0 : index
    %c0_90 = arith.constant 0 : index
    %142 = vector.load %arg8[%c0_88, %c0_89, %c0_90] : memref<18x18x32xf32, #tpu.memory_space<vmem>>, vector<18x18x32xf32>
    %c0_91 = arith.constant 0 : index
    %c0_92 = arith.constant 0 : index
    %c0_93 = arith.constant 0 : index
    %c0_94 = arith.constant 0 : index
    %143 = vector.load %arg7[%c0_91, %c0_92, %c0_93, %c0_94] : memref<1x18x18x32xf32, #tpu.memory_space<vmem>>, vector<1x18x18x32xf32>
    %144 = vector.shape_cast %143 : vector<1x18x18x32xf32> to vector<18x18x32xf32>
    %145 = vector.shape_cast %142 : vector<18x18x32xf32> to vector<1x18x18x32xf32>
    tpu.vector_store %arg7[%c0_91, %c0_92, %c0_93, %c0_94], %145 {strides = array<i32>} : memref<1x18x18x32xf32, #tpu.memory_space<vmem>>, vector<1x18x18x32xf32>,
    return
  }
  func.func @transform_0(%arg0: i32, %arg1: i32) -> (i32, i32, i32) {
    %c4_i32 = arith.constant 4 : i32
    %0 = arith.muli %arg0, %c4_i32 : i32
    %1 = arith.addi %0, %arg1 : i32
    %c0_i32 = arith.constant 0 : i32
    %c0_i32_0 = arith.constant 0 : i32
    %c0_i32_1 = arith.constant 0 : i32
    return %1, %c0_i32, %c0_i32_0 : i32, i32, i32
  }
  func.func @transform_1(%arg0: i32, %arg1: i32) -> (i32, i32, i32) {
    %c4_i32 = arith.constant 4 : i32
    %0 = arith.muli %arg0, %c4_i32 : i32
    %1 = arith.addi %0, %arg1 : i32
    %c0_i32 = arith.constant 0 : i32
    %c0_i32_0 = arith.constant 0 : i32
    %c0_i32_1 = arith.constant 0 : i32
    return %1, %c0_i32, %c0_i32_0 : i32, i32, i32
  }
  func.func @transform_2(%arg0: i32, %arg1: i32) -> (i32, i32, i32, i32) {
    %c0_i32 = arith.constant 0 : i32
    %c0_i32_0 = arith.constant 0 : i32
    %c0_i32_1 = arith.constant 0 : i32
    %c0_i32_2 = arith.constant 0 : i32
    return %arg0, %c0_i32, %c0_i32_0, %c0_i32_1 : i32, i32, i32, i32
  }
  func.func @transform_3(%arg0: i32, %arg1: i32) -> (i32, i32, i32) {
    %c0_i32 = arith.constant 0 : i32
    %c0_i32_0 = arith.constant 0 : i32
    %c0_i32_1 = arith.constant 0 : i32
    %c0_i32_2 = arith.constant 0 : i32
    return %c0_i32, %c0_i32_0, %c0_i32_1 : i32, i32, i32
  }
  func.func @transform_4(%arg0: i32, %arg1: i32) -> (i32, i32, i32) {
    %c0_i32 = arith.constant 0 : i32
    %c0_i32_0 = arith.constant 0 : i32
    %c0_i32_1 = arith.constant 0 : i32
    %c0_i32_2 = arith.constant 0 : i32
    return %c0_i32, %c0_i32_0, %c0_i32_1 : i32, i32, i32
  }
  func.func @transform_5(%arg0: i32, %arg1: i32) -> (i32, i32, i32, i32) {
    %c4_i32 = arith.constant 4 : i32
    %0 = arith.muli %arg0, %c4_i32 : i32
    %1 = arith.addi %0, %arg1 : i32
    %c0_i32 = arith.constant 0 : i32
    %c0_i32_0 = arith.constant 0 : i32
    %c0_i32_1 = arith.constant 0 : i32
    %c0_i32_2 = arith.constant 0 : i32
    return %1, %c0_i32, %c0_i32_0, %c0_i32_1 : i32, i32, i32, i32
  }
}

</mosaic_0001>

<bundles_post_ra>
// kernel: temporal_encdec_g7_forward.4
= control target key start
LH: loop header
LB: loop body
LE: loop exit
PB: predicated region body
PF: predicated region fallthrough
CT: control target
= control target key end

     0   :  { %s4870_s15 = smov 0   ;;  %s6283_s0 = inlined_call_operand.vmem [shape: f32[8,18,18,32], index: 0, kind: input, shape index: {}]   ;;  %s6284_s1 = inlined_call_operand.vmem [shape: f32[9,32,96], index: 1, kind: input, shape index: {}]   ;;  %s6285_s2 = inlined_call_operand.vmem [shape: f32[1,96], index: 2, kind: input, shape index: {}]   ;;  %s6286_s3 = inlined_call_operand.vmem [shape: f32[8,256,64], index: 3, kind: output, shape index: {0}]   ;;  %s6287_s4 = inlined_call_operand.vmem [shape: f32[8,256,32], index: 4, kind: output, shape index: {1}]  }
   0x1 LB: > { %s3331_s16 = sadd.s32 4294967295, %s4842_s15   ;;  %p3335_p0 = scmp.ge.s32.totalorder %s4842_s15, 1  ;;  %s4842_s15 = sphi %s4870_s15, %s15_s15  }
   0x2   : > { %p165_p1 = scmp.lt.s32.totalorder %s4842_s15, 9 }
   0x4   : > { %p166_p2 = pnand %p3335_p0, %p165_p1 }
   0x6   : > { %169 = sbr.rel (%p166_p2) target bundleno = 645 (0x285), region = 32 }
   0xd   : > { %v3481_v0 = vld [vmem:[%s6284_s1 + $0x80] sm:$0xff]  ;;  %v3482_v1 = vld [vmem:[%s6284_s1 + $0x88] sm:$0xff]  ;;  %p196_p3 = scmp.lt.s32.totalorder %s3331_s16, 7  ;;  %v3483_v5 = vld [vmem:[%s6284_s1 + $0x90] sm:$0xff]  ;;  %vm317_vm0 = vcmask 1046528   ;;  %vm403_vm1 = vcmask 261120  }
   0xe   : > { %v3341_v2 = vld [vmem:[%s6284_s1 + $0x20] sm:$0xff]  ;;  %v4887_v3 = vpack.c.bf16 %v3482_v1, %v3481_v0  ;;  %v3342_v4 = vld [vmem:[%s6284_s1 + $0x28] sm:$0xff]  ;;  %v3484_v6 = vld [vmem:[%s6284_s1 + $0x98] sm:$0xff]  ;;  %vm982_vm2 = vcmask 1045504   ;;  %vm3050_vm3 = vcmask 523264   ;;  %s4844_s28 = smov 64  }
   0xf   : > { %v4494_v7 = vpack.c.bf16 %v3342_v4, %v3341_v2  ;;  %v4898_v8 = vpack.c.bf16 %v3484_v6, %v3483_v5  ;;  %v3343_v9 = vld [vmem:[%s6284_s1 + $0x30] sm:$0xff]  ;;  %v3344_v10 = vld [vmem:[%s6284_s1 + $0x38] sm:$0xff]  ;;  %s6469_s16 = smov (!%p196_p3, %s3331_s16), 7  ;;  %v3517_v11 = vld [vmem:[%s6284_s1 + $0xa0] sm:$0xff] }
  0x10   : > { %4527 = vmatprep.subr.bf16.mxu0 %v4887_v3  ;;  %v4498_v12 = vpack.c.bf16 %v3344_v10, %v3343_v9  ;;  %v3518_v13 = vld [vmem:[%s6284_s1 + $0xa8] sm:$0xff]  ;;  %v265_v14 = vld [vmem:[%s6284_s1] sm:$0xff]  ;;  %s4826_s17 = smul.u32 432, %s6469_s16  ;;  %v3519_v18 = vld [vmem:[%s6284_s1 + $0xb0] sm:$0xff] }
  0x11   : > { %6364 = vst [vmem:[#allocation2_spill] sm:$0xff] %v4898_v8  ;;  %v266_v15 = vld [vmem:[%s6284_s1 + $0x8] sm:$0xff]  ;;  %4495 = vmatprep.subr.bf16.mxu1 %v4494_v7  ;;  %4529 = vmatpush3.bf16.msra.mxu0 %v4887_v3  ;;  %v4534_v16 = vpack.c.bf16 %v3518_v13, %v3517_v11  ;;  %v3520_v19 = vld [vmem:[%s6284_s1 + $0xb8] sm:$0xff]  ;;  %v267_v23 = vld [vmem:[%s6284_s1 + $0x10] sm:$0xff] }
  0x12   : > { %4497 = vmatpush3.bf16.msra.mxu1 %v4494_v7  ;;  %4531 = vmatprep.subr.bf16.mxu0 %v4898_v8  ;;  %s4927_s20 = scalar_lea.vmem %s6283_s0, %s4826_s17  ;;  %v4502_v17 = vpack.c.bf16 %v266_v15, %v265_v14  ;;  %v268_v33 = vld [vmem:[%s6284_s1 + $0x18] sm:$0xff]  ;;  %v4538_v39 = vpack.c.bf16 %v3520_v19, %v3519_v18  ;;  %v3553_v40 = vld [vmem:[%s6284_s1 + $0xc0] sm:$0xff]  ;;  %v3554_v53 = vld [vmem:[%s6284_s1 + $0xc8] sm:$0xff] }
  0x13   : > { %4499 = vmatprep.subr.bf16.mxu1 %v4498_v12  ;;  %v4936_v20 = vld [vmem:[%s4927_s20] sm:$0xff]  ;;  %v4939_v21 = vld [vmem:[%s4927_s20 + $0x8] sm:$0xff]  ;;  %v4942_v22 = vld [vmem:[%s4927_s20 + $0x18] sm:$0xff]  ;;  %v4506_v54 = vpack.c.bf16 %v268_v33, %v267_v23  ;;  %v5027_v62 = vpack.c.bf16 %v3554_v53, %v3553_v40 }
  0x14   : > { %6365 = vst [vmem:[#allocation3_spill] sm:$0xff] %v4942_v22  ;;  %v318_v24 = vrot.slane %v4936_v20, 1  ;;  %v319_v25 = vrot.slane %v4939_v21, 1  ;;  %v4951_v26 = vld [vmem:[%s4927_s20 + $0x20] sm:$0xff]  ;;  %v323_v27 = vrot.slane %v4942_v22, 1  ;;  %v4963_v32 = vld [vmem:[%s4927_s20 + $0x30] sm:$0xff] }
  0x15   : > { %4533 = vmatpush3.bf16.msra.mxu0 %v4898_v8  ;;  %6366 = vst [vmem:[#allocation4_spill] sm:$0xff] %v4951_v26  ;;  %v4955_v28 = vld [vmem:[%s4927_s20 + $0x10] sm:$0x3]  ;;  %v324_v29 = vrot.slane %v4951_v26, 1  ;;  %v4960_v31 = vld [vmem:[%s4927_s20 + $0x28] sm:$0x3] }
  0x16   : > { %4501 = vmatpush3.bf16.msra.mxu1 %v4498_v12  ;;  %4535 = vmatprep.subr.bf16.mxu0 %v4534_v16  ;;  %v321_v30 = vrot.slane %v4955_v28, 1  ;;  %v320_v34 = vsel %vm317_vm0, %v318_v24, %v319_v25  ;;  %v326_v35 = vrot.slane %v4960_v31, 1  ;;  %v4971_v36 = vld [vmem:[%s4927_s20 + $0x38] sm:$0xff]  ;;  %v328_v37 = vrot.slane %v4963_v32, 1  ;;  %v4975_v38 = vld [vmem:[%s4927_s20 + $0x40] sm:$0x3] }
  0x17   : > { %4503 = vmatprep.subr.bf16.mxu1 %v4502_v17  ;;  %3998 = vmatprep.mubr.msk.f32.mxu1 %vm403_vm1, %v320_v34  ;;  %v325_v41 = vsel %vm317_vm0, %v323_v27, %v324_v29  ;;  %v329_v43 = vrot.slane %v4971_v36, 1  ;;  %v331_v44 = vrot.slane %v4975_v38, 1  ;;  %v4986_v45 = vld [vmem:[%s4927_s20 + $0x48] sm:$0xff]  ;;  %v4989_v46 = vld [vmem:[%s4927_s20 + $0x50] sm:$0xff]  ;;  %v4992_v47 = vld [vmem:[%s4927_s20 + $0x58] sm:$0x3] }
  0x18   : > { %v322_v42 = vsel %vm317_vm0, %v319_v25, %v321_v30  ;;  %4222 = vmatprep.mubr.msk.f32.mxu0 %vm403_vm1, %v325_v41  ;;  %v327_v48 = vsel %vm317_vm0, %v324_v29, %v326_v35  ;;  %v333_v49 = vrot.slane %v4986_v45, 1  ;;  %v334_v50 = vrot.slane %v4989_v46, 1  ;;  %v5000_v51 = vld [vmem:[%s4927_s20 + $0x60] sm:$0xff]  ;;  %v5003_v52 = vld [vmem:[%s4927_s20 + $0x68] sm:$0xff]  ;;  %v5025_v61 = vld [vmem:[%s4927_s20 + $0x70] sm:$0x3] }
  0x19   : > { %3999 = vmatmul.mubr.msk.f32.vlgmr.msra.gmra.mrb[0].mxu1 %vm403_vm1, %v322_v42  ;;  %4223 = vmatmul.mubr.msk.f32.vlgmr.msra.gmra.mrb[0].mxu0 %vm403_vm1, %v327_v48  ;;  %v5011_v55 = vsel %vm317_vm0, %v328_v37, %v329_v43  ;;  %v5014_v56 = vsel %vm317_vm0, %v329_v43, %v331_v44  ;;  %v336_v57 = vrot.slane %v4992_v47, 1  ;;  %v338_v59 = vrot.slane %v5000_v51, 1  ;;  %v5031_v63 = vld [vmem:[%s4927_s20 + $0x78] sm:$0xff]  ;;  %v5034_v0 = vld [vmem:[%s4927_s20 + $0x80] sm:$0xff]  ;;  %v5052_v7 = vld [vmem:[%s4927_s20 + $0x88] sm:$0x3] }
  0x1a   : > { %4001 = vmatprep.mubr.msk.f32.mxu1 %vm403_vm1, %v325_v41  ;;  %6367 = vst [vmem:[#allocation5_spill] sm:$0xff] %v5011_v55  ;;  %4537 = vmatpush3.bf16.msra.mxu0 %v4534_v16  ;;  %6368 = vst [vmem:[#allocation6_spill] sm:$0xff] %v5014_v56  ;;  %v5020_v58 = vsel %vm317_vm0, %v333_v49, %v334_v50  ;;  %v339_v60 = vrot.slane %v5003_v52, 1  ;;  %v341_v2 = vrot.slane %v5025_v61, 1  ;;  %v343_v5 = vrot.slane %v5031_v63, 1  ;;  %v5058_v9 = vld [vmem:[%s4927_s20 + $0x90] sm:$0xff] }
  0x1b   : > { %4505 = vmatpush3.bf16.msra.mxu1 %v4502_v17  ;;  %4225 = vmatprep.mubr.msk.f32.mxu0 %vm403_vm1, %v5011_v55  ;;  %6369 = vst [vmem:[#allocation7_spill] sm:$0xff] %v5020_v58  ;;  %v5043_v1 = vsel %vm317_vm0, %v334_v50, %v336_v57  ;;  %v344_v6 = vrot.slane %v5034_v0, 1  ;;  %v5061_v10 = vld [vmem:[%s4927_s20 + $0x98] sm:$0xff]  ;;  %v346_v12 = vrot.slane %v5052_v7, 1  ;;  %v348_v14 = vrot.slane %v5058_v9, 1  ;;  %v5084_v17 = vld [vmem:[%s4927_s20 + $0xa8] sm:$0xff] }
  0x1c   : > { %4539 = vmatprep.subr.bf16.mxu0 %v4538_v39  ;;  %4507 = vmatprep.subr.bf16.mxu1 %v4506_v54  ;;  %6370 = vst [vmem:[#allocation8_spill] sm:$0xff] %v5043_v1  ;;  %v5047_v4 = vsel %vm317_vm0, %v338_v59, %v339_v60  ;;  %v5070_v11 = vsel %vm317_vm0, %v339_v60, %v341_v2  ;;  %v349_v15 = vrot.slane %v5061_v10, 1  ;;  %v5079_v16 = vld [vmem:[%s4927_s20 + $0xa0] sm:$0x3]  ;;  %v5087_v18 = vld [vmem:[%s4927_s20 + $0xb0] sm:$0xff]  ;;  %v353_v25 = vrot.slane %v5084_v17, 1 }
  0x1d   : > { %4002 = vmatmul.mubr.msk.f32.gmra.mrb[2].mxu1 %vm403_vm1, %v327_v48  ;;  %4226 = vmatmul.mubr.msk.f32.gmra.mrb[2].mxu0 %vm403_vm1, %v5014_v56  ;;  %6371 = vst [vmem:[#allocation9_spill] sm:$0xff] %v5047_v4  ;;  %6372 = vst [vmem:[#allocation10_spill] sm:$0xff] %v5070_v11  ;;  %v5074_v13 = vsel %vm317_vm0, %v343_v5, %v344_v6  ;;  %v5096_v19 = vsel %vm317_vm0, %v344_v6, %v346_v12  ;;  %v351_v23 = vrot.slane %v5079_v16, 1  ;;  %v5105_v29 = vld [vmem:[%s4927_s20 + $0xb8] sm:$0x3]  ;;  %v5110_v30 = vld [vmem:[%s4927_s20 + $0xc0] sm:$0xff] }
  0x1e   : > { %4004 = vmatprep.mubr.msk.f32.mxu1 %vm403_vm1, %v5011_v55  ;;  %4228 = vmatprep.mubr.msk.f32.mxu0 %vm403_vm1, %v5020_v58  ;;  %6373 = vst [vmem:[#allocation11_spill] sm:$0xff] %v5074_v13  ;;  %6374 = vst [vmem:[#allocation12_spill] sm:$0xff] %v5096_v19  ;;  %v5100_v24 = vsel %vm317_vm0, %v348_v14, %v349_v15  ;;  %v354_v27 = vrot.slane %v5087_v18, 1  ;;  %v5113_v33 = vld [vmem:[%s4927_s20 + $0xc8] sm:$0xff]  ;;  %v356_v35 = vrot.slane %v5105_v29, 1  ;;  %v988_v48 = vrot.slane %v4942_v22, 2 }
  0x1f   : > { %4541 = vmatpush3.bf16.msra.mxu0 %v4538_v39  ;;  %4509 = vmatpush3.bf16.msra.mxu1 %v4506_v54  ;;  %6375 = vst [vmem:[#allocation13_spill] sm:$0xff] %v5100_v24  ;;  %v5122_v34 = vsel %vm317_vm0, %v349_v15, %v351_v23  ;;  %v358_v39 = vrot.slane %v5110_v30, 1  ;;  %v359_v40 = vrot.slane %v5113_v33, 1  ;;  %v5131_v41 = vld [vmem:[%s4927_s20 + $0xd0] sm:$0x3]  ;;  %v989_v49 = vrot.slane %v4951_v26, 2 }
  0x20   : > { %4543 = vmatprep.subr.bf16.mxu0 %v5027_v62  ;;  %6376 = vst [vmem:[#allocation14_spill] sm:$0xff] %v5122_v34  ;;  %v5126_v37 = vsel %vm317_vm0, %v353_v25, %v354_v27  ;;  %v5142_v42 = vsel %vm317_vm0, %v354_v27, %v356_v35  ;;  %v361_v43 = vrot.slane %v5131_v41, 1  ;;  %v5151_v50 = vld [vmem:[%s4927_s20 + $0xd8] sm:$0xff]  ;;  %v5154_v53 = vld [vmem:[%s4927_s20 + $0xe0] sm:$0xff]  ;;  %v3410_v57 = vld [vmem:[%s6284_s1 + $0x48] sm:$0xff]  ;;  %v991_v59 = vrot.slane %v4960_v31, 2 }
  0x21   : > { %4005 = vmatmul.mubr.msk.f32.gmra.mrb[4].mxu1 %vm403_vm1, %v5014_v56  ;;  %4229 = vmatmul.mubr.msk.f32.gmra.mrb[4].mxu0 %vm403_vm1, %v5043_v1  ;;  %6377 = vst [vmem:[#allocation15_spill] sm:$0xff] %v5126_v37  ;;  %6378 = vst [vmem:[#allocation16_spill] sm:$0xff] %v5142_v42  ;;  %v5146_v44 = vsel %vm317_vm0, %v358_v39, %v359_v40  ;;  %v3409_v54 = vld [vmem:[%s6284_s1 + $0x40] sm:$0xff]  ;;  %v363_v2 = vrot.slane %v5151_v50, 1  ;;  %v364_v5 = vrot.slane %v5154_v53, 1  ;;  %v993_v14 = vrot.slane %v4963_v32, 2 }
  0x22   : > { %4007 = vmatprep.mubr.msk.f32.mxu1 %vm403_vm1, %v5020_v58  ;;  %4231 = vmatprep.mubr.msk.f32.mxu0 %vm403_vm1, %v5047_v4  ;;  %6379 = vst [vmem:[#allocation17_spill] sm:$0xff] %v5146_v44  ;;  %v5172_v60 = vsel %vm317_vm0, %v359_v40, %v361_v43  ;;  %v5177_v6 = vld [vmem:[%s4927_s20 + $0xe8] sm:$0x3]  ;;  %v5180_v12 = vsel %vm982_vm2, %v988_v48, %v989_v49  ;;  %v994_v15 = vrot.slane %v4971_v36, 2  ;;  %v5185_v31 = vld [vmem:[%s4927_s20 + $0xf0] sm:$0xff]  ;;  %v5188_v23 = vld [vmem:[%s4927_s20 + $0xf8] sm:$0xff] }
  0x23   : > { %6380 = vst [vmem:[#allocation18_spill] sm:$0xff] %v5172_v60  ;;  %v5190_v25 = vpack.c.bf16 %v3410_v57, %v3409_v54  ;;  %v3555_v27 = vld [vmem:[%s6284_s1 + $0xd0] sm:$0xff]  ;;  %v3556_v35 = vld [vmem:[%s6284_s1 + $0xd8] sm:$0xff]  ;;  %v366_v39 = vrot.slane %v5177_v6, 1  ;;  %v996_v40 = vrot.slane %v4975_v38, 2  ;;  %v5209_v43 = vsel %vm982_vm2, %v989_v49, %v991_v59  ;;  %v5226_v49 = vld [vmem:[%s4927_s20 + $0x108] sm:$0xff] }
  0x24   : > { %v5212_v48 = vsel %vm317_vm0, %v363_v2, %v364_v5  ;;  %v368_v54 = vrot.slane %v5185_v31, 1  ;;  %v369_v57 = vrot.slane %v5188_v23, 1  ;;  %v5217_v8 = vld [vmem:[%s4927_s20 + $0x100] sm:$0x3]  ;;  %v998_v38 = vrot.slane %v4986_v45, 2  ;;  %v5229_v59 = vld [vmem:[%s4927_s20 + $0x110] sm:$0xff] }
  0x25   : > { %4008 = vmatmul.mubr.msk.f32.gmra.mrb[6].mxu1 %vm403_vm1, %v5043_v1  ;;  %4232 = vmatmul.mubr.msk.f32.gmra.mrb[6].mxu0 %vm403_vm1, %v5070_v11  ;;  %6381 = vst [vmem:[#allocation19_spill] sm:$0xff] %v5212_v48  ;;  %v4546_v2 = vpack.c.bf16 %v3556_v35, %v3555_v27  ;;  %v3589_v27 = vld [vmem:[%s6284_s1 + $0xe0] sm:$0xff]  ;;  %v3590_v35 = vld [vmem:[%s6284_s1 + $0xe8] sm:$0xff]  ;;  %v1011_v1 = vrot.slane %v5052_v7, 2  ;;  %v1016_v55 = vrot.slane %v5079_v16, 2  ;;  %v1018_v16 = vrot.slane %v5084_v17, 2 }
  0x26   : > { %4010 = vmatprep.mubr.msk.f32.mxu1 %vm403_vm1, %v5047_v4  ;;  %4234 = vmatprep.mubr.msk.f32.mxu0 %vm403_vm1, %v5074_v13  ;;  %v5297_v4 = vld [vmem:[%s4927_s20 + $0x130] sm:$0x3]  ;;  %v5333_v56 = vld [vmem:[%s4927_s20 + $0x148] sm:$0x3] }
  0x27   : > { %4511 = vmatprep.subr.bf16.mxu1 %v5190_v25 }
  0x29   : > { %4011 = vmatmul.mubr.msk.f32.gmra.mrb[8].mxu1 %vm403_vm1, %v5070_v11  ;;  %4235 = vmatmul.mubr.msk.f32.gmra.mrb[8].mxu0 %vm403_vm1, %v5096_v19  ;;  %v1006_v11 = vrot.slane %v5025_v61, 2  ;;  %v1008_v61 = vrot.slane %v5031_v63, 2 }
  0x2a   : > { %4013 = vmatprep.mubr.msk.f32.mxu1 %vm403_vm1, %v5074_v13  ;;  %4237 = vmatprep.mubr.msk.f32.mxu0 %vm403_vm1, %v5100_v24 }
  0x2d   : > { %4014 = vmatmul.mubr.msk.f32.gmra.mrb[10].mxu1 %vm403_vm1, %v5096_v19  ;;  %4238 = vmatmul.mubr.msk.f32.gmra.mrb[10].mxu0 %vm403_vm1, %v5122_v34  ;;  %v5268_v19 = vld [vmem:[%s4927_s20 + $0x120] sm:$0xff] }
  0x2e   : > { %4016 = vmatprep.mubr.msk.f32.mxu1 %vm403_vm1, %v5100_v24  ;;  %4240 = vmatprep.mubr.msk.f32.mxu0 %vm403_vm1, %v5126_v37  ;;  %v1003_v24 = vrot.slane %v5000_v51, 2 }
  0x31   : > { %4017 = vmatmul.mubr.msk.f32.gmra.mrb[12].mxu1 %vm403_vm1, %v5122_v34  ;;  %4241 = vmatmul.mubr.msk.f32.gmra.mrb[12].mxu0 %vm403_vm1, %v5142_v42  ;;  %v371_v34 = vrot.slane %v5217_v8, 1 }
  0x32   : > { %4019 = vmatprep.mubr.msk.f32.mxu1 %vm403_vm1, %v5126_v37  ;;  %4243 = vmatprep.mubr.msk.f32.mxu0 %vm403_vm1, %v5146_v44  ;;  %v5241_v37 = vsel %vm982_vm2, %v994_v15, %v996_v40  ;;  %v374_v40 = vrot.slane %v5229_v59, 1 }
  0x33   : > { %6383 = vst [vmem:[#allocation21_spill] sm:$0xff] %v5241_v37 }
  0x35   : > { %4020 = vmatmul.mubr.msk.f32.gmra.mrb[14].mxu1 %vm403_vm1, %v5142_v42  ;;  %4244 = vmatmul.mubr.msk.f32.gmra.mrb[14].mxu0 %vm403_vm1, %v5172_v60  ;;  %v999_v42 = vrot.slane %v4989_v46, 2 }
  0x36   : > { %4022 = vmatprep.mubr.msk.f32.mxu1 %vm403_vm1, %v5146_v44  ;;  %4278 = vmatprep.mubr.msk.f32.mxu0 %vm403_vm1, %v5180_v12  ;;  %v5221_v44 = vsel %vm982_vm2, %v993_v14, %v994_v15  ;;  %v5238_v14 = vsel %vm317_vm0, %v364_v5, %v366_v39  ;;  %v5254_v5 = vsel %vm317_vm0, %v368_v54, %v369_v57  ;;  %v1001_v15 = vrot.slane %v4992_v47, 2  ;;  %v5271_v54 = vld [vmem:[%s4927_s20 + $0x128] sm:$0xff] }
  0x37   : > { %6382 = vst [vmem:[#allocation20_spill] sm:$0xff] %v5238_v14  ;;  %6384 = vst [vmem:[#allocation22_spill] sm:$0xff] %v5254_v5  ;;  %v373_v39 = vrot.slane %v5226_v49, 1  ;;  %v5275_v47 = vpack.c.bf16 %v3590_v35, %v3589_v27 }
  0x38   : > { %v5289_v27 = vsel %vm982_vm2, %v999_v42, %v1001_v15  ;;  %v5308_v15 = vld [vmem:[%s4927_s20 + $0x140] sm:$0xff] }
  0x39   : > { %4023 = vmatmul.mubr.msk.f32.gmra.mrb[16].mxu1 %vm403_vm1, %v5172_v60  ;;  %4279 = vmatmul.mubr.msk.f32.vlgmr.msra.gmra.mrb[0].mxu0 %vm403_vm1, %v5209_v43  ;;  %v5263_v60 = vsel %vm982_vm2, %v998_v38, %v999_v42  ;;  %v5282_v38 = vsel %vm317_vm0, %v369_v57, %v371_v34  ;;  %6387 = vst [vmem:[#allocation25_spill] sm:$0xff] %v5289_v27  ;;  %v1009_v57 = vrot.slane %v5034_v0, 2  ;;  %v5305_v42 = vld [vmem:[%s4927_s20 + $0x138] sm:$0xff] }
  0x3a   : > { %4025 = vmatprep.mubr.msk.f32.mxu1 %vm403_vm1, %v5212_v48  ;;  %4545 = vmatpush3.bf16.msra.mxu0 %v5027_v62  ;;  %v5260_v48 = vld [vmem:[%s4927_s20 + $0x118] sm:$0x3]  ;;  %6385 = vst [vmem:[#allocation23_spill] sm:$0xff] %v5263_v60  ;;  %v1004_v62 = vrot.slane %v5003_v52, 2  ;;  %6386 = vst [vmem:[#allocation24_spill] sm:$0xff] %v5282_v38  ;;  %v5292_v35 = vsel %vm317_vm0, %v373_v39, %v374_v40  ;;  %v381_v39 = vrot.slane %v5297_v4, 1 }
  0x3b   : > { %4281 = vmatprep.mubr.msk.f32.mxu0 %vm403_vm1, %v5221_v44  ;;  %4547 = vmatprep.subr.bf16.mxu0 %v4546_v2  ;;  %v376_v13 = vrot.slane %v5260_v48, 1  ;;  %6388 = vst [vmem:[#allocation26_spill] sm:$0xff] %v5292_v35  ;;  %v383_v58 = vrot.slane %v5305_v42, 1 }
  0x3c   : > { %v5300_v34 = vsel %vm982_vm2, %v1003_v24, %v1004_v62 }
  0x3d   : > { %4026 = vmatmul.mubr.msk.f32.gmra.mrb[18].mxu1 %vm403_vm1, %v5238_v14  ;;  %4282 = vmatmul.mubr.msk.f32.gmra.mrb[2].mxu0 %vm403_vm1, %v5241_v37  ;;  %v378_v14 = vrot.slane %v5268_v19, 1  ;;  %6389 = vst [vmem:[#allocation27_spill] sm:$0xff] %v5300_v34  ;;  %v5318_v24 = vsel %vm317_vm0, %v374_v40, %v376_v13  ;;  %v5336_v13 = vsel %vm982_vm2, %v1008_v61, %v1009_v57  ;;  %v1014_v40 = vrot.slane %v5061_v10, 2  ;;  %v5403_v37 = vld [vmem:[%s4927_s20 + $0x178] sm:$0x3] }
  0x3e   : > { %4028 = vmatprep.mubr.msk.f32.mxu1 %vm403_vm1, %v5254_v5  ;;  %4284 = vmatprep.mubr.msk.f32.mxu0 %vm403_vm1, %v5263_v60  ;;  %v379_v5 = vrot.slane %v5271_v54, 1  ;;  %6390 = vst [vmem:[#allocation28_spill] sm:$0xff] %v5318_v24  ;;  %6393 = vst [vmem:[#allocation31_spill] sm:$0xff] %v5336_v13  ;;  %v386_v61 = vrot.slane %v5333_v56, 1 }
  0x3f   : > { %4549 = vmatpush3.bf16.msra.mxu0 %v4546_v2  ;;  %v5321_v2 = vsel %vm982_vm2, %v1004_v62, %v1006_v11  ;;  %v1013_v11 = vrot.slane %v5058_v9, 2  ;;  %v5341_v62 = vld [vmem:[%s4927_s20 + $0x150] sm:$0xff] }
  0x40   : > { %4551 = vmatprep.subr.bf16.mxu0 %v5275_v47  ;;  %6391 = vst [vmem:[#allocation29_spill] sm:$0xff] %v5321_v2  ;;  %v5353_v7 = vsel %vm317_vm0, %v379_v5, %v381_v39  ;;  %v1019_v39 = vrot.slane %v5087_v18, 2 }
  0x41   : > { %4029 = vmatmul.mubr.msk.f32.gmra.mrb[20].mxu1 %vm403_vm1, %v5282_v38  ;;  %4285 = vmatmul.mubr.msk.f32.gmra.mrb[4].mxu0 %vm403_vm1, %v5289_v27  ;;  %v5327_v38 = vsel %vm317_vm0, %v378_v14, %v379_v5  ;;  %v5344_v14 = vld [vmem:[%s4927_s20 + $0x158] sm:$0xff]  ;;  %6394 = vst [vmem:[#allocation32_spill] sm:$0xff] %v5353_v7  ;;  %v5368_v27 = vld [vmem:[%s4927_s20 + $0x160] sm:$0x3]  ;;  %v5371_v5 = vsel %vm982_vm2, %v1013_v11, %v1014_v40 }
  0x42   : > { %4031 = vmatprep.mubr.msk.f32.mxu1 %vm403_vm1, %v5292_v35  ;;  %4287 = vmatprep.mubr.msk.f32.mxu0 %vm403_vm1, %v5300_v34  ;;  %6392 = vst [vmem:[#allocation30_spill] sm:$0xff] %v5327_v38  ;;  %v384_v35 = vrot.slane %v5308_v15, 1  ;;  %v5360_v34 = vsel %vm982_vm2, %v1009_v57, %v1011_v1  ;;  %v5379_v1 = vld [vmem:[%s4927_s20 + $0x170] sm:$0xff]  ;;  %v5391_v57 = vsel %vm982_vm2, %v1014_v40, %v1016_v55  ;;  %v391_v11 = vrot.slane %v5368_v27, 1 }
  0x43   : > { %6395 = vst [vmem:[#allocation33_spill] sm:$0xff] %v5360_v34  ;;  %6398 = vst [vmem:[#allocation36_spill] sm:$0xff] %v5379_v1  ;;  %v1023_v55 = vrot.slane %v5110_v30, 2  ;;  %v1024_v40 = vrot.slane %v5113_v33, 2 }
  0x44   : > { %6400 = vst [vmem:[#allocation38_spill] sm:$0xff] %v5391_v57 }
  0x45   : > { %4032 = vmatmul.mubr.msk.f32.gmra.mrb[22].mxu1 %vm403_vm1, %v5318_v24  ;;  %4288 = vmatmul.mubr.msk.f32.gmra.mrb[6].mxu0 %vm403_vm1, %v5321_v2  ;;  %v5363_v24 = vsel %vm317_vm0, %v383_v58, %v384_v35  ;;  %v388_v2 = vrot.slane %v5341_v62, 1  ;;  %v5388_v58 = vsel %vm317_vm0, %v384_v35, %v386_v61  ;;  %v5406_v35 = vsel %vm982_vm2, %v1018_v16, %v1019_v39 }
  0x46   : > { %4034 = vmatprep.mubr.msk.f32.mxu1 %vm403_vm1, %v5327_v38  ;;  %4290 = vmatprep.mubr.msk.f32.mxu0 %vm403_vm1, %v5336_v13  ;;  %6396 = vst [vmem:[#allocation34_spill] sm:$0xff] %v5363_v24  ;;  %v389_v38 = vrot.slane %v5344_v14, 1  ;;  %v5376_v13 = vld [vmem:[%s4927_s20 + $0x168] sm:$0xff]  ;;  %6399 = vst [vmem:[#allocation37_spill] sm:$0xff] %v5388_v58 }
  0x47   : > { %6397 = vst [vmem:[#allocation35_spill] sm:$0xff] %v5376_v13 }
  0x48   : > { %v5397_v60 = vsel %vm317_vm0, %v388_v2, %v389_v38  ;;  %v396_v2 = vrot.slane %v5403_v37, 1 }
  0x49   : > { %4035 = vmatmul.mubr.msk.f32.gmra.mrb[24].mxu1 %vm403_vm1, %v5353_v7  ;;  %4291 = vmatmul.mubr.msk.f32.gmra.mrb[8].mxu0 %vm403_vm1, %v5360_v34  ;;  %6401 = vst [vmem:[#allocation39_spill] sm:$0xff] %v5397_v60  ;;  %v1021_v7 = vrot.slane %v5105_v29, 2  ;;  %v393_v34 = vrot.slane %v5376_v13, 1  ;;  %v5417_v29 = vsel %vm317_vm0, %v389_v38, %v391_v11  ;;  %v1029_v38 = vrot.slane %v5154_v53, 2 }
  0x4a   : > { %4037 = vmatprep.mubr.msk.f32.mxu1 %vm403_vm1, %v5363_v24  ;;  %4293 = vmatprep.mubr.msk.f32.mxu0 %vm403_vm1, %v5371_v5  ;;  %v394_v24 = vrot.slane %v5379_v1, 1  ;;  %6402 = vst [vmem:[#allocation40_spill] sm:$0xff] %v5417_v29  ;;  %v1033_v11 = vrot.slane %v5185_v31, 2 }
  0x4b   : > { %v5423_v61 = vsel %vm982_vm2, %v1019_v39, %v1021_v7  ;;  %v1031_v7 = vrot.slane %v5177_v6, 2  ;;  %v1036_v6 = vrot.slane %v5217_v8, 2 }
  0x4c   : > { %6403 = vst [vmem:[#allocation41_spill] sm:$0xff] %v5423_v61  ;;  %v5426_v16 = vsel %vm317_vm0, %v393_v34, %v394_v24  ;;  %v5441_v34 = vsel %vm317_vm0, %v394_v24, %v396_v2  ;;  %v3411_v24 = vld [vmem:[%s6284_s1 + $0x50] sm:$0xff]  ;;  %v1038_v2 = vrot.slane %v5226_v49, 2 }
  0x4d   : > { %4038 = vmatmul.mubr.msk.f32.gmra.mrb[26].mxu1 %vm403_vm1, %v5388_v58  ;;  %4294 = vmatmul.mubr.msk.f32.gmra.mrb[10].mxu0 %vm403_vm1, %v5391_v57  ;;  %6404 = vst [vmem:[#allocation42_spill] sm:$0xff] %v5426_v16  ;;  %v1026_v58 = vrot.slane %v5131_v41, 2  ;;  %v5430_v57 = vsel %vm982_vm2, %v1023_v55, %v1024_v40  ;;  %6406 = vst [vmem:[#allocation44_spill] sm:$0xff] %v5441_v34  ;;  %v1034_v55 = vrot.slane %v5188_v23, 2 }
  0x4e   : > { %4040 = vmatprep.mubr.msk.f32.mxu1 %vm403_vm1, %v5397_v60  ;;  %4296 = vmatprep.mubr.msk.f32.mxu0 %vm403_vm1, %v5406_v35  ;;  %6405 = vst [vmem:[#allocation43_spill] sm:$0xff] %v5430_v57  ;;  %v1028_v60 = vrot.slane %v5151_v50, 2 }
  0x4f   : > { %v5446_v41 = vsel %vm982_vm2, %v1024_v40, %v1026_v58  ;;  %v3412_v58 = vld [vmem:[%s6284_s1 + $0x58] sm:$0xff]  ;;  %v5473_v40 = vsel %vm982_vm2, %v1033_v11, %v1034_v55  ;;  %v5493_v8 = vsel %vm982_vm2, %v1034_v55, %v1036_v6  ;;  %v1048_v55 = vrot.slane %v5305_v42, 2 }
  0x50   : > { %v5450_v39 = vsel %vm982_vm2, %v1028_v60, %v1029_v38  ;;  %v5469_v60 = vsel %vm982_vm2, %v1029_v38, %v1031_v7  ;;  %v3446_v38 = vld [vmem:[%s6284_s1 + $0x68] sm:$0xff]  ;;  %v1041_v7 = vrot.slane %v5260_v48, 2  ;;  %v1046_v48 = vrot.slane %v5297_v4, 2 }
  0x51   : > { %4041 = vmatmul.mubr.msk.f32.gmra.mrb[28].mxu1 %vm403_vm1, %v5417_v29  ;;  %4297 = vmatmul.mubr.msk.f32.gmra.mrb[12].mxu0 %vm403_vm1, %v5423_v61  ;;  %6407 = vst [vmem:[#allocation45_spill] sm:$0xff] %v5469_v60  ;;  %v3445_v29 = vld [vmem:[%s6284_s1 + $0x60] sm:$0xff]  ;;  %v1049_v6 = vrot.slane %v5308_v15, 2 }
  0x52   : > { %4043 = vmatprep.mubr.msk.f32.mxu1 %vm403_vm1, %v5426_v16  ;;  %4299 = vmatprep.mubr.msk.f32.mxu0 %vm403_vm1, %v5430_v57  ;;  %v4514_v16 = vpack.c.bf16 %v3412_v58, %v3411_v24  ;;  %v1043_v24 = vrot.slane %v5268_v19, 2  ;;  %v1044_v58 = vrot.slane %v5271_v54, 2 }
  0x54   : > { %v5530_v4 = vsel %vm982_vm2, %v1044_v58, %v1046_v48  ;;  %v1059_v48 = vrot.slane %v5379_v1, 2 }
  0x55   : > { %4044 = vmatmul.mubr.msk.f32.gmra.mrb[30].mxu1 %vm403_vm1, %v5441_v34  ;;  %4300 = vmatmul.mubr.msk.f32.gmra.mrb[14].mxu0 %vm403_vm1, %v5446_v41  ;;  %v1039_v34 = vrot.slane %v5229_v59, 2 }
  0x56   : > { %4054 = vmatprep.mubr.msk.f32.mxu1 %vm403_vm1, %v4936_v20  ;;  %4302 = vmatprep.mubr.msk.f32.mxu0 %vm403_vm1, %v5450_v39 }
  0x57   : > { %v5497_v11 = vsel %vm982_vm2, %v1038_v2, %v1039_v34  ;;  %v1053_v2 = vrot.slane %v5341_v62, 2 }
  0x59   : > { %4055 = vmatmul.mubr.msk.f32.vlgmr.msra.gmra.mrb[0].mxu1 %vm403_vm1, %v4939_v21  ;;  %4303 = vmatmul.mubr.msk.f32.gmra.mrb[16].mxu0 %vm403_vm1, %v5469_v60  ;;  %v5501_v60 = vpack.c.bf16 %v3446_v38, %v3445_v29  ;;  %v5516_v29 = vsel %vm982_vm2, %v1043_v24, %v1044_v58  ;;  %v1054_v38 = vrot.slane %v5344_v14, 2  ;;  %v1058_v58 = vrot.slane %v5376_v13, 2 }
  0x5a   : > { %4057 = vmatprep.mubr.msk.f32.mxu1 %vm403_vm1, %v4942_v22  ;;  %4513 = vmatpush3.bf16.msra.mxu1 %v5190_v25  ;;  %v5512_v25 = vsel %vm982_vm2, %v1039_v34, %v1041_v7  ;;  %v5534_v34 = vsel %vm982_vm2, %v1048_v55, %v1049_v6  ;;  %v1056_v7 = vrot.slane %v5368_v27, 2  ;;  %v5558_v55 = vld [vmem:[%s4927_s20 + $0x180] sm:$0xff] }
  0x5b   : > { %4305 = vmatprep.mubr.msk.f32.mxu0 %vm403_vm1, %v5473_v40  ;;  %4515 = vmatprep.subr.bf16.mxu1 %v4514_v16  ;;  %6408 = vst [vmem:[#allocation46_spill] sm:$0xff] %v5534_v34  ;;  %v5551_v24 = vsel %vm982_vm2, %v1053_v2, %v1054_v38  ;;  %v1929_v2 = vrot.slane %v5558_v55, 2 }
  0x5c   : > { %6409 = vst [vmem:[#allocation47_spill] sm:$0xff] %v5551_v24  ;;  %v5570_v27 = vsel %vm982_vm2, %v1054_v38, %v1056_v7 }
  0x5d   : > { %4058 = vmatmul.mubr.msk.f32.gmra.mrb[2].mxu1 %vm403_vm1, %v4951_v26  ;;  %4306 = vmatmul.mubr.msk.f32.gmra.mrb[18].mxu0 %vm403_vm1, %v5493_v8  ;;  %v5561_v26 = vld [vmem:[%s4927_s20 + $0x188] sm:$0xff]  ;;  %6410 = vst [vmem:[#allocation48_spill] sm:$0xff] %v5570_v27 }
  0x5e   : > { %4060 = vmatprep.mubr.msk.f32.mxu1 %vm403_vm1, %v4963_v32  ;;  %4308 = vmatprep.mubr.msk.f32.mxu0 %vm403_vm1, %v5497_v11  ;;  %v1930_v22 = vrot.slane %v5561_v26, 2 }
  0x5f   : > { %4517 = vmatpush3.bf16.msra.mxu1 %v4514_v16  ;;  %v1051_v16 = vrot.slane %v5333_v56, 2 }
  0x60   : > { %4519 = vmatprep.subr.bf16.mxu1 %v5501_v60  ;;  %v5594_v7 = vsel %vm982_vm2, %v1929_v2, %v1930_v22  ;;  %v3625_v2 = vld [vmem:[%s6284_s1 + $0x100] sm:$0xff] }
  0x61   : > { %4061 = vmatmul.mubr.msk.f32.gmra.mrb[4].mxu1 %vm403_vm1, %v4971_v36  ;;  %4309 = vmatmul.mubr.msk.f32.gmra.mrb[20].mxu0 %vm403_vm1, %v5512_v25  ;;  %v5547_v56 = vsel %vm982_vm2, %v1049_v6, %v1051_v16  ;;  %v1061_v6 = vrot.slane %v5403_v37, 2  ;;  %v5574_v16 = vsel %vm982_vm2, %v1058_v58, %v1059_v48  ;;  %6413 = vst [vmem:[#allocation51_spill] sm:$0xff] %v5594_v7 }
  0x62   : > { %4063 = vmatprep.mubr.msk.f32.mxu1 %vm403_vm1, %v4986_v45  ;;  %4311 = vmatprep.mubr.msk.f32.mxu0 %vm403_vm1, %v5516_v29  ;;  %6411 = vst [vmem:[#allocation49_spill] sm:$0xff] %v5574_v16 }
  0x63   : > { %v5590_v37 = vsel %vm982_vm2, %v1059_v48, %v1061_v6  ;;  %v3591_v48 = vld [vmem:[%s6284_s1 + $0xf0] sm:$0xff]  ;;  %v3592_v6 = vld [vmem:[%s6284_s1 + $0xf8] sm:$0xff] }
  0x64   : > { %6412 = vst [vmem:[#allocation50_spill] sm:$0xff] %v5590_v37 }
  0x65   : > { %4064 = vmatmul.mubr.msk.f32.gmra.mrb[6].mxu1 %vm403_vm1, %v4989_v46  ;;  %4312 = vmatmul.mubr.msk.f32.gmra.mrb[22].mxu0 %vm403_vm1, %v5530_v4 }
  0x66   : > { %4066 = vmatprep.mubr.msk.f32.mxu1 %vm403_vm1, %v5000_v51  ;;  %4314 = vmatprep.mubr.msk.f32.mxu0 %vm403_vm1, %v5534_v34  ;;  %v5579_v34 = vld [vmem:[%s4927_s20 + $0x190] sm:$0x3] }
  0x67   : > { %v1932_v38 = vrot.slane %v5579_v34, 2 }
  0x69   : > { %4067 = vmatmul.mubr.msk.f32.gmra.mrb[8].mxu1 %vm403_vm1, %v5003_v52  ;;  %4315 = vmatmul.mubr.msk.f32.gmra.mrb[24].mxu0 %vm403_vm1, %v5547_v56  ;;  %v5605_v58 = vsel %vm982_vm2, %v1930_v22, %v1932_v38  ;;  %v4554_v22 = vpack.c.bf16 %v3592_v6, %v3591_v48  ;;  %v3626_v38 = vld [vmem:[%s6284_s1 + $0x108] sm:$0xff]  ;;  %v984_v6 = vrot.slane %v4939_v21, 2  ;;  %v3448_v21 = vld [vmem:[%s6284_s1 + $0x78] sm:$0xff] }
  0x6a   : > { %4069 = vmatprep.mubr.msk.f32.mxu1 %vm403_vm1, %v5031_v63  ;;  %4317 = vmatprep.mubr.msk.f32.mxu0 %vm403_vm1, %v5551_v24  ;;  %6414 = vst [vmem:[#allocation52_spill] sm:$0xff] %v5605_v58  ;;  %v5636_v48 = vpack.c.bf16 %v3626_v38, %v3625_v2 }
  0x6d   : > { %4070 = vmatmul.mubr.msk.f32.gmra.mrb[10].mxu1 %vm403_vm1, %v5034_v0  ;;  %4318 = vmatmul.mubr.msk.f32.gmra.mrb[26].mxu0 %vm403_vm1, %v5570_v27 }
  0x6e   : > { %4072 = vmatprep.mubr.msk.f32.mxu1 %vm403_vm1, %v5058_v9  ;;  %4320 = vmatprep.mubr.msk.f32.mxu0 %vm403_vm1, %v5574_v16 }
  0x71   : > { %4073 = vmatmul.mubr.msk.f32.gmra.mrb[12].mxu1 %vm403_vm1, %v5061_v10  ;;  %4321 = vmatmul.mubr.msk.f32.gmra.mrb[28].mxu0 %vm403_vm1, %v5590_v37 }
  0x72   : > { %4075 = vmatprep.mubr.msk.f32.mxu1 %vm403_vm1, %v5084_v17  ;;  %4323 = vmatprep.mubr.msk.f32.mxu0 %vm403_vm1, %v5594_v7  ;;  %v6423_v7 = vld [vmem:[#allocation5_spill] sm:$0xff] }
  0x75   : > { %4076 = vmatmul.mubr.msk.f32.gmra.mrb[14].mxu1 %vm403_vm1, %v5087_v18  ;;  %4324 = vmatmul.mubr.msk.f32.gmra.mrb[30].mxu0 %vm403_vm1, %v5605_v58  ;;  %v3628_v58 = vld [vmem:[%s6284_s1 + $0x118] sm:$0xff] }
  0x76   : > { %4078 = vmatprep.mubr.msk.f32.mxu1 %vm403_vm1, %v5110_v30  ;;  %4334 = vmatprep.mubr.msk.f32.mxu0 %vm403_vm1, %v4963_v32 }
  0x79   : > { %4079 = vmatmul.mubr.msk.f32.gmra.mrb[16].mxu1 %vm403_vm1, %v5113_v33  ;;  %4335 = vmatmul.mubr.msk.f32.vlgmr.msra.gmra.mrb[0].mxu0 %vm403_vm1, %v4971_v36 }
  0x7a   : > { %4081 = vmatprep.mubr.msk.f32.mxu1 %vm403_vm1, %v5151_v50  ;;  %4553 = vmatpush3.bf16.msra.mxu0 %v5275_v47  ;;  %v983_v47 = vrot.slane %v4936_v20, 2  ;;  %v3447_v20 = vld [vmem:[%s6284_s1 + $0x70] sm:$0xff] }
  0x7b   : > { %4337 = vmatprep.mubr.msk.f32.mxu0 %vm403_vm1, %v4986_v45  ;;  %4555 = vmatprep.subr.bf16.mxu0 %v4554_v22  ;;  %v4522_v38 = vpack.c.bf16 %v3448_v21, %v3447_v20  ;;  %v5755_v20 = vld [vmem:[%s4927_s20 + $0x198] sm:$0xff]  ;;  %v6422_v21 = vld [vmem:[#allocation38_spill] sm:$0xff] }
  0x7c   : > { %v985_v2 = vsel %vm982_vm2, %v983_v47, %v984_v6  ;;  %v6418_v47 = vld [vmem:[#allocation27_spill] sm:$0xff] }
  0x7d   : > { %4082 = vmatmul.mubr.msk.f32.gmra.mrb[18].mxu1 %vm403_vm1, %v5154_v53  ;;  %4338 = vmatmul.mubr.msk.f32.gmra.mrb[2].mxu0 %vm403_vm1, %v4989_v46 }
  0x7e   : > { %4084 = vmatprep.mubr.msk.f32.mxu1 %vm403_vm1, %v5185_v31  ;;  %4340 = vmatprep.mubr.msk.f32.mxu0 %vm403_vm1, %v5000_v51 }
  0x7f   : > { %4557 = vmatpush3.bf16.msra.mxu0 %v4554_v22  ;;  %v986_v22 = vrot.slane %v4955_v28, 2 }
  0x80   : > { %4559 = vmatprep.subr.bf16.mxu0 %v5636_v48 }
  0x81   : > { %4085 = vmatmul.mubr.msk.f32.gmra.mrb[20].mxu1 %vm403_vm1, %v5188_v23  ;;  %4341 = vmatmul.mubr.msk.f32.gmra.mrb[4].mxu0 %vm403_vm1, %v5003_v52  ;;  %v987_v28 = vsel %vm982_vm2, %v984_v6, %v986_v22  ;;  %v6419_v6 = vld [vmem:[#allocation29_spill] sm:$0xff]  ;;  %v6420_v22 = vld [vmem:[#allocation31_spill] sm:$0xff] }
  0x82   : > { %4087 = vmatprep.mubr.msk.f32.mxu1 %vm403_vm1, %v5226_v49  ;;  %4343 = vmatprep.mubr.msk.f32.mxu0 %vm403_vm1, %v5031_v63 }
  0x85   : > { %4088 = vmatmul.mubr.msk.f32.gmra.mrb[22].mxu1 %vm403_vm1, %v5229_v59  ;;  %4344 = vmatmul.mubr.msk.f32.gmra.mrb[6].mxu0 %vm403_vm1, %v5034_v0 }
  0x86   : > { %4090 = vmatprep.mubr.msk.f32.mxu1 %vm403_vm1, %v5268_v19  ;;  %4346 = vmatprep.mubr.msk.f32.mxu0 %vm403_vm1, %v5058_v9 }
  0x89   : > { %4091 = vmatmul.mubr.msk.f32.gmra.mrb[24].mxu1 %vm403_vm1, %v5271_v54  ;;  %4347 = vmatmul.mubr.msk.f32.gmra.mrb[8].mxu0 %vm403_vm1, %v5061_v10 }
  0x8a   : > { %4093 = vmatprep.mubr.msk.f32.mxu1 %vm403_vm1, %v5305_v42  ;;  %4349 = vmatprep.mubr.msk.f32.mxu0 %vm403_vm1, %v5084_v17 }
  0x8d   : > { %4094 = vmatmul.mubr.msk.f32.gmra.mrb[26].mxu1 %vm403_vm1, %v5308_v15  ;;  %4350 = vmatmul.mubr.msk.f32.gmra.mrb[10].mxu0 %vm403_vm1, %v5087_v18 }
  0x8e   : > { %4096 = vmatprep.mubr.msk.f32.mxu1 %vm403_vm1, %v5341_v62  ;;  %4352 = vmatprep.mubr.msk.f32.mxu0 %vm403_vm1, %v5110_v30 }
  0x91   : > { %4097 = vmatmul.mubr.msk.f32.gmra.mrb[28].mxu1 %vm403_vm1, %v5344_v14  ;;  %4353 = vmatmul.mubr.msk.f32.gmra.mrb[12].mxu0 %vm403_vm1, %v5113_v33 }
  0x92   : > { %4099 = vmatprep.mubr.msk.f32.mxu1 %vm403_vm1, %v5376_v13  ;;  %4355 = vmatprep.mubr.msk.f32.mxu0 %vm403_vm1, %v5151_v50 }
  0x95   : > { %4100 = vmatmul.mubr.msk.f32.gmra.mrb[30].mxu1 %vm403_vm1, %v5379_v1  ;;  %4356 = vmatmul.mubr.msk.f32.gmra.mrb[14].mxu0 %vm403_vm1, %v5154_v53 }
  0x96   : > { %4110 = vmatprep.mubr.msk.f32.mxu1 %vm403_vm1, %v985_v2  ;;  %4358 = vmatprep.mubr.msk.f32.mxu0 %vm403_vm1, %v5185_v31  ;;  %v6421_v2 = vld [vmem:[#allocation33_spill] sm:$0xff] }
  0x99   : > { %4111 = vmatmul.mubr.msk.f32.vlgmr.msra.gmra.mrb[0].mxu1 %vm403_vm1, %v987_v28  ;;  %4359 = vmatmul.mubr.msk.f32.gmra.mrb[16].mxu0 %vm403_vm1, %v5188_v23  ;;  %v5766_v28 = vld [vmem:[%s4927_s20 + $0x1a0] sm:$0xff] }
  0x9a   : > { %4113 = vmatprep.mubr.msk.f32.mxu1 %vm403_vm1, %v5180_v12  ;;  %4521 = vmatpush3.bf16.msra.mxu1 %v5501_v60  ;;  %v6415_v12 = vld [vmem:[#allocation21_spill] sm:$0xff] }
  0x9b   : > { %4361 = vmatprep.mubr.msk.f32.mxu0 %vm403_vm1, %v5226_v49  ;;  %4523 = vmatprep.subr.bf16.mxu1 %v4522_v38  ;;  %v6417_v60 = vld [vmem:[#allocation25_spill] sm:$0xff] }
  0x9d   : > { %4114 = vmatmul.mubr.msk.f32.gmra.mrb[2].mxu1 %vm403_vm1, %v5209_v43  ;;  %4362 = vmatmul.mubr.msk.f32.gmra.mrb[18].mxu0 %vm403_vm1, %v5229_v59  ;;  %v6416_v43 = vld [vmem:[#allocation23_spill] sm:$0xff] }
  0x9e   : > { %4116 = vmatprep.mubr.msk.f32.mxu1 %vm403_vm1, %v5221_v44  ;;  %4364 = vmatprep.mubr.msk.f32.mxu0 %vm403_vm1, %v5268_v19 }
  0x9f   : > { %4525 = vmatpush3.bf16.msra.mxu1 %v4522_v38  ;;  %v3627_v38 = vld [vmem:[%s6284_s1 + $0x110] sm:$0xff] }
  0xa0   : > { %4566 = vmatprep.subr.bf16.mxu1 %v4887_v3 }
  0xa1   : > { %4117 = vmatmul.mubr.msk.f32.gmra.mrb[4].mxu1 %vm403_vm1, %v6415_v12  ;;  %4365 = vmatmul.mubr.msk.f32.gmra.mrb[20].mxu0 %vm403_vm1, %v5271_v54 }
  0xa2   : > { %4119 = vmatprep.mubr.msk.f32.mxu1 %vm403_vm1, %v6416_v43  ;;  %4367 = vmatprep.mubr.msk.f32.mxu0 %vm403_vm1, %v5305_v42 }
  0xa5   : > { %4120 = vmatmul.mubr.msk.f32.gmra.mrb[6].mxu1 %vm403_vm1, %v6417_v60  ;;  %4368 = vmatmul.mubr.msk.f32.gmra.mrb[22].mxu0 %vm403_vm1, %v5308_v15 }
  0xa6   : > { %4122 = vmatprep.mubr.msk.f32.mxu1 %vm403_vm1, %v6418_v47  ;;  %4370 = vmatprep.mubr.msk.f32.mxu0 %vm403_vm1, %v5341_v62 }
  0xa9   : > { %4123 = vmatmul.mubr.msk.f32.gmra.mrb[8].mxu1 %vm403_vm1, %v6419_v6  ;;  %4371 = vmatmul.mubr.msk.f32.gmra.mrb[24].mxu0 %vm403_vm1, %v5344_v14 }
  0xaa   : > { %4125 = vmatprep.mubr.msk.f32.mxu1 %vm403_vm1, %v6420_v22  ;;  %4373 = vmatprep.mubr.msk.f32.mxu0 %vm403_vm1, %v5376_v13  ;;  %v6424_v13 = vld [vmem:[#allocation6_spill] sm:$0xff] }
  0xad   : > { %4126 = vmatmul.mubr.msk.f32.gmra.mrb[10].mxu1 %vm403_vm1, %v6421_v2  ;;  %4374 = vmatmul.mubr.msk.f32.gmra.mrb[26].mxu0 %vm403_vm1, %v5379_v1  ;;  %v4562_v1 = vpack.c.bf16 %v3628_v58, %v3627_v38  ;;  %v6428_v58 = vld [vmem:[#allocation9_spill] sm:$0xff]  ;;  %v6433_v38 = vld [vmem:[#allocation14_spill] sm:$0xff] }
  0xae   : > { %4128 = vmatprep.mubr.msk.f32.mxu1 %vm403_vm1, %v5371_v5  ;;  %4376 = vmatprep.mubr.msk.f32.mxu0 %vm403_vm1, %v5558_v55 }
  0xb1   : > { %4129 = vmatmul.mubr.msk.f32.gmra.mrb[12].mxu1 %vm403_vm1, %v6422_v21  ;;  %4377 = vmatmul.mubr.msk.f32.gmra.mrb[28].mxu0 %vm403_vm1, %v5561_v26 }
  0xb2   : > { %4131 = vmatprep.mubr.msk.f32.mxu1 %vm403_vm1, %v5406_v35  ;;  %4379 = vmatprep.mubr.msk.f32.mxu0 %vm403_vm1, %v5755_v20 }
  0xb5   : > { %4132 = vmatmul.mubr.msk.f32.gmra.mrb[14].mxu1 %vm403_vm1, %v5423_v61  ;;  %4380 = vmatmul.mubr.msk.f32.gmra.mrb[30].mxu0 %vm403_vm1, %v5766_v28  ;;  %v6425_v61 = vld [vmem:[#allocation7_spill] sm:$0xff] }
  0xb6   : > { %4134 = vmatprep.mubr.msk.f32.mxu1 %vm403_vm1, %v5430_v57  ;;  %4390 = vmatprep.mubr.msk.f32.mxu0 %vm403_vm1, %v6423_v7  ;;  %v6426_v57 = vld [vmem:[#allocation45_spill] sm:$0xff]  ;;  %v6427_v7 = vld [vmem:[#allocation8_spill] sm:$0xff] }
  0xb9   : > { %4135 = vmatmul.mubr.msk.f32.gmra.mrb[16].mxu1 %vm403_vm1, %v5446_v41  ;;  %4391 = vmatmul.mubr.msk.f32.vlgmr.msra.gmra.mrb[0].mxu0 %vm403_vm1, %v6424_v13  ;;  %v6429_v13 = vld [vmem:[#allocation10_spill] sm:$0xff] }
  0xba   : > { %4137 = vmatprep.mubr.msk.f32.mxu1 %vm403_vm1, %v5450_v39  ;;  %4561 = vmatpush3.bf16.msra.mxu0 %v5636_v48  ;;  %v6431_v48 = vld [vmem:[#allocation12_spill] sm:$0xff] }
  0xbb   : > { %4393 = vmatprep.mubr.msk.f32.mxu0 %vm403_vm1, %v6425_v61  ;;  %4563 = vmatprep.subr.bf16.mxu0 %v4562_v1  ;;  %v6430_v61 = vld [vmem:[#allocation11_spill] sm:$0xff] }
  0xbd   : > { %4138 = vmatmul.mubr.msk.f32.gmra.mrb[18].mxu1 %vm403_vm1, %v6426_v57  ;;  %4394 = vmatmul.mubr.msk.f32.gmra.mrb[2].mxu0 %vm403_vm1, %v6427_v7  ;;  %v6434_v7 = vld [vmem:[#allocation46_spill] sm:$0xff] }
  0xbe   : > { %4140 = vmatprep.mubr.msk.f32.mxu1 %vm403_vm1, %v5473_v40  ;;  %4396 = vmatprep.mubr.msk.f32.mxu0 %vm403_vm1, %v6428_v58  ;;  %v6435_v58 = vld [vmem:[#allocation15_spill] sm:$0xff] }
  0xbf   : > { %4565 = vmatpush3.bf16.msra.mxu0 %v4562_v1  ;;  %v6432_v1 = vld [vmem:[#allocation13_spill] sm:$0xff] }
  0xc1   : > { %4141 = vmatmul.mubr.msk.f32.gmra.mrb[20].mxu1 %vm403_vm1, %v5493_v8  ;;  %4397 = vmatmul.mubr.msk.f32.gmra.mrb[4].mxu0 %vm403_vm1, %v6429_v13  ;;  %v6436_v13 = vld [vmem:[#allocation16_spill] sm:$0xff] }
  0xc2   : > { %4143 = vmatprep.mubr.msk.f32.mxu1 %vm403_vm1, %v5497_v11  ;;  %4399 = vmatprep.mubr.msk.f32.mxu0 %vm403_vm1, %v6430_v61  ;;  %v6437_v61 = vld [vmem:[#allocation17_spill] sm:$0xff] }
  0xc5   : > { %4144 = vmatmul.mubr.msk.f32.gmra.mrb[22].mxu1 %vm403_vm1, %v5512_v25  ;;  %4400 = vmatmul.mubr.msk.f32.gmra.mrb[6].mxu0 %vm403_vm1, %v6431_v48  ;;  %v6438_v48 = vld [vmem:[#allocation18_spill] sm:$0xff] }
  0xc6   : > { %4146 = vmatprep.mubr.msk.f32.mxu1 %vm403_vm1, %v5516_v29  ;;  %4402 = vmatprep.mubr.msk.f32.mxu0 %vm403_vm1, %v6432_v1  ;;  %v6439_v1 = vld [vmem:[#allocation19_spill] sm:$0xff] }
  0xc9   : > { %4147 = vmatmul.mubr.msk.f32.gmra.mrb[24].mxu1 %vm403_vm1, %v5530_v4  ;;  %4403 = vmatmul.mubr.msk.f32.gmra.mrb[8].mxu0 %vm403_vm1, %v6433_v38  ;;  %v6440_v38 = vld [vmem:[#allocation20_spill] sm:$0xff] }
  0xca   : > { %4149 = vmatprep.mubr.msk.f32.mxu1 %vm403_vm1, %v6434_v7  ;;  %4405 = vmatprep.mubr.msk.f32.mxu0 %vm403_vm1, %v6435_v58  ;;  %v6441_v58 = vld [vmem:[#allocation3_spill] sm:$0xff] }
  0xcd   : > { %4150 = vmatmul.mubr.msk.f32.gmra.mrb[26].mxu1 %vm403_vm1, %v5547_v56  ;;  %4406 = vmatmul.mubr.msk.f32.gmra.mrb[10].mxu0 %vm403_vm1, %v6436_v13  ;;  %v6442_v13 = vld [vmem:[#allocation22_spill] sm:$0xff] }
  0xce   : > { %4152 = vmatprep.mubr.msk.f32.mxu1 %vm403_vm1, %v5551_v24  ;;  %4408 = vmatprep.mubr.msk.f32.mxu0 %vm403_vm1, %v6437_v61  ;;  %v6443_v61 = vld [vmem:[#allocation4_spill] sm:$0xff]  ;;  %v5899_v24 = vld [vmem:[%s4927_s20 + $0x1a8] sm:$0x3]  ;;  %s3664_s20 = sshll.u32 %s6469_s16, 8 }
  0xcf   : > { %s6075_s27 = scalar_lea.vmem %s6286_s3, %s3664_s20  ;;  %s6214_s5 = scalar_lea.vmem %s6287_s4, %s3664_s20 }
  0xd1   : > { %4153 = vmatmul.mubr.msk.f32.gmra.mrb[28].mxu1 %vm403_vm1, %v5570_v27  ;;  %4409 = vmatmul.mubr.msk.f32.gmra.mrb[12].mxu0 %vm403_vm1, %v6438_v48  ;;  %v6444_v48 = vld [vmem:[#allocation24_spill] sm:$0xff]  ;;  %v2470_v27 = vrot.slane %v5766_v28, 1 }
  0xd2   : > { %4155 = vmatprep.mubr.msk.f32.mxu1 %vm403_vm1, %v5574_v16  ;;  %4411 = vmatprep.mubr.msk.f32.mxu0 %vm403_vm1, %v6439_v1  ;;  %v6446_v16 = vld [vmem:[#allocation2_spill] sm:$0xff] }
  0xd5   : > { %4156 = vmatmul.mubr.msk.f32.gmra.mrb[30].mxu1 %vm403_vm1, %v5590_v37  ;;  %4412 = vmatmul.mubr.msk.f32.gmra.mrb[14].mxu0 %vm403_vm1, %v6440_v38  ;;  %v6445_v37 = vld [vmem:[#allocation26_spill] sm:$0xff] }
  0xd6   : > { %4166 = vmatprep.mubr.msk.f32.mxu1 %vm403_vm1, %v6441_v58  ;;  %4414 = vmatprep.mubr.msk.f32.mxu0 %vm403_vm1, %v6442_v13  ;;  %v6447_v58 = vld [vmem:[#allocation28_spill] sm:$0xff] }
  0xd9   : > { %4167 = vmatmul.mubr.msk.f32.vlgmr.msra.gmra.mrb[0].mxu1 %vm403_vm1, %v6443_v61  ;;  %4415 = vmatmul.mubr.msk.f32.gmra.mrb[16].mxu0 %vm403_vm1, %v6444_v48  ;;  %v6448_v61 = vld [vmem:[#allocation30_spill] sm:$0xff] }
  0xda   : > { %4169 = vmatprep.mubr.msk.f32.mxu1 %vm403_vm1, %v4963_v32  ;;  %4568 = vmatpush3.bf16.msra.mxu1 %v4887_v3  ;;  %v6449_v3 = vld [vmem:[#allocation32_spill] sm:$0xff]  ;;  %v6450_v32 = vld [vmem:[#allocation34_spill] sm:$0xff] }
  0xdb   : > { %4417 = vmatprep.mubr.msk.f32.mxu0 %vm403_vm1, %v6445_v37  ;;  %4567 = vmatprep.subr.bf16.mxu1 %v6446_v16 }
  0xdd   : > { %4170 = vmatmul.mubr.msk.f32.gmra.mrb[2].mxu1 %vm403_vm1, %v4971_v36  ;;  %4418 = vmatmul.mubr.msk.f32.gmra.mrb[18].mxu0 %vm403_vm1, %v6447_v58  ;;  %v6451_v36 = vld [vmem:[#allocation37_spill] sm:$0xff] }
  0xde   : > { %4172 = vmatprep.mubr.msk.f32.mxu1 %vm403_vm1, %v4986_v45  ;;  %4420 = vmatprep.mubr.msk.f32.mxu0 %vm403_vm1, %v6448_v61  ;;  %v6452_v45 = vld [vmem:[#allocation39_spill] sm:$0xff] }
  0xdf   : > { %4569 = vmatpush3.bf16.msra.mxu1 %v6446_v16  ;;  %v6453_v16 = vld [vmem:[#allocation40_spill] sm:$0xff] }
  0xe1   : > { %4173 = vmatmul.mubr.msk.f32.gmra.mrb[4].mxu1 %vm403_vm1, %v4989_v46  ;;  %4421 = vmatmul.mubr.msk.f32.gmra.mrb[20].mxu0 %vm403_vm1, %v6449_v3  ;;  %v1658_v46 = vrot.slane %v5558_v55, 1 }
  0xe2   : > { %4175 = vmatprep.mubr.msk.f32.mxu1 %vm403_vm1, %v5000_v51  ;;  %4423 = vmatprep.mubr.msk.f32.mxu0 %vm403_vm1, %v6450_v32  ;;  %v1659_v51 = vrot.slane %v5561_v26, 1 }
  0xe5   : > { %4176 = vmatmul.mubr.msk.f32.gmra.mrb[6].mxu1 %vm403_vm1, %v5003_v52  ;;  %4424 = vmatmul.mubr.msk.f32.gmra.mrb[22].mxu0 %vm403_vm1, %v6451_v36  ;;  %v6454_v52 = vld [vmem:[#allocation42_spill] sm:$0xff]  ;;  %v5896_v36 = vsel %vm317_vm0, %v1658_v46, %v1659_v51 }
  0xe6   : > { %4178 = vmatprep.mubr.msk.f32.mxu1 %vm403_vm1, %v5031_v63  ;;  %4426 = vmatprep.mubr.msk.f32.mxu0 %vm403_vm1, %v6452_v45  ;;  %v1661_v63 = vrot.slane %v5579_v34, 1  ;;  %v2469_v45 = vrot.slane %v5755_v20, 1  ;;  %v2472_v34 = vrot.slane %v5899_v24, 1 }
  0xe8   : > { %v2471_v46 = vsel %vm317_vm0, %v2469_v45, %v2470_v27 }
  0xe9   : > { %4179 = vmatmul.mubr.msk.f32.gmra.mrb[8].mxu1 %vm403_vm1, %v5034_v0  ;;  %4427 = vmatmul.mubr.msk.f32.gmra.mrb[24].mxu0 %vm403_vm1, %v6453_v16  ;;  %v6455_v0 = vld [vmem:[#allocation44_spill] sm:$0xff] }
  0xea   : > { %4181 = vmatprep.mubr.msk.f32.mxu1 %vm403_vm1, %v5058_v9  ;;  %4429 = vmatprep.mubr.msk.f32.mxu0 %vm403_vm1, %v6454_v52  ;;  %v5910_v9 = vsel %vm317_vm0, %v1659_v51, %v1661_v63 }
  0xed   : > { %4182 = vmatmul.mubr.msk.f32.gmra.mrb[10].mxu1 %vm403_vm1, %v5061_v10  ;;  %4430 = vmatmul.mubr.msk.f32.gmra.mrb[26].mxu0 %vm403_vm1, %v6455_v0  ;;  %v2473_v10 = vsel %vm317_vm0, %v2470_v27, %v2472_v34 }
  0xee   : > { %4184 = vmatprep.mubr.msk.f32.mxu1 %vm403_vm1, %v5084_v17  ;;  %4432 = vmatprep.mubr.msk.f32.mxu0 %vm403_vm1, %v5896_v36  ;;  %v6456_v17 = vld [vmem:[#allocation41_spill] sm:$0xff] }
  0xf1   : > { %4185 = vmatmul.mubr.msk.f32.gmra.mrb[12].mxu1 %vm403_vm1, %v5087_v18  ;;  %4433 = vmatmul.mubr.msk.f32.gmra.mrb[28].mxu0 %vm403_vm1, %v5910_v9  ;;  %v6457_v18 = vld [vmem:[#allocation35_spill] sm:$0xff] }
  0xf2   : > { %4187 = vmatprep.mubr.msk.f32.mxu1 %vm403_vm1, %v5110_v30  ;;  %4435 = vmatprep.mubr.msk.f32.mxu0 %vm403_vm1, %v2471_v46  ;;  %v6459_v30 = vld [vmem:[#allocation36_spill] sm:$0xff] }
  0xf5   : > { %4188 = vmatmul.mubr.msk.f32.gmra.mrb[14].mxu1 %vm403_vm1, %v5113_v33  ;;  %4436 = vmatmul.mubr.msk.f32.gmra.mrb[30].mxu0 %vm403_vm1, %v2473_v10  ;;  %v6461_v33 = vld [vmem:[#allocation37_spill] sm:$0xff] }
  0xf6   : > { %4190 = vmatprep.mubr.msk.f32.mxu1 %vm403_vm1, %v5151_v50  ;;  %4446 = vmatprep.mubr.msk.f32.mxu0 %vm403_vm1, %v5221_v44  ;;  %v6462_v44 = vld [vmem:[#allocation48_spill] sm:$0xff]  ;;  %v6463_v50 = vld [vmem:[#allocation39_spill] sm:$0xff] }
  0xf9   : > { %4191 = vmatmul.mubr.msk.f32.gmra.mrb[16].mxu1 %vm403_vm1, %v5154_v53  ;;  %4447 = vmatmul.mubr.msk.f32.vlgmr.msra.gmra.mrb[0].mxu0 %vm403_vm1, %v6415_v12  ;;  %v6464_v53 = vld [vmem:[#allocation49_spill] sm:$0xff]  ;;  %v6068_v12 = vld [vmem:[%s6285_s2] ss:$0 sm:$0xff] }
  0xfa   : > { %4193 = vmatprep.mubr.msk.f32.mxu1 %vm403_vm1, %v5185_v31  ;;  %4449 = vmatprep.mubr.msk.f32.mxu0 %vm403_vm1, %v6416_v43  ;;  %v2740_v31 = vrot.slane %v5755_v20, 2 }
  0xfd   : > { %4194 = vmatmul.mubr.msk.f32.gmra.mrb[18].mxu1 %vm403_vm1, %v5188_v23  ;;  %4450 = vmatmul.mubr.msk.f32.gmra.mrb[2].mxu0 %vm403_vm1, %v6417_v60  ;;  %v2741_v23 = vrot.slane %v5766_v28, 2 }
  0xfe   : > { %4196 = vmatprep.mubr.msk.f32.mxu1 %vm403_vm1, %v5226_v49  ;;  %4452 = vmatprep.mubr.msk.f32.mxu0 %vm403_vm1, %v6418_v47  ;;  %v6465_v49 = vld [vmem:[#allocation50_spill] sm:$0xff] }
 0x101   : > { %4197 = vmatmul.mubr.msk.f32.gmra.mrb[20].mxu1 %vm403_vm1, %v5229_v59  ;;  %4453 = vmatmul.mubr.msk.f32.gmra.mrb[4].mxu0 %vm403_vm1, %v6419_v6  ;;  %v6466_v59 = vld [vmem:[#allocation51_spill] sm:$0xff] }
 0x102   : > { %4199 = vmatprep.mubr.msk.f32.mxu1 %vm403_vm1, %v5268_v19  ;;  %4455 = vmatprep.mubr.msk.f32.mxu0 %vm403_vm1, %v6420_v22  ;;  %v6458_v19 = vld [vmem:[#allocation43_spill] sm:$0xff] }
 0x105   : > { %4200 = vmatmul.mubr.msk.f32.gmra.mrb[22].mxu1 %vm403_vm1, %v5271_v54  ;;  %4456 = vmatmul.mubr.msk.f32.gmra.mrb[6].mxu0 %vm403_vm1, %v6421_v2  ;;  %v2743_v54 = vrot.slane %v5899_v24, 2 }
 0x106   : > { %4202 = vmatprep.mubr.msk.f32.mxu1 %vm403_vm1, %v5305_v42  ;;  %4458 = vmatprep.mubr.msk.f32.mxu0 %vm403_vm1, %v5371_v5  ;;  %v2742_v42 = vsel %vm982_vm2, %v2740_v31, %v2741_v23 }
 0x109   : > { %4203 = vmatmul.mubr.msk.f32.gmra.mrb[24].mxu1 %vm403_vm1, %v5308_v15  ;;  %4459 = vmatmul.mubr.msk.f32.gmra.mrb[8].mxu0 %vm403_vm1, %v6422_v21  ;;  %v6467_v15 = vld [vmem:[#allocation52_spill] sm:$0xff] }
 0x10a   : > { %4205 = vmatprep.mubr.msk.f32.mxu1 %vm403_vm1, %v5341_v62  ;;  %4461 = vmatprep.mubr.msk.f32.mxu0 %vm403_vm1, %v5406_v35  ;;  %v2744_v62 = vsel %vm982_vm2, %v2741_v23, %v2743_v54 }
 0x10d   : > { %4206 = vmatmul.mubr.msk.f32.gmra.mrb[26].mxu1 %vm403_vm1, %v5344_v14  ;;  %4462 = vmatmul.mubr.msk.f32.gmra.mrb[10].mxu0 %vm403_vm1, %v6456_v17 }
 0x10e   : > { %4208 = vmatprep.mubr.msk.f32.mxu1 %vm403_vm1, %v6457_v18  ;;  %4464 = vmatprep.mubr.msk.f32.mxu0 %vm403_vm1, %v6458_v19 }
 0x111   : > { %4209 = vmatmul.mubr.msk.f32.gmra.mrb[28].mxu1 %vm403_vm1, %v6459_v30  ;;  %4465 = vmatmul.mubr.msk.f32.gmra.mrb[12].mxu0 %vm403_vm1, %v5446_v41 }
 0x112   : > { %4211 = vmatprep.mubr.msk.f32.mxu1 %vm403_vm1, %v5558_v55  ;;  %4467 = vmatprep.mubr.msk.f32.mxu0 %vm403_vm1, %v5450_v39 }
 0x115   : > { %4212 = vmatmul.mubr.msk.f32.gmra.mrb[30].mxu1 %vm403_vm1, %v5561_v26  ;;  %4468 = vmatmul.mubr.msk.f32.gmra.mrb[14].mxu0 %vm403_vm1, %v6426_v57  ;;  %v6460_v26 = vld [vmem:[#allocation47_spill] sm:$0xff] }
 0x116   : > { %4246 = vmatprep.mubr.msk.f32.mxu1 %vm403_vm1, %v6439_v1  ;;  %4470 = vmatprep.mubr.msk.f32.mxu0 %vm403_vm1, %v5473_v40 }
 0x119   : > { %4247 = vmatmul.mubr.msk.f32.vlgmr.msra.gmra.mrb[16].mxu1 %vm403_vm1, %v6440_v38  ;;  %4471 = vmatmul.mubr.msk.f32.gmra.mrb[16].mxu0 %vm403_vm1, %v5493_v8 }
 0x11a   : > { %4249 = vmatprep.mubr.msk.f32.mxu1 %vm403_vm1, %v6442_v13  ;;  %4473 = vmatprep.mubr.msk.f32.mxu0 %vm403_vm1, %v5497_v11 }
 0x11d   : > { %4250 = vmatmul.mubr.msk.f32.gmra.mrb[18].mxu1 %vm403_vm1, %v6444_v48  ;;  %4474 = vmatmul.mubr.msk.f32.gmra.mrb[18].mxu0 %vm403_vm1, %v5512_v25 }
 0x11e   : > { %4252 = vmatprep.mubr.msk.f32.mxu1 %vm403_vm1, %v6445_v37  ;;  %4476 = vmatprep.mubr.msk.f32.mxu0 %vm403_vm1, %v5516_v29 }
 0x121   : > { %4253 = vmatmul.mubr.msk.f32.gmra.mrb[20].mxu1 %vm403_vm1, %v6447_v58  ;;  %4477 = vmatmul.mubr.msk.f32.gmra.mrb[20].mxu0 %vm403_vm1, %v5530_v4 }
 0x122   : > { %4255 = vmatprep.mubr.msk.f32.mxu1 %vm403_vm1, %v6448_v61  ;;  %4479 = vmatprep.mubr.msk.f32.mxu0 %vm403_vm1, %v6434_v7 }
 0x125   : > { %4256 = vmatmul.mubr.msk.f32.gmra.mrb[22].mxu1 %vm403_vm1, %v6449_v3  ;;  %4480 = vmatmul.mubr.msk.f32.gmra.mrb[22].mxu0 %vm403_vm1, %v5547_v56 }
 0x126   : > { %4258 = vmatprep.mubr.msk.f32.mxu1 %vm403_vm1, %v6450_v32  ;;  %4482 = vmatprep.mubr.msk.f32.mxu0 %vm403_vm1, %v6460_v26 }
 0x129   : > { %4259 = vmatmul.mubr.msk.f32.gmra.mrb[24].mxu1 %vm403_vm1, %v6461_v33  ;;  %4483 = vmatmul.mubr.msk.f32.gmra.mrb[24].mxu0 %vm403_vm1, %v6462_v44 }
 0x12a   : > { %4261 = vmatprep.mubr.msk.f32.mxu1 %vm403_vm1, %v6463_v50  ;;  %4485 = vmatprep.mubr.msk.f32.mxu0 %vm403_vm1, %v6464_v53 }
 0x12d   : > { %4262 = vmatmul.mubr.msk.f32.gmra.mrb[26].mxu1 %vm403_vm1, %v6453_v16  ;;  %4486 = vmatmul.mubr.msk.f32.gmra.mrb[26].mxu0 %vm403_vm1, %v6465_v49 }
 0x12e   : > { %4264 = vmatprep.mubr.msk.f32.mxu1 %vm403_vm1, %v6454_v52  ;;  %4488 = vmatprep.mubr.msk.f32.mxu0 %vm403_vm1, %v6466_v59 }
 0x131   : > { %4265 = vmatmul.mubr.msk.f32.gmra.mrb[28].mxu1 %vm403_vm1, %v6455_v0  ;;  %4489 = vmatmul.mubr.msk.f32.gmra.mrb[28].mxu0 %vm403_vm1, %v6467_v15 }
 0x132   : > { %4267 = vmatprep.mubr.msk.f32.mxu1 %vm403_vm1, %v5896_v36  ;;  %4491 = vmatprep.mubr.msk.f32.mxu0 %vm403_vm1, %v2742_v42 }
 0x135   : > { %4268 = vmatmul.mubr.msk.f32.gmra.mrb[30].mxu1 %vm403_vm1, %v5910_v9  ;;  %4492 = vmatmul.mubr.msk.f32.gmra.mrb[30].mxu0 %vm403_vm1, %v2744_v62 }
 0x1ac   : > { %v4168_v14 = vpop.f32.mrb[0].mxu1 }
 0x1ad   : > { %v1466_v5 = vpop.f32.mrb[1].mxu1 }
 0x1b0   : > { %v4171_v57 = vpop.f32.mrb[2].mxu1 }
 0x1b1   : > { %v1476_v35 = vpop.f32.mrb[3].mxu1 }
 0x1b4   : > { %v4174_v41 = vpop.f32.mrb[4].mxu1 }
 0x1b5   : > { %v1486_v39 = vpop.f32.mrb[5].mxu1 }
 0x1b8   : > { %v4177_v40 = vpop.f32.mrb[6].mxu1 }
 0x1b9   : > { %v1496_v8 = vpop.f32.mrb[7].mxu1 }
 0x1bc   : > { %v4180_v11 = vpop.f32.mrb[8].mxu1 }
 0x1bd   : > { %v1506_v25 = vpop.f32.mrb[9].mxu1 }
 0x1c0   : > { %v4183_v29 = vpop.f32.mrb[10].mxu1 }
 0x1c1   : > { %v1516_v4 = vpop.f32.mrb[11].mxu1 }
 0x1c4   : > { %v6056_v56 = vpop.f32.mrb[12].mxu1 }
 0x1c5   : > { %v6058_v24 = vpop.f32.mrb[13].mxu1 }
 0x1c8   : > { %v6060_v55 = vpop.f32.mrb[14].mxu1 }
 0x1c9   : > { %v6062_v27 = vpop.f32.mrb[15].mxu1 }
 0x1cc   : > { %v4448_v37 = vpop.f32.mrb[0].mxu0 }
 0x1cd   : > { %v4570_v43 = vadd.f32 %v4448_v37, %v4168_v14  ;;  %v2820_v60 = vpop.f32.mrb[1].mxu0 }
 0x1ce   : > { %v4571_v47 = vadd.f32 %v2820_v60, %v1466_v5 }
 0x1cf   : > { %v3019_v6 = vadd.f32 %v4570_v43, %v6068_v12 }
 0x1d0   : > { %v3018_v22 = vadd.f32 %v4571_v47, %v6068_v12  ;;  %v4451_v2 = vpop.f32.mrb[2].mxu0 }
 0x1d1   : > { %v4572_v20 = vadd.f32 %v4451_v2, %v4171_v57  ;;  %v2830_v21 = vpop.f32.mrb[3].mxu0  ;;  %3117 = vrot.lane.b32.xlu0 %v3019_v6, %s4844_s28  ;;  %3052 = vst.msk [vmem:[%s6075_s27 + $0x8] sm:$0xff] %vm3050_vm3, %v3019_v6 }
 0x1d2   : > { %3051 = vst.msk [vmem:[%s6075_s27] sm:$0xff] %vm3050_vm3, %v3018_v22  ;;  %v4573_v28 = vadd.f32 %v2830_v21, %v1476_v35 }
 0x1d3   : > { %v3021_v7 = vadd.f32 %v4572_v20, %v6068_v12 }
 0x1d4   : > { %v3020_v1 = vadd.f32 %v4573_v28, %v6068_v12  ;;  %v4454_v38 = vpop.f32.mrb[4].mxu0 }
 0x1d5   : > { %v4574_v13 = vadd.f32 %v4454_v38, %v4174_v41  ;;  %v2840_v48 = vpop.f32.mrb[5].mxu0  ;;  %3115 = vrot.lane.b32.xlu0 %v3018_v22, %s4844_s28  ;;  %3121 = vrot.lane.b32.xlu1 %v3021_v7, %s4844_s28  ;;  %3054 = vst.msk [vmem:[%s6075_s27 + $0x18] sm:$0xff] %vm3050_vm3, %v3021_v7 }
 0x1d6   : > { %3053 = vst.msk [vmem:[%s6075_s27 + $0x10] sm:$0xff] %vm3050_vm3, %v3020_v1  ;;  %v4575_v58 = vadd.f32 %v2840_v48, %v1486_v39 }
 0x1d7   : > { %v3023_v61 = vadd.f32 %v4574_v13, %v6068_v12 }
 0x1d8   : > { %v3022_v3 = vadd.f32 %v4575_v58, %v6068_v12  ;;  %v4457_v32 = vpop.f32.mrb[6].mxu0 }
 0x1d9   : > { %3056 = vst.msk [vmem:[%s6075_s27 + $0x28] sm:$0xff] %vm3050_vm3, %v3023_v61  ;;  %v4576_v36 = vadd.f32 %v4457_v32, %v4177_v40  ;;  %v2850_v45 = vpop.f32.mrb[7].mxu0  ;;  %3119 = vrot.lane.b32.xlu1 %v3020_v1, %s4844_s28 }
 0x1da   : > { %3055 = vst.msk [vmem:[%s6075_s27 + $0x20] sm:$0xff] %vm3050_vm3, %v3022_v3  ;;  %v4577_v51 = vadd.f32 %v2850_v45, %v1496_v8  ;;  %3123 = vrot.lane.b32.xlu0 %v3022_v3, %s4844_s28 }
 0x1db   : > { %v3025_v16 = vadd.f32 %v4576_v36, %v6068_v12 }
 0x1dc   : > { %v3024_v52 = vadd.f32 %v4577_v51, %v6068_v12  ;;  %v4460_v63 = vpop.f32.mrb[8].mxu0 }
 0x1dd   : > { %3058 = vst.msk [vmem:[%s6075_s27 + $0x38] sm:$0xff] %vm3050_vm3, %v3025_v16  ;;  %v4578_v0 = vadd.f32 %v4460_v63, %v4180_v11  ;;  %v2860_v9 = vpop.f32.mrb[9].mxu0  ;;  %3125 = vrot.lane.b32.xlu1 %v3023_v61, %s4844_s28 }
 0x1de   : > { %3057 = vst.msk [vmem:[%s6075_s27 + $0x30] sm:$0xff] %vm3050_vm3, %v3024_v52  ;;  %v4579_v34 = vadd.f32 %v2860_v9, %v1506_v25  ;;  %3127 = vrot.lane.b32.xlu0 %v3024_v52, %s4844_s28 }
 0x1df   : > { %v3027_v46 = vadd.f32 %v4578_v0, %v6068_v12 }
 0x1e0   : > { %v3026_v10 = vadd.f32 %v4579_v34, %v6068_v12  ;;  %v4463_v17 = vpop.f32.mrb[10].mxu0 }
 0x1e1   : > { %3060 = vst.msk [vmem:[%s6075_s27 + $0x48] sm:$0xff] %vm3050_vm3, %v3027_v46  ;;  %v4580_v18 = vadd.f32 %v4463_v17, %v4183_v29  ;;  %v2870_v19 = vpop.f32.mrb[11].mxu0  ;;  %3129 = vrot.lane.b32.xlu1 %v3025_v16, %s4844_s28 }
 0x1e2   : > { %3059 = vst.msk [vmem:[%s6075_s27 + $0x40] sm:$0xff] %vm3050_vm3, %v3026_v10  ;;  %v4581_v30 = vadd.f32 %v2870_v19, %v1516_v4  ;;  %3131 = vrot.lane.b32.xlu0 %v3026_v10, %s4844_s28 }
 0x1e3   : > { %v3029_v26 = vadd.f32 %v4580_v18, %v6068_v12 }
 0x1e4   : > { %v3028_v33 = vadd.f32 %v4581_v30, %v6068_v12  ;;  %v4466_v44 = vpop.f32.mrb[12].mxu0 }
 0x1e5   : > { %3062 = vst.msk [vmem:[%s6075_s27 + $0x58] sm:$0xff] %vm3050_vm3, %v3029_v26  ;;  %v4582_v50 = vadd.f32 %v4466_v44, %v6056_v56  ;;  %v2880_v53 = vpop.f32.mrb[13].mxu0  ;;  %3133 = vrot.lane.b32.xlu1 %v3027_v46, %s4844_s28 }
 0x1e6   : > { %3061 = vst.msk [vmem:[%s6075_s27 + $0x50] sm:$0xff] %vm3050_vm3, %v3028_v33  ;;  %v4583_v31 = vadd.f32 %v2880_v53, %v6058_v24  ;;  %3135 = vrot.lane.b32.xlu0 %v3028_v33, %s4844_s28 }
 0x1e7   : > { %v3031_v23 = vadd.f32 %v4582_v50, %v6068_v12 }
 0x1e8   : > { %v3030_v49 = vadd.f32 %v4583_v31, %v6068_v12  ;;  %v4469_v59 = vpop.f32.mrb[14].mxu0 }
 0x1e9   : > { %3064 = vst.msk [vmem:[%s6075_s27 + $0x68] sm:$0xff] %vm3050_vm3, %v3031_v23  ;;  %v4584_v54 = vadd.f32 %v4469_v59, %v6060_v55  ;;  %v2890_v42 = vpop.f32.mrb[15].mxu0  ;;  %3137 = vrot.lane.b32.xlu1 %v3029_v26, %s4844_s28 }
 0x1ea   : > { %3063 = vst.msk [vmem:[%s6075_s27 + $0x60] sm:$0xff] %vm3050_vm3, %v3030_v49  ;;  %v4585_v15 = vadd.f32 %v2890_v42, %v6062_v27  ;;  %3139 = vrot.lane.b32.xlu0 %v3030_v49, %s4844_s28 }
 0x1eb   : > { %v3033_v62 = vadd.f32 %v4584_v54, %v6068_v12 }
 0x1ec   : > { %v4248_v14 = vpop.f32.mrb[16].mxu1  ;;  %v3032_v5 = vadd.f32 %v4585_v15, %v6068_v12  ;;  %v4472_v57 = vpop.f32.mrb[16].mxu0 }
 0x1ed   : > { %v1818_v35 = vpop.f32.mrb[17].mxu1  ;;  %3066 = vst.msk [vmem:[%s6075_s27 + $0x78] sm:$0xff] %vm3050_vm3, %v3033_v62  ;;  %v4586_v41 = vadd.f32 %v4472_v57, %v4248_v14  ;;  %v2900_v39 = vpop.f32.mrb[17].mxu0  ;;  %3141 = vrot.lane.b32.xlu1 %v3031_v23, %s4844_s28 }
 0x1ee   : > { %3065 = vst.msk [vmem:[%s6075_s27 + $0x70] sm:$0xff] %vm3050_vm3, %v3032_v5  ;;  %v4587_v40 = vadd.f32 %v2900_v39, %v1818_v35  ;;  %3143 = vrot.lane.b32.xlu0 %v3032_v5, %s4844_s28 }
 0x1ef   : > { %v3035_v8 = vadd.f32 %v4586_v41, %v6068_v12 }
 0x1f0   : > { %v4251_v11 = vpop.f32.mrb[18].mxu1  ;;  %v3034_v25 = vadd.f32 %v4587_v40, %v6068_v12  ;;  %v4475_v29 = vpop.f32.mrb[18].mxu0 }
 0x1f1   : > { %v1828_v4 = vpop.f32.mrb[19].mxu1  ;;  %3068 = vst.msk [vmem:[%s6075_s27 + $0x88] sm:$0xff] %vm3050_vm3, %v3035_v8  ;;  %v4588_v56 = vadd.f32 %v4475_v29, %v4251_v11  ;;  %v2910_v24 = vpop.f32.mrb[19].mxu0  ;;  %3145 = vrot.lane.b32.xlu1 %v3033_v62, %s4844_s28 }
 0x1f2   : > { %3067 = vst.msk [vmem:[%s6075_s27 + $0x80] sm:$0xff] %vm3050_vm3, %v3034_v25  ;;  %v4589_v55 = vadd.f32 %v2910_v24, %v1828_v4  ;;  %3147 = vrot.lane.b32.xlu0 %v3034_v25, %s4844_s28 }
 0x1f3   : > { %v3037_v27 = vadd.f32 %v4588_v56, %v6068_v12 }
 0x1f4   : > { %v4254_v37 = vpop.f32.mrb[20].mxu1  ;;  %v3036_v43 = vadd.f32 %v4589_v55, %v6068_v12  ;;  %v4478_v60 = vpop.f32.mrb[20].mxu0 }
 0x1f5   : > { %v1838_v47 = vpop.f32.mrb[21].mxu1  ;;  %3070 = vst.msk [vmem:[%s6075_s27 + $0x98] sm:$0xff] %vm3050_vm3, %v3037_v27  ;;  %v4590_v6 = vadd.f32 %v4478_v60, %v4254_v37  ;;  %v2920_v22 = vpop.f32.mrb[21].mxu0  ;;  %3149 = vrot.lane.b32.xlu1 %v3035_v8, %s4844_s28 }
 0x1f6   : > { %3069 = vst.msk [vmem:[%s6075_s27 + $0x90] sm:$0xff] %vm3050_vm3, %v3036_v43  ;;  %v4591_v2 = vadd.f32 %v2920_v22, %v1838_v47  ;;  %3151 = vrot.lane.b32.xlu0 %v3036_v43, %s4844_s28 }
 0x1f7   : > { %v3039_v20 = vadd.f32 %v4590_v6, %v6068_v12 }
 0x1f8   : > { %v4257_v21 = vpop.f32.mrb[22].mxu1  ;;  %v3038_v28 = vadd.f32 %v4591_v2, %v6068_v12  ;;  %v4481_v7 = vpop.f32.mrb[22].mxu0 }
 0x1f9   : > { %v1848_v1 = vpop.f32.mrb[23].mxu1  ;;  %3072 = vst.msk [vmem:[%s6075_s27 + $0xa8] sm:$0xff] %vm3050_vm3, %v3039_v20  ;;  %v4592_v38 = vadd.f32 %v4481_v7, %v4257_v21  ;;  %v2930_v13 = vpop.f32.mrb[23].mxu0  ;;  %3153 = vrot.lane.b32.xlu1 %v3037_v27, %s4844_s28 }
 0x1fa   : > { %3071 = vst.msk [vmem:[%s6075_s27 + $0xa0] sm:$0xff] %vm3050_vm3, %v3038_v28  ;;  %v4593_v48 = vadd.f32 %v2930_v13, %v1848_v1  ;;  %3155 = vrot.lane.b32.xlu0 %v3038_v28, %s4844_s28 }
 0x1fb   : > { %v3041_v58 = vadd.f32 %v4592_v38, %v6068_v12 }
 0x1fc   : > { %v4260_v61 = vpop.f32.mrb[24].mxu1  ;;  %v3040_v3 = vadd.f32 %v4593_v48, %v6068_v12  ;;  %v4484_v32 = vpop.f32.mrb[24].mxu0 }
 0x1fd   : > { %v1858_v36 = vpop.f32.mrb[25].mxu1  ;;  %3074 = vst.msk [vmem:[%s6075_s27 + $0xb8] sm:$0xff] %vm3050_vm3, %v3041_v58  ;;  %v4594_v45 = vadd.f32 %v4484_v32, %v4260_v61  ;;  %v2940_v51 = vpop.f32.mrb[25].mxu0  ;;  %3157 = vrot.lane.b32.xlu1 %v3039_v20, %s4844_s28 }
 0x1fe   : > { %3073 = vst.msk [vmem:[%s6075_s27 + $0xb0] sm:$0xff] %vm3050_vm3, %v3040_v3  ;;  %v4595_v16 = vadd.f32 %v2940_v51, %v1858_v36  ;;  %3159 = vrot.lane.b32.xlu0 %v3040_v3, %s4844_s28 }
 0x1ff   : > { %v3043_v52 = vadd.f32 %v4594_v45, %v6068_v12 }
 0x200   : > { %v4263_v63 = vpop.f32.mrb[26].mxu1  ;;  %v3042_v0 = vadd.f32 %v4595_v16, %v6068_v12  ;;  %v4487_v9 = vpop.f32.mrb[26].mxu0 }
 0x201   : > { %v1868_v34 = vpop.f32.mrb[27].mxu1  ;;  %3076 = vst.msk [vmem:[%s6075_s27 + $0xc8] sm:$0xff] %vm3050_vm3, %v3043_v52  ;;  %v4596_v46 = vadd.f32 %v4487_v9, %v4263_v63  ;;  %v2950_v10 = vpop.f32.mrb[27].mxu0  ;;  %3161 = vrot.lane.b32.xlu1 %v3041_v58, %s4844_s28 }
 0x202   : > { %3075 = vst.msk [vmem:[%s6075_s27 + $0xc0] sm:$0xff] %vm3050_vm3, %v3042_v0  ;;  %v4597_v17 = vadd.f32 %v2950_v10, %v1868_v34  ;;  %3163 = vrot.lane.b32.xlu0 %v3042_v0, %s4844_s28 }
 0x203   : > { %v3045_v18 = vadd.f32 %v4596_v46, %v6068_v12 }
 0x204   : > { %v4266_v19 = vpop.f32.mrb[28].mxu1  ;;  %v3044_v30 = vadd.f32 %v4597_v17, %v6068_v12  ;;  %v4490_v26 = vpop.f32.mrb[28].mxu0 }
 0x205   : > { %v1878_v33 = vpop.f32.mrb[29].mxu1  ;;  %3078 = vst.msk [vmem:[%s6075_s27 + $0xd8] sm:$0xff] %vm3050_vm3, %v3045_v18  ;;  %v4598_v44 = vadd.f32 %v4490_v26, %v4266_v19  ;;  %v2960_v50 = vpop.f32.mrb[29].mxu0  ;;  %3165 = vrot.lane.b32.xlu1 %v3043_v52, %s4844_s28 }
 0x206   : > { %3077 = vst.msk [vmem:[%s6075_s27 + $0xd0] sm:$0xff] %vm3050_vm3, %v3044_v30  ;;  %v4599_v53 = vadd.f32 %v2960_v50, %v1878_v33  ;;  %3167 = vrot.lane.b32.xlu0 %v3044_v30, %s4844_s28 }
 0x207   : > { %v3047_v31 = vadd.f32 %v4598_v44, %v6068_v12 }
 0x208   : > { %v4269_v23 = vpop.f32.mrb[30].mxu1  ;;  %v3046_v49 = vadd.f32 %v4599_v53, %v6068_v12  ;;  %v4493_v59 = vpop.f32.mrb[30].mxu0 }
 0x209   : > { %v1888_v54 = vpop.f32.mrb[31].mxu1  ;;  %3080 = vst.msk [vmem:[%s6075_s27 + $0xe8] sm:$0xff] %vm3050_vm3, %v3047_v31  ;;  %v4600_v42 = vadd.f32 %v4493_v59, %v4269_v23  ;;  %v2970_v15 = vpop.f32.mrb[31].mxu0  ;;  %3169 = vrot.lane.b32.xlu1 %v3045_v18, %s4844_s28 }
 0x20a   : > { %3079 = vst.msk [vmem:[%s6075_s27 + $0xe0] sm:$0xff] %vm3050_vm3, %v3046_v49  ;;  %v4601_v62 = vadd.f32 %v2970_v15, %v1888_v54  ;;  %3171 = vrot.lane.b32.xlu0 %v3046_v49, %s4844_s28 }
 0x20b   : > { %v3049_v14 = vadd.f32 %v4600_v42, %v6068_v12 }
 0x20c   : > { %v3048_v5 = vadd.f32 %v4601_v62, %v6068_v12 }
 0x20d   : > { %3082 = vst.msk [vmem:[%s6075_s27 + $0xf8] sm:$0xff] %vm3050_vm3, %v3049_v14  ;;  %3173 = vrot.lane.b32.xlu1 %v3047_v31, %s4844_s28 }
 0x20e   : > { %3081 = vst.msk [vmem:[%s6075_s27 + $0xf0] sm:$0xff] %vm3050_vm3, %v3048_v5  ;;  %3175 = vrot.lane.b32.xlu0 %v3048_v5, %s4844_s28 }
 0x211   : > { %3177 = vrot.lane.b32.xlu1 %v3049_v14, %s4844_s28 }
 0x243   : > { %v3118_v12 = vpop.permute.xlu0 %3117 }
 0x244   : > { %3212 = vst.msk [vmem:[%s6214_s5 + $0x8] sm:$0xff] %vm403_vm1, %v3118_v12 }
 0x247   : > { %v3116_v57 = vpop.permute.xlu0 %3115  ;;  %v3122_v35 = vpop.permute.xlu1 %3121 }
 0x248   : > { %3211 = vst.msk [vmem:[%s6214_s5] sm:$0xff] %vm403_vm1, %v3116_v57  ;;  %3214 = vst.msk [vmem:[%s6214_s5 + $0x18] sm:$0xff] %vm403_vm1, %v3122_v35 }
 0x24b   : > { %v3120_v41 = vpop.permute.xlu1 %3119 }
 0x24c   : > { %3213 = vst.msk [vmem:[%s6214_s5 + $0x10] sm:$0xff] %vm403_vm1, %v3120_v41  ;;  %v3124_v39 = vpop.permute.xlu0 %3123 }
 0x24d   : > { %3215 = vst.msk [vmem:[%s6214_s5 + $0x20] sm:$0xff] %vm403_vm1, %v3124_v39 }
 0x24f   : > { %v3126_v40 = vpop.permute.xlu1 %3125 }
 0x250   : > { %3216 = vst.msk [vmem:[%s6214_s5 + $0x28] sm:$0xff] %vm403_vm1, %v3126_v40  ;;  %v3128_v8 = vpop.permute.xlu0 %3127 }
 0x251   : > { %3217 = vst.msk [vmem:[%s6214_s5 + $0x30] sm:$0xff] %vm403_vm1, %v3128_v8 }
 0x253   : > { %v3130_v11 = vpop.permute.xlu1 %3129 }
 0x254   : > { %3218 = vst.msk [vmem:[%s6214_s5 + $0x38] sm:$0xff] %vm403_vm1, %v3130_v11  ;;  %v3132_v25 = vpop.permute.xlu0 %3131 }
 0x255   : > { %3219 = vst.msk [vmem:[%s6214_s5 + $0x40] sm:$0xff] %vm403_vm1, %v3132_v25 }
 0x257   : > { %v3134_v29 = vpop.permute.xlu1 %3133 }
 0x258   : > { %3220 = vst.msk [vmem:[%s6214_s5 + $0x48] sm:$0xff] %vm403_vm1, %v3134_v29  ;;  %v3136_v4 = vpop.permute.xlu0 %3135 }
 0x259   : > { %3221 = vst.msk [vmem:[%s6214_s5 + $0x50] sm:$0xff] %vm403_vm1, %v3136_v4 }
 0x25b   : > { %v3138_v56 = vpop.permute.xlu1 %3137 }
 0x25c   : > { %3222 = vst.msk [vmem:[%s6214_s5 + $0x58] sm:$0xff] %vm403_vm1, %v3138_v56  ;;  %v3140_v24 = vpop.permute.xlu0 %3139 }
 0x25d   : > { %3223 = vst.msk [vmem:[%s6214_s5 + $0x60] sm:$0xff] %vm403_vm1, %v3140_v24 }
 0x25f   : > { %v3142_v55 = vpop.permute.xlu1 %3141 }
 0x260   : > { %3224 = vst.msk [vmem:[%s6214_s5 + $0x68] sm:$0xff] %vm403_vm1, %v3142_v55  ;;  %v3144_v27 = vpop.permute.xlu0 %3143 }
 0x261   : > { %3225 = vst.msk [vmem:[%s6214_s5 + $0x70] sm:$0xff] %vm403_vm1, %v3144_v27 }
 0x263   : > { %v3146_v37 = vpop.permute.xlu1 %3145 }
 0x264   : > { %3226 = vst.msk [vmem:[%s6214_s5 + $0x78] sm:$0xff] %vm403_vm1, %v3146_v37  ;;  %v3148_v43 = vpop.permute.xlu0 %3147 }
 0x265   : > { %3227 = vst.msk [vmem:[%s6214_s5 + $0x80] sm:$0xff] %vm403_vm1, %v3148_v43 }
 0x267   : > { %v3150_v60 = vpop.permute.xlu1 %3149 }
 0x268   : > { %3228 = vst.msk [vmem:[%s6214_s5 + $0x88] sm:$0xff] %vm403_vm1, %v3150_v60  ;;  %v3152_v47 = vpop.permute.xlu0 %3151 }
 0x269   : > { %3229 = vst.msk [vmem:[%s6214_s5 + $0x90] sm:$0xff] %vm403_vm1, %v3152_v47 }
 0x26b   : > { %v3154_v6 = vpop.permute.xlu1 %3153 }
 0x26c   : > { %3230 = vst.msk [vmem:[%s6214_s5 + $0x98] sm:$0xff] %vm403_vm1, %v3154_v6  ;;  %v3156_v22 = vpop.permute.xlu0 %3155 }
 0x26d   : > { %3231 = vst.msk [vmem:[%s6214_s5 + $0xa0] sm:$0xff] %vm403_vm1, %v3156_v22 }
 0x26f   : > { %v3158_v2 = vpop.permute.xlu1 %3157 }
 0x270   : > { %3232 = vst.msk [vmem:[%s6214_s5 + $0xa8] sm:$0xff] %vm403_vm1, %v3158_v2  ;;  %v3160_v20 = vpop.permute.xlu0 %3159 }
 0x271   : > { %3233 = vst.msk [vmem:[%s6214_s5 + $0xb0] sm:$0xff] %vm403_vm1, %v3160_v20 }
 0x273   : > { %v3162_v21 = vpop.permute.xlu1 %3161 }
 0x274   : > { %3234 = vst.msk [vmem:[%s6214_s5 + $0xb8] sm:$0xff] %vm403_vm1, %v3162_v21  ;;  %v3164_v28 = vpop.permute.xlu0 %3163 }
 0x275   : > { %3235 = vst.msk [vmem:[%s6214_s5 + $0xc0] sm:$0xff] %vm403_vm1, %v3164_v28 }
 0x277   : > { %v3166_v7 = vpop.permute.xlu1 %3165 }
 0x278   : > { %3236 = vst.msk [vmem:[%s6214_s5 + $0xc8] sm:$0xff] %vm403_vm1, %v3166_v7  ;;  %v3168_v1 = vpop.permute.xlu0 %3167 }
 0x279   : > { %3237 = vst.msk [vmem:[%s6214_s5 + $0xd0] sm:$0xff] %vm403_vm1, %v3168_v1 }
 0x27b   : > { %v3170_v38 = vpop.permute.xlu1 %3169 }
 0x27c   : > { %3238 = vst.msk [vmem:[%s6214_s5 + $0xd8] sm:$0xff] %vm403_vm1, %v3170_v38  ;;  %v3172_v13 = vpop.permute.xlu0 %3171 }
 0x27d   : > { %3239 = vst.msk [vmem:[%s6214_s5 + $0xe0] sm:$0xff] %vm403_vm1, %v3172_v13 }
 0x27f   : > { %v3174_v48 = vpop.permute.xlu1 %3173 }
 0x280   : > { %3240 = vst.msk [vmem:[%s6214_s5 + $0xe8] sm:$0xff] %vm403_vm1, %v3174_v48  ;;  %v3176_v58 = vpop.permute.xlu0 %3175 }
 0x281   : > { %3241 = vst.msk [vmem:[%s6214_s5 + $0xf0] sm:$0xff] %vm403_vm1, %v3176_v58 }
 0x283   : > { %v3178_v61 = vpop.permute.xlu1 %3177 }
 0x284   : > { %3242 = vst.msk [vmem:[%s6214_s5 + $0xf8] sm:$0xff] %vm403_vm1, %v3178_v61 }
 0x285 PF: > { %s15_s15 = sadd.s32 1, %s4842_s15  }
 0x286   : > { %p12_p4 = scmp.ge.s32.totalorder %s15_s15, 10  }
 0x288   :  { %14 = sbr.rel (!%p12_p4) target bundleno = 1 (0x1), region = 82 }

// kernel: temporal_encdec_g7_forward.5
= control target key start
LH: loop header
LB: loop body
LE: loop exit
PB: predicated region body
PF: predicated region fallthrough
CT: control target
= control target key end

     0   :  { %s10966_s18 = smov 0   ;;  %s10968_s19 = smov 0   ;;  %s14258_s0 = inlined_call_operand.vmem [shape: f32[8,256,64], index: 0, kind: input, shape index: {}]   ;;  %s14259_s1 = inlined_call_operand.vmem [shape: f32[8,256,32], index: 1, kind: input, shape index: {}]   ;;  %s14260_s2 = inlined_call_operand.vmem [shape: f32[2,18,18,32], index: 2, kind: input, shape index: {}]   ;;  %s14261_s3 = inlined_call_operand.vmem [shape: f32[9,32,64], index: 3, kind: input, shape index: {}]   ;;  %s14262_s4 = inlined_call_operand.vmem [shape: f32[9,32,32], index: 4, kind: input, shape index: {}]   ;;  %s14263_s5 = inlined_call_operand.vmem [shape: f32[8,18,18,32], index: 5, kind: output, shape index: {}]  }
   0x1   :  { %s10970_s20 = smov 0   ;;  %s10972_s21 = smov 0  }
   0x2   :  { %s10974_s22 = smov 0  }
   0x3 LB: > { %s24_s23 = sadd.s32 1, %s10923_s20  ;;  %s27_s24 = sadd.s32 1, %s10927_s21  ;;  %s10931_s22 = sphi %s10974_s22, %s15_s22   ;;  %s10927_s21 = sphi %s10972_s21, %s14756_s21   ;;  %s10923_s20 = sphi %s10970_s20, %s14755_s20   ;;  %s10919_s19 = sphi %s10968_s19, %s14754_s19   ;;  %s10915_s18 = sphi %s10966_s18, %s14753_s18  }
   0x4   : > { %p25_p0 = scmp.ge.s32.totalorder %s24_s23, 4  ;;  %p7579_p1 = scmp.ge.s32.totalorder %s10931_s22, 1 }
   0x5   : > { %p239_p2 = scmp.lt.s32.totalorder %s10931_s22, 9 }
   0x6   : > { %s14758_s23 = smov (%p25_p0, %s24_s23), 0  ;;  %s14760_s24 = smov (!%p25_p0, %s27_s24), %s10927_s21 }
   0x7   : > { %p240_p3 = pnand %p7579_p1, %p239_p2  ;;  %p29_p4 = scmp.ge.s32.totalorder %s14760_s24, 2 }
   0x9   : > { %s14762_s24 = smov (%p29_p4, %s14760_s24), 0  ;;  %243 = sbr.rel (%p240_p3) target bundleno = 1908 (0x774), region = 40 }
  0x10   : > { %s7580_s25 = sshll.u32 %s10919_s19, 2  ;;  %p301_p5 = scmp.lt.s32.totalorder %s10919_s19, 1 }
  0x11   : > { %s284_s26 = sadd.s32 %s10915_s18, %s7580_s25  ;;  %p7589_p7 = scmp.ne.s32.totalorder %s10915_s18, 0 }
  0x12   : > { %p285_p6 = scmp.lt.s32.totalorder %s284_s26, 7  ;;  %s14764_s19 = smov (!%p301_p5, %s10919_s19), 1  ;;  %vm373_vm0 = vcmask (!%p7589_p7), 261120   ;;  %vm376_vm1 = vcmask (!%p7589_p7), 254976   ;;  %vm531_vm2 = vcmask (!%p7589_p7), 1046528   ;;  %v10933_v12 = vmov (!%p7589_p7), 0.0  }
  0x13   : > { %s10642_s27 = smul.u32 432, %s14764_s19  ;;  %429 = vst.msk [vmem:[#allocation3] sm:$0xff] (!%p7589_p7), %vm373_vm0, %v10933_v12  ;;  %430 = vst.msk [vmem:[#allocation3 + $0x8] sm:$0xff] (!%p7589_p7), %vm373_vm0, %v10933_v12 }
  0x14   : > { %s14766_s26 = smov (!%p285_p6, %s284_s26), 7  ;;  %318 = sbr.rel (%p7589_p7) target bundleno = 91 (0x5b), region = 44 }
  0x15   : > { %s8264_s28 = sshll.u32 %s14766_s26, 8  ;;  %s10643_s29 = smul.u32 432, %s14766_s26  ;;  %431 = vst.msk [vmem:[#allocation3 + $0x10] sm:$0x3] (!%p7589_p7), %vm376_vm1, %v10933_v12  ;;  %434 = vst.msk [vmem:[#allocation3 + $0x28] sm:$0x3] (!%p7589_p7), %vm376_vm1, %v10933_v12 }
  0x16   : > { %s11002_s7 = scalar_lea.vmem %s14258_s0, %s8264_s28  ;;  %s11007_s10 = scalar_lea.vmem %s14259_s1, %s8264_s28  ;;  %432 = vst.msk [vmem:[#allocation3 + $0x18] sm:$0xff] (!%p7589_p7), %vm373_vm0, %v10933_v12  ;;  %433 = vst.msk [vmem:[#allocation3 + $0x20] sm:$0xff] (!%p7589_p7), %vm373_vm0, %v10933_v12 }
  0x17   : > { %s11012_s13 = scalar_lea.vmem %s14260_s2, %s10642_s27  ;;  %s11017_s16 = scalar_lea.vmem %s14263_s5, %s10643_s29  ;;  %435 = vst.msk [vmem:[#allocation3 + $0x30] sm:$0xff] (!%p7589_p7), %vm373_vm0, %v10933_v12  ;;  %436 = vst.msk [vmem:[#allocation3 + $0x38] sm:$0xff] (!%p7589_p7), %vm373_vm0, %v10933_v12 }
  0x18   : > { %v319_v0 = vld [vmem:[%s11012_s13] sm:$0xff] (!%p7589_p7)  ;;  %v320_v1 = vld [vmem:[%s11012_s13 + $0x8] sm:$0xff] (!%p7589_p7)  ;;  %v321_v2 = vld [vmem:[%s11012_s13 + $0x10] sm:$0x3] (!%p7589_p7)  ;;  %437 = vst.msk [vmem:[#allocation3 + $0x40] sm:$0x3] (!%p7589_p7), %vm376_vm1, %v10933_v12 }
  0x19   : > { %374 = vst.msk [vmem:[#allocation2] sm:$0xff] (!%p7589_p7), %vm373_vm0, %v319_v0  ;;  %375 = vst.msk [vmem:[#allocation2 + $0x8] sm:$0xff] (!%p7589_p7), %vm373_vm0, %v320_v1  ;;  %v11027_v3 = vld [vmem:[%s11012_s13 + $0x18] sm:$0xff] (!%p7589_p7)  ;;  %v11030_v4 = vld [vmem:[%s11012_s13 + $0x20] sm:$0xff] (!%p7589_p7) }
  0x1a   : > { %377 = vst.msk [vmem:[#allocation2 + $0x10] sm:$0x3] (!%p7589_p7), %vm376_vm1, %v321_v2  ;;  %v11033_v5 = vld [vmem:[%s11012_s13 + $0x28] sm:$0x3] (!%p7589_p7)  ;;  %v532_v6 = vrot.slane (!%p7589_p7), %v11027_v3, 1  ;;  %v533_v7 = vrot.slane (!%p7589_p7), %v11030_v4, 1 }
  0x1b   : > { %378 = vst.msk [vmem:[#allocation2 + $0x18] sm:$0xff] %vm373_vm0, %v11027_v3  ;;  %379 = vst.msk [vmem:[#allocation2 + $0x20] sm:$0xff] %vm373_vm0, %v11030_v4  ;;  %v535_v8 = vrot.slane %v11033_v5, 1  ;;  %v11045_v9 = vld [vmem:[%s11012_s13 + $0x30] sm:$0xff]  ;;  %v11048_v10 = vld [vmem:[%s11012_s13 + $0x38] sm:$0xff] }
  0x1c   : > { %380 = vst.msk [vmem:[#allocation2 + $0x28] sm:$0x3] %vm376_vm1, %v11033_v5  ;;  %v11051_v11 = vld [vmem:[%s11012_s13 + $0x48] sm:$0xff]  ;;  %440 = vst.msk [vmem:[#allocation3 + $0x58] sm:$0x3] %vm376_vm1, %v10933_v12  ;;  %v537_v13 = vrot.slane %v11045_v9, 1  ;;  %v534_v23 = vsel %vm531_vm2, %v532_v6, %v533_v7 }
  0x1d   : > { %438 = vst.msk [vmem:[#allocation3 + $0x48] sm:$0xff] %vm373_vm0, %v10933_v12  ;;  %439 = vst.msk [vmem:[#allocation3 + $0x50] sm:$0xff] %vm373_vm0, %v10933_v12  ;;  %v538_v14 = vrot.slane %v11048_v10, 1  ;;  %v327_v15 = vld [vmem:[%s11012_s13 + $0x40] sm:$0x3]  ;;  %v542_v16 = vrot.slane %v11051_v11, 1  ;;  %v536_v24 = vsel %vm531_vm2, %v533_v7, %v535_v8 }
  0x1e   : > { %441 = vst.msk [vmem:[#allocation3 + $0x60] sm:$0xff] %vm373_vm0, %v10933_v12  ;;  %442 = vst.msk [vmem:[#allocation3 + $0x68] sm:$0xff] %vm373_vm0, %v10933_v12  ;;  %v329_v17 = vld [vmem:[%s11012_s13 + $0x50] sm:$0xff]  ;;  %v540_v18 = vrot.slane %v327_v15, 1  ;;  %v330_v20 = vld [vmem:[%s11012_s13 + $0x58] sm:$0x3] }
  0x1f   : > { %443 = vst.msk [vmem:[#allocation3 + $0x70] sm:$0x3] %vm376_vm1, %v10933_v12  ;;  %446 = vst.msk [vmem:[#allocation3 + $0x88] sm:$0x3] %vm376_vm1, %v10933_v12  ;;  %v543_v19 = vrot.slane %v329_v17, 1  ;;  %v331_v21 = vld [vmem:[%s11012_s13 + $0x60] sm:$0xff]  ;;  %v539_v30 = vsel %vm531_vm2, %v537_v13, %v538_v14 }
  0x20   : > { %444 = vst.msk [vmem:[#allocation3 + $0x78] sm:$0xff] %vm373_vm0, %v10933_v12  ;;  %445 = vst.msk [vmem:[#allocation3 + $0x80] sm:$0xff] %vm373_vm0, %v10933_v12  ;;  %v332_v22 = vld [vmem:[%s11012_s13 + $0x68] sm:$0xff]  ;;  %v545_v25 = vrot.slane %v330_v20, 1  ;;  %v547_v26 = vrot.slane %v331_v21, 1  ;;  %v334_v29 = vld [vmem:[%s11012_s13 + $0x78] sm:$0xff]  ;;  %v541_v36 = vsel %vm531_vm2, %v538_v14, %v540_v18 }
  0x21   : > { %447 = vst.msk [vmem:[#allocation3 + $0x90] sm:$0xff] %vm373_vm0, %v10933_v12  ;;  %448 = vst.msk [vmem:[#allocation3 + $0x98] sm:$0xff] %vm373_vm0, %v10933_v12  ;;  %v548_v27 = vrot.slane %v332_v22, 1  ;;  %v333_v28 = vld [vmem:[%s11012_s13 + $0x70] sm:$0x3]  ;;  %v552_v32 = vrot.slane %v334_v29, 1  ;;  %v544_v37 = vsel %vm531_vm2, %v542_v16, %v543_v19 }
  0x22   : > { %449 = vst.msk [vmem:[#allocation3 + $0xa0] sm:$0x3] %vm376_vm1, %v10933_v12  ;;  %452 = vst.msk [vmem:[#allocation3 + $0xb8] sm:$0x3] %vm376_vm1, %v10933_v12  ;;  %v550_v31 = vrot.slane %v333_v28, 1  ;;  %v335_v33 = vld [vmem:[%s11012_s13 + $0x80] sm:$0xff]  ;;  %v546_v43 = vsel %vm531_vm2, %v543_v19, %v545_v25 }
  0x23   : > { %450 = vst.msk [vmem:[#allocation3 + $0xa8] sm:$0xff] %vm373_vm0, %v10933_v12  ;;  %451 = vst.msk [vmem:[#allocation3 + $0xb0] sm:$0xff] %vm373_vm0, %v10933_v12  ;;  %v336_v34 = vld [vmem:[%s11012_s13 + $0x88] sm:$0x3]  ;;  %v337_v35 = vld [vmem:[%s11012_s13 + $0x90] sm:$0xff]  ;;  %v553_v38 = vrot.slane %v335_v33, 1  ;;  %v549_v49 = vsel %vm531_vm2, %v547_v26, %v548_v27 }
  0x24   : > { %453 = vst.msk [vmem:[#allocation3 + $0xc0] sm:$0xff] %vm373_vm0, %v10933_v12  ;;  %454 = vst.msk [vmem:[#allocation3 + $0xc8] sm:$0xff] %vm373_vm0, %v10933_v12  ;;  %v555_v39 = vrot.slane %v336_v34, 1  ;;  %v557_v40 = vrot.slane %v337_v35, 1  ;;  %v338_v41 = vld [vmem:[%s11012_s13 + $0x98] sm:$0xff]  ;;  %v340_v46 = vld [vmem:[%s11012_s13 + $0xa8] sm:$0xff]  ;;  %v551_v50 = vsel %vm531_vm2, %v548_v27, %v550_v31 }
  0x25   : > { %455 = vst.msk [vmem:[#allocation3 + $0xd0] sm:$0x3] %vm376_vm1, %v10933_v12  ;;  %458 = vst.msk [vmem:[#allocation3 + $0xe8] sm:$0x3] %vm376_vm1, %v10933_v12  ;;  %v339_v42 = vld [vmem:[%s11012_s13 + $0xa0] sm:$0x3]  ;;  %v554_v57 = vsel %vm531_vm2, %v552_v32, %v553_v38 }
  0x26   : > { %456 = vst.msk [vmem:[#allocation3 + $0xd8] sm:$0xff] %vm373_vm0, %v10933_v12  ;;  %457 = vst.msk [vmem:[#allocation3 + $0xe0] sm:$0xff] %vm373_vm0, %v10933_v12  ;;  %v558_v44 = vrot.slane %v338_v41, 1  ;;  %v560_v45 = vrot.slane %v339_v42, 1  ;;  %v341_v47 = vld [vmem:[%s11012_s13 + $0xb0] sm:$0xff]  ;;  %v562_v51 = vrot.slane %v340_v46, 1  ;;  %v556_v63 = vsel %vm531_vm2, %v553_v38, %v555_v39 }
  0x27   : > { %459 = vst.msk [vmem:[#allocation3 + $0xf0] sm:$0xff] %vm373_vm0, %v10933_v12  ;;  %460 = vst.msk [vmem:[#allocation3 + $0xf8] sm:$0xff] %vm373_vm0, %v10933_v12  ;;  %v342_v48 = vld [vmem:[%s11012_s13 + $0xb8] sm:$0x3]  ;;  %v563_v52 = vrot.slane %v341_v47, 1  ;;  %v343_v54 = vld [vmem:[%s11012_s13 + $0xc0] sm:$0xff] }
  0x28   : > { %461 = vst.msk [vmem:[#allocation3 + $0x100] sm:$0x3] %vm376_vm1, %v10933_v12  ;;  %464 = vst.msk [vmem:[#allocation3 + $0x118] sm:$0x3] %vm376_vm1, %v10933_v12  ;;  %v565_v53 = vrot.slane %v342_v48, 1  ;;  %v344_v55 = vld [vmem:[%s11012_s13 + $0xc8] sm:$0xff]  ;;  %v559_v5 = vsel %vm531_vm2, %v557_v40, %v558_v44  ;;  %v561_v6 = vsel %vm531_vm2, %v558_v44, %v560_v45 }
  0x29   : > { %462 = vst.msk [vmem:[#allocation3 + $0x108] sm:$0xff] %vm373_vm0, %v10933_v12  ;;  %463 = vst.msk [vmem:[#allocation3 + $0x110] sm:$0xff] %vm373_vm0, %v10933_v12  ;;  %v11171_v56 = vld [vmem:[%s11012_s13 + $0xd8] sm:$0xff]  ;;  %v567_v58 = vrot.slane %v343_v54, 1  ;;  %v568_v59 = vrot.slane %v344_v55, 1  ;;  %v347_v62 = vld [vmem:[%s11012_s13 + $0xe0] sm:$0xff] }
  0x2a   : > { %465 = vst.msk [vmem:[#allocation3 + $0x120] sm:$0xff] %vm373_vm0, %v10933_v12  ;;  %466 = vst.msk [vmem:[#allocation3 + $0x128] sm:$0xff] %vm373_vm0, %v10933_v12  ;;  %v345_v60 = vld [vmem:[%s11012_s13 + $0xd0] sm:$0x3]  ;;  %v572_v61 = vrot.slane %v11171_v56, 1  ;;  %v573_v1 = vrot.slane %v347_v62, 1  ;;  %v566_v18 = vsel %vm531_vm2, %v563_v52, %v565_v53 }
  0x2b   : > { %467 = vst.msk [vmem:[#allocation3 + $0x130] sm:$0x3] %vm376_vm1, %v10933_v12  ;;  %470 = vst.msk [vmem:[#allocation3 + $0x148] sm:$0x3] %vm376_vm1, %v10933_v12  ;;  %v570_v0 = vrot.slane %v345_v60, 1  ;;  %v349_v3 = vld [vmem:[%s11012_s13 + $0xf0] sm:$0xff]  ;;  %v569_v19 = vsel %vm531_vm2, %v567_v58, %v568_v59 }
  0x2c   : > { %468 = vst.msk [vmem:[#allocation3 + $0x138] sm:$0xff] %vm373_vm0, %v10933_v12  ;;  %469 = vst.msk [vmem:[#allocation3 + $0x140] sm:$0xff] %vm373_vm0, %v10933_v12  ;;  %v348_v2 = vld [vmem:[%s11012_s13 + $0xe8] sm:$0x3]  ;;  %v11190_v4 = vld [vmem:[%s11012_s13 + $0xf8] sm:$0xff]  ;;  %v577_v8 = vrot.slane %v349_v3, 1  ;;  %v574_v31 = vsel %vm531_vm2, %v572_v61, %v573_v1 }
  0x2d   : > { %471 = vst.msk [vmem:[#allocation3 + $0x150] sm:$0xff] %vm373_vm0, %v10933_v12  ;;  %472 = vst.msk [vmem:[#allocation3 + $0x158] sm:$0xff] %vm373_vm0, %v10933_v12  ;;  %v575_v7 = vrot.slane %v348_v2, 1  ;;  %v354_v16 = vld [vmem:[%s11012_s13 + $0x118] sm:$0x3]  ;;  %v571_v25 = vsel %vm531_vm2, %v568_v59, %v570_v0  ;;  %v364_v38 = vld [vmem:[%s11012_s13 + $0x168] sm:$0xff] }
  0x2e   : > { %473 = vst.msk [vmem:[#allocation3 + $0x160] sm:$0x3] %vm376_vm1, %v10933_v12  ;;  %476 = vst.msk [vmem:[#allocation3 + $0x178] sm:$0x3] %vm376_vm1, %v10933_v12  ;;  %v365_v44 = vld [vmem:[%s11012_s13 + $0x170] sm:$0xff] }
  0x2f   : > { %474 = vst.msk [vmem:[#allocation3 + $0x168] sm:$0xff] %vm373_vm0, %v10933_v12  ;;  %475 = vst.msk [vmem:[#allocation3 + $0x170] sm:$0xff] %vm373_vm0, %v10933_v12  ;;  %v576_v32 = vsel %vm531_vm2, %v573_v1, %v575_v7  ;;  %v372_v61 = vld [vmem:[%s11012_s13 + $0x1a8] sm:$0x3] }
  0x30   : > { %477 = vst.msk [vmem:[#allocation3 + $0x180] sm:$0xff] %vm373_vm0, %v10933_v12  ;;  %478 = vst.msk [vmem:[#allocation3 + $0x188] sm:$0xff] %vm373_vm0, %v10933_v12 }
  0x31   : > { %479 = vst.msk [vmem:[#allocation3 + $0x190] sm:$0x3] %vm376_vm1, %v10933_v12  ;;  %482 = vst.msk [vmem:[#allocation3 + $0x1a8] sm:$0x3] %vm376_vm1, %v10933_v12 }
  0x32   : > { %480 = vst.msk [vmem:[#allocation3 + $0x198] sm:$0xff] %vm373_vm0, %v10933_v12  ;;  %481 = vst.msk [vmem:[#allocation3 + $0x1a0] sm:$0xff] %vm373_vm0, %v10933_v12  ;;  %v564_v12 = vsel %vm531_vm2, %v562_v51, %v563_v52 }
  0x33   : > { %381 = vst.msk [vmem:[#allocation2 + $0x30] sm:$0xff] %vm373_vm0, %v11045_v9  ;;  %382 = vst.msk [vmem:[#allocation2 + $0x38] sm:$0xff] %vm373_vm0, %v11048_v10  ;;  %v578_v9 = vrot.slane %v11190_v4, 1  ;;  %v351_v10 = vld [vmem:[%s11012_s13 + $0x100] sm:$0x3] }
  0x34   : > { %384 = vst.msk [vmem:[#allocation2 + $0x48] sm:$0xff] %vm373_vm0, %v11051_v11  ;;  %385 = vst.msk [vmem:[#allocation2 + $0x50] sm:$0xff] %vm373_vm0, %v329_v17  ;;  %v11202_v11 = vld [vmem:[%s11012_s13 + $0x108] sm:$0xff]  ;;  %v580_v13 = vrot.slane %v351_v10, 1  ;;  %v11214_v17 = vld [vmem:[%s11012_s13 + $0x120] sm:$0xff] }
  0x35   : > { %383 = vst.msk [vmem:[#allocation2 + $0x40] sm:$0x3] %vm376_vm1, %v327_v15  ;;  %386 = vst.msk [vmem:[#allocation2 + $0x58] sm:$0x3] %vm376_vm1, %v330_v20  ;;  %v582_v14 = vrot.slane %v11202_v11, 1  ;;  %v353_v15 = vld [vmem:[%s11012_s13 + $0x110] sm:$0xff]  ;;  %v579_v39 = vsel %vm531_vm2, %v577_v8, %v578_v9 }
  0x36   : > { %387 = vst.msk [vmem:[#allocation2 + $0x60] sm:$0xff] %vm373_vm0, %v331_v21  ;;  %388 = vst.msk [vmem:[#allocation2 + $0x68] sm:$0xff] %vm373_vm0, %v332_v22  ;;  %v583_v20 = vrot.slane %v353_v15, 1  ;;  %v585_v21 = vrot.slane %v354_v16, 1  ;;  %v587_v22 = vrot.slane %v11214_v17, 1  ;;  %v581_v45 = vsel %vm531_vm2, %v578_v9, %v580_v13 }
  0x37   : > { %644 = vst.msk [vmem:[#allocation4] sm:$0xff] %vm373_vm0, %v534_v23  ;;  %645 = vst.msk [vmem:[#allocation4 + $0x8] sm:$0xff] %vm373_vm0, %v536_v24  ;;  %v11225_v23 = vld [vmem:[%s11012_s13 + $0x128] sm:$0xff]  ;;  %v11228_v24 = vld [vmem:[%s11012_s13 + $0x130] sm:$0x3] }
  0x38   : > { %389 = vst.msk [vmem:[#allocation2 + $0x70] sm:$0x3] %vm376_vm1, %v333_v28  ;;  %392 = vst.msk [vmem:[#allocation2 + $0x88] sm:$0x3] %vm376_vm1, %v336_v34  ;;  %v588_v26 = vrot.slane %v11225_v23, 1  ;;  %v590_v27 = vrot.slane %v11228_v24, 1  ;;  %v584_v51 = vsel %vm531_vm2, %v582_v14, %v583_v20  ;;  %v586_v52 = vsel %vm531_vm2, %v583_v20, %v585_v21 }
  0x39   : > { %390 = vst.msk [vmem:[#allocation2 + $0x78] sm:$0xff] %vm373_vm0, %v334_v29  ;;  %646 = vst.msk [vmem:[#allocation4 + $0x10] sm:$0xff] %vm373_vm0, %v539_v30  ;;  %v358_v28 = vld [vmem:[%s11012_s13 + $0x138] sm:$0xff]  ;;  %v359_v29 = vld [vmem:[%s11012_s13 + $0x140] sm:$0xff] }
  0x3a   : > { %391 = vst.msk [vmem:[#allocation2 + $0x80] sm:$0xff] %vm373_vm0, %v335_v33  ;;  %393 = vst.msk [vmem:[#allocation2 + $0x90] sm:$0xff] %vm373_vm0, %v337_v35  ;;  %v360_v30 = vld [vmem:[%s11012_s13 + $0x148] sm:$0x3]  ;;  %v592_v33 = vrot.slane %v358_v28, 1  ;;  %v593_v34 = vrot.slane %v359_v29, 1  ;;  %v589_v58 = vsel %vm531_vm2, %v587_v22, %v588_v26 }
  0x3b   : > { %647 = vst.msk [vmem:[#allocation4 + $0x18] sm:$0xff] %vm373_vm0, %v541_v36  ;;  %648 = vst.msk [vmem:[#allocation4 + $0x20] sm:$0xff] %vm373_vm0, %v544_v37  ;;  %v595_v35 = vrot.slane %v360_v30, 1  ;;  %v361_v36 = vld [vmem:[%s11012_s13 + $0x150] sm:$0xff]  ;;  %v362_v37 = vld [vmem:[%s11012_s13 + $0x158] sm:$0xff] }
  0x3c   : > { %394 = vst.msk [vmem:[#allocation2 + $0x98] sm:$0xff] %vm373_vm0, %v338_v41  ;;  %649 = vst.msk [vmem:[#allocation4 + $0x28] sm:$0xff] %vm373_vm0, %v546_v43  ;;  %v597_v40 = vrot.slane %v361_v36, 1  ;;  %v598_v41 = vrot.slane %v362_v37, 1  ;;  %v602_v43 = vrot.slane %v364_v38, 1 }
  0x3d   : > { %395 = vst.msk [vmem:[#allocation2 + $0xa0] sm:$0x3] %vm376_vm1, %v339_v42  ;;  %398 = vst.msk [vmem:[#allocation2 + $0xb8] sm:$0x3] %vm376_vm1, %v342_v48  ;;  %v363_v42 = vld [vmem:[%s11012_s13 + $0x160] sm:$0x3]  ;;  %v596_v0 = vsel %vm531_vm2, %v593_v34, %v595_v35 }
  0x3e   : > { %396 = vst.msk [vmem:[#allocation2 + $0xa8] sm:$0xff] %vm373_vm0, %v340_v46  ;;  %397 = vst.msk [vmem:[#allocation2 + $0xb0] sm:$0xff] %vm373_vm0, %v341_v47  ;;  %v600_v46 = vrot.slane %v363_v42, 1  ;;  %v603_v47 = vrot.slane %v365_v44, 1  ;;  %v366_v48 = vld [vmem:[%s11012_s13 + $0x178] sm:$0x3]  ;;  %v599_v1 = vsel %vm531_vm2, %v597_v40, %v598_v41 }
  0x3f   : > { %650 = vst.msk [vmem:[#allocation4 + $0x30] sm:$0xff] %vm373_vm0, %v549_v49  ;;  %651 = vst.msk [vmem:[#allocation4 + $0x38] sm:$0xff] %vm373_vm0, %v551_v50  ;;  %v367_v49 = vld [vmem:[%s11012_s13 + $0x180] sm:$0xff]  ;;  %v368_v50 = vld [vmem:[%s11012_s13 + $0x188] sm:$0xff]  ;;  %v605_v53 = vrot.slane %v366_v48, 1 }
  0x40   : > { %399 = vst.msk [vmem:[#allocation2 + $0xc0] sm:$0xff] %vm373_vm0, %v343_v54  ;;  %400 = vst.msk [vmem:[#allocation2 + $0xc8] sm:$0xff] %vm373_vm0, %v344_v55  ;;  %v607_v54 = vrot.slane %v367_v49, 1  ;;  %v608_v55 = vrot.slane %v368_v50, 1 }
  0x41   : > { %402 = vst.msk [vmem:[#allocation2 + $0xd8] sm:$0xff] %vm373_vm0, %v11171_v56  ;;  %652 = vst.msk [vmem:[#allocation4 + $0x40] sm:$0xff] %vm373_vm0, %v554_v57  ;;  %v369_v56 = vld [vmem:[%s11012_s13 + $0x190] sm:$0x3]  ;;  %v370_v57 = vld [vmem:[%s11012_s13 + $0x198] sm:$0xff] }
  0x42   : > { %401 = vst.msk [vmem:[#allocation2 + $0xd0] sm:$0x3] %vm376_vm1, %v345_v60  ;;  %404 = vst.msk [vmem:[#allocation2 + $0xe8] sm:$0x3] %vm376_vm1, %v348_v2  ;;  %v610_v59 = vrot.slane %v369_v56, 1  ;;  %v371_v60 = vld [vmem:[%s11012_s13 + $0x1a0] sm:$0xff]  ;;  %v601_v2 = vsel %vm531_vm2, %v598_v41, %v600_v46 }
  0x43   : > { %403 = vst.msk [vmem:[#allocation2 + $0xe0] sm:$0xff] %vm373_vm0, %v347_v62  ;;  %653 = vst.msk [vmem:[#allocation4 + $0x48] sm:$0xff] %vm373_vm0, %v556_v63  ;;  %v591_v62 = vsel %vm531_vm2, %v588_v26, %v590_v27  ;;  %v594_v63 = vsel %vm531_vm2, %v592_v33, %v593_v34 }
  0x44   : > { %405 = vst.msk [vmem:[#allocation2 + $0xf0] sm:$0xff] %vm373_vm0, %v349_v3  ;;  %406 = vst.msk [vmem:[#allocation2 + $0xf8] sm:$0xff] %vm373_vm0, %v11190_v4  ;;  %v604_v3 = vsel %vm531_vm2, %v602_v43, %v603_v47  ;;  %v606_v4 = vsel %vm531_vm2, %v603_v47, %v605_v53 }
  0x45   : > { %654 = vst.msk [vmem:[#allocation4 + $0x50] sm:$0xff] %vm373_vm0, %v559_v5  ;;  %655 = vst.msk [vmem:[#allocation4 + $0x58] sm:$0xff] %vm373_vm0, %v561_v6  ;;  %v609_v5 = vsel %vm531_vm2, %v607_v54, %v608_v55  ;;  %v611_v6 = vsel %vm531_vm2, %v608_v55, %v610_v59 }
  0x46   : > { %407 = vst.msk [vmem:[#allocation2 + $0x100] sm:$0x3] %vm376_vm1, %v351_v10  ;;  %410 = vst.msk [vmem:[#allocation2 + $0x118] sm:$0x3] %vm376_vm1, %v354_v16 }
  0x47   : > { %408 = vst.msk [vmem:[#allocation2 + $0x108] sm:$0xff] %vm373_vm0, %v11202_v11  ;;  %656 = vst.msk [vmem:[#allocation4 + $0x60] sm:$0xff] %vm373_vm0, %v564_v12 }
  0x48   : > { %409 = vst.msk [vmem:[#allocation2 + $0x110] sm:$0xff] %vm373_vm0, %v353_v15  ;;  %411 = vst.msk [vmem:[#allocation2 + $0x120] sm:$0xff] %vm373_vm0, %v11214_v17 }
  0x49   : > { %657 = vst.msk [vmem:[#allocation4 + $0x68] sm:$0xff] %vm373_vm0, %v566_v18  ;;  %658 = vst.msk [vmem:[#allocation4 + $0x70] sm:$0xff] %vm373_vm0, %v569_v19 }
  0x4a   : > { %412 = vst.msk [vmem:[#allocation2 + $0x128] sm:$0xff] %vm373_vm0, %v11225_v23  ;;  %659 = vst.msk [vmem:[#allocation4 + $0x78] sm:$0xff] %vm373_vm0, %v571_v25 }
  0x4b   : > { %413 = vst.msk [vmem:[#allocation2 + $0x130] sm:$0x3] %vm376_vm1, %v11228_v24  ;;  %416 = vst.msk [vmem:[#allocation2 + $0x148] sm:$0x3] %vm376_vm1, %v360_v30 }
  0x4c   : > { %414 = vst.msk [vmem:[#allocation2 + $0x138] sm:$0xff] %vm373_vm0, %v358_v28  ;;  %415 = vst.msk [vmem:[#allocation2 + $0x140] sm:$0xff] %vm373_vm0, %v359_v29 }
  0x4d   : > { %660 = vst.msk [vmem:[#allocation4 + $0x80] sm:$0xff] %vm373_vm0, %v574_v31  ;;  %661 = vst.msk [vmem:[#allocation4 + $0x88] sm:$0xff] %vm373_vm0, %v576_v32 }
  0x4e   : > { %417 = vst.msk [vmem:[#allocation2 + $0x150] sm:$0xff] %vm373_vm0, %v361_v36  ;;  %418 = vst.msk [vmem:[#allocation2 + $0x158] sm:$0xff] %vm373_vm0, %v362_v37 }
  0x4f   : > { %420 = vst.msk [vmem:[#allocation2 + $0x168] sm:$0xff] %vm373_vm0, %v364_v38  ;;  %662 = vst.msk [vmem:[#allocation4 + $0x90] sm:$0xff] %vm373_vm0, %v579_v39 }
  0x50   : > { %419 = vst.msk [vmem:[#allocation2 + $0x160] sm:$0x3] %vm376_vm1, %v363_v42  ;;  %422 = vst.msk [vmem:[#allocation2 + $0x178] sm:$0x3] %vm376_vm1, %v366_v48 }
  0x51   : > { %421 = vst.msk [vmem:[#allocation2 + $0x170] sm:$0xff] %vm373_vm0, %v365_v44  ;;  %663 = vst.msk [vmem:[#allocation4 + $0x98] sm:$0xff] %vm373_vm0, %v581_v45 }
  0x52   : > { %423 = vst.msk [vmem:[#allocation2 + $0x180] sm:$0xff] %vm373_vm0, %v367_v49  ;;  %424 = vst.msk [vmem:[#allocation2 + $0x188] sm:$0xff] %vm373_vm0, %v368_v50 }
  0x53   : > { %664 = vst.msk [vmem:[#allocation4 + $0xa0] sm:$0xff] %vm373_vm0, %v584_v51  ;;  %665 = vst.msk [vmem:[#allocation4 + $0xa8] sm:$0xff] %vm373_vm0, %v586_v52 }
  0x54   : > { %425 = vst.msk [vmem:[#allocation2 + $0x190] sm:$0x3] %vm376_vm1, %v369_v56  ;;  %428 = vst.msk [vmem:[#allocation2 + $0x1a8] sm:$0x3] %vm376_vm1, %v372_v61 }
  0x55   : > { %426 = vst.msk [vmem:[#allocation2 + $0x198] sm:$0xff] %vm373_vm0, %v370_v57  ;;  %666 = vst.msk [vmem:[#allocation4 + $0xb0] sm:$0xff] %vm373_vm0, %v589_v58 }
  0x56   : > { %427 = vst.msk [vmem:[#allocation2 + $0x1a0] sm:$0xff] %vm373_vm0, %v371_v60  ;;  %667 = vst.msk [vmem:[#allocation4 + $0xb8] sm:$0xff] %vm373_vm0, %v591_v62 }
  0x57   : > { %668 = vst.msk [vmem:[#allocation4 + $0xc0] sm:$0xff] %vm373_vm0, %v594_v63  ;;  %669 = vst.msk [vmem:[#allocation4 + $0xc8] sm:$0xff] %vm373_vm0, %v596_v0 }
  0x58   : > { %670 = vst.msk [vmem:[#allocation4 + $0xd0] sm:$0xff] %vm373_vm0, %v599_v1  ;;  %671 = vst.msk [vmem:[#allocation4 + $0xd8] sm:$0xff] %vm373_vm0, %v601_v2 }
  0x59   : > { %672 = vst.msk [vmem:[#allocation4 + $0xe0] sm:$0xff] %vm373_vm0, %v604_v3  ;;  %673 = vst.msk [vmem:[#allocation4 + $0xe8] sm:$0xff] %vm373_vm0, %v606_v4 }
  0x5a   : > { %674 = vst.msk [vmem:[#allocation4 + $0xf0] sm:$0xff] %vm373_vm0, %v609_v5  ;;  %675 = vst.msk [vmem:[#allocation4 + $0xf8] sm:$0xff] %vm373_vm0, %v611_v6 }
  0x5b PF: > { %v794_v7 = vld [vmem:[%s14261_s3] sm:$0xff]  ;;  %v795_v8 = vld [vmem:[%s14261_s3 + $0x8] sm:$0xff]  ;;  %v796_v9 = vld [vmem:[%s14261_s3 + $0x10] sm:$0xff]  ;;  %vm798_vm3 = vcmask 261120   ;;  %vm1575_vm4 = vcmask 1045504   ;;  %vm1168_vm5 = vcmask 1046528  }
  0x5c   : > { %v9922_v10 = vpack.c.bf16 %v795_v8, %v794_v7  ;;  %v797_v11 = vld [vmem:[%s14261_s3 + $0x18] sm:$0xff]  ;;  %v7622_v14 = vld [vmem:[%s14261_s3 + $0x20] sm:$0xff]  ;;  %v7623_v15 = vld [vmem:[%s14261_s3 + $0x28] sm:$0xff]  ;;  %s10934_s26 = smov 32   ;;  %vm7419_vm6 = vcmask 254976  }
  0x5d   : > { %v9926_v13 = vpack.c.bf16 %v797_v11, %v796_v9  ;;  %v9930_v16 = vpack.c.bf16 %v7623_v15, %v7622_v14  ;;  %v7624_v18 = vld [vmem:[%s14261_s3 + $0x30] sm:$0xff]  ;;  %v7625_v19 = vld [vmem:[%s14261_s3 + $0x38] sm:$0xff]  ;;  %v7658_v24 = vld [vmem:[%s14261_s3 + $0x40] sm:$0xff] }
  0x5e   : > { %9923 = vmatprep.subr.bf16.mxu0 %v9922_v10  ;;  %v9934_v21 = vpack.c.bf16 %v7625_v19, %v7624_v18  ;;  %v11340_v23 = vld [vmem:[#allocation2 + $0x30] sm:$0xff]  ;;  %v7659_v25 = vld [vmem:[%s14261_s3 + $0x48] sm:$0xff]  ;;  %v11354_v27 = vld [vmem:[#allocation2 + $0x38] sm:$0xff] }
  0x5f   : > { %9925 = vmatpush3.bf16.msra.mxu0 %v9922_v10  ;;  %v11350_v26 = vpack.c.bf16 %v7659_v25, %v7658_v24  ;;  %v11356_v28 = vld [vmem:[#allocation2 + $0x48] sm:$0xff]  ;;  %v11363_v29 = vld [vmem:[#allocation2 + $0x50] sm:$0xff]  ;;  %v11367_v32 = vld [vmem:[#allocation2 + $0x60] sm:$0xff]  ;;  %v1179_v8 = vrot.slane %v11340_v23, 1  ;;  %v1180_v9 = vrot.slane %v11354_v27, 1 }
  0x60   : > { %v11314_v12 = vld [vmem:[#allocation2] sm:$0xff]  ;;  %9927 = vmatprep.subr.bf16.mxu0 %v9926_v13  ;;  %v11324_v17 = vld [vmem:[#allocation2 + $0x8] sm:$0xff]  ;;  %v11378_v36 = vld [vmem:[#allocation2 + $0x78] sm:$0xff]  ;;  %v1185_v18 = vrot.slane %v11363_v29, 1 }
  0x61   : > { %8922 = vmatprep.mubr.msk.f32.mxu0 %vm798_vm3, %v11314_v12  ;;  %v1576_v30 = vrot.slane %v11314_v12, 2  ;;  %v1577_v31 = vrot.slane %v11324_v17, 2  ;;  %v11371_v33 = vld [vmem:[#allocation2 + $0x10] sm:$0x3]  ;;  %v11375_v34 = vld [vmem:[#allocation2 + $0x68] sm:$0xff]  ;;  %v11390_v39 = vld [vmem:[#allocation2 + $0x80] sm:$0xff] }
  0x62   : > { %v11332_v20 = vld [vmem:[#allocation2 + $0x18] sm:$0xff]  ;;  %v11338_v22 = vld [vmem:[#allocation2 + $0x20] sm:$0xff]  ;;  %v1579_v35 = vrot.slane %v11371_v33, 2  ;;  %v11392_v40 = vld [vmem:[#allocation2 + $0x90] sm:$0xff]  ;;  %v1169_v58 = vrot.slane %v11314_v12, 1  ;;  %v1170_v59 = vrot.slane %v11324_v17, 1 }
  0x63   : > { %9929 = vmatpush3.bf16.msra.mxu0 %v9926_v13  ;;  %v11381_v37 = vsel %vm1575_vm4, %v1576_v30, %v1577_v31  ;;  %v11398_v41 = vld [vmem:[#allocation2 + $0x98] sm:$0xff]  ;;  %v11400_v42 = vld [vmem:[#allocation2 + $0xa8] sm:$0xff]  ;;  %v11406_v43 = vld [vmem:[#allocation2 + $0xb0] sm:$0xff]  ;;  %v1172_v62 = vrot.slane %v11371_v33, 1  ;;  %v1174_v0 = vrot.slane %v11332_v20, 1  ;;  %v1175_v1 = vrot.slane %v11338_v22, 1 }
  0x64   : > { %9931 = vmatprep.subr.bf16.mxu0 %v9930_v16  ;;  %v11384_v38 = vsel %vm1575_vm4, %v1577_v31, %v1579_v35  ;;  %v11408_v44 = vld [vmem:[#allocation2 + $0xc0] sm:$0xff]  ;;  %v11414_v45 = vld [vmem:[#allocation2 + $0xc8] sm:$0xff]  ;;  %v11416_v46 = vld [vmem:[#allocation2 + $0xd8] sm:$0xff]  ;;  %v1171_v63 = vsel %vm1168_vm5, %v1169_v58, %v1170_v59  ;;  %v1189_v30 = vrot.slane %v11367_v32, 1  ;;  %v1190_v31 = vrot.slane %v11375_v34, 1 }
  0x65   : > { %v11422_v47 = vld [vmem:[#allocation2 + $0xe0] sm:$0xff]  ;;  %v11424_v48 = vld [vmem:[#allocation2 + $0xf0] sm:$0xff]  ;;  %v11430_v49 = vld [vmem:[#allocation2 + $0xf8] sm:$0xff]  ;;  %v1173_v5 = vsel %vm1168_vm5, %v1170_v59, %v1172_v62  ;;  %v11492_v7 = vsel %vm1168_vm5, %v1174_v0, %v1175_v1  ;;  %v1194_v62 = vrot.slane %v11378_v36, 1 }
  0x66   : > { %8923 = vmatmul.mubr.msk.f32.vlgmr.msra.gmra.mrb[0].mxu0 %vm798_vm3, %v11324_v17  ;;  %v11432_v50 = vld [vmem:[#allocation2 + $0x108] sm:$0xff]  ;;  %v11438_v51 = vld [vmem:[#allocation2 + $0x110] sm:$0xff]  ;;  %v11440_v52 = vld [vmem:[#allocation2 + $0x120] sm:$0xff]  ;;  %v1184_v17 = vrot.slane %v11356_v28, 1  ;;  %v11546_v59 = vsel %vm1168_vm5, %v1189_v30, %v1190_v31 }
  0x67   : > { %9933 = vmatpush3.bf16.msra.mxu0 %v9930_v16  ;;  %8925 = vmatprep.mubr.msk.f32.mxu0 %vm798_vm3, %v11332_v20  ;;  %v11446_v53 = vld [vmem:[#allocation2 + $0x128] sm:$0xff]  ;;  %v11448_v54 = vld [vmem:[#allocation2 + $0x138] sm:$0xff]  ;;  %v11454_v55 = vld [vmem:[#allocation2 + $0x140] sm:$0xff]  ;;  %v11513_v16 = vsel %vm1168_vm5, %v1179_v8, %v1180_v9  ;;  %14482 = vst [vmem:[#allocation8_spill] sm:$0xff] %v11546_v59 }
  0x68   : > { %9935 = vmatprep.subr.bf16.mxu0 %v9934_v21  ;;  %v11456_v56 = vld [vmem:[#allocation2 + $0x150] sm:$0xff]  ;;  %v11462_v57 = vld [vmem:[#allocation2 + $0x158] sm:$0xff]  ;;  %v11466_v60 = vld [vmem:[#allocation2 + $0x168] sm:$0xff] }
  0x69   : > { %v11472_v61 = vld [vmem:[#allocation2 + $0x170] sm:$0xff]  ;;  %v11478_v2 = vld [vmem:[#allocation2 + $0x28] sm:$0x3]  ;;  %v7661_v4 = vld [vmem:[%s14261_s3 + $0x58] sm:$0xff] }
  0x6a   : > { %8926 = vmatmul.mubr.msk.f32.gmra.mrb[2].mxu0 %vm798_vm3, %v11338_v22  ;;  %v7660_v3 = vld [vmem:[%s14261_s3 + $0x50] sm:$0xff]  ;;  %v1177_v6 = vrot.slane %v11478_v2, 1  ;;  %v11496_v10 = vld [vmem:[#allocation2 + $0x40] sm:$0x3]  ;;  %v7695_v13 = vld [vmem:[%s14261_s3 + $0x68] sm:$0xff] }
  0x6b   : > { %8928 = vmatprep.mubr.msk.f32.mxu0 %vm798_vm3, %v11340_v23  ;;  %9937 = vmatpush3.bf16.msra.mxu0 %v9934_v21  ;;  %v9942_v11 = vpack.c.bf16 %v7661_v4, %v7660_v3  ;;  %v7694_v12 = vld [vmem:[%s14261_s3 + $0x60] sm:$0xff]  ;;  %v1182_v15 = vrot.slane %v11496_v10, 1  ;;  %v11517_v19 = vld [vmem:[#allocation2 + $0x58] sm:$0x3]  ;;  %v11534_v33 = vld [vmem:[#allocation2 + $0x70] sm:$0x3] }
  0x6c   : > { %9939 = vmatprep.subr.bf16.mxu0 %v11350_v26  ;;  %v11509_v14 = vsel %vm1168_vm5, %v1175_v1, %v1177_v6  ;;  %v11519_v21 = vpack.c.bf16 %v7695_v13, %v7694_v12  ;;  %v1187_v25 = vrot.slane %v11517_v19, 1  ;;  %v1192_v58 = vrot.slane %v11534_v33, 1  ;;  %v11550_v0 = vld [vmem:[#allocation2 + $0x88] sm:$0x3]  ;;  %v11565_v8 = vld [vmem:[#allocation2 + $0xa0] sm:$0x3] }
  0x6d   : > { %v11526_v24 = vsel %vm1168_vm5, %v1180_v9, %v1182_v15  ;;  %v1197_v3 = vrot.slane %v11550_v0, 1  ;;  %v1200_v6 = vrot.slane %v11398_v41, 1  ;;  %v1204_v13 = vrot.slane %v11400_v42, 1 }
  0x6e   : > { %8929 = vmatmul.mubr.msk.f32.gmra.mrb[4].mxu0 %vm798_vm3, %v11354_v27  ;;  %14479 = vst [vmem:[#allocation5_spill] sm:$0xff] %v11526_v24  ;;  %v11542_v35 = vsel %vm1168_vm5, %v1185_v18, %v1187_v25  ;;  %v11557_v1 = vsel %vm1168_vm5, %v1190_v31, %v1192_v58  ;;  %v1205_v15 = vrot.slane %v11406_v43, 1  ;;  %v1209_v31 = vrot.slane %v11408_v44, 1 }
  0x6f   : > { %8931 = vmatprep.mubr.msk.f32.mxu0 %vm798_vm3, %v11356_v28  ;;  %14481 = vst [vmem:[#allocation7_spill] sm:$0xff] %v11542_v35  ;;  %14483 = vst [vmem:[#allocation9_spill] sm:$0xff] %v11557_v1  ;;  %v1210_v58 = vrot.slane %v11414_v45, 1 }
  0x70   : > { %v11591_v30 = vsel %vm1168_vm5, %v1204_v13, %v1205_v15  ;;  %v11610_v13 = vld [vmem:[#allocation2 + $0xe8] sm:$0x3] }
  0x71   : > { %14488 = vst [vmem:[#allocation14_spill] sm:$0xff] %v11591_v30 }
  0x72   : > { %8932 = vmatmul.mubr.msk.f32.gmra.mrb[6].mxu0 %vm798_vm3, %v11363_v29 }
  0x73   : > { %8934 = vmatprep.mubr.msk.f32.mxu0 %vm798_vm3, %v11367_v32 }
  0x76   : > { %8935 = vmatmul.mubr.msk.f32.gmra.mrb[8].mxu0 %vm798_vm3, %v11375_v34 }
  0x77   : > { %8937 = vmatprep.mubr.msk.f32.mxu0 %vm798_vm3, %v11378_v36 }
  0x7a   : > { %8938 = vmatmul.mubr.msk.f32.gmra.mrb[10].mxu0 %vm798_vm3, %v11390_v39 }
  0x7b   : > { %8940 = vmatprep.mubr.msk.f32.mxu0 %vm798_vm3, %v11392_v40 }
  0x7e   : > { %8941 = vmatmul.mubr.msk.f32.gmra.mrb[12].mxu0 %vm798_vm3, %v11398_v41 }
  0x7f   : > { %8943 = vmatprep.mubr.msk.f32.mxu0 %vm798_vm3, %v11400_v42 }
  0x82   : > { %8944 = vmatmul.mubr.msk.f32.gmra.mrb[14].mxu0 %vm798_vm3, %v11406_v43 }
  0x83   : > { %8946 = vmatprep.mubr.msk.f32.mxu0 %vm798_vm3, %v11408_v44 }
  0x86   : > { %8947 = vmatmul.mubr.msk.f32.gmra.mrb[16].mxu0 %vm798_vm3, %v11414_v45 }
  0x87   : > { %8949 = vmatprep.mubr.msk.f32.mxu0 %vm798_vm3, %v11416_v46 }
  0x8a   : > { %8950 = vmatmul.mubr.msk.f32.gmra.mrb[18].mxu0 %vm798_vm3, %v11422_v47 }
  0x8b   : > { %8952 = vmatprep.mubr.msk.f32.mxu0 %vm798_vm3, %v11424_v48 }
  0x8e   : > { %8953 = vmatmul.mubr.msk.f32.gmra.mrb[20].mxu0 %vm798_vm3, %v11430_v49 }
  0x8f   : > { %8955 = vmatprep.mubr.msk.f32.mxu0 %vm798_vm3, %v11432_v50 }
  0x92   : > { %8956 = vmatmul.mubr.msk.f32.gmra.mrb[22].mxu0 %vm798_vm3, %v11438_v51 }
  0x93   : > { %8958 = vmatprep.mubr.msk.f32.mxu0 %vm798_vm3, %v11440_v52 }
  0x96   : > { %8959 = vmatmul.mubr.msk.f32.gmra.mrb[24].mxu0 %vm798_vm3, %v11446_v53 }
  0x97   : > { %8961 = vmatprep.mubr.msk.f32.mxu0 %vm798_vm3, %v11448_v54 }
  0x9a   : > { %8962 = vmatmul.mubr.msk.f32.gmra.mrb[26].mxu0 %vm798_vm3, %v11454_v55 }
  0x9b   : > { %8964 = vmatprep.mubr.msk.f32.mxu0 %vm798_vm3, %v11456_v56 }
  0x9e   : > { %8965 = vmatmul.mubr.msk.f32.gmra.mrb[28].mxu0 %vm798_vm3, %v11462_v57 }
  0x9f   : > { %8967 = vmatprep.mubr.msk.f32.mxu0 %vm798_vm3, %v11466_v60 }
  0xa2   : > { %8968 = vmatmul.mubr.msk.f32.gmra.mrb[30].mxu0 %vm798_vm3, %v11472_v61 }
  0xa3   : > { %8978 = vmatprep.mubr.msk.f32.mxu0 %vm798_vm3, %v1171_v63  ;;  %v1195_v63 = vrot.slane %v11390_v39, 1 }
  0xa5   : > { %v11561_v4 = vsel %vm1168_vm5, %v1194_v62, %v1195_v63  ;;  %v11572_v9 = vsel %vm1168_vm5, %v1195_v63, %v1197_v3  ;;  %v11595_v62 = vld [vmem:[#allocation2 + $0xd0] sm:$0x3] }
  0xa6   : > { %8979 = vmatmul.mubr.msk.f32.vlgmr.msra.gmra.mrb[0].mxu0 %vm798_vm3, %v1173_v5  ;;  %14484 = vst [vmem:[#allocation10_spill] sm:$0xff] %v11561_v4  ;;  %v1199_v5 = vrot.slane %v11392_v40, 1  ;;  %14485 = vst [vmem:[#allocation11_spill] sm:$0xff] %v11572_v9  ;;  %v1212_v3 = vrot.slane %v11595_v62, 1 }
  0xa7   : > { %9941 = vmatpush3.bf16.msra.mxu0 %v11350_v26  ;;  %8981 = vmatprep.mubr.msk.f32.mxu0 %vm798_vm3, %v11492_v7  ;;  %v11530_v26 = vsel %vm1168_vm5, %v1184_v17, %v1185_v18  ;;  %v11580_v17 = vld [vmem:[#allocation2 + $0xb8] sm:$0x3] }
  0xa8   : > { %9943 = vmatprep.subr.bf16.mxu0 %v9942_v11  ;;  %14480 = vst [vmem:[#allocation6_spill] sm:$0xff] %v11530_v26  ;;  %v11576_v12 = vsel %vm1168_vm5, %v1199_v5, %v1200_v6  ;;  %v1207_v25 = vrot.slane %v11580_v17, 1  ;;  %v11606_v5 = vsel %vm1168_vm5, %v1209_v31, %v1210_v58 }
  0xa9   : > { %14486 = vst [vmem:[#allocation12_spill] sm:$0xff] %v11576_v12  ;;  %14490 = vst [vmem:[#allocation16_spill] sm:$0xff] %v11606_v5 }
  0xaa   : > { %8982 = vmatmul.mubr.msk.f32.gmra.mrb[2].mxu0 %vm798_vm3, %v11509_v14  ;;  %v11602_v63 = vsel %vm1168_vm5, %v1205_v15, %v1207_v25  ;;  %v11617_v15 = vsel %vm1168_vm5, %v1210_v58, %v1212_v3  ;;  %v1217_v25 = vrot.slane %v11610_v13, 1 }
  0xab   : > { %8984 = vmatprep.mubr.msk.f32.mxu0 %vm798_vm3, %v11513_v16  ;;  %9945 = vmatpush3.bf16.msra.mxu0 %v9942_v11  ;;  %v1202_v11 = vrot.slane %v11565_v8, 1  ;;  %14489 = vst [vmem:[#allocation15_spill] sm:$0xff] %v11602_v63  ;;  %14491 = vst [vmem:[#allocation17_spill] sm:$0xff] %v11617_v15 }
  0xac   : > { %9947 = vmatprep.subr.bf16.mxu0 %v11519_v21 }
  0xad   : > { %v11587_v18 = vsel %vm1168_vm5, %v1200_v6, %v1202_v11  ;;  %v1214_v6 = vrot.slane %v11416_v46, 1  ;;  %v1215_v11 = vrot.slane %v11422_v47, 1 }
  0xae   : > { %8985 = vmatmul.mubr.msk.f32.gmra.mrb[4].mxu0 %vm798_vm3, %v11526_v24  ;;  %14487 = vst [vmem:[#allocation13_spill] sm:$0xff] %v11587_v18 }
  0xaf   : > { %8987 = vmatprep.mubr.msk.f32.mxu0 %vm798_vm3, %v11530_v26  ;;  %v11621_v31 = vsel %vm1168_vm5, %v1214_v6, %v1215_v11  ;;  %v11632_v58 = vsel %vm1168_vm5, %v1215_v11, %v1217_v25 }
  0xb0   : > { %14492 = vst [vmem:[#allocation18_spill] sm:$0xff] %v11621_v31  ;;  %14493 = vst [vmem:[#allocation19_spill] sm:$0xff] %v11632_v58 }
  0xb2   : > { %8988 = vmatmul.mubr.msk.f32.gmra.mrb[6].mxu0 %vm798_vm3, %v11542_v35  ;;  %v11700_v35 = vld [vmem:[#allocation2 + $0x178] sm:$0x3] }
  0xb3   : > { %8990 = vmatprep.mubr.msk.f32.mxu0 %vm798_vm3, %v11546_v59  ;;  %v11685_v59 = vld [vmem:[#allocation2 + $0x160] sm:$0x3] }
  0xb6   : > { %8991 = vmatmul.mubr.msk.f32.gmra.mrb[8].mxu0 %vm798_vm3, %v11557_v1  ;;  %v11670_v1 = vld [vmem:[#allocation2 + $0x148] sm:$0x3] }
  0xb7   : > { %8993 = vmatprep.mubr.msk.f32.mxu0 %vm798_vm3, %v11561_v4  ;;  %v11655_v4 = vld [vmem:[#allocation2 + $0x130] sm:$0x3] }
  0xba   : > { %8994 = vmatmul.mubr.msk.f32.gmra.mrb[10].mxu0 %vm798_vm3, %v11572_v9  ;;  %v11640_v9 = vld [vmem:[#allocation2 + $0x118] sm:$0x3] }
  0xbb   : > { %8996 = vmatprep.mubr.msk.f32.mxu0 %vm798_vm3, %v11576_v12  ;;  %v11625_v12 = vld [vmem:[#allocation2 + $0x100] sm:$0x3]  ;;  %v1227_v25 = vrot.slane %v11640_v9, 1 }
  0xbc   : > { %v1222_v3 = vrot.slane %v11625_v12, 1 }
  0xbe   : > { %8997 = vmatmul.mubr.msk.f32.gmra.mrb[12].mxu0 %vm798_vm3, %v11587_v18  ;;  %v1220_v18 = vrot.slane %v11430_v49, 1 }
  0xbf   : > { %8999 = vmatprep.mubr.msk.f32.mxu0 %vm798_vm3, %v11591_v30  ;;  %v1219_v30 = vrot.slane %v11424_v48, 1 }
  0xc0   : > { %v11647_v11 = vsel %vm1168_vm5, %v1220_v18, %v1222_v3  ;;  %v1232_v3 = vrot.slane %v11655_v4, 1 }
  0xc1   : > { %v11636_v6 = vsel %vm1168_vm5, %v1219_v30, %v1220_v18  ;;  %14495 = vst [vmem:[#allocation21_spill] sm:$0xff] %v11647_v11 }
  0xc2   : > { %9000 = vmatmul.mubr.msk.f32.gmra.mrb[14].mxu0 %vm798_vm3, %v11602_v63  ;;  %14494 = vst [vmem:[#allocation20_spill] sm:$0xff] %v11636_v6  ;;  %v1225_v63 = vrot.slane %v11438_v51, 1 }
  0xc3   : > { %9002 = vmatprep.mubr.msk.f32.mxu0 %vm798_vm3, %v11606_v5  ;;  %v1224_v5 = vrot.slane %v11432_v50, 1 }
  0xc4   : > { %v11662_v18 = vsel %vm1168_vm5, %v1225_v63, %v1227_v25  ;;  %v1237_v25 = vrot.slane %v11670_v1, 1 }
  0xc5   : > { %v11651_v30 = vsel %vm1168_vm5, %v1224_v5, %v1225_v63  ;;  %14497 = vst [vmem:[#allocation23_spill] sm:$0xff] %v11662_v18 }
  0xc6   : > { %9003 = vmatmul.mubr.msk.f32.gmra.mrb[16].mxu0 %vm798_vm3, %v11617_v15  ;;  %14496 = vst [vmem:[#allocation22_spill] sm:$0xff] %v11651_v30  ;;  %v1230_v15 = vrot.slane %v11446_v53, 1 }
  0xc7   : > { %9005 = vmatprep.mubr.msk.f32.mxu0 %vm798_vm3, %v11621_v31  ;;  %v1229_v31 = vrot.slane %v11440_v52, 1 }
  0xc8   : > { %v11677_v63 = vsel %vm1168_vm5, %v1230_v15, %v1232_v3  ;;  %v1242_v3 = vrot.slane %v11685_v59, 1 }
  0xc9   : > { %v11666_v5 = vsel %vm1168_vm5, %v1229_v31, %v1230_v15  ;;  %14499 = vst [vmem:[#allocation25_spill] sm:$0xff] %v11677_v63 }
  0xca   : > { %9006 = vmatmul.mubr.msk.f32.gmra.mrb[18].mxu0 %vm798_vm3, %v11632_v58  ;;  %14498 = vst [vmem:[#allocation24_spill] sm:$0xff] %v11666_v5  ;;  %v1235_v58 = vrot.slane %v11454_v55, 1 }
  0xcb   : > { %9008 = vmatprep.mubr.msk.f32.mxu0 %vm798_vm3, %v11636_v6  ;;  %v1234_v6 = vrot.slane %v11448_v54, 1 }
  0xcc   : > { %v11692_v15 = vsel %vm1168_vm5, %v1235_v58, %v1237_v25  ;;  %v1247_v25 = vrot.slane %v11700_v35, 1 }
  0xcd   : > { %v11681_v31 = vsel %vm1168_vm5, %v1234_v6, %v1235_v58  ;;  %14501 = vst [vmem:[#allocation27_spill] sm:$0xff] %v11692_v15 }
  0xce   : > { %9009 = vmatmul.mubr.msk.f32.gmra.mrb[20].mxu0 %vm798_vm3, %v11647_v11  ;;  %14500 = vst [vmem:[#allocation26_spill] sm:$0xff] %v11681_v31  ;;  %v1240_v11 = vrot.slane %v11462_v57, 1 }
  0xcf   : > { %9011 = vmatprep.mubr.msk.f32.mxu0 %vm798_vm3, %v11651_v30  ;;  %v1239_v30 = vrot.slane %v11456_v56, 1 }
  0xd0   : > { %v11707_v58 = vsel %vm1168_vm5, %v1240_v11, %v1242_v3 }
  0xd1   : > { %v11696_v6 = vsel %vm1168_vm5, %v1239_v30, %v1240_v11  ;;  %14503 = vst [vmem:[#allocation29_spill] sm:$0xff] %v11707_v58  ;;  %v7696_v11 = vld [vmem:[%s14261_s3 + $0x70] sm:$0xff] }
  0xd2   : > { %9012 = vmatmul.mubr.msk.f32.gmra.mrb[22].mxu0 %vm798_vm3, %v11662_v18  ;;  %14502 = vst [vmem:[#allocation28_spill] sm:$0xff] %v11696_v6  ;;  %v1245_v18 = vrot.slane %v11472_v61, 1 }
  0xd3   : > { %9014 = vmatprep.mubr.msk.f32.mxu0 %vm798_vm3, %v11666_v5  ;;  %v1244_v5 = vrot.slane %v11466_v60, 1 }
  0xd5   : > { %v11711_v30 = vsel %vm1168_vm5, %v1244_v5, %v1245_v18  ;;  %v7697_v5 = vld [vmem:[%s14261_s3 + $0x78] sm:$0xff] }
  0xd6   : > { %9015 = vmatmul.mubr.msk.f32.gmra.mrb[24].mxu0 %vm798_vm3, %v11677_v63  ;;  %14504 = vst [vmem:[#allocation30_spill] sm:$0xff] %v11711_v30  ;;  %v7730_v63 = vld [vmem:[%s14261_s3 + $0x80] sm:$0xff] }
  0xd7   : > { %9017 = vmatprep.mubr.msk.f32.mxu0 %vm798_vm3, %v11681_v31  ;;  %v11718_v31 = vsel %vm1168_vm5, %v1245_v18, %v1247_v25  ;;  %v1584_v18 = vrot.slane %v11478_v2, 2  ;;  %v1586_v25 = vrot.slane %v11340_v23, 2  ;;  %v1589_v2 = vrot.slane %v11496_v10, 2 }
  0xd8   : > { %14505 = vst [vmem:[#allocation31_spill] sm:$0xff] %v11718_v31  ;;  %v1594_v10 = vrot.slane %v11517_v19, 2  ;;  %v1599_v19 = vrot.slane %v11534_v33, 2 }
  0xda   : > { %9018 = vmatmul.mubr.msk.f32.gmra.mrb[26].mxu0 %vm798_vm3, %v11692_v15  ;;  %v1581_v15 = vrot.slane %v11332_v20, 2 }
  0xdb   : > { %9020 = vmatprep.mubr.msk.f32.mxu0 %vm798_vm3, %v11696_v6  ;;  %v1582_v6 = vrot.slane %v11338_v22, 2 }
  0xdd   : > { %v11734_v3 = vsel %vm1575_vm4, %v1581_v15, %v1582_v6 }
  0xde   : > { %9021 = vmatmul.mubr.msk.f32.gmra.mrb[28].mxu0 %vm798_vm3, %v11707_v58  ;;  %v9950_v58 = vpack.c.bf16 %v7697_v5, %v7696_v11  ;;  %v1591_v11 = vrot.slane %v11356_v28, 2  ;;  %v1592_v5 = vrot.slane %v11363_v29, 2 }
  0xdf   : > { %9023 = vmatprep.mubr.msk.f32.mxu0 %vm798_vm3, %v11711_v30  ;;  %v1587_v30 = vrot.slane %v11354_v27, 2 }
  0xe1   : > { %v11754_v15 = vsel %vm1575_vm4, %v1586_v25, %v1587_v30 }
  0xe2   : > { %9024 = vmatmul.mubr.msk.f32.gmra.mrb[30].mxu0 %vm798_vm3, %v11718_v31  ;;  %v7731_v31 = vld [vmem:[%s14261_s3 + $0x88] sm:$0xff] }
  0xe3   : > { %9034 = vmatprep.mubr.msk.f32.mxu0 %vm798_vm3, %v11381_v37  ;;  %v11750_v37 = vsel %vm1575_vm4, %v1582_v6, %v1584_v18  ;;  %v11758_v26 = vpack.c.bf16 %v7731_v31, %v7730_v63  ;;  %v1596_v6 = vrot.slane %v11367_v32, 2  ;;  %v1597_v63 = vrot.slane %v11375_v34, 2 }
  0xe4   : > { %v11779_v31 = vsel %vm1575_vm4, %v1592_v5, %v1594_v10  ;;  %v1602_v18 = vrot.slane %v11390_v39, 2 }
  0xe5   : > { %v11792_v25 = vsel %vm1575_vm4, %v1597_v63, %v1599_v19  ;;  %v1612_v19 = vrot.slane %v11406_v43, 2 }
  0xe6   : > { %9035 = vmatmul.mubr.msk.f32.vlgmr.msra.gmra.mrb[0].mxu0 %vm798_vm3, %v11384_v38  ;;  %v11765_v38 = vsel %vm1575_vm4, %v1587_v30, %v1589_v2  ;;  %v1601_v30 = vrot.slane %v11378_v36, 2  ;;  %v1604_v2 = vrot.slane %v11550_v0, 2 }
  0xe7   : > { %9949 = vmatpush3.bf16.msra.mxu0 %v11519_v21  ;;  %9037 = vmatprep.mubr.msk.f32.mxu0 %vm798_vm3, %v11734_v3  ;;  %v11769_v21 = vsel %vm1575_vm4, %v1591_v11, %v1592_v5  ;;  %v1606_v11 = vrot.slane %v11392_v40, 2  ;;  %v1607_v5 = vrot.slane %v11398_v41, 2 }
  0xe8   : > { %9951 = vmatprep.subr.bf16.mxu0 %v9950_v58  ;;  %v11796_v33 = vsel %vm1575_vm4, %v1601_v30, %v1602_v18  ;;  %v11805_v10 = vsel %vm1575_vm4, %v1602_v18, %v1604_v2  ;;  %v1614_v18 = vrot.slane %v11580_v17, 2  ;;  %v1616_v2 = vrot.slane %v11408_v44, 2 }
  0xe9   : > { %v11809_v0 = vsel %vm1575_vm4, %v1606_v11, %v1607_v5  ;;  %v1617_v11 = vrot.slane %v11414_v45, 2 }
  0xea   : > { %9038 = vmatmul.mubr.msk.f32.gmra.mrb[2].mxu0 %vm798_vm3, %v11750_v37  ;;  %14506 = vst [vmem:[#allocation32_spill] sm:$0xff] %v11809_v0 }
  0xeb   : > { %9040 = vmatprep.mubr.msk.f32.mxu0 %vm798_vm3, %v11754_v15  ;;  %9953 = vmatpush3.bf16.msra.mxu0 %v9950_v58  ;;  %v11783_v58 = vsel %vm1575_vm4, %v1596_v6, %v1597_v63  ;;  %v1609_v6 = vrot.slane %v11565_v8, 2  ;;  %v1611_v63 = vrot.slane %v11400_v42, 2  ;;  %v11835_v17 = vsel %vm1575_vm4, %v1616_v2, %v1617_v11 }
  0xec   : > { %9955 = vmatprep.subr.bf16.mxu0 %v11758_v26  ;;  %14508 = vst [vmem:[#allocation34_spill] sm:$0xff] %v11835_v17  ;;  %v1627_v2 = vrot.slane %v11430_v49, 2 }
  0xed   : > { %v11818_v30 = vsel %vm1575_vm4, %v1607_v5, %v1609_v6  ;;  %v11822_v8 = vsel %vm1575_vm4, %v1611_v63, %v1612_v19  ;;  %v1619_v5 = vrot.slane %v11595_v62, 2  ;;  %v1621_v6 = vrot.slane %v11416_v46, 2 }
  0xee   : > { %9041 = vmatmul.mubr.msk.f32.gmra.mrb[4].mxu0 %vm798_vm3, %v11765_v38  ;;  %14507 = vst [vmem:[#allocation33_spill] sm:$0xff] %v11822_v8  ;;  %v1622_v63 = vrot.slane %v11422_v47, 2 }
  0xef   : > { %9043 = vmatprep.mubr.msk.f32.mxu0 %vm798_vm3, %v11769_v21 }
  0xf0   : > { %v11848_v62 = vsel %vm1575_vm4, %v1621_v6, %v1622_v63  ;;  %v1632_v6 = vrot.slane %v11438_v51, 2 }
  0xf1   : > { %14509 = vst [vmem:[#allocation35_spill] sm:$0xff] %v11848_v62 }
  0xf2   : > { %9044 = vmatmul.mubr.msk.f32.gmra.mrb[6].mxu0 %vm798_vm3, %v11779_v31 }
  0xf3   : > { %9046 = vmatprep.mubr.msk.f32.mxu0 %vm798_vm3, %v11783_v58 }
  0xf6   : > { %9047 = vmatmul.mubr.msk.f32.gmra.mrb[8].mxu0 %vm798_vm3, %v11792_v25 }
  0xf7   : > { %9049 = vmatprep.mubr.msk.f32.mxu0 %vm798_vm3, %v11796_v33 }
  0xfa   : > { %9050 = vmatmul.mubr.msk.f32.gmra.mrb[10].mxu0 %vm798_vm3, %v11805_v10 }
  0xfb   : > { %9052 = vmatprep.mubr.msk.f32.mxu0 %vm798_vm3, %v11809_v0  ;;  %v11831_v0 = vsel %vm1575_vm4, %v1612_v19, %v1614_v18  ;;  %v1624_v19 = vrot.slane %v11610_v13, 2  ;;  %v1626_v18 = vrot.slane %v11424_v48, 2 }
  0xfd   : > { %v11861_v13 = vsel %vm1575_vm4, %v1626_v18, %v1627_v2  ;;  %v1637_v18 = vrot.slane %v11446_v53, 2 }
  0xfe   : > { %9053 = vmatmul.mubr.msk.f32.gmra.mrb[12].mxu0 %vm798_vm3, %v11818_v30  ;;  %14510 = vst [vmem:[#allocation36_spill] sm:$0xff] %v11861_v13 }
  0xff   : > { %9055 = vmatprep.mubr.msk.f32.mxu0 %vm798_vm3, %v11822_v8  ;;  %v11844_v8 = vsel %vm1575_vm4, %v1617_v11, %v1619_v5  ;;  %v1629_v11 = vrot.slane %v11625_v12, 2  ;;  %v1631_v5 = vrot.slane %v11432_v50, 2 }
 0x101   : > { %v11874_v12 = vsel %vm1575_vm4, %v1631_v5, %v1632_v6  ;;  %v1642_v5 = vrot.slane %v11454_v55, 2 }
 0x102   : > { %9056 = vmatmul.mubr.msk.f32.gmra.mrb[14].mxu0 %vm798_vm3, %v11831_v0  ;;  %14512 = vst [vmem:[#allocation38_spill] sm:$0xff] %v11874_v12 }
 0x103   : > { %9058 = vmatprep.mubr.msk.f32.mxu0 %vm798_vm3, %v11835_v17  ;;  %v11857_v17 = vsel %vm1575_vm4, %v1622_v63, %v1624_v19  ;;  %v1634_v63 = vrot.slane %v11640_v9, 2  ;;  %v1636_v19 = vrot.slane %v11440_v52, 2 }
 0x105   : > { %v11887_v9 = vsel %vm1575_vm4, %v1636_v19, %v1637_v18  ;;  %v1647_v19 = vrot.slane %v11462_v57, 2 }
 0x106   : > { %9059 = vmatmul.mubr.msk.f32.gmra.mrb[16].mxu0 %vm798_vm3, %v11844_v8  ;;  %14513 = vst [vmem:[#allocation39_spill] sm:$0xff] %v11887_v9 }
 0x107   : > { %9061 = vmatprep.mubr.msk.f32.mxu0 %vm798_vm3, %v11848_v62  ;;  %v11870_v62 = vsel %vm1575_vm4, %v1627_v2, %v1629_v11  ;;  %v1639_v2 = vrot.slane %v11655_v4, 2  ;;  %v1641_v11 = vrot.slane %v11448_v54, 2 }
 0x108   : > { %14511 = vst [vmem:[#allocation37_spill] sm:$0xff] %v11870_v62 }
 0x109   : > { %v11900_v4 = vsel %vm1575_vm4, %v1641_v11, %v1642_v5  ;;  %v1652_v11 = vrot.slane %v11472_v61, 2 }
 0x10a   : > { %9062 = vmatmul.mubr.msk.f32.gmra.mrb[18].mxu0 %vm798_vm3, %v11857_v17  ;;  %14515 = vst [vmem:[#allocation41_spill] sm:$0xff] %v11900_v4 }
 0x10b   : > { %9064 = vmatprep.mubr.msk.f32.mxu0 %vm798_vm3, %v11861_v13  ;;  %v11883_v13 = vsel %vm1575_vm4, %v1632_v6, %v1634_v63  ;;  %v1644_v6 = vrot.slane %v11670_v1, 2  ;;  %v1646_v63 = vrot.slane %v11456_v56, 2 }
 0x10d   : > { %v11913_v1 = vsel %vm1575_vm4, %v1646_v63, %v1647_v19  ;;  %v7732_v63 = vld [vmem:[%s14261_s3 + $0x90] sm:$0xff] }
 0x10e   : > { %9065 = vmatmul.mubr.msk.f32.gmra.mrb[20].mxu0 %vm798_vm3, %v11870_v62  ;;  %14516 = vst [vmem:[#allocation42_spill] sm:$0xff] %v11913_v1 }
 0x10f   : > { %9067 = vmatprep.mubr.msk.f32.mxu0 %vm798_vm3, %v11874_v12  ;;  %v11896_v12 = vsel %vm1575_vm4, %v1637_v18, %v1639_v2  ;;  %v1649_v18 = vrot.slane %v11685_v59, 2  ;;  %v1651_v2 = vrot.slane %v11466_v60, 2 }
 0x110   : > { %14514 = vst [vmem:[#allocation40_spill] sm:$0xff] %v11896_v12 }
 0x111   : > { %v11926_v59 = vsel %vm1575_vm4, %v1651_v2, %v1652_v11  ;;  %v7767_v2 = vld [vmem:[%s14261_s3 + $0xa8] sm:$0xff] }
 0x112   : > { %9068 = vmatmul.mubr.msk.f32.gmra.mrb[22].mxu0 %vm798_vm3, %v11883_v13 }
 0x113   : > { %9070 = vmatprep.mubr.msk.f32.mxu0 %vm798_vm3, %v11887_v9  ;;  %v11909_v9 = vsel %vm1575_vm4, %v1642_v5, %v1644_v6  ;;  %v1654_v5 = vrot.slane %v11700_v35, 2  ;;  %v7733_v35 = vld [vmem:[%s14261_s3 + $0x98] sm:$0xff] }
 0x115   : > { %v11933_v6 = vsel %vm1575_vm4, %v1652_v11, %v1654_v5  ;;  %v7769_v5 = vld [vmem:[%s14261_s3 + $0xb8] sm:$0xff] }
 0x116   : > { %9071 = vmatmul.mubr.msk.f32.gmra.mrb[24].mxu0 %vm798_vm3, %v11896_v12 }
 0x117   : > { %9073 = vmatprep.mubr.msk.f32.mxu0 %vm798_vm3, %v11900_v4  ;;  %v11922_v4 = vsel %vm1575_vm4, %v1647_v19, %v1649_v18  ;;  %v9958_v19 = vpack.c.bf16 %v7733_v35, %v7732_v63  ;;  %v7766_v18 = vld [vmem:[%s14261_s3 + $0xa0] sm:$0xff] }
 0x118   : > { %14517 = vst [vmem:[#allocation43_spill] sm:$0xff] %v11922_v4  ;;  %v9962_v11 = vpack.c.bf16 %v7767_v2, %v7766_v18  ;;  %v7802_v35 = vld [vmem:[%s14261_s3 + $0xc0] sm:$0xff]  ;;  %v14519_v2 = vld [vmem:[#allocation7_spill] sm:$0xff] }
 0x11a   : > { %9074 = vmatmul.mubr.msk.f32.gmra.mrb[26].mxu0 %vm798_vm3, %v11909_v9 }
 0x11b   : > { %9076 = vmatprep.mubr.msk.f32.mxu0 %vm798_vm3, %v11913_v1 }
 0x11e   : > { %9077 = vmatmul.mubr.msk.f32.gmra.mrb[28].mxu0 %vm798_vm3, %v11922_v4 }
 0x11f   : > { %9079 = vmatprep.mubr.msk.f32.mxu0 %vm798_vm3, %v11926_v59 }
 0x122   : > { %9080 = vmatmul.mubr.msk.f32.gmra.mrb[30].mxu0 %vm798_vm3, %v11933_v6 }
 0x123   : > { %9090 = vmatprep.mubr.msk.f32.mxu0 %vm798_vm3, %v11332_v20  ;;  %v12008_v20 = vld [vmem:[#allocation2 + $0x180] sm:$0xff] }
 0x126   : > { %9091 = vmatmul.mubr.msk.f32.vlgmr.msra.gmra.mrb[0].mxu0 %vm798_vm3, %v11338_v22  ;;  %v12014_v22 = vld [vmem:[#allocation2 + $0x188] sm:$0xff] }
 0x127   : > { %9957 = vmatpush3.bf16.msra.mxu0 %v11758_v26  ;;  %9093 = vmatprep.mubr.msk.f32.mxu0 %vm798_vm3, %v11340_v23  ;;  %v7768_v26 = vld [vmem:[%s14261_s3 + $0xb0] sm:$0xff] }
 0x128   : > { %9959 = vmatprep.subr.bf16.mxu0 %v9958_v19  ;;  %v9966_v63 = vpack.c.bf16 %v7769_v5, %v7768_v26  ;;  %v14520_v26 = vld [vmem:[#allocation8_spill] sm:$0xff]  ;;  %v14523_v5 = vld [vmem:[#allocation11_spill] sm:$0xff] }
 0x12a   : > { %9094 = vmatmul.mubr.msk.f32.gmra.mrb[2].mxu0 %vm798_vm3, %v11354_v27 }
 0x12b   : > { %9096 = vmatprep.mubr.msk.f32.mxu0 %vm798_vm3, %v11356_v28  ;;  %9961 = vmatpush3.bf16.msra.mxu0 %v9958_v19  ;;  %v7803_v19 = vld [vmem:[%s14261_s3 + $0xc8] sm:$0xff] }
 0x12c   : > { %9963 = vmatprep.subr.bf16.mxu0 %v9962_v11  ;;  %v9970_v18 = vpack.c.bf16 %v7803_v19, %v7802_v35  ;;  %v14524_v35 = vld [vmem:[#allocation12_spill] sm:$0xff]  ;;  %v14526_v19 = vld [vmem:[#allocation14_spill] sm:$0xff] }
 0x12e   : > { %9097 = vmatmul.mubr.msk.f32.gmra.mrb[4].mxu0 %vm798_vm3, %v11363_v29 }
 0x12f   : > { %9099 = vmatprep.mubr.msk.f32.mxu0 %vm798_vm3, %v11367_v32 }
 0x132   : > { %9100 = vmatmul.mubr.msk.f32.gmra.mrb[6].mxu0 %vm798_vm3, %v11375_v34 }
 0x133   : > { %9102 = vmatprep.mubr.msk.f32.mxu0 %vm798_vm3, %v11378_v36 }
 0x136   : > { %9103 = vmatmul.mubr.msk.f32.gmra.mrb[8].mxu0 %vm798_vm3, %v11390_v39 }
 0x137   : > { %9105 = vmatprep.mubr.msk.f32.mxu0 %vm798_vm3, %v11392_v40 }
 0x13a   : > { %9106 = vmatmul.mubr.msk.f32.gmra.mrb[10].mxu0 %vm798_vm3, %v11398_v41 }
 0x13b   : > { %9108 = vmatprep.mubr.msk.f32.mxu0 %vm798_vm3, %v11400_v42 }
 0x13e   : > { %9109 = vmatmul.mubr.msk.f32.gmra.mrb[12].mxu0 %vm798_vm3, %v11406_v43 }
 0x13f   : > { %9111 = vmatprep.mubr.msk.f32.mxu0 %vm798_vm3, %v11408_v44 }
 0x142   : > { %9112 = vmatmul.mubr.msk.f32.gmra.mrb[14].mxu0 %vm798_vm3, %v11414_v45 }
 0x143   : > { %9114 = vmatprep.mubr.msk.f32.mxu0 %vm798_vm3, %v11416_v46 }
 0x146   : > { %9115 = vmatmul.mubr.msk.f32.gmra.mrb[16].mxu0 %vm798_vm3, %v11422_v47 }
 0x147   : > { %9117 = vmatprep.mubr.msk.f32.mxu0 %vm798_vm3, %v11424_v48 }
 0x14a   : > { %9118 = vmatmul.mubr.msk.f32.gmra.mrb[18].mxu0 %vm798_vm3, %v11430_v49 }
 0x14b   : > { %9120 = vmatprep.mubr.msk.f32.mxu0 %vm798_vm3, %v11432_v50 }
 0x14e   : > { %9121 = vmatmul.mubr.msk.f32.gmra.mrb[20].mxu0 %vm798_vm3, %v11438_v51 }
 0x14f   : > { %9123 = vmatprep.mubr.msk.f32.mxu0 %vm798_vm3, %v11440_v52 }
 0x152   : > { %9124 = vmatmul.mubr.msk.f32.gmra.mrb[22].mxu0 %vm798_vm3, %v11446_v53 }
 0x153   : > { %9126 = vmatprep.mubr.msk.f32.mxu0 %vm798_vm3, %v11448_v54 }
 0x156   : > { %9127 = vmatmul.mubr.msk.f32.gmra.mrb[24].mxu0 %vm798_vm3, %v11454_v55 }
 0x157   : > { %9129 = vmatprep.mubr.msk.f32.mxu0 %vm798_vm3, %v11456_v56 }
 0x15a   : > { %9130 = vmatmul.mubr.msk.f32.gmra.mrb[26].mxu0 %vm798_vm3, %v11462_v57 }
 0x15b   : > { %9132 = vmatprep.mubr.msk.f32.mxu0 %vm798_vm3, %v11466_v60 }
 0x15e   : > { %9133 = vmatmul.mubr.msk.f32.gmra.mrb[28].mxu0 %vm798_vm3, %v11472_v61 }
 0x15f   : > { %9135 = vmatprep.mubr.msk.f32.mxu0 %vm798_vm3, %v12008_v20 }
 0x162   : > { %9136 = vmatmul.mubr.msk.f32.gmra.mrb[30].mxu0 %vm798_vm3, %v12014_v22 }
 0x163   : > { %9146 = vmatprep.mubr.msk.f32.mxu0 %vm798_vm3, %v11492_v7  ;;  %v14518_v7 = vld [vmem:[#allocation6_spill] sm:$0xff] }
 0x166   : > { %9147 = vmatmul.mubr.msk.f32.vlgmr.msra.gmra.mrb[0].mxu0 %vm798_vm3, %v11509_v14  ;;  %v14521_v14 = vld [vmem:[#allocation9_spill] sm:$0xff] }
 0x167   : > { %9965 = vmatpush3.bf16.msra.mxu0 %v9962_v11  ;;  %9149 = vmatprep.mubr.msk.f32.mxu0 %vm798_vm3, %v11513_v16  ;;  %v14522_v11 = vld [vmem:[#allocation10_spill] sm:$0xff] }
 0x168   : > { %9967 = vmatprep.subr.bf16.mxu0 %v9966_v63 }
 0x16a   : > { %9150 = vmatmul.mubr.msk.f32.gmra.mrb[2].mxu0 %vm798_vm3, %v11526_v24  ;;  %v14543_v24 = vld [vmem:[#allocation31_spill] sm:$0xff] }
 0x16b   : > { %9152 = vmatprep.mubr.msk.f32.mxu0 %vm798_vm3, %v14518_v7  ;;  %9969 = vmatpush3.bf16.msra.mxu0 %v9966_v63  ;;  %v14525_v63 = vld [vmem:[#allocation13_spill] sm:$0xff] }
 0x16c   : > { %9971 = vmatprep.subr.bf16.mxu0 %v9970_v18  ;;  %v14541_v7 = vld [vmem:[#allocation29_spill] sm:$0xff] }
 0x16e   : > { %9153 = vmatmul.mubr.msk.f32.gmra.mrb[4].mxu0 %vm798_vm3, %v14519_v2  ;;  %v14527_v2 = vld [vmem:[#allocation15_spill] sm:$0xff] }
 0x16f   : > { %9155 = vmatprep.mubr.msk.f32.mxu0 %vm798_vm3, %v14520_v26  ;;  %v14528_v26 = vld [vmem:[#allocation16_spill] sm:$0xff] }
 0x172   : > { %9156 = vmatmul.mubr.msk.f32.gmra.mrb[6].mxu0 %vm798_vm3, %v14521_v14  ;;  %v14529_v14 = vld [vmem:[#allocation17_spill] sm:$0xff] }
 0x173   : > { %9158 = vmatprep.mubr.msk.f32.mxu0 %vm798_vm3, %v14522_v11  ;;  %v14530_v11 = vld [vmem:[#allocation18_spill] sm:$0xff] }
 0x176   : > { %9159 = vmatmul.mubr.msk.f32.gmra.mrb[8].mxu0 %vm798_vm3, %v14523_v5  ;;  %v14531_v5 = vld [vmem:[#allocation19_spill] sm:$0xff] }
 0x177   : > { %9161 = vmatprep.mubr.msk.f32.mxu0 %vm798_vm3, %v14524_v35  ;;  %v14532_v35 = vld [vmem:[#allocation20_spill] sm:$0xff] }
 0x17a   : > { %9162 = vmatmul.mubr.msk.f32.gmra.mrb[10].mxu0 %vm798_vm3, %v14525_v63  ;;  %v14533_v63 = vld [vmem:[#allocation21_spill] sm:$0xff] }
 0x17b   : > { %9164 = vmatprep.mubr.msk.f32.mxu0 %vm798_vm3, %v14526_v19  ;;  %v14534_v19 = vld [vmem:[#allocation22_spill] sm:$0xff] }
 0x17e   : > { %9165 = vmatmul.mubr.msk.f32.gmra.mrb[12].mxu0 %vm798_vm3, %v14527_v2  ;;  %v14535_v2 = vld [vmem:[#allocation23_spill] sm:$0xff] }
 0x17f   : > { %9167 = vmatprep.mubr.msk.f32.mxu0 %vm798_vm3, %v14528_v26  ;;  %v14536_v26 = vld [vmem:[#allocation24_spill] sm:$0xff] }
 0x182   : > { %9168 = vmatmul.mubr.msk.f32.gmra.mrb[14].mxu0 %vm798_vm3, %v14529_v14  ;;  %v14537_v14 = vld [vmem:[#allocation25_spill] sm:$0xff] }
 0x183   : > { %9170 = vmatprep.mubr.msk.f32.mxu0 %vm798_vm3, %v14530_v11  ;;  %v14538_v11 = vld [vmem:[#allocation26_spill] sm:$0xff] }
 0x186   : > { %9171 = vmatmul.mubr.msk.f32.gmra.mrb[16].mxu0 %vm798_vm3, %v14531_v5  ;;  %v14539_v5 = vld [vmem:[#allocation27_spill] sm:$0xff] }
 0x187   : > { %9173 = vmatprep.mubr.msk.f32.mxu0 %vm798_vm3, %v14532_v35  ;;  %v14540_v35 = vld [vmem:[#allocation28_spill] sm:$0xff] }
 0x18a   : > { %9174 = vmatmul.mubr.msk.f32.gmra.mrb[18].mxu0 %vm798_vm3, %v14533_v63  ;;  %v2252_v63 = vrot.slane %v12014_v22, 1 }
 0x18b   : > { %9176 = vmatprep.mubr.msk.f32.mxu0 %vm798_vm3, %v14534_v19  ;;  %v2251_v19 = vrot.slane %v12008_v20, 1 }
 0x18e   : > { %9177 = vmatmul.mubr.msk.f32.gmra.mrb[20].mxu0 %vm798_vm3, %v14535_v2  ;;  %v758_v2 = vld [vmem:[#allocation2 + $0x190] sm:$0x3] }
 0x18f   : > { %9179 = vmatprep.mubr.msk.f32.mxu0 %vm798_vm3, %v14536_v26  ;;  %v14542_v26 = vld [vmem:[#allocation30_spill] sm:$0xff] }
 0x192   : > { %9180 = vmatmul.mubr.msk.f32.gmra.mrb[22].mxu0 %vm798_vm3, %v14537_v14  ;;  %v2254_v14 = vrot.slane %v758_v2, 1 }
 0x193   : > { %9182 = vmatprep.mubr.msk.f32.mxu0 %vm798_vm3, %v14538_v11  ;;  %v12091_v11 = vsel %vm1168_vm5, %v2251_v19, %v2252_v63 }
 0x196   : > { %9183 = vmatmul.mubr.msk.f32.gmra.mrb[24].mxu0 %vm798_vm3, %v14539_v5 }
 0x197   : > { %9185 = vmatprep.mubr.msk.f32.mxu0 %vm798_vm3, %v14540_v35  ;;  %v12098_v35 = vsel %vm1168_vm5, %v2252_v63, %v2254_v14  ;;  %v7838_v14 = vld [vmem:[%s14261_s3 + $0xe0] sm:$0xff]  ;;  %v7839_v63 = vld [vmem:[%s14261_s3 + $0xe8] sm:$0xff] }
 0x198   : > { %14544 = vst [vmem:[#allocation27_spill] sm:$0xff] %v12098_v35 }
 0x19a   : > { %9186 = vmatmul.mubr.msk.f32.gmra.mrb[26].mxu0 %vm798_vm3, %v14541_v7  ;;  %v7804_v7 = vld [vmem:[%s14261_s3 + $0xd0] sm:$0xff] }
 0x19b   : > { %9188 = vmatprep.mubr.msk.f32.mxu0 %vm798_vm3, %v14542_v26  ;;  %v7805_v26 = vld [vmem:[%s14261_s3 + $0xd8] sm:$0xff] }
 0x19c   : > { %v9974_v19 = vpack.c.bf16 %v7805_v26, %v7804_v7  ;;  %v14548_v7 = vld [vmem:[#allocation35_spill] sm:$0xff]  ;;  %v14549_v26 = vld [vmem:[#allocation36_spill] sm:$0xff] }
 0x19e   : > { %9189 = vmatmul.mubr.msk.f32.gmra.mrb[28].mxu0 %vm798_vm3, %v14543_v24 }
 0x19f   : > { %9191 = vmatprep.mubr.msk.f32.mxu0 %vm798_vm3, %v12091_v11 }
 0x1a2   : > { %9192 = vmatmul.mubr.msk.f32.gmra.mrb[30].mxu0 %vm798_vm3, %v12098_v35  ;;  %v9978_v35 = vpack.c.bf16 %v7839_v63, %v7838_v14  ;;  %v14551_v14 = vld [vmem:[#allocation39_spill] sm:$0xff]  ;;  %v14552_v63 = vld [vmem:[#allocation41_spill] sm:$0xff] }
 0x1a3   : > { %9202 = vmatprep.mubr.msk.f32.mxu0 %vm798_vm3, %v11734_v3  ;;  %v14545_v3 = vld [vmem:[#allocation32_spill] sm:$0xff] }
 0x1a6   : > { %9203 = vmatmul.mubr.msk.f32.vlgmr.msra.gmra.mrb[0].mxu0 %vm798_vm3, %v11750_v37  ;;  %v14546_v37 = vld [vmem:[#allocation33_spill] sm:$0xff] }
 0x1a7   : > { %9973 = vmatpush3.bf16.msra.mxu0 %v9970_v18  ;;  %9205 = vmatprep.mubr.msk.f32.mxu0 %vm798_vm3, %v11754_v15  ;;  %v14547_v18 = vld [vmem:[#allocation34_spill] sm:$0xff] }
 0x1a8   : > { %9975 = vmatprep.subr.bf16.mxu0 %v9974_v19 }
 0x1aa   : > { %9206 = vmatmul.mubr.msk.f32.gmra.mrb[2].mxu0 %vm798_vm3, %v11765_v38 }
 0x1ab   : > { %9208 = vmatprep.mubr.msk.f32.mxu0 %vm798_vm3, %v11769_v21  ;;  %9977 = vmatpush3.bf16.msra.mxu0 %v9974_v19  ;;  %v14550_v19 = vld [vmem:[#allocation38_spill] sm:$0xff] }
 0x1ac   : > { %9979 = vmatprep.subr.bf16.mxu0 %v9978_v35 }
 0x1ae   : > { %9209 = vmatmul.mubr.msk.f32.gmra.mrb[4].mxu0 %vm798_vm3, %v11779_v31 }
 0x1af   : > { %9211 = vmatprep.mubr.msk.f32.mxu0 %vm798_vm3, %v11783_v58 }
 0x1b2   : > { %9212 = vmatmul.mubr.msk.f32.gmra.mrb[6].mxu0 %vm798_vm3, %v11792_v25 }
 0x1b3   : > { %9214 = vmatprep.mubr.msk.f32.mxu0 %vm798_vm3, %v11796_v33 }
 0x1b6   : > { %9215 = vmatmul.mubr.msk.f32.gmra.mrb[8].mxu0 %vm798_vm3, %v11805_v10 }
 0x1b7   : > { %9217 = vmatprep.mubr.msk.f32.mxu0 %vm798_vm3, %v14545_v3 }
 0x1ba   : > { %9218 = vmatmul.mubr.msk.f32.gmra.mrb[10].mxu0 %vm798_vm3, %v11818_v30 }
 0x1bb   : > { %9220 = vmatprep.mubr.msk.f32.mxu0 %vm798_vm3, %v14546_v37 }
 0x1be   : > { %9221 = vmatmul.mubr.msk.f32.gmra.mrb[12].mxu0 %vm798_vm3, %v11831_v0 }
 0x1bf   : > { %9223 = vmatprep.mubr.msk.f32.mxu0 %vm798_vm3, %v14547_v18 }
 0x1c2   : > { %9224 = vmatmul.mubr.msk.f32.gmra.mrb[14].mxu0 %vm798_vm3, %v11844_v8 }
 0x1c3   : > { %9226 = vmatprep.mubr.msk.f32.mxu0 %vm798_vm3, %v14548_v7 }
 0x1c6   : > { %9227 = vmatmul.mubr.msk.f32.gmra.mrb[16].mxu0 %vm798_vm3, %v11857_v17 }
 0x1c7   : > { %9229 = vmatprep.mubr.msk.f32.mxu0 %vm798_vm3, %v14549_v26 }
 0x1ca   : > { %9230 = vmatmul.mubr.msk.f32.gmra.mrb[18].mxu0 %vm798_vm3, %v11870_v62  ;;  %v2523_v62 = vrot.slane %v12014_v22, 2 }
 0x1cb   : > { %9232 = vmatprep.mubr.msk.f32.mxu0 %vm798_vm3, %v14550_v19  ;;  %v2522_v19 = vrot.slane %v12008_v20, 2 }
 0x1ce   : > { %9233 = vmatmul.mubr.msk.f32.gmra.mrb[20].mxu0 %vm798_vm3, %v11883_v13 }
 0x1cf   : > { %9235 = vmatprep.mubr.msk.f32.mxu0 %vm798_vm3, %v14551_v14  ;;  %v12175_v14 = vsel %vm1575_vm4, %v2522_v19, %v2523_v62 }
 0x1d2   : > { %9236 = vmatmul.mubr.msk.f32.gmra.mrb[22].mxu0 %vm798_vm3, %v11896_v12  ;;  %v2525_v12 = vrot.slane %v758_v2, 2  ;;  %v7841_v2 = vld [vmem:[%s14261_s3 + $0xf8] sm:$0xff] }
 0x1d3   : > { %9238 = vmatprep.mubr.msk.f32.mxu0 %vm798_vm3, %v14552_v63 }
 0x1d6   : > { %9239 = vmatmul.mubr.msk.f32.gmra.mrb[24].mxu0 %vm798_vm3, %v11909_v9 }
 0x1d7   : > { %9241 = vmatprep.mubr.msk.f32.mxu0 %vm798_vm3, %v11913_v1  ;;  %v12182_v1 = vsel %vm1575_vm4, %v2523_v62, %v2525_v12  ;;  %v7874_v62 = vld [vmem:[%s14261_s3 + $0x100] sm:$0xff]  ;;  %v7875_v12 = vld [vmem:[%s14261_s3 + $0x108] sm:$0xff] }
 0x1d8   : > { %14553 = vst [vmem:[#allocation31_spill] sm:$0xff] %v12182_v1 }
 0x1da   : > { %9242 = vmatmul.mubr.msk.f32.gmra.mrb[26].mxu0 %vm798_vm3, %v11922_v4  ;;  %v7840_v4 = vld [vmem:[%s14261_s3 + $0xf0] sm:$0xff] }
 0x1db   : > { %9244 = vmatprep.mubr.msk.f32.mxu0 %vm798_vm3, %v11926_v59  ;;  %v9982_v19 = vpack.c.bf16 %v7841_v2, %v7840_v4  ;;  %v12346_v4 = vld [vmem:[#allocation4 + $0x68] sm:$0xff] }
 0x1dc   : > { %v14567_v2 = vld [vmem:[#allocation18_spill] sm:$0xff] }
 0x1de   : > { %9245 = vmatmul.mubr.msk.f32.gmra.mrb[28].mxu0 %vm798_vm3, %v11933_v6 }
 0x1df   : > { %9247 = vmatprep.mubr.msk.f32.mxu0 %vm798_vm3, %v12175_v14 }
 0x1e2   : > { %9248 = vmatmul.mubr.msk.f32.gmra.mrb[30].mxu0 %vm798_vm3, %v12182_v1  ;;  %v9986_v1 = vpack.c.bf16 %v7875_v12, %v7874_v62  ;;  %v14568_v62 = vld [vmem:[#allocation19_spill] sm:$0xff]  ;;  %v12370_v12 = vld [vmem:[#allocation4 + $0x88] sm:$0xff] }
 0x1e3   : > { %9258 = vmatprep.mubr.msk.f32.mxu0 %vm798_vm3, %v11340_v23  ;;  %v12256_v23 = vld [vmem:[#allocation2 + $0x198] sm:$0xff] }
 0x1e6   : > { %9259 = vmatmul.mubr.msk.f32.vlgmr.msra.gmra.mrb[0].mxu0 %vm798_vm3, %v11354_v27  ;;  %v12262_v27 = vld [vmem:[#allocation2 + $0x1a0] sm:$0xff] }
 0x1e7   : > { %9981 = vmatpush3.bf16.msra.mxu0 %v9978_v35  ;;  %9261 = vmatprep.mubr.msk.f32.mxu0 %vm798_vm3, %v11356_v28  ;;  %v7876_v28 = vld [vmem:[%s14261_s3 + $0x110] sm:$0xff]  ;;  %v12358_v35 = vld [vmem:[#allocation4 + $0x78] sm:$0xff] }
 0x1e8   : > { %9983 = vmatprep.subr.bf16.mxu0 %v9982_v19 }
 0x1ea   : > { %9262 = vmatmul.mubr.msk.f32.gmra.mrb[2].mxu0 %vm798_vm3, %v11363_v29  ;;  %v7877_v29 = vld [vmem:[%s14261_s3 + $0x118] sm:$0xff] }
 0x1eb   : > { %9264 = vmatprep.mubr.msk.f32.mxu0 %vm798_vm3, %v11367_v32  ;;  %9985 = vmatpush3.bf16.msra.mxu0 %v9982_v19  ;;  %v12272_v32 = vld [vmem:[#allocation4] sm:$0xff] }
 0x1ec   : > { %9987 = vmatprep.subr.bf16.mxu0 %v9986_v1  ;;  %6850 = vrot.lane.b32.xlu0 %v12272_v32, %s10934_s26  ;;  %v12366_v19 = vld [vmem:[#allocation4 + $0x80] sm:$0xff] }
 0x1ee   : > { %9265 = vmatmul.mubr.msk.f32.gmra.mrb[4].mxu0 %vm798_vm3, %v11375_v34  ;;  %v12274_v34 = vld [vmem:[#allocation4 + $0x10] sm:$0xff] }
 0x1ef   : > { %9267 = vmatprep.mubr.msk.f32.mxu0 %vm798_vm3, %v11378_v36  ;;  %v9990_v36 = vpack.c.bf16 %v7877_v29, %v7876_v28  ;;  %6854 = vrot.lane.b32.xlu1 %v12274_v34, %s10934_s26  ;;  %v14569_v28 = vld [vmem:[#allocation20_spill] sm:$0xff]  ;;  %v12378_v29 = vld [vmem:[#allocation4 + $0x90] sm:$0xff] }
 0x1f2   : > { %9268 = vmatmul.mubr.msk.f32.gmra.mrb[6].mxu0 %vm798_vm3, %v11390_v39  ;;  %v12282_v39 = vld [vmem:[#allocation4 + $0x8] sm:$0xff] }
 0x1f3   : > { %9270 = vmatprep.mubr.msk.f32.mxu0 %vm798_vm3, %v11392_v40  ;;  %v14554_v40 = vld [vmem:[#allocation5_spill] sm:$0xff]  ;;  %6852 = vrot.lane.b32.xlu0 %v12282_v39, %s10934_s26 }
 0x1f6   : > { %9271 = vmatmul.mubr.msk.f32.gmra.mrb[8].mxu0 %vm798_vm3, %v11398_v41  ;;  %v12286_v41 = vld [vmem:[#allocation4 + $0x18] sm:$0xff] }
 0x1f7   : > { %9273 = vmatprep.mubr.msk.f32.mxu0 %vm798_vm3, %v11400_v42  ;;  %v14555_v42 = vld [vmem:[#allocation6_spill] sm:$0xff]  ;;  %6856 = vrot.lane.b32.xlu1 %v12286_v41, %s10934_s26 }
 0x1fa   : > { %9274 = vmatmul.mubr.msk.f32.gmra.mrb[10].mxu0 %vm798_vm3, %v11406_v43  ;;  %v12294_v43 = vld [vmem:[#allocation4 + $0x20] sm:$0xff] }
 0x1fb   : > { %9276 = vmatprep.mubr.msk.f32.mxu0 %vm798_vm3, %v11408_v44  ;;  %v14556_v44 = vld [vmem:[#allocation7_spill] sm:$0xff]  ;;  %6858 = vrot.lane.b32.xlu0 %v12294_v43, %s10934_s26 }
 0x1fe   : > { %9277 = vmatmul.mubr.msk.f32.gmra.mrb[12].mxu0 %vm798_vm3, %v11414_v45  ;;  %v12298_v45 = vld [vmem:[#allocation4 + $0x28] sm:$0xff] }
 0x1ff   : > { %9279 = vmatprep.mubr.msk.f32.mxu0 %vm798_vm3, %v11416_v46  ;;  %v14557_v46 = vld [vmem:[#allocation8_spill] sm:$0xff]  ;;  %6860 = vrot.lane.b32.xlu1 %v12298_v45, %s10934_s26 }
 0x202   : > { %9280 = vmatmul.mubr.msk.f32.gmra.mrb[14].mxu0 %vm798_vm3, %v11422_v47  ;;  %v12306_v47 = vld [vmem:[#allocation4 + $0x30] sm:$0xff] }
 0x203   : > { %9282 = vmatprep.mubr.msk.f32.mxu0 %vm798_vm3, %v11424_v48  ;;  %v14558_v48 = vld [vmem:[#allocation9_spill] sm:$0xff]  ;;  %6862 = vrot.lane.b32.xlu0 %v12306_v47, %s10934_s26 }
 0x206   : > { %9283 = vmatmul.mubr.msk.f32.gmra.mrb[16].mxu0 %vm798_vm3, %v11430_v49  ;;  %v12310_v49 = vld [vmem:[#allocation4 + $0x38] sm:$0xff] }
 0x207   : > { %9285 = vmatprep.mubr.msk.f32.mxu0 %vm798_vm3, %v11432_v50  ;;  %v14559_v50 = vld [vmem:[#allocation10_spill] sm:$0xff]  ;;  %6864 = vrot.lane.b32.xlu1 %v12310_v49, %s10934_s26 }
 0x20a   : > { %9286 = vmatmul.mubr.msk.f32.gmra.mrb[18].mxu0 %vm798_vm3, %v11438_v51  ;;  %v12318_v51 = vld [vmem:[#allocation4 + $0x40] sm:$0xff] }
 0x20b   : > { %9288 = vmatprep.mubr.msk.f32.mxu0 %vm798_vm3, %v11440_v52  ;;  %v14560_v52 = vld [vmem:[#allocation11_spill] sm:$0xff]  ;;  %6866 = vrot.lane.b32.xlu0 %v12318_v51, %s10934_s26 }
 0x20e   : > { %9289 = vmatmul.mubr.msk.f32.gmra.mrb[20].mxu0 %vm798_vm3, %v11446_v53  ;;  %v12322_v53 = vld [vmem:[#allocation4 + $0x48] sm:$0xff] }
 0x20f   : > { %9291 = vmatprep.mubr.msk.f32.mxu0 %vm798_vm3, %v11448_v54  ;;  %v14561_v54 = vld [vmem:[#allocation12_spill] sm:$0xff]  ;;  %6868 = vrot.lane.b32.xlu1 %v12322_v53, %s10934_s26 }
 0x212   : > { %9292 = vmatmul.mubr.msk.f32.gmra.mrb[22].mxu0 %vm798_vm3, %v11454_v55  ;;  %v12330_v55 = vld [vmem:[#allocation4 + $0x50] sm:$0xff] }
 0x213   : > { %9294 = vmatprep.mubr.msk.f32.mxu0 %vm798_vm3, %v11456_v56  ;;  %v14562_v56 = vld [vmem:[#allocation13_spill] sm:$0xff]  ;;  %6870 = vrot.lane.b32.xlu0 %v12330_v55, %s10934_s26 }
 0x216   : > { %9295 = vmatmul.mubr.msk.f32.gmra.mrb[24].mxu0 %vm798_vm3, %v11462_v57  ;;  %v12334_v57 = vld [vmem:[#allocation4 + $0x58] sm:$0xff] }
 0x217   : > { %9297 = vmatprep.mubr.msk.f32.mxu0 %vm798_vm3, %v11466_v60  ;;  %v14563_v60 = vld [vmem:[#allocation14_spill] sm:$0xff]  ;;  %6872 = vrot.lane.b32.xlu1 %v12334_v57, %s10934_s26 }
 0x21a   : > { %9298 = vmatmul.mubr.msk.f32.gmra.mrb[26].mxu0 %vm798_vm3, %v11472_v61  ;;  %v12342_v61 = vld [vmem:[#allocation4 + $0x60] sm:$0xff] }
 0x21b   : > { %9300 = vmatprep.mubr.msk.f32.mxu0 %vm798_vm3, %v12008_v20  ;;  %6874 = vrot.lane.b32.xlu0 %v12342_v61, %s10934_s26  ;;  %v12354_v20 = vld [vmem:[#allocation4 + $0x70] sm:$0xff] }
 0x21c   : > { %6876 = vrot.lane.b32.xlu1 %v12346_v4, %s10934_s26 }
 0x21e   : > { %9301 = vmatmul.mubr.msk.f32.gmra.mrb[28].mxu0 %vm798_vm3, %v12014_v22  ;;  %v14566_v22 = vld [vmem:[#allocation17_spill] sm:$0xff] }
 0x21f   : > { %9303 = vmatprep.mubr.msk.f32.mxu0 %vm798_vm3, %v12256_v23  ;;  %6878 = vrot.lane.b32.xlu0 %v12354_v20, %s10934_s26 }
 0x220   : > { %6880 = vrot.lane.b32.xlu1 %v12358_v35, %s10934_s26 }
 0x222   : > { %9304 = vmatmul.mubr.msk.f32.gmra.mrb[30].mxu0 %vm798_vm3, %v12262_v27 }
 0x223   : > { %9314 = vmatprep.mubr.msk.f32.mxu0 %vm798_vm3, %v11513_v16  ;;  %v14564_v16 = vld [vmem:[#allocation15_spill] sm:$0xff]  ;;  %6882 = vrot.lane.b32.xlu0 %v12366_v19, %s10934_s26 }
 0x224   : > { %6884 = vrot.lane.b32.xlu1 %v12370_v12, %s10934_s26 }
 0x226   : > { %9315 = vmatmul.mubr.msk.f32.vlgmr.msra.gmra.mrb[0].mxu0 %vm798_vm3, %v14554_v40  ;;  %v12382_v40 = vld [vmem:[#allocation4 + $0x98] sm:$0xff] }
 0x227   : > { %9989 = vmatpush3.bf16.msra.mxu0 %v9986_v1  ;;  %9317 = vmatprep.mubr.msk.f32.mxu0 %vm798_vm3, %v14555_v42  ;;  %v14565_v1 = vld [vmem:[#allocation16_spill] sm:$0xff]  ;;  %v14571_v42 = vld [vmem:[#allocation22_spill] sm:$0xff] }
 0x228   : > { %9991 = vmatprep.subr.bf16.mxu0 %v9990_v36  ;;  %6886 = vrot.lane.b32.xlu0 %v12378_v29, %s10934_s26 }
 0x229   : > { %6888 = vrot.lane.b32.xlu1 %v12382_v40, %s10934_s26 }
 0x22a   : > { %9318 = vmatmul.mubr.msk.f32.gmra.mrb[2].mxu0 %vm798_vm3, %v14556_v44  ;;  %v12390_v44 = vld [vmem:[#allocation4 + $0xa0] sm:$0xff] }
 0x22b   : > { %9320 = vmatprep.mubr.msk.f32.mxu0 %vm798_vm3, %v14557_v46  ;;  %9993 = vmatpush3.bf16.msra.mxu0 %v9990_v36  ;;  %v14570_v36 = vld [vmem:[#allocation21_spill] sm:$0xff]  ;;  %v14572_v46 = vld [vmem:[#allocation23_spill] sm:$0xff] }
 0x22c   : > { %6890 = vrot.lane.b32.xlu0 %v12390_v44, %s10934_s26 }
 0x22e   : > { %9321 = vmatmul.mubr.msk.f32.gmra.mrb[4].mxu0 %vm798_vm3, %v14558_v48  ;;  %v12394_v48 = vld [vmem:[#allocation4 + $0xa8] sm:$0xff] }
 0x22f   : > { %9323 = vmatprep.mubr.msk.f32.mxu0 %vm798_vm3, %v14559_v50  ;;  %v14573_v50 = vld [vmem:[#allocation24_spill] sm:$0xff]  ;;  %6892 = vrot.lane.b32.xlu1 %v12394_v48, %s10934_s26 }
 0x232   : > { %9324 = vmatmul.mubr.msk.f32.gmra.mrb[6].mxu0 %vm798_vm3, %v14560_v52  ;;  %v12402_v52 = vld [vmem:[#allocation4 + $0xb0] sm:$0xff] }
 0x233   : > { %9326 = vmatprep.mubr.msk.f32.mxu0 %vm798_vm3, %v14561_v54  ;;  %v14574_v54 = vld [vmem:[#allocation25_spill] sm:$0xff]  ;;  %6894 = vrot.lane.b32.xlu0 %v12402_v52, %s10934_s26 }
 0x236   : > { %9327 = vmatmul.mubr.msk.f32.gmra.mrb[8].mxu0 %vm798_vm3, %v14562_v56  ;;  %v12406_v56 = vld [vmem:[#allocation4 + $0xb8] sm:$0xff] }
 0x237   : > { %9329 = vmatprep.mubr.msk.f32.mxu0 %vm798_vm3, %v14563_v60  ;;  %v14575_v60 = vld [vmem:[#allocation26_spill] sm:$0xff]  ;;  %6896 = vrot.lane.b32.xlu1 %v12406_v56, %s10934_s26 }
 0x23a   : > { %9330 = vmatmul.mubr.msk.f32.gmra.mrb[10].mxu0 %vm798_vm3, %v14564_v16  ;;  %v12414_v16 = vld [vmem:[#allocation4 + $0xc0] sm:$0xff] }
 0x23b   : > { %9332 = vmatprep.mubr.msk.f32.mxu0 %vm798_vm3, %v14565_v1  ;;  %v12418_v1 = vld [vmem:[#allocation4 + $0xc8] sm:$0xff]  ;;  %6898 = vrot.lane.b32.xlu0 %v12414_v16, %s10934_s26 }
 0x23c   : > { %6900 = vrot.lane.b32.xlu1 %v12418_v1, %s10934_s26 }
 0x23e   : > { %9333 = vmatmul.mubr.msk.f32.gmra.mrb[12].mxu0 %vm798_vm3, %v14566_v22  ;;  %v14576_v22 = vld [vmem:[#allocation28_spill] sm:$0xff] }
 0x23f   : > { %9335 = vmatprep.mubr.msk.f32.mxu0 %vm798_vm3, %v14567_v2  ;;  %v12426_v2 = vld [vmem:[#allocation4 + $0xd0] sm:$0xff] }
 0x240   : > { %6902 = vrot.lane.b32.xlu0 %v12426_v2, %s10934_s26 }
 0x242   : > { %9336 = vmatmul.mubr.msk.f32.gmra.mrb[14].mxu0 %vm798_vm3, %v14568_v62  ;;  %v14577_v62 = vld [vmem:[#allocation29_spill] sm:$0xff] }
 0x243   : > { %9338 = vmatprep.mubr.msk.f32.mxu0 %vm798_vm3, %v14569_v28  ;;  %v12430_v28 = vld [vmem:[#allocation4 + $0xd8] sm:$0xff] }
 0x244   : > { %6904 = vrot.lane.b32.xlu1 %v12430_v28, %s10934_s26 }
 0x246   : > { %9339 = vmatmul.mubr.msk.f32.gmra.mrb[16].mxu0 %vm798_vm3, %v14570_v36  ;;  %v14578_v36 = vld [vmem:[#allocation30_spill] sm:$0xff] }
 0x247   : > { %9341 = vmatprep.mubr.msk.f32.mxu0 %vm798_vm3, %v14571_v42  ;;  %v3063_v42 = vrot.slane %v12262_v27, 1 }
 0x24a   : > { %9342 = vmatmul.mubr.msk.f32.gmra.mrb[18].mxu0 %vm798_vm3, %v14572_v46  ;;  %v761_v46 = vld [vmem:[#allocation2 + $0x1a8] sm:$0x3] }
 0x24b   : > { %9344 = vmatprep.mubr.msk.f32.mxu0 %vm798_vm3, %v14573_v50  ;;  %v12440_v50 = vld [vmem:[#allocation4 + $0xe0] sm:$0xff] }
 0x24c   : > { %6906 = vrot.lane.b32.xlu0 %v12440_v50, %s10934_s26 }
 0x24e   : > { %9345 = vmatmul.mubr.msk.f32.gmra.mrb[20].mxu0 %vm798_vm3, %v14574_v54  ;;  %v12444_v54 = vld [vmem:[#allocation4 + $0xe8] sm:$0xff] }
 0x24f   : > { %9347 = vmatprep.mubr.msk.f32.mxu0 %vm798_vm3, %v14575_v60  ;;  %v3065_v60 = vrot.slane %v761_v46, 1  ;;  %6908 = vrot.lane.b32.xlu1 %v12444_v54, %s10934_s26 }
 0x252   : > { %9348 = vmatmul.mubr.msk.f32.gmra.mrb[22].mxu0 %vm798_vm3, %v14539_v5  ;;  %v3062_v5 = vrot.slane %v12256_v23, 1 }
 0x253   : > { %9350 = vmatprep.mubr.msk.f32.mxu0 %vm798_vm3, %v14576_v22 }
 0x254   : > { %v3064_v22 = vsel %vm1168_vm5, %v3062_v5, %v3063_v42 }
 0x256   : > { %9351 = vmatmul.mubr.msk.f32.gmra.mrb[24].mxu0 %vm798_vm3, %v14577_v62  ;;  %v12453_v62 = vld [vmem:[#allocation4 + $0xf0] sm:$0xff] }
 0x257   : > { %9353 = vmatprep.mubr.msk.f32.mxu0 %vm798_vm3, %v14578_v36  ;;  %v14579_v36 = vld [vmem:[#allocation27_spill] sm:$0xff]  ;;  %6910 = vrot.lane.b32.xlu0 %v12453_v62, %s10934_s26 }
 0x25a   : > { %9354 = vmatmul.mubr.msk.f32.gmra.mrb[26].mxu0 %vm798_vm3, %v14543_v24  ;;  %v12457_v24 = vld [vmem:[#allocation4 + $0xf8] sm:$0xff] }
 0x25b   : > { %9356 = vmatprep.mubr.msk.f32.mxu0 %vm798_vm3, %v12091_v11  ;;  %v3066_v11 = vsel %vm1168_vm5, %v3063_v42, %v3065_v60  ;;  %6912 = vrot.lane.b32.xlu1 %v12457_v24, %s10934_s26 }
 0x25e   : > { %9357 = vmatmul.mubr.msk.f32.gmra.mrb[28].mxu0 %vm798_vm3, %v14579_v36  ;;  %v8011_v36 = vld [vmem:[%s14262_s4 + $0x48] sm:$0xff] }
 0x25f   : > { %9359 = vmatprep.mubr.msk.f32.mxu0 %vm798_vm3, %v3064_v22  ;;  %v8010_v22 = vld [vmem:[%s14262_s4 + $0x40] sm:$0xff] }
 0x262   : > { %9360 = vmatmul.mubr.msk.f32.gmra.mrb[30].mxu0 %vm798_vm3, %v3066_v11  ;;  %v12577_v11 = vpack.c.bf16 %v8011_v36, %v8010_v22 }
 0x263   : > { %9370 = vmatprep.mubr.msk.f32.mxu0 %vm798_vm3, %v11754_v15  ;;  %v14580_v15 = vld [vmem:[#allocation37_spill] sm:$0xff] }
 0x266   : > { %9371 = vmatmul.mubr.msk.f32.vlgmr.msra.gmra.mrb[0].mxu0 %vm798_vm3, %v11765_v38  ;;  %v14581_v38 = vld [vmem:[#allocation38_spill] sm:$0xff] }
 0x267   : > { %9373 = vmatprep.mubr.msk.f32.mxu0 %vm798_vm3, %v11769_v21  ;;  %v14582_v21 = vld [vmem:[#allocation39_spill] sm:$0xff] }
 0x26a   : > { %9374 = vmatmul.mubr.msk.f32.gmra.mrb[2].mxu0 %vm798_vm3, %v11779_v31  ;;  %v14583_v31 = vld [vmem:[#allocation40_spill] sm:$0xff] }
 0x26b   : > { %9376 = vmatprep.mubr.msk.f32.mxu0 %vm798_vm3, %v11783_v58  ;;  %v14584_v58 = vld [vmem:[#allocation42_spill] sm:$0xff] }
 0x26e   : > { %9377 = vmatmul.mubr.msk.f32.gmra.mrb[4].mxu0 %vm798_vm3, %v11792_v25  ;;  %v14585_v25 = vld [vmem:[#allocation43_spill] sm:$0xff] }
 0x26f   : > { %9379 = vmatprep.mubr.msk.f32.mxu0 %vm798_vm3, %v11796_v33  ;;  %v3333_v33 = vrot.slane %v12256_v23, 2  ;;  %v7976_v23 = vld [vmem:[%s14262_s4 + $0x30] sm:$0xff] }
 0x272   : > { %9380 = vmatmul.mubr.msk.f32.gmra.mrb[6].mxu0 %vm798_vm3, %v11805_v10  ;;  %v3334_v10 = vrot.slane %v12262_v27, 2  ;;  %v7977_v27 = vld [vmem:[%s14262_s4 + $0x38] sm:$0xff] }
 0x273   : > { %9382 = vmatprep.mubr.msk.f32.mxu0 %vm798_vm3, %v14545_v3  ;;  %v3950_v3 = vld [vmem:[%s14262_s4 + $0x18] sm:$0xff] }
 0x276   : > { %9383 = vmatmul.mubr.msk.f32.gmra.mrb[8].mxu0 %vm798_vm3, %v11818_v30  ;;  %v3335_v30 = vsel %vm1575_vm4, %v3333_v33, %v3334_v10  ;;  %v765_v33 = vld [vmem:[%s11002_s7 + $0x18] sm:$0xff] }
 0x277   : > { %9385 = vmatprep.mubr.msk.f32.mxu0 %vm798_vm3, %v14546_v37 }
 0x27a   : > { %9386 = vmatmul.mubr.msk.f32.gmra.mrb[10].mxu0 %vm798_vm3, %v11831_v0  ;;  %v3336_v0 = vrot.slane %v761_v46, 2  ;;  %v10006_v46 = vpack.c.bf16 %v7977_v27, %v7976_v23  ;;  %v769_v27 = vld [vmem:[%s11002_s7 + $0x38] sm:$0xff] }
 0x27b   : > { %9388 = vmatprep.mubr.msk.f32.mxu0 %vm798_vm3, %v14547_v18  ;;  %v12544_v18 = vld [vmem:[#allocation3] sm:$0xff] }
 0x27c   : > { %9426 = vmatprep.mubr.msk.f32.mxu1 %vm798_vm3, %v12544_v18  ;;  %v4320_v5 = vrot.slane %v12544_v18, 1 }
 0x27e   : > { %9389 = vmatmul.mubr.msk.f32.gmra.mrb[12].mxu0 %vm798_vm3, %v11844_v8  ;;  %v14586_v8 = vld [vmem:[#allocation31_spill] sm:$0xff] }
 0x27f   : > { %9391 = vmatprep.mubr.msk.f32.mxu0 %vm798_vm3, %v14548_v7  ;;  %v12548_v7 = vld [vmem:[#allocation3 + $0x8] sm:$0xff] }
 0x280   : > { %v14339_v42 = vrot.slane %v12548_v7, 1 }
 0x282   : > { %9392 = vmatmul.mubr.msk.f32.gmra.mrb[14].mxu0 %vm798_vm3, %v11857_v17  ;;  %v3337_v17 = vsel %vm1575_vm4, %v3334_v10, %v3336_v0  ;;  %v12569_v60 = vsel %vm1168_vm5, %v4320_v5, %v14339_v42  ;;  %v764_v0 = vld [vmem:[%s11002_s7 + $0x10] sm:$0xff] }
 0x283   : > { %9394 = vmatprep.mubr.msk.f32.mxu0 %vm798_vm3, %v14549_v26  ;;  %v7974_v26 = vld [vmem:[%s14262_s4 + $0x20] sm:$0xff] }
 0x286   : > { %9395 = vmatmul.mubr.msk.f32.gmra.mrb[16].mxu0 %vm798_vm3, %v14580_v15  ;;  %v763_v15 = vld [vmem:[%s11002_s7 + $0x8] sm:$0xff] }
 0x287   : > { %9397 = vmatprep.mubr.msk.f32.mxu0 %vm798_vm3, %v14581_v38  ;;  %v762_v38 = vld [vmem:[%s11002_s7] sm:$0xff] }
 0x28a   : > { %9398 = vmatmul.mubr.msk.f32.gmra.mrb[18].mxu0 %vm798_vm3, %v11883_v13  ;;  %v3947_v13 = vld [vmem:[%s14262_s4] sm:$0xff] }
 0x28b   : > { %9400 = vmatprep.mubr.msk.f32.mxu0 %vm798_vm3, %v14582_v21 }
 0x28e   : > { %9401 = vmatmul.mubr.msk.f32.gmra.mrb[20].mxu0 %vm798_vm3, %v14583_v31 }
 0x28f   : > { %9403 = vmatprep.mubr.msk.f32.mxu0 %vm798_vm3, %v14552_v63 }
 0x292   : > { %9404 = vmatmul.mubr.msk.f32.gmra.mrb[22].mxu0 %vm798_vm3, %v11909_v9  ;;  %v3948_v9 = vld [vmem:[%s14262_s4 + $0x8] sm:$0xff] }
 0x293   : > { %9406 = vmatprep.mubr.msk.f32.mxu0 %vm798_vm3, %v14584_v58 }
 0x296   : > { %9407 = vmatmul.mubr.msk.f32.gmra.mrb[24].mxu0 %vm798_vm3, %v14585_v25 }
 0x297   : > { %9409 = vmatprep.mubr.msk.f32.mxu0 %vm798_vm3, %v11926_v59  ;;  %v9994_v59 = vpack.c.bf16 %v3948_v9, %v3947_v13 }
 0x299   : > { %9995 = vmatprep.subr.bf16.mxu1 %v9994_v59 }
 0x29a   : > { %9410 = vmatmul.mubr.msk.f32.gmra.mrb[26].mxu0 %vm798_vm3, %v11933_v6  ;;  %9997 = vmatpush3.bf16.msra.mxu1 %v9994_v59  ;;  %v3949_v6 = vld [vmem:[%s14262_s4 + $0x10] sm:$0xff]  ;;  %v767_v59 = vld [vmem:[%s11002_s7 + $0x28] sm:$0xff] }
 0x29b   : > { %9412 = vmatprep.mubr.msk.f32.mxu0 %vm798_vm3, %v12175_v14  ;;  %v9998_v37 = vpack.c.bf16 %v3950_v3, %v3949_v6  ;;  %v7975_v14 = vld [vmem:[%s14262_s4 + $0x28] sm:$0xff]  ;;  %v766_v3 = vld [vmem:[%s11002_s7 + $0x20] sm:$0xff] }
 0x29c   : > { %v10002_v63 = vpack.c.bf16 %v7975_v14, %v7974_v26 }
 0x29d   : > { %9999 = vmatprep.subr.bf16.mxu1 %v9998_v37 }
 0x29e   : > { %9413 = vmatmul.mubr.msk.f32.gmra.mrb[28].mxu0 %vm798_vm3, %v14586_v8  ;;  %10001 = vmatpush3.bf16.msra.mxu1 %v9998_v37 }
 0x29f   : > { %9415 = vmatprep.mubr.msk.f32.mxu0 %vm798_vm3, %v3335_v30  ;;  %10003 = vmatprep.subr.bf16.mxu1 %v10002_v63 }
 0x2a1   : > { %9427 = vmatmul.mubr.msk.f32.vlgmr.msra.gmra.mrb[0].mxu1 %vm798_vm3, %v12548_v7 }
 0x2a2   : > { %9416 = vmatmul.mubr.msk.f32.gmra.mrb[30].mxu0 %vm798_vm3, %v3337_v17  ;;  %10005 = vmatpush3.bf16.msra.mxu1 %v10002_v63 }
 0x2a3   : > { %10007 = vmatprep.subr.bf16.mxu1 %v10006_v46 }
 0x2a6   : > { %10009 = vmatpush3.bf16.msra.mxu1 %v10006_v46  ;;  %v768_v46 = vld [vmem:[%s11002_s7 + $0x30] sm:$0xff] }
 0x2a7   : > { %10011 = vmatprep.subr.bf16.mxu1 %v12577_v11 }
 0x339   : > { %v9372_v21 = vpop.f32.mrb[0].mxu0 }
 0x33a   : > { %v10066_v31 = vadd.f32 %v9372_v21, %v763_v15  ;;  %v3413_v58 = vpop.f32.mrb[1].mxu0 }
 0x33b   : > { %v10067_v25 = vadd.f32 %v3413_v58, %v762_v38 }
 0x33c   : > { %v7911_v10 = vmul.f32 -1.442695, %v10066_v31  ;;  %v771_v31 = vld [vmem:[%s11002_s7 + $0x48] sm:$0xff] }
 0x33d   : > { %v7910_v30 = vmul.f32 -1.442695, %v10067_v25  ;;  %v9375_v8 = vpop.f32.mrb[2].mxu0 }
 0x33e   : > { %10687 = vpow2.f32 %v7911_v10  ;;  %v10068_v17 = vadd.f32 %v9375_v8, %v765_v33  ;;  %v3423_v13 = vpop.f32.mrb[3].mxu0  ;;  %v770_v33 = vld [vmem:[%s11002_s7 + $0x40] sm:$0xff] }
 0x33f   : > { %10689 = vpow2.f32 %v7910_v30  ;;  %v10069_v9 = vadd.f32 %v3423_v13, %v764_v0 }
 0x340   : > { %v7913_v6 = vmul.f32 -1.442695, %v10068_v17 }
 0x341   : > { %v7912_v37 = vmul.f32 -1.442695, %v10069_v9  ;;  %v9378_v26 = vpop.f32.mrb[4].mxu0 }
 0x342   : > { %10691 = vpow2.f32 %v7913_v6  ;;  %v10070_v14 = vadd.f32 %v9378_v26, %v767_v59  ;;  %v3433_v63 = vpop.f32.mrb[5].mxu0  ;;  %v773_v6 = vld [vmem:[%s11002_s7 + $0x58] sm:$0xff]  ;;  %v772_v26 = vld [vmem:[%s11002_s7 + $0x50] sm:$0xff] }
 0x343   : > { %10693 = vpow2.f32 %v7912_v37  ;;  %v10071_v23 = vadd.f32 %v3433_v63, %v766_v3 }
 0x344   : > { %v7915_v5 = vmul.f32 -1.442695, %v10070_v14 }
 0x345   : > { %v7914_v22 = vmul.f32 -1.442695, %v10071_v23  ;;  %v9381_v36 = vpop.f32.mrb[6].mxu0 }
 0x346   : > { %10695 = vpow2.f32 %v7915_v5  ;;  %v10072_v15 = vadd.f32 %v9381_v36, %v769_v27  ;;  %v3443_v38 = vpop.f32.mrb[7].mxu0 }
 0x347   : > { %10697 = vpow2.f32 %v7914_v22  ;;  %v10073_v21 = vadd.f32 %v3443_v38, %v768_v46 }
 0x348   : > { %v10688_v58 = vpop.eup %10687  ;;  %v7917_v25 = vmul.f32 -1.442695, %v10072_v15  ;;  %v775_v15 = vld [vmem:[%s11002_s7 + $0x68] sm:$0xff] }
 0x349   : > { %v10690_v10 = vpop.eup %10689  ;;  %v3701_v0 = vadd.f32 1.0, %v10688_v58  ;;  %v7916_v30 = vmul.f32 -1.442695, %v10073_v21  ;;  %v9384_v8 = vpop.f32.mrb[8].mxu0 }
 0x34a   : > { %v3700_v17 = vadd.f32 1.0, %v10690_v10  ;;  %10699 = vpow2.f32 %v7917_v25  ;;  %v10074_v13 = vadd.f32 %v9384_v8, %v771_v31  ;;  %v3453_v9 = vpop.f32.mrb[9].mxu0  ;;  %v774_v31 = vld [vmem:[%s11002_s7 + $0x60] sm:$0xff] }
 0x34b   : > { %10701 = vrcp.f32 %v3701_v0  ;;  %v10075_v59 = vadd.f32 %v3453_v9, %v770_v33 }
 0x34c   : > { %v10692_v3 = vpop.eup %10691  ;;  %10703 = vrcp.f32 %v3700_v17  ;;  %v7919_v37 = vmul.f32 -1.442695, %v10074_v13  ;;  %v777_v13 = vld [vmem:[%s11002_s7 + $0x78] sm:$0xff] }
 0x34d   : > { %v10694_v14 = vpop.eup %10693  ;;  %v3703_v63 = vadd.f32 1.0, %v10692_v3  ;;  %10705 = vpow2.f32 %v7916_v30  ;;  %v7918_v23 = vmul.f32 -1.442695, %v10075_v59  ;;  %v9387_v27 = vpop.f32.mrb[10].mxu0 }
 0x34e   : > { %v3702_v5 = vadd.f32 1.0, %v10694_v14  ;;  %10707 = vpow2.f32 %v7919_v37  ;;  %v10076_v46 = vadd.f32 %v9387_v27, %v773_v6  ;;  %v3463_v22 = vpop.f32.mrb[11].mxu0  ;;  %v776_v6 = vld [vmem:[%s11002_s7 + $0x70] sm:$0xff] }
 0x34f   : > { %10709 = vrcp.f32 %v3703_v63  ;;  %v10077_v36 = vadd.f32 %v3463_v22, %v772_v26 }
 0x350   : > { %v10696_v38 = vpop.eup %10695  ;;  %10711 = vrcp.f32 %v3702_v5  ;;  %v7921_v21 = vmul.f32 -1.442695, %v10076_v46 }
 0x351   : > { %v10698_v58 = vpop.eup %10697  ;;  %v3705_v25 = vadd.f32 1.0, %v10696_v38  ;;  %10713 = vpow2.f32 %v7918_v23  ;;  %v7920_v33 = vmul.f32 -1.442695, %v10077_v36  ;;  %v9390_v10 = vpop.f32.mrb[12].mxu0 }
 0x352   : > { %v3704_v0 = vadd.f32 1.0, %v10698_v58  ;;  %10715 = vpow2.f32 %v7921_v21  ;;  %v10078_v30 = vadd.f32 %v9390_v10, %v775_v15  ;;  %v3473_v8 = vpop.f32.mrb[13].mxu0  ;;  %v779_v15 = vld [vmem:[%s11002_s7 + $0x88] sm:$0xff]  ;;  %v778_v58 = vld [vmem:[%s11002_s7 + $0x80] sm:$0xff] }
 0x353   : > { %10717 = vrcp.f32 %v3705_v25  ;;  %v10079_v17 = vadd.f32 %v3473_v8, %v774_v31 }
 0x354   : > { %v10700_v9 = vpop.eup %10699  ;;  %10719 = vrcp.f32 %v3704_v0  ;;  %v7923_v59 = vmul.f32 -1.442695, %v10078_v30 }
 0x355   : > { %v12596_v3 = vpop.eup %10701  ;;  %v3707_v37 = vadd.f32 1.0, %v10700_v9  ;;  %10721 = vpow2.f32 %v7920_v33  ;;  %v7922_v26 = vmul.f32 -1.442695, %v10079_v17  ;;  %v9393_v14 = vpop.f32.mrb[14].mxu0 }
 0x356   : > { %14587 = vst [vmem:[#allocation32_spill] sm:$0xff] %v12596_v3  ;;  %v12598_v63 = vpop.eup %10703  ;;  %v3797_v23 = vmul.f32 %v12596_v3, %v12282_v39  ;;  %10723 = vpow2.f32 %v7923_v59  ;;  %v10080_v27 = vadd.f32 %v9393_v14, %v777_v13  ;;  %v3483_v5 = vpop.f32.mrb[15].mxu0  ;;  %v781_v59 = vld [vmem:[%s11002_s7 + $0x98] sm:$0xff]  ;;  %v780_v14 = vld [vmem:[%s11002_s7 + $0x90] sm:$0xff] }
 0x357   : > { %14588 = vst [vmem:[#allocation33_spill] sm:$0xff] %v12598_v63  ;;  %v10706_v46 = vpop.eup %10705  ;;  %v3796_v22 = vmul.f32 %v12598_v63, %v12272_v32  ;;  %10725 = vrcp.f32 %v3707_v37  ;;  %v10081_v36 = vadd.f32 %v3483_v5, %v776_v6 }
 0x358   : > { %v10708_v38 = vpop.eup %10707  ;;  %3830 = vst.msk [vmem:[#allocation3 + $0x21] sm:$0xff] %vm798_vm3, %v3797_v23  ;;  %v3706_v21 = vadd.f32 1.0, %v10706_v46  ;;  %10727 = vpow2.f32 %v7922_v26  ;;  %v7925_v31 = vmul.f32 -1.442695, %v10080_v27 }
 0x359   : > { %v12607_v25 = vpop.eup %10709  ;;  %3829 = vst.msk [vmem:[#allocation3 + $0x19] sm:$0xff] %vm798_vm3, %v3796_v22  ;;  %v3709_v39 = vadd.f32 1.0, %v10708_v38  ;;  %v7924_v33 = vmul.f32 -1.442695, %v10081_v36  ;;  %v9396_v10 = vpop.f32.mrb[16].mxu0 }
 0x35a   : > { %14589 = vst [vmem:[#allocation34_spill] sm:$0xff] %v12607_v25  ;;  %v12610_v32 = vpop.eup %10711  ;;  %v3799_v0 = vmul.f32 %v12607_v25, %v12286_v41  ;;  %10729 = vrcp.f32 %v3706_v21  ;;  %v10082_v30 = vadd.f32 %v9396_v10, %v779_v15  ;;  %v3493_v8 = vpop.f32.mrb[17].mxu0 }
 0x35b   : > { %14590 = vst [vmem:[#allocation35_spill] sm:$0xff] %v12610_v32  ;;  %v10714_v17 = vpop.eup %10713  ;;  %v3798_v13 = vmul.f32 %v12610_v32, %v12274_v34  ;;  %10731 = vrcp.f32 %v3709_v39  ;;  %v10083_v9 = vadd.f32 %v3493_v8, %v778_v58 }
 0x35c   : > { %v10716_v6 = vpop.eup %10715  ;;  %3832 = vst.msk [vmem:[#allocation3 + $0x39] sm:$0xff] %vm798_vm3, %v3799_v0  ;;  %v3708_v37 = vadd.f32 1.0, %v10714_v17  ;;  %10733 = vpow2.f32 %v7925_v31  ;;  %v7927_v26 = vmul.f32 -1.442695, %v10082_v30  ;;  %v783_v31 = vld [vmem:[%s11002_s7 + $0xa8] sm:$0xff]  ;;  %v782_v0 = vld [vmem:[%s11002_s7 + $0xa0] sm:$0xff] }
 0x35d   : > { %v12619_v23 = vpop.eup %10717  ;;  %3831 = vst.msk [vmem:[#allocation3 + $0x31] sm:$0xff] %vm798_vm3, %v3798_v13  ;;  %v3711_v41 = vadd.f32 1.0, %v10716_v6  ;;  %10735 = vpow2.f32 %v7924_v33  ;;  %v7926_v27 = vmul.f32 -1.442695, %v10083_v9  ;;  %v9399_v5 = vpop.f32.mrb[18].mxu0 }
 0x35e   : > { %14591 = vst [vmem:[#allocation36_spill] sm:$0xff] %v12619_v23  ;;  %v12622_v34 = vpop.eup %10719  ;;  %v3801_v46 = vmul.f32 %v12619_v23, %v12298_v45  ;;  %10737 = vrcp.f32 %v3708_v37  ;;  %v10084_v22 = vadd.f32 %v9399_v5, %v781_v59  ;;  %v3503_v36 = vpop.f32.mrb[19].mxu0 }
 0x35f   : > { %14592 = vst [vmem:[#allocation41_spill] sm:$0xff] %v12622_v34  ;;  %v10722_v15 = vpop.eup %10721  ;;  %v3800_v38 = vmul.f32 %v12622_v34, %v12294_v43  ;;  %10739 = vrcp.f32 %v3711_v41  ;;  %v10085_v21 = vadd.f32 %v3503_v36, %v780_v14  ;;  %v785_v14 = vld [vmem:[%s11002_s7 + $0xb8] sm:$0xff] }
 0x360   : > { %v10724_v58 = vpop.eup %10723  ;;  %3834 = vst.msk [vmem:[#allocation3 + $0x51] sm:$0xff] %vm798_vm3, %v3801_v46  ;;  %v3710_v39 = vadd.f32 1.0, %v10722_v15  ;;  %10741 = vpow2.f32 %v7927_v26  ;;  %v7929_v33 = vmul.f32 -1.442695, %v10084_v22  ;;  %v12630_v10 = vld [vmem:[#allocation3 + $0x18] sm:$0xff]  ;;  %v12633_v45 = vld [vmem:[#allocation3 + $0x20] sm:$0xff] }
 0x361   : > { %v12635_v30 = vpop.eup %10725  ;;  %3833 = vst.msk [vmem:[#allocation3 + $0x49] sm:$0xff] %vm798_vm3, %v3800_v38  ;;  %v3713_v43 = vadd.f32 1.0, %v10724_v58  ;;  %10743 = vpow2.f32 %v7926_v27  ;;  %v9402_v8 = vpop.f32.mrb[20].mxu0  ;;  %9429 = vmatprep.mubr.msk.f32.mxu1 %vm798_vm3, %v12630_v10  ;;  %v7928_v9 = vmul.f32 -1.442695, %v10085_v21 }
 0x362   : > { %14593 = vst [vmem:[#allocation5_spill] sm:$0xff] %v12635_v30  ;;  %v10728_v17 = vpop.eup %10727  ;;  %v3803_v13 = vmul.f32 %v12635_v30, %v12310_v49  ;;  %10745 = vrcp.f32 %v3710_v39  ;;  %v10086_v59 = vadd.f32 %v9402_v8, %v783_v31  ;;  %v3513_v6 = vpop.f32.mrb[21].mxu0  ;;  %9430 = vmatmul.mubr.msk.f32.gmra.mrb[2].mxu1 %vm798_vm3, %v12633_v45  ;;  %v784_v49 = vld [vmem:[%s11002_s7 + $0xb0] sm:$0xff] }
 0x363   : > { %10747 = vrcp.f32 %v3713_v43  ;;  %v3712_v37 = vadd.f32 1.0, %v10728_v17  ;;  %v10087_v26 = vadd.f32 %v3513_v6, %v782_v0  ;;  %v787_v43 = vld [vmem:[%s11002_s7 + $0xc8] sm:$0xff] }
 0x364   : > { %v12645_v41 = vpop.eup %10729  ;;  %3836 = vst.msk [vmem:[#allocation3 + $0x69] sm:$0xff] %vm798_vm3, %v3803_v13  ;;  %10749 = vpow2.f32 %v7929_v33  ;;  %v7931_v27 = vmul.f32 -1.442695, %v10086_v59  ;;  %v12648_v5 = vld [vmem:[#allocation3 + $0x30] sm:$0xff]  ;;  %v12651_v46 = vld [vmem:[#allocation3 + $0x38] sm:$0xff] }
 0x365   : > { %14594 = vst [vmem:[#allocation6_spill] sm:$0xff] %v12645_v41  ;;  %v12653_v22 = vpop.eup %10731  ;;  %v3802_v36 = vmul.f32 %v12645_v41, %v12306_v47  ;;  %10751 = vrcp.f32 %v3712_v37  ;;  %v7930_v15 = vmul.f32 -1.442695, %v10087_v26  ;;  %v9405_v38 = vpop.f32.mrb[22].mxu0  ;;  %9432 = vmatprep.mubr.msk.f32.mxu1 %vm798_vm3, %v12648_v5 }
 0x366   : > { %14595 = vst [vmem:[#allocation7_spill] sm:$0xff] %v12653_v22  ;;  %v10734_v21 = vpop.eup %10733  ;;  %v3805_v31 = vmul.f32 %v12653_v22, %v12322_v53  ;;  %10753 = vpow2.f32 %v7928_v9  ;;  %v10088_v58 = vadd.f32 %v9405_v38, %v785_v14  ;;  %v3523_v39 = vpop.f32.mrb[23].mxu0  ;;  %9433 = vmatmul.mubr.msk.f32.gmra.mrb[4].mxu1 %vm798_vm3, %v12651_v46  ;;  %v786_v9 = vld [vmem:[%s11002_s7 + $0xc0] sm:$0xff] }
 0x367   : > { %v10736_v33 = vpop.eup %10735  ;;  %3835 = vst.msk [vmem:[#allocation3 + $0x61] sm:$0xff] %vm798_vm3, %v3802_v36  ;;  %v3715_v47 = vadd.f32 1.0, %v10734_v21  ;;  %10755 = vpow2.f32 %v7931_v27  ;;  %v10089_v0 = vadd.f32 %v3523_v39, %v784_v49 }
 0x368   : > { %v12665_v8 = vpop.eup %10737  ;;  %3838 = vst.msk [vmem:[#allocation3 + $0x81] sm:$0xff] %vm798_vm3, %v3805_v31  ;;  %v3714_v17 = vadd.f32 1.0, %v10736_v33  ;;  %10757 = vpow2.f32 %v7930_v15  ;;  %v7933_v53 = vmul.f32 -1.442695, %v10088_v58  ;;  %v12668_v13 = vld [vmem:[#allocation3 + $0x48] sm:$0xff]  ;;  %v12671_v59 = vld [vmem:[#allocation3 + $0x50] sm:$0xff] }
 0x369   : > { %14596 = vst [vmem:[#allocation8_spill] sm:$0xff] %v12665_v8  ;;  %v12673_v6 = vpop.eup %10739  ;;  %v3804_v37 = vmul.f32 %v12665_v8, %v12318_v51  ;;  %10759 = vrcp.f32 %v3715_v47  ;;  %v7932_v26 = vmul.f32 -1.442695, %v10089_v0  ;;  %v9408_v14 = vpop.f32.mrb[24].mxu0  ;;  %9435 = vmatprep.mubr.msk.f32.mxu1 %vm798_vm3, %v12668_v13  ;;  %v789_v31 = vld [vmem:[%s11002_s7 + $0xd8] sm:$0xff]  ;;  %v788_v33 = vld [vmem:[%s11002_s7 + $0xd0] sm:$0xff] }
 0x36a   : > { %14597 = vst [vmem:[#allocation9_spill] sm:$0xff] %v12673_v6  ;;  %v10742_v27 = vpop.eup %10741  ;;  %v3807_v49 = vmul.f32 %v12673_v6, %v12334_v57  ;;  %10761 = vrcp.f32 %v3714_v17  ;;  %v10090_v36 = vadd.f32 %v9408_v14, %v787_v43  ;;  %v3533_v15 = vpop.f32.mrb[25].mxu0  ;;  %9436 = vmatmul.mubr.msk.f32.gmra.mrb[6].mxu1 %vm798_vm3, %v12671_v59 }
 0x36b   : > { %v10744_v38 = vpop.eup %10743  ;;  %3837 = vst.msk [vmem:[#allocation3 + $0x79] sm:$0xff] %vm798_vm3, %v3804_v37  ;;  %v3717_v51 = vadd.f32 1.0, %v10742_v27  ;;  %10763 = vpow2.f32 %v7933_v53  ;;  %v10091_v21 = vadd.f32 %v3533_v15, %v786_v9  ;;  %v791_v15 = vld [vmem:[%s11002_s7 + $0xe8] sm:$0xff] }
 0x36c   : > { %v12685_v58 = vpop.eup %10745  ;;  %3840 = vst.msk [vmem:[#allocation3 + $0x99] sm:$0xff] %vm798_vm3, %v3807_v49  ;;  %v3716_v39 = vadd.f32 1.0, %v10744_v38  ;;  %10765 = vpow2.f32 %v7932_v26  ;;  %v7935_v57 = vmul.f32 -1.442695, %v10090_v36 }
 0x36d   : > { %14598 = vst [vmem:[#allocation10_spill] sm:$0xff] %v12685_v58  ;;  %v12689_v47 = vpop.eup %10747  ;;  %v3806_v0 = vmul.f32 %v12685_v58, %v12330_v55  ;;  %10767 = vrcp.f32 %v3717_v51  ;;  %v7934_v43 = vmul.f32 -1.442695, %v10091_v21  ;;  %v9411_v17 = vpop.f32.mrb[26].mxu0  ;;  %v790_v21 = vld [vmem:[%s11002_s7 + $0xe0] sm:$0xff] }
 0x36e   : > { %14599 = vst [vmem:[#allocation11_spill] sm:$0xff] %v12689_v47  ;;  %v10750_v53 = vpop.eup %10749  ;;  %v3809_v9 = vmul.f32 %v12689_v47, %v12346_v4  ;;  %10769 = vrcp.f32 %v3716_v39  ;;  %v10092_v37 = vadd.f32 %v9411_v17, %v789_v31  ;;  %v12695_v14 = vld [vmem:[#allocation3 + $0x60] sm:$0xff]  ;;  %v3543_v26 = vpop.f32.mrb[27].mxu0  ;;  %v12697_v27 = vld [vmem:[#allocation3 + $0x68] sm:$0xff] }
 0x36f   : > { %v12699_v49 = vpop.eup %10751  ;;  %3839 = vst.msk [vmem:[#allocation3 + $0x91] sm:$0xff] %vm798_vm3, %v3806_v0  ;;  %v3719_v55 = vadd.f32 1.0, %v10750_v53  ;;  %10771 = vpow2.f32 %v7935_v57  ;;  %9438 = vmatprep.mubr.msk.f32.mxu1 %vm798_vm3, %v12695_v14  ;;  %v10093_v36 = vadd.f32 %v3543_v26, %v788_v33  ;;  %v12977_v47 = vld [vmem:[#allocation3 + $0x88] sm:$0x3] }
 0x370   : > { %14600 = vst [vmem:[#allocation12_spill] sm:$0xff] %v12699_v49  ;;  %v10754_v4 = vpop.eup %10753  ;;  %3842 = vst.msk [vmem:[#allocation3 + $0xb1] sm:$0xff] %vm798_vm3, %v3809_v9  ;;  %v3808_v38 = vmul.f32 %v12699_v49, %v12342_v61  ;;  %10773 = vpow2.f32 %v7934_v43  ;;  %v7937_v51 = vmul.f32 -1.442695, %v10092_v37  ;;  %9439 = vmatmul.mubr.msk.f32.gmra.mrb[8].mxu1 %vm798_vm3, %v12697_v27 }
 0x371   : > { %v10756_v31 = vpop.eup %10755  ;;  %10775 = vrcp.f32 %v3719_v55  ;;  %v3718_v39 = vadd.f32 1.0, %v10754_v4  ;;  %v9414_v57 = vpop.f32.mrb[28].mxu0  ;;  %v7936_v17 = vmul.f32 -1.442695, %v10093_v36  ;;  %v793_v4 = vld [vmem:[%s11002_s7 + $0xf8] sm:$0xff] }
 0x372   : > { %v10758_v0 = vpop.eup %10757  ;;  %3841 = vst.msk [vmem:[#allocation3 + $0xa9] sm:$0xff] %vm798_vm3, %v3808_v38  ;;  %v3721_v33 = vadd.f32 1.0, %v10756_v31  ;;  %10777 = vpow2.f32 %v7937_v51  ;;  %v10094_v53 = vadd.f32 %v9414_v57, %v791_v15  ;;  %v12712_v61 = vld [vmem:[#allocation3 + $0x78] sm:$0xff]  ;;  %v3553_v43 = vpop.f32.mrb[29].mxu0  ;;  %v12714_v9 = vld [vmem:[#allocation3 + $0x80] sm:$0xff] }
 0x373   : > { %v12716_v37 = vpop.eup %10759  ;;  %10779 = vrcp.f32 %v3718_v39  ;;  %v3720_v26 = vadd.f32 1.0, %v10758_v0  ;;  %9441 = vmatprep.mubr.msk.f32.mxu1 %vm798_vm3, %v12712_v61  ;;  %v10095_v55 = vadd.f32 %v3553_v43, %v790_v21  ;;  %v792_v51 = vld [vmem:[%s11002_s7 + $0xf0] sm:$0xff] }
 0x374   : > { %14601 = vst [vmem:[#allocation13_spill] sm:$0xff] %v12716_v37  ;;  %v12721_v38 = vpop.eup %10761  ;;  %v3811_v36 = vmul.f32 %v12716_v37, %v12358_v35  ;;  %10781 = vrcp.f32 %v3721_v33  ;;  %v7939_v15 = vmul.f32 -1.442695, %v10094_v53  ;;  %9442 = vmatmul.mubr.msk.f32.gmra.mrb[10].mxu1 %vm798_vm3, %v12714_v9  ;;  %v12992_v8 = vld [vmem:[#allocation3 + $0xa0] sm:$0x3] }
 0x375   : > { %14602 = vst [vmem:[#allocation14_spill] sm:$0xff] %v12721_v38  ;;  %v10764_v31 = vpop.eup %10763  ;;  %v3810_v39 = vmul.f32 %v12721_v38, %v12354_v20  ;;  %10783 = vrcp.f32 %v3720_v26  ;;  %v9417_v57 = vpop.f32.mrb[30].mxu0  ;;  %v7938_v43 = vmul.f32 -1.442695, %v10095_v55  ;;  %v4346_v38 = vrot.slane %v12714_v9, 1 }
 0x376   : > { %v10766_v0 = vpop.eup %10765  ;;  %3844 = vst.msk [vmem:[#allocation3 + $0xc9] sm:$0xff] %vm798_vm3, %v3811_v36  ;;  %v3723_v21 = vadd.f32 1.0, %v10764_v31  ;;  %10785 = vpow2.f32 %v7936_v17  ;;  %v10096_v42 = vadd.f32 %v9417_v57, %v793_v4  ;;  %v12731_v35 = vld [vmem:[#allocation3 + $0x90] sm:$0xff]  ;;  %v3563_v33 = vpop.f32.mrb[31].mxu0  ;;  %v12733_v53 = vld [vmem:[#allocation3 + $0x98] sm:$0xff] }
 0x377   : > { %v12735_v37 = vpop.eup %10767  ;;  %3843 = vst.msk [vmem:[#allocation3 + $0xc1] sm:$0xff] %vm798_vm3, %v3810_v39  ;;  %v3722_v49 = vadd.f32 1.0, %v10766_v0  ;;  %10787 = vpow2.f32 %v7939_v15  ;;  %9444 = vmatprep.mubr.msk.f32.mxu1 %vm798_vm3, %v12731_v35  ;;  %v10097_v20 = vadd.f32 %v3563_v33, %v792_v51  ;;  %v4350_v58 = vrot.slane %v12731_v35, 1  ;;  %v13007_v30 = vld [vmem:[#allocation3 + $0xb8] sm:$0x3] }
 0x378   : > { %14603 = vst [vmem:[#allocation15_spill] sm:$0xff] %v12735_v37  ;;  %v12740_v26 = vpop.eup %10769  ;;  %v3813_v17 = vmul.f32 %v12735_v37, %v12370_v12  ;;  %10789 = vrcp.f32 %v3723_v21  ;;  %v7941_v55 = vmul.f32 -1.442695, %v10096_v42  ;;  %9445 = vmatmul.mubr.msk.f32.gmra.mrb[12].mxu1 %vm798_vm3, %v12733_v53  ;;  %v12946_v37 = vld [vmem:[#allocation3 + $0x58] sm:$0x3]  ;;  %v4351_v6 = vrot.slane %v12733_v53, 1 }
 0x379   : > { %14604 = vst [vmem:[#allocation16_spill] sm:$0xff] %v12740_v26  ;;  %v10772_v4 = vpop.eup %10771  ;;  %v3812_v36 = vmul.f32 %v12740_v26, %v12366_v19  ;;  %10791 = vrcp.f32 %v3722_v49  ;;  %v12748_v15 = vld [vmem:[#allocation3 + $0xa8] sm:$0xff]  ;;  %v12750_v31 = vld [vmem:[#allocation3 + $0xb0] sm:$0xff]  ;;  %v7940_v12 = vmul.f32 -1.442695, %v10097_v20  ;;  %v8047_v26 = vld [vmem:[%s14262_s4 + $0x68] sm:$0xff] }
 0x37a   : > { %v10774_v51 = vpop.eup %10773  ;;  %3846 = vst.msk [vmem:[#allocation3 + $0xe1] sm:$0xff] %vm798_vm3, %v3813_v17  ;;  %v3725_v39 = vadd.f32 1.0, %v10772_v4  ;;  %10793 = vpow2.f32 %v7938_v43  ;;  %9447 = vmatprep.mubr.msk.f32.mxu1 %vm798_vm3, %v12748_v15  ;;  %v4355_v22 = vrot.slane %v12748_v15, 1  ;;  %v4356_v41 = vrot.slane %v12750_v31, 1 }
 0x37b   : > { %v12755_v42 = vpop.eup %10775  ;;  %3845 = vst.msk [vmem:[#allocation3 + $0xd9] sm:$0xff] %vm798_vm3, %v3812_v36  ;;  %v3724_v57 = vadd.f32 1.0, %v10774_v51  ;;  %10795 = vpow2.f32 %v7941_v55 }
 0x37c   : > { %14605 = vst [vmem:[#allocation17_spill] sm:$0xff] %v12755_v42  ;;  %v10778_v19 = vpop.eup %10777  ;;  %v3815_v49 = vmul.f32 %v12755_v42, %v12382_v40  ;;  %10797 = vrcp.f32 %v3725_v39  ;;  %9448 = vmatmul.mubr.msk.f32.gmra.mrb[14].mxu1 %vm798_vm3, %v12750_v31  ;;  %v8046_v42 = vld [vmem:[%s14262_s4 + $0x60] sm:$0xff] }
 0x37d   : > { %v12762_v0 = vpop.eup %10779  ;;  %10799 = vrcp.f32 %v3724_v57  ;;  %v3727_v21 = vadd.f32 1.0, %v10778_v19  ;;  %v13022_v32 = vld [vmem:[#allocation3 + $0xd0] sm:$0x3] }
 0x37e   : > { %14606 = vst [vmem:[#allocation18_spill] sm:$0xff] %v12762_v0  ;;  %v12764_v43 = vpop.eup %10781  ;;  %3848 = vst.msk [vmem:[#allocation3 + $0xf9] sm:$0xff] %vm798_vm3, %v3815_v49  ;;  %v3814_v33 = vmul.f32 %v12762_v0, %v12378_v29  ;;  %10801 = vpow2.f32 %v7940_v12  ;;  %v12769_v20 = vld [vmem:[#allocation3 + $0xc0] sm:$0xff]  ;;  %v12771_v17 = vld [vmem:[#allocation3 + $0xc8] sm:$0xff] }
 0x37f   : > { %14607 = vst [vmem:[#allocation19_spill] sm:$0xff] %v12764_v43  ;;  %v12773_v40 = vpop.eup %10783  ;;  %v3817_v55 = vmul.f32 %v12764_v43, %v12394_v48  ;;  %10803 = vrcp.f32 %v3727_v21  ;;  %9450 = vmatprep.mubr.msk.f32.mxu1 %vm798_vm3, %v12769_v20  ;;  %v4360_v34 = vrot.slane %v12769_v20, 1  ;;  %v4361_v23 = vrot.slane %v12771_v17, 1 }
 0x380   : > { %14608 = vst [vmem:[#allocation20_spill] sm:$0xff] %v12773_v40  ;;  %v10786_v4 = vpop.eup %10785  ;;  %3847 = vst.msk [vmem:[#allocation3 + $0xf1] sm:$0xff] %vm798_vm3, %v3814_v33  ;;  %v3816_v29 = vmul.f32 %v12773_v40, %v12390_v44  ;;  %9451 = vmatmul.mubr.msk.f32.gmra.mrb[16].mxu1 %vm798_vm3, %v12771_v17 }
 0x381   : > { %v10788_v36 = vpop.eup %10787  ;;  %3850 = vst.msk [vmem:[#allocation3 + $0x111] sm:$0xff] %vm798_vm3, %v3817_v55  ;;  %v3726_v51 = vadd.f32 1.0, %v10786_v4  ;;  %v13037_v3 = vld [vmem:[#allocation3 + $0xe8] sm:$0x3] }
 0x382   : > { %v12785_v39 = vpop.eup %10789  ;;  %3849 = vst.msk [vmem:[#allocation3 + $0x109] sm:$0xff] %vm798_vm3, %v3816_v29  ;;  %v3729_v48 = vadd.f32 1.0, %v10788_v36  ;;  %v12788_v12 = vld [vmem:[#allocation3 + $0xd8] sm:$0xff]  ;;  %v12790_v57 = vld [vmem:[#allocation3 + $0xe0] sm:$0xff] }
 0x383   : > { %14609 = vst [vmem:[#allocation21_spill] sm:$0xff] %v12785_v39  ;;  %v12792_v19 = vpop.eup %10791  ;;  %v3819_v44 = vmul.f32 %v12785_v39, %v12406_v56  ;;  %10805 = vrcp.f32 %v3726_v51  ;;  %9453 = vmatprep.mubr.msk.f32.mxu1 %vm798_vm3, %v12788_v12  ;;  %v14619_v39 = vrot.slane %v12548_v7, 1  ;;  %v4365_v25 = vrot.slane %v12788_v12, 1 }
 0x384   : > { %14610 = vst [vmem:[#allocation22_spill] sm:$0xff] %v12792_v19  ;;  %v10794_v49 = vpop.eup %10793  ;;  %v3818_v21 = vmul.f32 %v12792_v19, %v12402_v52  ;;  %10807 = vrcp.f32 %v3729_v48  ;;  %9454 = vmatmul.mubr.msk.f32.gmra.mrb[18].mxu1 %vm798_vm3, %v12790_v57  ;;  %v12905_v19 = vld [vmem:[#allocation3 + $0x28] sm:$0x3]  ;;  %v4366_v63 = vrot.slane %v12790_v57, 1 }
 0x385   : > { %v10796_v33 = vpop.eup %10795  ;;  %3852 = vst.msk [vmem:[#allocation3 + $0x129] sm:$0xff] %vm798_vm3, %v3819_v44  ;;  %v3728_v55 = vadd.f32 1.0, %v10794_v49  ;;  %v4328_v0 = vrot.slane %v12905_v19, 1 }
 0x386   : > { %v12803_v4 = vpop.eup %10797  ;;  %3851 = vst.msk [vmem:[#allocation3 + $0x121] sm:$0xff] %vm798_vm3, %v3818_v21  ;;  %v3731_v56 = vadd.f32 1.0, %v10796_v33 }
 0x387   : > { %14611 = vst [vmem:[#allocation23_spill] sm:$0xff] %v12803_v4  ;;  %v12806_v29 = vpop.eup %10799  ;;  %v3821_v36 = vmul.f32 %v12803_v4, %v12418_v1  ;;  %10809 = vrcp.f32 %v3728_v55  ;;  %v12810_v52 = vld [vmem:[#allocation3 + $0xf0] sm:$0xff]  ;;  %v12812_v51 = vld [vmem:[#allocation3 + $0xf8] sm:$0xff]  ;;  %v4325_v4 = vrot.slane %v12630_v10, 1 }
 0x388   : > { %14612 = vst [vmem:[#allocation24_spill] sm:$0xff] %v12806_v29  ;;  %v10802_v48 = vpop.eup %10801  ;;  %v3820_v44 = vmul.f32 %v12806_v29, %v12414_v16  ;;  %10811 = vrcp.f32 %v3731_v56  ;;  %9456 = vmatprep.mubr.msk.f32.mxu1 %vm798_vm3, %v12810_v52 }
 0x389   : > { %v12818_v49 = vpop.eup %10803  ;;  %3854 = vst.msk [vmem:[#allocation3 + $0x141] sm:$0xff] %vm798_vm3, %v3821_v36  ;;  %v3730_v21 = vadd.f32 1.0, %v10802_v48  ;;  %9457 = vmatmul.mubr.msk.f32.gmra.mrb[20].mxu1 %vm798_vm3, %v12812_v51  ;;  %v12823_v1 = vld [vmem:[#allocation3 + $0x108] sm:$0xff]  ;;  %v12830_v16 = vld [vmem:[#allocation3 + $0x110] sm:$0xff] }
 0x38a   : > { %14613 = vst [vmem:[#allocation25_spill] sm:$0xff] %v12818_v49  ;;  %3853 = vst.msk [vmem:[#allocation3 + $0x139] sm:$0xff] %vm798_vm3, %v3820_v44  ;;  %v3823_v33 = vmul.f32 %v12818_v49, %v12430_v28  ;;  %9459 = vmatprep.mubr.msk.f32.mxu1 %vm798_vm3, %v12823_v1 }
 0x38b   : > { %10813 = vrcp.f32 %v3730_v21 }
 0x38c   : > { %3856 = vst.msk [vmem:[#allocation3 + $0x159] sm:$0xff] %vm798_vm3, %v3823_v33 }
 0x38d   : > { %v12833_v55 = vpop.eup %10805  ;;  %9460 = vmatmul.mubr.msk.f32.gmra.mrb[22].mxu1 %vm798_vm3, %v12830_v16  ;;  %v12837_v56 = vld [vmem:[#allocation3 + $0x120] sm:$0xff]  ;;  %v12845_v48 = vld [vmem:[#allocation3 + $0x128] sm:$0xff] }
 0x38e   : > { %14614 = vst [vmem:[#allocation26_spill] sm:$0xff] %v12833_v55  ;;  %v12839_v36 = vpop.eup %10807  ;;  %v3822_v28 = vmul.f32 %v12833_v55, %v12426_v2  ;;  %9462 = vmatprep.mubr.msk.f32.mxu1 %vm798_vm3, %v12837_v56 }
 0x38f   : > { %14615 = vst [vmem:[#allocation28_spill] sm:$0xff] %v12839_v36  ;;  %v3825_v44 = vmul.f32 %v12839_v36, %v12444_v54  ;;  %v4726_v36 = vrot.slane %v12544_v18, 2 }
 0x390   : > { %3855 = vst.msk [vmem:[#allocation3 + $0x151] sm:$0xff] %vm798_vm3, %v3822_v28 }
 0x391   : > { %v12850_v21 = vpop.eup %10809  ;;  %3858 = vst.msk [vmem:[#allocation3 + $0x171] sm:$0xff] %vm798_vm3, %v3825_v44  ;;  %9463 = vmatmul.mubr.msk.f32.gmra.mrb[24].mxu1 %vm798_vm3, %v12845_v48  ;;  %v12855_v33 = vld [vmem:[#allocation3 + $0x138] sm:$0xff]  ;;  %v12863_v54 = vld [vmem:[#allocation3 + $0x140] sm:$0xff] }
 0x392   : > { %14616 = vst [vmem:[#allocation29_spill] sm:$0xff] %v12850_v21  ;;  %v12857_v2 = vpop.eup %10811  ;;  %v3824_v55 = vmul.f32 %v12850_v21, %v12440_v50  ;;  %9465 = vmatprep.mubr.msk.f32.mxu1 %vm798_vm3, %v12855_v33  ;;  %v4727_v50 = vrot.slane %v12548_v7, 2  ;;  %v4330_v7 = vrot.slane %v12648_v5, 1 }
 0x393   : > { %14617 = vst [vmem:[#allocation30_spill] sm:$0xff] %v12857_v2  ;;  %v3827_v28 = vmul.f32 %v12857_v2, %v12457_v24  ;;  %v3863_v24 = vld [vmem:[#allocation3 + $0x10] sm:$0x3]  ;;  %v8013_v2 = vld [vmem:[%s14262_s4 + $0x58] sm:$0xff] }
 0x394   : > { %3857 = vst.msk [vmem:[#allocation3 + $0x169] sm:$0xff] %vm798_vm3, %v3824_v55  ;;  %v4323_v55 = vrot.slane %v3863_v24, 1  ;;  %v12887_v18 = vsel %vm1575_vm4, %v4726_v36, %v4727_v50  ;;  %v4326_v36 = vrot.slane %v12633_v45, 1 }
 0x395   : > { %v12868_v44 = vpop.eup %10813  ;;  %3860 = vst.msk [vmem:[#allocation3 + $0x189] sm:$0xff] %vm798_vm3, %v3827_v28  ;;  %9466 = vmatmul.mubr.msk.f32.gmra.mrb[26].mxu1 %vm798_vm3, %v12863_v54 }
 0x396   : > { %14618 = vst [vmem:[#allocation27_spill] sm:$0xff] %v12868_v44  ;;  %v3826_v21 = vmul.f32 %v12868_v44, %v12453_v62  ;;  %v4729_v44 = vrot.slane %v3863_v24, 2  ;;  %v4324_v40 = vsel %vm1168_vm5, %v14619_v39, %v4323_v55  ;;  %v12928_v39 = vld [vmem:[#allocation3 + $0x40] sm:$0x3]  ;;  %v4335_v55 = vrot.slane %v12668_v13, 1 }
 0x397   : > { %v12877_v49 = vld [vmem:[#allocation3 + $0x150] sm:$0xff]  ;;  %v12879_v29 = vld [vmem:[#allocation3 + $0x158] sm:$0xff] }
 0x398   : > { %3859 = vst.msk [vmem:[#allocation3 + $0x181] sm:$0xff] %vm798_vm3, %v3826_v21  ;;  %9468 = vmatprep.mubr.msk.f32.mxu1 %vm798_vm3, %v12877_v49  ;;  %v8012_v21 = vld [vmem:[%s14262_s4 + $0x50] sm:$0xff]  ;;  %v12908_v24 = vsel %vm1575_vm4, %v4727_v50, %v4729_v44  ;;  %v12924_v44 = vsel %vm1168_vm5, %v4325_v4, %v4326_v36  ;;  %v12936_v50 = vsel %vm1168_vm5, %v4326_v36, %v4328_v0  ;;  %v4340_v0 = vrot.slane %v12695_v14, 1 }
 0x399   : > { %9469 = vmatmul.mubr.msk.f32.gmra.mrb[28].mxu1 %vm798_vm3, %v12879_v29  ;;  %v10014_v43 = vpack.c.bf16 %v8013_v2, %v8012_v21  ;;  %v12933_v2 = vpack.c.bf16 %v8047_v26, %v8046_v42  ;;  %v4336_v21 = vrot.slane %v12671_v59, 1  ;;  %v4338_v26 = vrot.slane %v12946_v37, 1 }
 0x39a   : > { %v4341_v36 = vrot.slane %v12697_v27, 1 }
 0x39b   : > { %v12889_v28 = vld [vmem:[#allocation3 + $0x168] sm:$0xff]  ;;  %v12891_v62 = vld [vmem:[#allocation3 + $0x170] sm:$0xff]  ;;  %v12958_v42 = vsel %vm1168_vm5, %v4335_v55, %v4336_v21  ;;  %v4345_v55 = vrot.slane %v12712_v61, 1 }
 0x39c   : > { %9471 = vmatprep.mubr.msk.f32.mxu1 %vm798_vm3, %v12889_v28 }
 0x39d   : > { %9472 = vmatmul.mubr.msk.f32.gmra.mrb[30].mxu1 %vm798_vm3, %v12891_v62 }
 0x39e   : > { %9482 = vmatprep.mubr.msk.f32.mxu1 %vm798_vm3, %v12569_v60  ;;  %v4331_v60 = vrot.slane %v12651_v46, 1 }
 0x3a0   : > { %v12942_v4 = vsel %vm1168_vm5, %v4330_v7, %v4331_v60  ;;  %v12962_v7 = vld [vmem:[#allocation3 + $0x70] sm:$0x3] }
 0x3a1   : > { %9483 = vmatmul.mubr.msk.f32.vlgmr.msra.gmra.mrb[0].mxu1 %vm798_vm3, %v4324_v40  ;;  %v4333_v40 = vrot.slane %v12928_v39, 1 }
 0x3a2   : > { %9485 = vmatprep.mubr.msk.f32.mxu1 %vm798_vm3, %v12924_v44  ;;  %10013 = vmatpush3.bf16.msra.mxu1 %v12577_v11 }
 0x3a3   : > { %10015 = vmatprep.subr.bf16.mxu1 %v10014_v43  ;;  %v12952_v11 = vsel %vm1168_vm5, %v4331_v60, %v4333_v40  ;;  %v4343_v60 = vrot.slane %v12962_v7, 1  ;;  %v12973_v40 = vsel %vm1168_vm5, %v4340_v0, %v4341_v36  ;;  %v12988_v0 = vsel %vm1168_vm5, %v4345_v55, %v4346_v38 }
 0x3a4   : > { %14620 = vst [vmem:[#allocation37_spill] sm:$0xff] %v12973_v40  ;;  %14622 = vst [vmem:[#allocation39_spill] sm:$0xff] %v12988_v0  ;;  %v13003_v55 = vsel %vm1168_vm5, %v4350_v58, %v4351_v6  ;;  %v13018_v58 = vsel %vm1168_vm5, %v4355_v22, %v4356_v41  ;;  %v13033_v22 = vsel %vm1168_vm5, %v4360_v34, %v4361_v23 }
 0x3a5   : > { %9486 = vmatmul.mubr.msk.f32.gmra.mrb[2].mxu1 %vm798_vm3, %v12936_v50  ;;  %14624 = vst [vmem:[#allocation42_spill] sm:$0xff] %v13003_v55  ;;  %14626 = vst [vmem:[#allocation31_spill] sm:$0xff] %v13018_v58  ;;  %v13048_v34 = vsel %vm1168_vm5, %v4365_v25, %v4366_v63 }
 0x3a6   : > { %9488 = vmatprep.mubr.msk.f32.mxu1 %vm798_vm3, %v12942_v4  ;;  %10017 = vmatpush3.bf16.msra.mxu1 %v10014_v43  ;;  %v12967_v43 = vsel %vm1168_vm5, %v4336_v21, %v4338_v26  ;;  %v12982_v21 = vsel %vm1168_vm5, %v4341_v36, %v4343_v60  ;;  %v4348_v26 = vrot.slane %v12977_v47, 1  ;;  %v4353_v60 = vrot.slane %v12992_v8, 1  ;;  %14628 = vst [vmem:[#allocation45_spill] sm:$0xff] %v13033_v22 }
 0x3a7   : > { %10019 = vmatprep.subr.bf16.mxu1 %v12933_v2  ;;  %14621 = vst [vmem:[#allocation38_spill] sm:$0xff] %v12982_v21  ;;  %14630 = vst [vmem:[#allocation47_spill] sm:$0xff] %v13048_v34 }
 0x3a8   : > { %v12997_v36 = vsel %vm1168_vm5, %v4346_v38, %v4348_v26  ;;  %v13012_v38 = vsel %vm1168_vm5, %v4351_v6, %v4353_v60  ;;  %v4358_v26 = vrot.slane %v13007_v30, 1  ;;  %v4363_v60 = vrot.slane %v13022_v32, 1 }
 0x3a9   : > { %9489 = vmatmul.mubr.msk.f32.gmra.mrb[4].mxu1 %vm798_vm3, %v12952_v11  ;;  %14623 = vst [vmem:[#allocation40_spill] sm:$0xff] %v12997_v36  ;;  %14625 = vst [vmem:[#allocation43_spill] sm:$0xff] %v13012_v38 }
 0x3aa   : > { %9491 = vmatprep.mubr.msk.f32.mxu1 %vm798_vm3, %v12958_v42  ;;  %v13027_v6 = vsel %vm1168_vm5, %v4356_v41, %v4358_v26  ;;  %v13042_v41 = vsel %vm1168_vm5, %v4361_v23, %v4363_v60  ;;  %v4368_v26 = vrot.slane %v13037_v3, 1 }
 0x3ab   : > { %14627 = vst [vmem:[#allocation44_spill] sm:$0xff] %v13027_v6  ;;  %14629 = vst [vmem:[#allocation46_spill] sm:$0xff] %v13042_v41 }
 0x3ac   : > { %v13057_v23 = vsel %vm1168_vm5, %v4366_v63, %v4368_v26 }
 0x3ad   : > { %9492 = vmatmul.mubr.msk.f32.gmra.mrb[6].mxu1 %vm798_vm3, %v12967_v43  ;;  %14631 = vst [vmem:[#allocation48_spill] sm:$0xff] %v13057_v23 }
 0x3ae   : > { %9494 = vmatprep.mubr.msk.f32.mxu1 %vm798_vm3, %v12973_v40  ;;  %v13127_v40 = vld [vmem:[#allocation3 + $0x178] sm:$0x3] }
 0x3b1   : > { %9495 = vmatmul.mubr.msk.f32.gmra.mrb[8].mxu1 %vm798_vm3, %v12982_v21  ;;  %v13112_v21 = vld [vmem:[#allocation3 + $0x160] sm:$0x3] }
 0x3b2   : > { %9497 = vmatprep.mubr.msk.f32.mxu1 %vm798_vm3, %v12988_v0  ;;  %v13097_v0 = vld [vmem:[#allocation3 + $0x148] sm:$0x3] }
 0x3b5   : > { %9498 = vmatmul.mubr.msk.f32.gmra.mrb[10].mxu1 %vm798_vm3, %v12997_v36  ;;  %v13082_v36 = vld [vmem:[#allocation3 + $0x130] sm:$0x3] }
 0x3b6   : > { %9500 = vmatprep.mubr.msk.f32.mxu1 %vm798_vm3, %v13003_v55  ;;  %v13067_v55 = vld [vmem:[#allocation3 + $0x118] sm:$0x3] }
 0x3b7   : > { %v4378_v26 = vrot.slane %v13067_v55, 1 }
 0x3b9   : > { %9501 = vmatmul.mubr.msk.f32.gmra.mrb[12].mxu1 %vm798_vm3, %v13012_v38  ;;  %v13052_v38 = vld [vmem:[#allocation3 + $0x100] sm:$0x3] }
 0x3ba   : > { %9503 = vmatprep.mubr.msk.f32.mxu1 %vm798_vm3, %v13018_v58  ;;  %v4371_v58 = vrot.slane %v12812_v51, 1  ;;  %v4373_v60 = vrot.slane %v13052_v38, 1 }
 0x3bc   : > { %v13072_v63 = vsel %vm1168_vm5, %v4371_v58, %v4373_v60  ;;  %v4383_v60 = vrot.slane %v13082_v36, 1 }
 0x3bd   : > { %9504 = vmatmul.mubr.msk.f32.gmra.mrb[14].mxu1 %vm798_vm3, %v13027_v6  ;;  %v4370_v6 = vrot.slane %v12810_v52, 1  ;;  %14633 = vst [vmem:[#allocation50_spill] sm:$0xff] %v13072_v63 }
 0x3be   : > { %9506 = vmatprep.mubr.msk.f32.mxu1 %vm798_vm3, %v13033_v22  ;;  %v4376_v22 = vrot.slane %v12830_v16, 1 }
 0x3bf   : > { %v13063_v25 = vsel %vm1168_vm5, %v4370_v6, %v4371_v58 }
 0x3c0   : > { %14632 = vst [vmem:[#allocation49_spill] sm:$0xff] %v13063_v25  ;;  %v13087_v58 = vsel %vm1168_vm5, %v4376_v22, %v4378_v26  ;;  %v4388_v26 = vrot.slane %v13097_v0, 1 }
 0x3c1   : > { %9507 = vmatmul.mubr.msk.f32.gmra.mrb[16].mxu1 %vm798_vm3, %v13042_v41  ;;  %v4375_v41 = vrot.slane %v12823_v1, 1  ;;  %14635 = vst [vmem:[#allocation52_spill] sm:$0xff] %v13087_v58 }
 0x3c2   : > { %9509 = vmatprep.mubr.msk.f32.mxu1 %vm798_vm3, %v13048_v34  ;;  %v4381_v34 = vrot.slane %v12845_v48, 1 }
 0x3c3   : > { %v13078_v6 = vsel %vm1168_vm5, %v4375_v41, %v4376_v22 }
 0x3c4   : > { %14634 = vst [vmem:[#allocation51_spill] sm:$0xff] %v13078_v6  ;;  %v13102_v22 = vsel %vm1168_vm5, %v4381_v34, %v4383_v60  ;;  %v4393_v60 = vrot.slane %v13112_v21, 1 }
 0x3c5   : > { %9510 = vmatmul.mubr.msk.f32.gmra.mrb[18].mxu1 %vm798_vm3, %v13057_v23  ;;  %v4380_v23 = vrot.slane %v12837_v56, 1  ;;  %14637 = vst [vmem:[#allocation54_spill] sm:$0xff] %v13102_v22 }
 0x3c6   : > { %9512 = vmatprep.mubr.msk.f32.mxu1 %vm798_vm3, %v13063_v25  ;;  %v4386_v25 = vrot.slane %v12863_v54, 1 }
 0x3c7   : > { %v13093_v41 = vsel %vm1168_vm5, %v4380_v23, %v4381_v34 }
 0x3c8   : > { %14636 = vst [vmem:[#allocation53_spill] sm:$0xff] %v13093_v41  ;;  %v13117_v34 = vsel %vm1168_vm5, %v4386_v25, %v4388_v26  ;;  %v4398_v26 = vrot.slane %v13127_v40, 1 }
 0x3c9   : > { %9513 = vmatmul.mubr.msk.f32.gmra.mrb[20].mxu1 %vm798_vm3, %v13072_v63  ;;  %v4385_v63 = vrot.slane %v12855_v33, 1  ;;  %14638 = vst [vmem:[#allocation55_spill] sm:$0xff] %v13117_v34 }
 0x3ca   : > { %9515 = vmatprep.mubr.msk.f32.mxu1 %vm798_vm3, %v13078_v6  ;;  %v4391_v6 = vrot.slane %v12879_v29, 1 }
 0x3cb   : > { %v13108_v23 = vsel %vm1168_vm5, %v4385_v63, %v4386_v25 }
 0x3cc   : > { %v13132_v25 = vsel %vm1168_vm5, %v4391_v6, %v4393_v60  ;;  %v4731_v60 = vrot.slane %v12630_v10, 2 }
 0x3cd   : > { %9516 = vmatmul.mubr.msk.f32.gmra.mrb[22].mxu1 %vm798_vm3, %v13087_v58  ;;  %v4390_v58 = vrot.slane %v12877_v49, 1  ;;  %14640 = vst [vmem:[#allocation57_spill] sm:$0xff] %v13132_v25 }
 0x3ce   : > { %9518 = vmatprep.mubr.msk.f32.mxu1 %vm798_vm3, %v13093_v41  ;;  %v4396_v41 = vrot.slane %v12891_v62, 1 }
 0x3cf   : > { %v13123_v63 = vsel %vm1168_vm5, %v4390_v58, %v4391_v6  ;;  %v8049_v6 = vld [vmem:[%s14262_s4 + $0x78] sm:$0xff] }
 0x3d0   : > { %14639 = vst [vmem:[#allocation56_spill] sm:$0xff] %v13123_v63 }
 0x3d1   : > { %9519 = vmatmul.mubr.msk.f32.gmra.mrb[24].mxu1 %vm798_vm3, %v13102_v22  ;;  %v4395_v22 = vrot.slane %v12889_v28, 1 }
 0x3d2   : > { %9521 = vmatprep.mubr.msk.f32.mxu1 %vm798_vm3, %v13108_v23 }
 0x3d3   : > { %v13138_v58 = vsel %vm1168_vm5, %v4395_v22, %v4396_v41  ;;  %v4734_v22 = vrot.slane %v12905_v19, 2 }
 0x3d4   : > { %14641 = vst [vmem:[#allocation58_spill] sm:$0xff] %v13138_v58 }
 0x3d5   : > { %9522 = vmatmul.mubr.msk.f32.gmra.mrb[26].mxu1 %vm798_vm3, %v13117_v34  ;;  %v13143_v34 = vsel %vm1168_vm5, %v4396_v41, %v4398_v26  ;;  %v8082_v26 = vld [vmem:[%s14262_s4 + $0x80] sm:$0xff] }
 0x3d6   : > { %9524 = vmatprep.mubr.msk.f32.mxu1 %vm798_vm3, %v13123_v63  ;;  %14642 = vst [vmem:[#allocation59_spill] sm:$0xff] %v13143_v34  ;;  %v8048_v63 = vld [vmem:[%s14262_s4 + $0x70] sm:$0xff] }
 0x3d7   : > { %v10022_v41 = vpack.c.bf16 %v8049_v6, %v8048_v63 }
 0x3d9   : > { %9525 = vmatmul.mubr.msk.f32.gmra.mrb[28].mxu1 %vm798_vm3, %v13132_v25  ;;  %v4732_v25 = vrot.slane %v12633_v45, 2  ;;  %v4736_v45 = vrot.slane %v12648_v5, 2 }
 0x3da   : > { %9527 = vmatprep.mubr.msk.f32.mxu1 %vm798_vm3, %v13138_v58  ;;  %v8083_v58 = vld [vmem:[%s14262_s4 + $0x88] sm:$0xff] }
 0x3db   : > { %v13167_v10 = vsel %vm1575_vm4, %v4731_v60, %v4732_v25  ;;  %v13174_v19 = vpack.c.bf16 %v8083_v58, %v8082_v26  ;;  %v13177_v63 = vsel %vm1575_vm4, %v4732_v25, %v4734_v22  ;;  %v4741_v60 = vrot.slane %v12668_v13, 2 }
 0x3dc   : > { %14643 = vst [vmem:[#allocation60_spill] sm:$0xff] %v13167_v10  ;;  %v4746_v58 = vrot.slane %v12695_v14, 2  ;;  %v4747_v22 = vrot.slane %v12697_v27, 2  ;;  %v4749_v26 = vrot.slane %v12962_v7, 2 }
 0x3dd   : > { %9528 = vmatmul.mubr.msk.f32.gmra.mrb[30].mxu1 %vm798_vm3, %v13143_v34 }
 0x3de   : > { %9538 = vmatprep.mubr.msk.f32.mxu1 %vm798_vm3, %v12887_v18  ;;  %v4737_v18 = vrot.slane %v12651_v46, 2 }
 0x3e0   : > { %v13183_v6 = vsel %vm1575_vm4, %v4736_v45, %v4737_v18  ;;  %v4751_v45 = vrot.slane %v12712_v61, 2 }
 0x3e1   : > { %9539 = vmatmul.mubr.msk.f32.vlgmr.msra.gmra.mrb[0].mxu1 %vm798_vm3, %v12908_v24  ;;  %v4739_v24 = vrot.slane %v12928_v39, 2  ;;  %v4744_v39 = vrot.slane %v12946_v37, 2  ;;  %v13210_v37 = vsel %vm1575_vm4, %v4746_v58, %v4747_v22 }
 0x3e2   : > { %9541 = vmatprep.mubr.msk.f32.mxu1 %vm798_vm3, %v13167_v10  ;;  %10021 = vmatpush3.bf16.msra.mxu1 %v12933_v2  ;;  %v4742_v10 = vrot.slane %v12671_v59, 2 }
 0x3e3   : > { %10023 = vmatprep.subr.bf16.mxu1 %v10022_v41  ;;  %v13191_v2 = vsel %vm1575_vm4, %v4737_v18, %v4739_v24  ;;  %v4752_v18 = vrot.slane %v12714_v9, 2  ;;  %v13217_v24 = vsel %vm1575_vm4, %v4747_v22, %v4749_v26  ;;  %v4759_v22 = vrot.slane %v12992_v8, 2 }
 0x3e4   : > { %v13197_v25 = vsel %vm1575_vm4, %v4741_v60, %v4742_v10  ;;  %v4756_v60 = vrot.slane %v12731_v35, 2  ;;  %v4761_v26 = vrot.slane %v12748_v15, 2 }
 0x3e5   : > { %9542 = vmatmul.mubr.msk.f32.gmra.mrb[2].mxu1 %vm798_vm3, %v13177_v63  ;;  %v13223_v7 = vsel %vm1575_vm4, %v4751_v45, %v4752_v18  ;;  %v4762_v45 = vrot.slane %v12750_v31, 2 }
 0x3e6   : > { %9544 = vmatprep.mubr.msk.f32.mxu1 %vm798_vm3, %v13183_v6  ;;  %10025 = vmatpush3.bf16.msra.mxu1 %v10022_v41  ;;  %v13204_v41 = vsel %vm1575_vm4, %v4742_v10, %v4744_v39  ;;  %v4754_v10 = vrot.slane %v12977_v47, 2  ;;  %14644 = vst [vmem:[#allocation61_spill] sm:$0xff] %v13223_v7  ;;  %v4757_v39 = vrot.slane %v12733_v53, 2 }
 0x3e7   : > { %10027 = vmatprep.subr.bf16.mxu1 %v13174_v19  ;;  %v13249_v8 = vsel %vm1575_vm4, %v4761_v26, %v4762_v45  ;;  %v4772_v26 = vrot.slane %v12790_v57, 2 }
 0x3e8   : > { %v13230_v58 = vsel %vm1575_vm4, %v4752_v18, %v4754_v10  ;;  %v13236_v47 = vsel %vm1575_vm4, %v4756_v60, %v4757_v39  ;;  %v4764_v18 = vrot.slane %v13007_v30, 2  ;;  %14646 = vst [vmem:[#allocation63_spill] sm:$0xff] %v13249_v8  ;;  %v4766_v10 = vrot.slane %v12769_v20, 2 }
 0x3e9   : > { %9545 = vmatmul.mubr.msk.f32.gmra.mrb[4].mxu1 %vm798_vm3, %v13191_v2  ;;  %14645 = vst [vmem:[#allocation62_spill] sm:$0xff] %v13236_v47  ;;  %v4767_v60 = vrot.slane %v12771_v17, 2 }
 0x3ea   : > { %9547 = vmatprep.mubr.msk.f32.mxu1 %vm798_vm3, %v13197_v25 }
 0x3eb   : > { %v13262_v30 = vsel %vm1575_vm4, %v4766_v10, %v4767_v60  ;;  %v4777_v10 = vrot.slane %v12812_v51, 2 }
 0x3ec   : > { %14647 = vst [vmem:[#allocation64_spill] sm:$0xff] %v13262_v30 }
 0x3ed   : > { %9548 = vmatmul.mubr.msk.f32.gmra.mrb[6].mxu1 %vm798_vm3, %v13204_v41 }
 0x3ee   : > { %9550 = vmatprep.mubr.msk.f32.mxu1 %vm798_vm3, %v13210_v37 }
 0x3f1   : > { %9551 = vmatmul.mubr.msk.f32.gmra.mrb[8].mxu1 %vm798_vm3, %v13217_v24 }
 0x3f2   : > { %9553 = vmatprep.mubr.msk.f32.mxu1 %vm798_vm3, %v13223_v7  ;;  %v13243_v7 = vsel %vm1575_vm4, %v4757_v39, %v4759_v22  ;;  %v4769_v39 = vrot.slane %v13022_v32, 2  ;;  %v4771_v22 = vrot.slane %v12788_v12, 2 }
 0x3f4   : > { %v13275_v32 = vsel %vm1575_vm4, %v4771_v22, %v4772_v26  ;;  %v4782_v22 = vrot.slane %v12830_v16, 2 }
 0x3f5   : > { %9554 = vmatmul.mubr.msk.f32.gmra.mrb[10].mxu1 %vm798_vm3, %v13230_v58  ;;  %14648 = vst [vmem:[#allocation65_spill] sm:$0xff] %v13275_v32 }
 0x3f6   : > { %9556 = vmatprep.mubr.msk.f32.mxu1 %vm798_vm3, %v13236_v47  ;;  %v13256_v47 = vsel %vm1575_vm4, %v4762_v45, %v4764_v18  ;;  %v4774_v45 = vrot.slane %v13037_v3, 2  ;;  %v4776_v18 = vrot.slane %v12810_v52, 2 }
 0x3f8   : > { %v13288_v3 = vsel %vm1575_vm4, %v4776_v18, %v4777_v10  ;;  %v4787_v18 = vrot.slane %v12845_v48, 2 }
 0x3f9   : > { %9557 = vmatmul.mubr.msk.f32.gmra.mrb[12].mxu1 %vm798_vm3, %v13243_v7  ;;  %14649 = vst [vmem:[#allocation66_spill] sm:$0xff] %v13288_v3 }
 0x3fa   : > { %9559 = vmatprep.mubr.msk.f32.mxu1 %vm798_vm3, %v13249_v8  ;;  %v13269_v8 = vsel %vm1575_vm4, %v4767_v60, %v4769_v39  ;;  %v4779_v60 = vrot.slane %v13052_v38, 2  ;;  %v4781_v39 = vrot.slane %v12823_v1, 2 }
 0x3fc   : > { %v13301_v38 = vsel %vm1575_vm4, %v4781_v39, %v4782_v22  ;;  %v4792_v39 = vrot.slane %v12863_v54, 2 }
 0x3fd   : > { %9560 = vmatmul.mubr.msk.f32.gmra.mrb[14].mxu1 %vm798_vm3, %v13256_v47  ;;  %14651 = vst [vmem:[#allocation68_spill] sm:$0xff] %v13301_v38 }
 0x3fe   : > { %9562 = vmatprep.mubr.msk.f32.mxu1 %vm798_vm3, %v13262_v30  ;;  %v13282_v30 = vsel %vm1575_vm4, %v4772_v26, %v4774_v45  ;;  %v4784_v26 = vrot.slane %v13067_v55, 2  ;;  %v4786_v45 = vrot.slane %v12837_v56, 2 }
 0x400   : > { %v13314_v55 = vsel %vm1575_vm4, %v4786_v45, %v4787_v18  ;;  %v4797_v45 = vrot.slane %v12879_v29, 2 }
 0x401   : > { %9563 = vmatmul.mubr.msk.f32.gmra.mrb[16].mxu1 %vm798_vm3, %v13269_v8  ;;  %14652 = vst [vmem:[#allocation69_spill] sm:$0xff] %v13314_v55 }
 0x402   : > { %9565 = vmatprep.mubr.msk.f32.mxu1 %vm798_vm3, %v13275_v32  ;;  %v13295_v32 = vsel %vm1575_vm4, %v4777_v10, %v4779_v60  ;;  %v4789_v10 = vrot.slane %v13082_v36, 2  ;;  %v4791_v60 = vrot.slane %v12855_v33, 2 }
 0x403   : > { %14650 = vst [vmem:[#allocation67_spill] sm:$0xff] %v13295_v32 }
 0x404   : > { %v13327_v36 = vsel %vm1575_vm4, %v4791_v60, %v4792_v39  ;;  %v4802_v60 = vrot.slane %v12891_v62, 2 }
 0x405   : > { %9566 = vmatmul.mubr.msk.f32.gmra.mrb[18].mxu1 %vm798_vm3, %v13282_v30  ;;  %14654 = vst [vmem:[#allocation71_spill] sm:$0xff] %v13327_v36 }
 0x406   : > { %9568 = vmatprep.mubr.msk.f32.mxu1 %vm798_vm3, %v13288_v3  ;;  %v13308_v3 = vsel %vm1575_vm4, %v4782_v22, %v4784_v26  ;;  %v4794_v22 = vrot.slane %v13097_v0, 2  ;;  %v4796_v26 = vrot.slane %v12877_v49, 2 }
 0x408   : > { %v13340_v0 = vsel %vm1575_vm4, %v4796_v26, %v4797_v45  ;;  %v8084_v26 = vld [vmem:[%s14262_s4 + $0x90] sm:$0xff] }
 0x409   : > { %9569 = vmatmul.mubr.msk.f32.gmra.mrb[20].mxu1 %vm798_vm3, %v13295_v32  ;;  %14656 = vst [vmem:[#allocation73_spill] sm:$0xff] %v13340_v0 }
 0x40a   : > { %9571 = vmatprep.mubr.msk.f32.mxu1 %vm798_vm3, %v13301_v38  ;;  %v13321_v38 = vsel %vm1575_vm4, %v4787_v18, %v4789_v10  ;;  %v4799_v18 = vrot.slane %v13112_v21, 2  ;;  %v4801_v10 = vrot.slane %v12889_v28, 2 }
 0x40b   : > { %14653 = vst [vmem:[#allocation70_spill] sm:$0xff] %v13321_v38 }
 0x40c   : > { %v13353_v21 = vsel %vm1575_vm4, %v4801_v10, %v4802_v60  ;;  %v8118_v10 = vld [vmem:[%s14262_s4 + $0xa0] sm:$0xff] }
 0x40d   : > { %9572 = vmatmul.mubr.msk.f32.gmra.mrb[22].mxu1 %vm798_vm3, %v13308_v3  ;;  %14658 = vst [vmem:[#allocation75_spill] sm:$0xff] %v13353_v21 }
 0x40e   : > { %9574 = vmatprep.mubr.msk.f32.mxu1 %vm798_vm3, %v13314_v55  ;;  %v13334_v55 = vsel %vm1575_vm4, %v4792_v39, %v4794_v22  ;;  %v4804_v39 = vrot.slane %v13127_v40, 2  ;;  %v8085_v40 = vld [vmem:[%s14262_s4 + $0x98] sm:$0xff] }
 0x40f   : > { %14655 = vst [vmem:[#allocation72_spill] sm:$0xff] %v13334_v55 }
 0x410   : > { %v13358_v22 = vsel %vm1575_vm4, %v4802_v60, %v4804_v39  ;;  %v8119_v60 = vld [vmem:[%s14262_s4 + $0xa8] sm:$0xff]  ;;  %v10880_v39 = vld [vmem:[#allocation3 + $0x20] sm:$0xff] }
 0x411   : > { %9575 = vmatmul.mubr.msk.f32.gmra.mrb[24].mxu1 %vm798_vm3, %v13321_v38  ;;  %14659 = vst [vmem:[#allocation76_spill] sm:$0xff] %v13358_v22 }
 0x412   : > { %9577 = vmatprep.mubr.msk.f32.mxu1 %vm798_vm3, %v13327_v36  ;;  %v13347_v36 = vsel %vm1575_vm4, %v4797_v45, %v4799_v18  ;;  %v10879_v45 = vld [vmem:[#allocation3 + $0x18] sm:$0xff]  ;;  %v10030_v18 = vpack.c.bf16 %v8085_v40, %v8084_v26  ;;  %v14668_v26 = vld [vmem:[#allocation45_spill] sm:$0xff] }
 0x413   : > { %14657 = vst [vmem:[#allocation74_spill] sm:$0xff] %v13347_v36  ;;  %v14669_v40 = vld [vmem:[#allocation46_spill] sm:$0xff] }
 0x415   : > { %9578 = vmatmul.mubr.msk.f32.gmra.mrb[26].mxu1 %vm798_vm3, %v13334_v55 }
 0x416   : > { %9580 = vmatprep.mubr.msk.f32.mxu1 %vm798_vm3, %v13340_v0 }
 0x419   : > { %9581 = vmatmul.mubr.msk.f32.gmra.mrb[28].mxu1 %vm798_vm3, %v13347_v36 }
 0x41a   : > { %9583 = vmatprep.mubr.msk.f32.mxu1 %vm798_vm3, %v13353_v21 }
 0x41d   : > { %9584 = vmatmul.mubr.msk.f32.gmra.mrb[30].mxu1 %vm798_vm3, %v13358_v22  ;;  %v10034_v22 = vpack.c.bf16 %v8119_v60, %v8118_v10  ;;  %v14672_v10 = vld [vmem:[#allocation49_spill] sm:$0xff]  ;;  %v14673_v60 = vld [vmem:[#allocation50_spill] sm:$0xff] }
 0x41e   : > { %9594 = vmatprep.mubr.msk.f32.mxu1 %vm798_vm3, %v10879_v45  ;;  %v14670_v45 = vld [vmem:[#allocation47_spill] sm:$0xff] }
 0x421   : > { %9595 = vmatmul.mubr.msk.f32.vlgmr.msra.gmra.mrb[0].mxu1 %vm798_vm3, %v10880_v39  ;;  %v14674_v39 = vld [vmem:[#allocation51_spill] sm:$0xff] }
 0x422   : > { %9597 = vmatprep.mubr.msk.f32.mxu1 %vm798_vm3, %v12648_v5  ;;  %10029 = vmatpush3.bf16.msra.mxu1 %v13174_v19  ;;  %v13433_v5 = vld [vmem:[#allocation3 + $0x180] sm:$0xff] }
 0x423   : > { %10031 = vmatprep.subr.bf16.mxu1 %v10030_v18  ;;  %v14666_v19 = vld [vmem:[#allocation31_spill] sm:$0xff] }
 0x425   : > { %9598 = vmatmul.mubr.msk.f32.gmra.mrb[2].mxu1 %vm798_vm3, %v12651_v46  ;;  %v13437_v46 = vld [vmem:[#allocation3 + $0x188] sm:$0xff] }
 0x426   : > { %9600 = vmatprep.mubr.msk.f32.mxu1 %vm798_vm3, %v12668_v13  ;;  %10033 = vmatpush3.bf16.msra.mxu1 %v10030_v18  ;;  %v8120_v13 = vld [vmem:[%s14262_s4 + $0xb0] sm:$0xff]  ;;  %v14671_v18 = vld [vmem:[#allocation48_spill] sm:$0xff] }
 0x427   : > { %10035 = vmatprep.subr.bf16.mxu1 %v10034_v22 }
 0x429   : > { %9601 = vmatmul.mubr.msk.f32.gmra.mrb[4].mxu1 %vm798_vm3, %v12671_v59  ;;  %v8121_v59 = vld [vmem:[%s14262_s4 + $0xb8] sm:$0xff] }
 0x42a   : > { %9603 = vmatprep.mubr.msk.f32.mxu1 %vm798_vm3, %v12695_v14  ;;  %v10038_v14 = vpack.c.bf16 %v8121_v59, %v8120_v13  ;;  %v14675_v13 = vld [vmem:[#allocation52_spill] sm:$0xff]  ;;  %v14676_v59 = vld [vmem:[#allocation53_spill] sm:$0xff] }
 0x42d   : > { %9604 = vmatmul.mubr.msk.f32.gmra.mrb[6].mxu1 %vm798_vm3, %v12697_v27  ;;  %v8154_v27 = vld [vmem:[%s14262_s4 + $0xc0] sm:$0xff] }
 0x42e   : > { %9606 = vmatprep.mubr.msk.f32.mxu1 %vm798_vm3, %v12712_v61  ;;  %v8155_v61 = vld [vmem:[%s14262_s4 + $0xc8] sm:$0xff] }
 0x431   : > { %9607 = vmatmul.mubr.msk.f32.gmra.mrb[8].mxu1 %vm798_vm3, %v12714_v9  ;;  %v10042_v9 = vpack.c.bf16 %v8155_v61, %v8154_v27  ;;  %v14678_v27 = vld [vmem:[#allocation55_spill] sm:$0xff]  ;;  %v14679_v61 = vld [vmem:[#allocation56_spill] sm:$0xff] }
 0x432   : > { %9609 = vmatprep.mubr.msk.f32.mxu1 %vm798_vm3, %v12731_v35  ;;  %v14660_v35 = vld [vmem:[#allocation37_spill] sm:$0xff] }
 0x435   : > { %9610 = vmatmul.mubr.msk.f32.gmra.mrb[10].mxu1 %vm798_vm3, %v12733_v53  ;;  %v14661_v53 = vld [vmem:[#allocation38_spill] sm:$0xff] }
 0x436   : > { %9612 = vmatprep.mubr.msk.f32.mxu1 %vm798_vm3, %v12748_v15  ;;  %v14662_v15 = vld [vmem:[#allocation39_spill] sm:$0xff] }
 0x439   : > { %9613 = vmatmul.mubr.msk.f32.gmra.mrb[12].mxu1 %vm798_vm3, %v12750_v31  ;;  %v14663_v31 = vld [vmem:[#allocation40_spill] sm:$0xff] }
 0x43a   : > { %9615 = vmatprep.mubr.msk.f32.mxu1 %vm798_vm3, %v12769_v20 }
 0x43d   : > { %9616 = vmatmul.mubr.msk.f32.gmra.mrb[14].mxu1 %vm798_vm3, %v12771_v17 }
 0x43e   : > { %9618 = vmatprep.mubr.msk.f32.mxu1 %vm798_vm3, %v12788_v12 }
 0x441   : > { %9619 = vmatmul.mubr.msk.f32.gmra.mrb[16].mxu1 %vm798_vm3, %v12790_v57 }
 0x442   : > { %9621 = vmatprep.mubr.msk.f32.mxu1 %vm798_vm3, %v12810_v52 }
 0x445   : > { %9622 = vmatmul.mubr.msk.f32.gmra.mrb[18].mxu1 %vm798_vm3, %v12812_v51 }
 0x446   : > { %9624 = vmatprep.mubr.msk.f32.mxu1 %vm798_vm3, %v12823_v1 }
 0x449   : > { %9625 = vmatmul.mubr.msk.f32.gmra.mrb[20].mxu1 %vm798_vm3, %v12830_v16 }
 0x44a   : > { %9627 = vmatprep.mubr.msk.f32.mxu1 %vm798_vm3, %v12837_v56 }
 0x44d   : > { %9628 = vmatmul.mubr.msk.f32.gmra.mrb[22].mxu1 %vm798_vm3, %v12845_v48 }
 0x44e   : > { %9630 = vmatprep.mubr.msk.f32.mxu1 %vm798_vm3, %v12855_v33 }
 0x451   : > { %9631 = vmatmul.mubr.msk.f32.gmra.mrb[24].mxu1 %vm798_vm3, %v12863_v54 }
 0x452   : > { %9633 = vmatprep.mubr.msk.f32.mxu1 %vm798_vm3, %v12877_v49 }
 0x455   : > { %9634 = vmatmul.mubr.msk.f32.gmra.mrb[26].mxu1 %vm798_vm3, %v12879_v29 }
 0x456   : > { %9636 = vmatprep.mubr.msk.f32.mxu1 %vm798_vm3, %v12889_v28 }
 0x459   : > { %9637 = vmatmul.mubr.msk.f32.gmra.mrb[28].mxu1 %vm798_vm3, %v12891_v62 }
 0x45a   : > { %9639 = vmatprep.mubr.msk.f32.mxu1 %vm798_vm3, %v13433_v5 }
 0x45d   : > { %9640 = vmatmul.mubr.msk.f32.gmra.mrb[30].mxu1 %vm798_vm3, %v13437_v46 }
 0x45e   : > { %9650 = vmatprep.mubr.msk.f32.mxu1 %vm798_vm3, %v12924_v44  ;;  %v14664_v44 = vld [vmem:[#allocation42_spill] sm:$0xff] }
 0x461   : > { %9651 = vmatmul.mubr.msk.f32.vlgmr.msra.gmra.mrb[0].mxu1 %vm798_vm3, %v12936_v50  ;;  %v14665_v50 = vld [vmem:[#allocation43_spill] sm:$0xff] }
 0x462   : > { %9653 = vmatprep.mubr.msk.f32.mxu1 %vm798_vm3, %v12942_v4  ;;  %10037 = vmatpush3.bf16.msra.mxu1 %v10034_v22  ;;  %v14667_v22 = vld [vmem:[#allocation44_spill] sm:$0xff] }
 0x463   : > { %10039 = vmatprep.subr.bf16.mxu1 %v10038_v14 }
 0x465   : > { %9654 = vmatmul.mubr.msk.f32.gmra.mrb[2].mxu1 %vm798_vm3, %v12952_v11 }
 0x466   : > { %9656 = vmatprep.mubr.msk.f32.mxu1 %vm798_vm3, %v12958_v42  ;;  %10041 = vmatpush3.bf16.msra.mxu1 %v10038_v14  ;;  %v14677_v14 = vld [vmem:[#allocation54_spill] sm:$0xff] }
 0x467   : > { %10043 = vmatprep.subr.bf16.mxu1 %v10042_v9 }
 0x469   : > { %9657 = vmatmul.mubr.msk.f32.gmra.mrb[4].mxu1 %vm798_vm3, %v12967_v43 }
 0x46a   : > { %9659 = vmatprep.mubr.msk.f32.mxu1 %vm798_vm3, %v14660_v35 }
 0x46d   : > { %9660 = vmatmul.mubr.msk.f32.gmra.mrb[6].mxu1 %vm798_vm3, %v14661_v53 }
 0x46e   : > { %9662 = vmatprep.mubr.msk.f32.mxu1 %vm798_vm3, %v14662_v15 }
 0x471   : > { %9663 = vmatmul.mubr.msk.f32.gmra.mrb[8].mxu1 %vm798_vm3, %v14663_v31 }
 0x472   : > { %9665 = vmatprep.mubr.msk.f32.mxu1 %vm798_vm3, %v14664_v44 }
 0x475   : > { %9666 = vmatmul.mubr.msk.f32.gmra.mrb[10].mxu1 %vm798_vm3, %v14665_v50 }
 0x476   : > { %9668 = vmatprep.mubr.msk.f32.mxu1 %vm798_vm3, %v14666_v19 }
 0x479   : > { %9669 = vmatmul.mubr.msk.f32.gmra.mrb[12].mxu1 %vm798_vm3, %v14667_v22 }
 0x47a   : > { %9671 = vmatprep.mubr.msk.f32.mxu1 %vm798_vm3, %v14668_v26 }
 0x47d   : > { %9672 = vmatmul.mubr.msk.f32.gmra.mrb[14].mxu1 %vm798_vm3, %v14669_v40 }
 0x47e   : > { %9674 = vmatprep.mubr.msk.f32.mxu1 %vm798_vm3, %v14670_v45 }
 0x481   : > { %9675 = vmatmul.mubr.msk.f32.gmra.mrb[16].mxu1 %vm798_vm3, %v14671_v18 }
 0x482   : > { %9677 = vmatprep.mubr.msk.f32.mxu1 %vm798_vm3, %v14672_v10  ;;  %v14681_v10 = vld [vmem:[#allocation58_spill] sm:$0xff] }
 0x485   : > { %9678 = vmatmul.mubr.msk.f32.gmra.mrb[18].mxu1 %vm798_vm3, %v14673_v60  ;;  %v5402_v60 = vrot.slane %v13437_v46, 1 }
 0x486   : > { %9680 = vmatprep.mubr.msk.f32.mxu1 %vm798_vm3, %v14674_v39  ;;  %v5401_v39 = vrot.slane %v13433_v5, 1 }
 0x489   : > { %9681 = vmatmul.mubr.msk.f32.gmra.mrb[20].mxu1 %vm798_vm3, %v14675_v13  ;;  %v14680_v13 = vld [vmem:[#allocation57_spill] sm:$0xff] }
 0x48a   : > { %9683 = vmatprep.mubr.msk.f32.mxu1 %vm798_vm3, %v14676_v59  ;;  %v3911_v59 = vld [vmem:[#allocation3 + $0x190] sm:$0x3] }
 0x48d   : > { %9684 = vmatmul.mubr.msk.f32.gmra.mrb[22].mxu1 %vm798_vm3, %v14677_v14  ;;  %v5404_v14 = vrot.slane %v3911_v59, 1 }
 0x48e   : > { %9686 = vmatprep.mubr.msk.f32.mxu1 %vm798_vm3, %v13108_v23 }
 0x491   : > { %9687 = vmatmul.mubr.msk.f32.gmra.mrb[24].mxu1 %vm798_vm3, %v14678_v27  ;;  %v13516_v27 = vsel %vm1168_vm5, %v5401_v39, %v5402_v60 }
 0x492   : > { %9689 = vmatprep.mubr.msk.f32.mxu1 %vm798_vm3, %v14679_v61  ;;  %v13521_v61 = vsel %vm1168_vm5, %v5402_v60, %v5404_v14  ;;  %v8190_v60 = vld [vmem:[%s14262_s4 + $0xe0] sm:$0xff]  ;;  %v8191_v14 = vld [vmem:[%s14262_s4 + $0xe8] sm:$0xff] }
 0x493   : > { %14682 = vst [vmem:[#allocation37_spill] sm:$0xff] %v13521_v61 }
 0x495   : > { %9690 = vmatmul.mubr.msk.f32.gmra.mrb[26].mxu1 %vm798_vm3, %v14680_v13  ;;  %v8156_v13 = vld [vmem:[%s14262_s4 + $0xd0] sm:$0xff] }
 0x496   : > { %9692 = vmatprep.mubr.msk.f32.mxu1 %vm798_vm3, %v14681_v10  ;;  %v8157_v10 = vld [vmem:[%s14262_s4 + $0xd8] sm:$0xff] }
 0x497   : > { %v10046_v39 = vpack.c.bf16 %v8157_v10, %v8156_v13  ;;  %v14687_v10 = vld [vmem:[#allocation64_spill] sm:$0xff]  ;;  %v14688_v13 = vld [vmem:[#allocation65_spill] sm:$0xff] }
 0x499   : > { %9693 = vmatmul.mubr.msk.f32.gmra.mrb[28].mxu1 %vm798_vm3, %v13143_v34  ;;  %v14683_v34 = vld [vmem:[#allocation60_spill] sm:$0xff] }
 0x49a   : > { %9695 = vmatprep.mubr.msk.f32.mxu1 %vm798_vm3, %v13516_v27 }
 0x49d   : > { %9696 = vmatmul.mubr.msk.f32.gmra.mrb[30].mxu1 %vm798_vm3, %v13521_v61  ;;  %v10050_v61 = vpack.c.bf16 %v8191_v14, %v8190_v60  ;;  %v14690_v60 = vld [vmem:[#allocation68_spill] sm:$0xff]  ;;  %v14691_v14 = vld [vmem:[#allocation69_spill] sm:$0xff] }
 0x49e   : > { %9706 = vmatprep.mubr.msk.f32.mxu1 %vm798_vm3, %v14683_v34  ;;  %v14684_v34 = vld [vmem:[#allocation61_spill] sm:$0xff] }
 0x4a1   : > { %9707 = vmatmul.mubr.msk.f32.vlgmr.msra.gmra.mrb[0].mxu1 %vm798_vm3, %v13177_v63  ;;  %v14685_v63 = vld [vmem:[#allocation62_spill] sm:$0xff] }
 0x4a2   : > { %9709 = vmatprep.mubr.msk.f32.mxu1 %vm798_vm3, %v13183_v6  ;;  %10045 = vmatpush3.bf16.msra.mxu1 %v10042_v9  ;;  %v14686_v9 = vld [vmem:[#allocation63_spill] sm:$0xff] }
 0x4a3   : > { %10047 = vmatprep.subr.bf16.mxu1 %v10046_v39 }
 0x4a5   : > { %9710 = vmatmul.mubr.msk.f32.gmra.mrb[2].mxu1 %vm798_vm3, %v13191_v2 }
 0x4a6   : > { %9712 = vmatprep.mubr.msk.f32.mxu1 %vm798_vm3, %v13197_v25  ;;  %10049 = vmatpush3.bf16.msra.mxu1 %v10046_v39  ;;  %v14689_v39 = vld [vmem:[#allocation66_spill] sm:$0xff] }
 0x4a7   : > { %10051 = vmatprep.subr.bf16.mxu1 %v10050_v61 }
 0x4a9   : > { %9713 = vmatmul.mubr.msk.f32.gmra.mrb[4].mxu1 %vm798_vm3, %v13204_v41 }
 0x4aa   : > { %9715 = vmatprep.mubr.msk.f32.mxu1 %vm798_vm3, %v13210_v37 }
 0x4ad   : > { %9716 = vmatmul.mubr.msk.f32.gmra.mrb[6].mxu1 %vm798_vm3, %v13217_v24 }
 0x4ae   : > { %9718 = vmatprep.mubr.msk.f32.mxu1 %vm798_vm3, %v14684_v34 }
 0x4b1   : > { %9719 = vmatmul.mubr.msk.f32.gmra.mrb[8].mxu1 %vm798_vm3, %v13230_v58 }
 0x4b2   : > { %9721 = vmatprep.mubr.msk.f32.mxu1 %vm798_vm3, %v14685_v63 }
 0x4b5   : > { %9722 = vmatmul.mubr.msk.f32.gmra.mrb[10].mxu1 %vm798_vm3, %v13243_v7 }
 0x4b6   : > { %9724 = vmatprep.mubr.msk.f32.mxu1 %vm798_vm3, %v14686_v9 }
 0x4b9   : > { %9725 = vmatmul.mubr.msk.f32.gmra.mrb[12].mxu1 %vm798_vm3, %v13256_v47 }
 0x4ba   : > { %9727 = vmatprep.mubr.msk.f32.mxu1 %vm798_vm3, %v14687_v10 }
 0x4bd   : > { %9728 = vmatmul.mubr.msk.f32.gmra.mrb[14].mxu1 %vm798_vm3, %v13269_v8 }
 0x4be   : > { %9730 = vmatprep.mubr.msk.f32.mxu1 %vm798_vm3, %v14688_v13  ;;  %v14692_v13 = vld [vmem:[#allocation71_spill] sm:$0xff] }
 0x4c1   : > { %9731 = vmatmul.mubr.msk.f32.gmra.mrb[16].mxu1 %vm798_vm3, %v13282_v30 }
 0x4c2   : > { %9733 = vmatprep.mubr.msk.f32.mxu1 %vm798_vm3, %v14689_v39 }
 0x4c5   : > { %9734 = vmatmul.mubr.msk.f32.gmra.mrb[18].mxu1 %vm798_vm3, %v13295_v32  ;;  %v5673_v32 = vrot.slane %v13437_v46, 2 }
 0x4c6   : > { %9736 = vmatprep.mubr.msk.f32.mxu1 %vm798_vm3, %v14690_v60  ;;  %v5672_v60 = vrot.slane %v13433_v5, 2 }
 0x4c9   : > { %9737 = vmatmul.mubr.msk.f32.gmra.mrb[20].mxu1 %vm798_vm3, %v13308_v3 }
 0x4ca   : > { %9739 = vmatprep.mubr.msk.f32.mxu1 %vm798_vm3, %v14691_v14  ;;  %v14693_v14 = vld [vmem:[#allocation76_spill] sm:$0xff] }
 0x4cd   : > { %9740 = vmatmul.mubr.msk.f32.gmra.mrb[22].mxu1 %vm798_vm3, %v13321_v38  ;;  %v5675_v38 = vrot.slane %v3911_v59, 2  ;;  %v8193_v59 = vld [vmem:[%s14262_s4 + $0xf8] sm:$0xff] }
 0x4ce   : > { %9742 = vmatprep.mubr.msk.f32.mxu1 %vm798_vm3, %v14692_v13  ;;  %v13600_v13 = vsel %vm1575_vm4, %v5672_v60, %v5673_v32 }
 0x4cf   : > { %14694 = vst [vmem:[#allocation38_spill] sm:$0xff] %v13600_v13 }
 0x4d1   : > { %9743 = vmatmul.mubr.msk.f32.gmra.mrb[24].mxu1 %vm798_vm3, %v13334_v55  ;;  %v10884_v55 = vld [vmem:[#allocation3 + $0x50] sm:$0xff] }
 0x4d2   : > { %9745 = vmatprep.mubr.msk.f32.mxu1 %vm798_vm3, %v13340_v0  ;;  %v13605_v0 = vsel %vm1575_vm4, %v5673_v32, %v5675_v38  ;;  %v8226_v32 = vld [vmem:[%s14262_s4 + $0x100] sm:$0xff]  ;;  %v8227_v38 = vld [vmem:[%s14262_s4 + $0x108] sm:$0xff] }
 0x4d3   : > { %14695 = vst [vmem:[#allocation39_spill] sm:$0xff] %v13605_v0 }
 0x4d5   : > { %9746 = vmatmul.mubr.msk.f32.gmra.mrb[26].mxu1 %vm798_vm3, %v13347_v36  ;;  %v8192_v36 = vld [vmem:[%s14262_s4 + $0xf0] sm:$0xff] }
 0x4d6   : > { %9748 = vmatprep.mubr.msk.f32.mxu1 %vm798_vm3, %v13353_v21  ;;  %v10054_v60 = vpack.c.bf16 %v8193_v59, %v8192_v36  ;;  %v10883_v21 = vld [vmem:[#allocation3 + $0x48] sm:$0xff]  ;;  %v10885_v36 = vld [vmem:[#allocation3 + $0x60] sm:$0xff]  ;;  %v10887_v59 = vld [vmem:[#allocation3 + $0x78] sm:$0xff] }
 0x4d9   : > { %9749 = vmatmul.mubr.msk.f32.gmra.mrb[28].mxu1 %vm798_vm3, %v14693_v14  ;;  %v10881_v14 = vld [vmem:[#allocation3 + $0x30] sm:$0xff] }
 0x4da   : > { %9751 = vmatprep.mubr.msk.f32.mxu1 %vm798_vm3, %v13600_v13  ;;  %v10882_v13 = vld [vmem:[#allocation3 + $0x38] sm:$0xff] }
 0x4dd   : > { %9752 = vmatmul.mubr.msk.f32.gmra.mrb[30].mxu1 %vm798_vm3, %v13605_v0  ;;  %v10058_v0 = vpack.c.bf16 %v8227_v38, %v8226_v32  ;;  %v3919_v32 = vld [vmem:[%s11007_s10 + $0x20] sm:$0xff] }
 0x4de   : > { %9762 = vmatprep.mubr.msk.f32.mxu1 %vm798_vm3, %v10881_v14  ;;  %v10886_v14 = vld [vmem:[#allocation3 + $0x68] sm:$0xff] }
 0x4e1   : > { %9763 = vmatmul.mubr.msk.f32.vlgmr.msra.gmra.mrb[0].mxu1 %vm798_vm3, %v10882_v13  ;;  %v10888_v13 = vld [vmem:[#allocation3 + $0x80] sm:$0xff] }
 0x4e2   : > { %9765 = vmatprep.mubr.msk.f32.mxu1 %vm798_vm3, %v10883_v21  ;;  %10053 = vmatpush3.bf16.msra.mxu1 %v10050_v61  ;;  %v10889_v21 = vld [vmem:[#allocation3 + $0x90] sm:$0xff]  ;;  %v10890_v61 = vld [vmem:[#allocation3 + $0x98] sm:$0xff] }
 0x4e3   : > { %10055 = vmatprep.subr.bf16.mxu1 %v10054_v60 }
 0x4e5   : > { %9766 = vmatmul.mubr.msk.f32.gmra.mrb[2].mxu1 %vm798_vm3, %v10884_v55  ;;  %v10891_v55 = vld [vmem:[#allocation3 + $0xa8] sm:$0xff] }
 0x4e6   : > { %9768 = vmatprep.mubr.msk.f32.mxu1 %vm798_vm3, %v10885_v36  ;;  %10057 = vmatpush3.bf16.msra.mxu1 %v10054_v60  ;;  %v10892_v60 = vld [vmem:[#allocation3 + $0xb0] sm:$0xff] }
 0x4e7   : > { %10059 = vmatprep.subr.bf16.mxu1 %v10058_v0 }
 0x4e9   : > { %9769 = vmatmul.mubr.msk.f32.gmra.mrb[4].mxu1 %vm798_vm3, %v10886_v14 }
 0x4ea   : > { %9771 = vmatprep.mubr.msk.f32.mxu1 %vm798_vm3, %v10887_v59 }
 0x4ed   : > { %9772 = vmatmul.mubr.msk.f32.gmra.mrb[6].mxu1 %vm798_vm3, %v10888_v13  ;;  %v3922_v13 = vld [vmem:[%s11007_s10 + $0x38] sm:$0xff] }
 0x4ee   : > { %9774 = vmatprep.mubr.msk.f32.mxu1 %vm798_vm3, %v10889_v21  ;;  %v3921_v21 = vld [vmem:[%s11007_s10 + $0x30] sm:$0xff] }
 0x4f1   : > { %9775 = vmatmul.mubr.msk.f32.gmra.mrb[8].mxu1 %vm798_vm3, %v10890_v61 }
 0x4f2   : > { %9777 = vmatprep.mubr.msk.f32.mxu1 %vm798_vm3, %v10891_v55 }
 0x4f5   : > { %9778 = vmatmul.mubr.msk.f32.gmra.mrb[10].mxu1 %vm798_vm3, %v10892_v60 }
 0x4f6   : > { %9780 = vmatprep.mubr.msk.f32.mxu1 %vm798_vm3, %v12769_v20  ;;  %v13667_v20 = vld [vmem:[#allocation3 + $0x198] sm:$0xff] }
 0x4f9   : > { %9781 = vmatmul.mubr.msk.f32.gmra.mrb[12].mxu1 %vm798_vm3, %v12771_v17  ;;  %v13673_v17 = vld [vmem:[#allocation3 + $0x1a0] sm:$0xff] }
 0x4fa   : > { %9783 = vmatprep.mubr.msk.f32.mxu1 %vm798_vm3, %v12788_v12  ;;  %v8228_v12 = vld [vmem:[%s14262_s4 + $0x110] sm:$0xff] }
 0x4fd   : > { %9784 = vmatmul.mubr.msk.f32.gmra.mrb[14].mxu1 %vm798_vm3, %v12790_v57  ;;  %v8229_v57 = vld [vmem:[%s14262_s4 + $0x118] sm:$0xff] }
 0x4fe   : > { %9786 = vmatprep.mubr.msk.f32.mxu1 %vm798_vm3, %v12810_v52  ;;  %v14696_v52 = vld [vmem:[#allocation49_spill] sm:$0xff] }
 0x501   : > { %9787 = vmatmul.mubr.msk.f32.gmra.mrb[16].mxu1 %vm798_vm3, %v12812_v51  ;;  %v14697_v51 = vld [vmem:[#allocation50_spill] sm:$0xff] }
 0x502   : > { %9789 = vmatprep.mubr.msk.f32.mxu1 %vm798_vm3, %v12823_v1  ;;  %v14699_v1 = vld [vmem:[#allocation52_spill] sm:$0xff] }
 0x505   : > { %9790 = vmatmul.mubr.msk.f32.gmra.mrb[18].mxu1 %vm798_vm3, %v12830_v16  ;;  %v14700_v16 = vld [vmem:[#allocation53_spill] sm:$0xff] }
 0x506   : > { %9792 = vmatprep.mubr.msk.f32.mxu1 %vm798_vm3, %v12837_v56  ;;  %v14701_v56 = vld [vmem:[#allocation54_spill] sm:$0xff] }
 0x509   : > { %9793 = vmatmul.mubr.msk.f32.gmra.mrb[20].mxu1 %vm798_vm3, %v12845_v48  ;;  %v14702_v48 = vld [vmem:[#allocation55_spill] sm:$0xff] }
 0x50a   : > { %9795 = vmatprep.mubr.msk.f32.mxu1 %vm798_vm3, %v12855_v33  ;;  %v14703_v33 = vld [vmem:[#allocation56_spill] sm:$0xff] }
 0x50d   : > { %9796 = vmatmul.mubr.msk.f32.gmra.mrb[22].mxu1 %vm798_vm3, %v12863_v54  ;;  %v14704_v54 = vld [vmem:[#allocation57_spill] sm:$0xff] }
 0x50e   : > { %9798 = vmatprep.mubr.msk.f32.mxu1 %vm798_vm3, %v12877_v49  ;;  %v14698_v49 = vld [vmem:[#allocation51_spill] sm:$0xff] }
 0x511   : > { %9799 = vmatmul.mubr.msk.f32.gmra.mrb[24].mxu1 %vm798_vm3, %v12879_v29  ;;  %v10062_v29 = vpack.c.bf16 %v8229_v57, %v8228_v12  ;;  %v3924_v57 = vld [vmem:[%s11007_s10 + $0x48] sm:$0xff] }
 0x512   : > { %9801 = vmatprep.mubr.msk.f32.mxu1 %vm798_vm3, %v12889_v28  ;;  %v14705_v28 = vld [vmem:[#allocation58_spill] sm:$0xff] }
 0x515   : > { %9802 = vmatmul.mubr.msk.f32.gmra.mrb[26].mxu1 %vm798_vm3, %v12891_v62  ;;  %v6212_v62 = vrot.slane %v13667_v20, 1 }
 0x516   : > { %9804 = vmatprep.mubr.msk.f32.mxu1 %vm798_vm3, %v13433_v5 }
 0x519   : > { %9805 = vmatmul.mubr.msk.f32.gmra.mrb[28].mxu1 %vm798_vm3, %v13437_v46  ;;  %v14718_v46 = vld [vmem:[#allocation76_spill] sm:$0xff] }
 0x51a   : > { %9807 = vmatprep.mubr.msk.f32.mxu1 %vm798_vm3, %v13667_v20 }
 0x51d   : > { %9808 = vmatmul.mubr.msk.f32.gmra.mrb[30].mxu1 %vm798_vm3, %v13673_v17 }
 0x51e   : > { %9818 = vmatprep.mubr.msk.f32.mxu1 %vm798_vm3, %v12942_v4  ;;  %v6213_v4 = vrot.slane %v13673_v17, 1 }
 0x521   : > { %9819 = vmatmul.mubr.msk.f32.vlgmr.msra.gmra.mrb[0].mxu1 %vm798_vm3, %v12952_v11  ;;  %v3914_v11 = vld [vmem:[#allocation3 + $0x1a8] sm:$0x3] }
 0x522   : > { %9821 = vmatprep.mubr.msk.f32.mxu1 %vm798_vm3, %v12958_v42  ;;  %10061 = vmatpush3.bf16.msra.mxu1 %v10058_v0  ;;  %v14706_v42 = vld [vmem:[#allocation59_spill] sm:$0xff]  ;;  %v14707_v0 = vld [vmem:[#allocation37_spill] sm:$0xff] }
 0x523   : > { %10063 = vmatprep.subr.bf16.mxu1 %v10062_v29 }
 0x525   : > { %9822 = vmatmul.mubr.msk.f32.gmra.mrb[2].mxu1 %vm798_vm3, %v12967_v43  ;;  %v6215_v43 = vrot.slane %v3914_v11, 1 }
 0x526   : > { %9824 = vmatprep.mubr.msk.f32.mxu1 %vm798_vm3, %v14660_v35  ;;  %10065 = vmatpush3.bf16.msra.mxu1 %v10062_v29  ;;  %v14719_v35 = vld [vmem:[#allocation38_spill] sm:$0xff]  ;;  %v3923_v29 = vld [vmem:[%s11007_s10 + $0x40] sm:$0xff] }
 0x527   : > { %v6216_v5 = vsel %vm1168_vm5, %v6213_v4, %v6215_v43  ;;  %v3928_v43 = vld [vmem:[%s11007_s10 + $0x68] sm:$0xff] }
 0x529   : > { %9825 = vmatmul.mubr.msk.f32.gmra.mrb[4].mxu1 %vm798_vm3, %v14661_v53  ;;  %v6486_v53 = vrot.slane %v3914_v11, 2 }
 0x52a   : > { %9827 = vmatprep.mubr.msk.f32.mxu1 %vm798_vm3, %v14662_v15 }
 0x52d   : > { %9828 = vmatmul.mubr.msk.f32.gmra.mrb[6].mxu1 %vm798_vm3, %v14663_v31  ;;  %v14720_v31 = vld [vmem:[#allocation39_spill] sm:$0xff] }
 0x52e   : > { %9830 = vmatprep.mubr.msk.f32.mxu1 %vm798_vm3, %v14664_v44 }
 0x531   : > { %9831 = vmatmul.mubr.msk.f32.gmra.mrb[8].mxu1 %vm798_vm3, %v14665_v50  ;;  %v3916_v50 = vld [vmem:[%s11007_s10 + $0x8] sm:$0xff] }
 0x532   : > { %9833 = vmatprep.mubr.msk.f32.mxu1 %vm798_vm3, %v14666_v19  ;;  %v3915_v19 = vld [vmem:[%s11007_s10] sm:$0xff] }
 0x535   : > { %9834 = vmatmul.mubr.msk.f32.gmra.mrb[10].mxu1 %vm798_vm3, %v14667_v22 }
 0x536   : > { %9836 = vmatprep.mubr.msk.f32.mxu1 %vm798_vm3, %v14668_v26 }
 0x539   : > { %9837 = vmatmul.mubr.msk.f32.gmra.mrb[12].mxu1 %vm798_vm3, %v14669_v40 }
 0x53a   : > { %9839 = vmatprep.mubr.msk.f32.mxu1 %vm798_vm3, %v14670_v45 }
 0x53d   : > { %9840 = vmatmul.mubr.msk.f32.gmra.mrb[14].mxu1 %vm798_vm3, %v14671_v18  ;;  %v3918_v18 = vld [vmem:[%s11007_s10 + $0x18] sm:$0xff] }
 0x53e   : > { %9842 = vmatprep.mubr.msk.f32.mxu1 %vm798_vm3, %v14696_v52 }
 0x541   : > { %9843 = vmatmul.mubr.msk.f32.gmra.mrb[16].mxu1 %vm798_vm3, %v14697_v51 }
 0x542   : > { %9845 = vmatprep.mubr.msk.f32.mxu1 %vm798_vm3, %v14698_v49 }
 0x545   : > { %9846 = vmatmul.mubr.msk.f32.gmra.mrb[18].mxu1 %vm798_vm3, %v14699_v1 }
 0x546   : > { %9848 = vmatprep.mubr.msk.f32.mxu1 %vm798_vm3, %v14700_v16 }
 0x549   : > { %9849 = vmatmul.mubr.msk.f32.gmra.mrb[20].mxu1 %vm798_vm3, %v14701_v56 }
 0x54a   : > { %9851 = vmatprep.mubr.msk.f32.mxu1 %vm798_vm3, %v13108_v23  ;;  %v6214_v23 = vsel %vm1168_vm5, %v6212_v62, %v6213_v4 }
 0x54d   : > { %9852 = vmatmul.mubr.msk.f32.gmra.mrb[22].mxu1 %vm798_vm3, %v14702_v48  ;;  %v3926_v48 = vld [vmem:[%s11007_s10 + $0x58] sm:$0xff] }
 0x54e   : > { %9854 = vmatprep.mubr.msk.f32.mxu1 %vm798_vm3, %v14703_v33  ;;  %v3925_v33 = vld [vmem:[%s11007_s10 + $0x50] sm:$0xff] }
 0x551   : > { %9855 = vmatmul.mubr.msk.f32.gmra.mrb[24].mxu1 %vm798_vm3, %v14704_v54 }
 0x552   : > { %9857 = vmatprep.mubr.msk.f32.mxu1 %vm798_vm3, %v14705_v28 }
 0x555   : > { %9858 = vmatmul.mubr.msk.f32.gmra.mrb[26].mxu1 %vm798_vm3, %v14706_v42 }
 0x556   : > { %9860 = vmatprep.mubr.msk.f32.mxu1 %vm798_vm3, %v13516_v27  ;;  %v3917_v27 = vld [vmem:[%s11007_s10 + $0x10] sm:$0xff] }
 0x559   : > { %9861 = vmatmul.mubr.msk.f32.gmra.mrb[28].mxu1 %vm798_vm3, %v14707_v0 }
 0x55a   : > { %9863 = vmatprep.mubr.msk.f32.mxu1 %vm798_vm3, %v6214_v23  ;;  %v3927_v23 = vld [vmem:[%s11007_s10 + $0x60] sm:$0xff] }
 0x55d   : > { %9864 = vmatmul.mubr.msk.f32.gmra.mrb[30].mxu1 %vm798_vm3, %v6216_v5 }
 0x55e   : > { %9874 = vmatprep.mubr.msk.f32.mxu1 %vm798_vm3, %v13183_v6  ;;  %v14708_v6 = vld [vmem:[#allocation65_spill] sm:$0xff] }
 0x561   : > { %9875 = vmatmul.mubr.msk.f32.vlgmr.msra.gmra.mrb[0].mxu1 %vm798_vm3, %v13191_v2  ;;  %v14709_v2 = vld [vmem:[#allocation67_spill] sm:$0xff] }
 0x562   : > { %9877 = vmatprep.mubr.msk.f32.mxu1 %vm798_vm3, %v13197_v25  ;;  %v14710_v25 = vld [vmem:[#allocation68_spill] sm:$0xff] }
 0x565   : > { %9878 = vmatmul.mubr.msk.f32.gmra.mrb[2].mxu1 %vm798_vm3, %v13204_v41  ;;  %v14711_v41 = vld [vmem:[#allocation69_spill] sm:$0xff] }
 0x566   : > { %9880 = vmatprep.mubr.msk.f32.mxu1 %vm798_vm3, %v13210_v37  ;;  %v14712_v37 = vld [vmem:[#allocation70_spill] sm:$0xff] }
 0x569   : > { %9881 = vmatmul.mubr.msk.f32.gmra.mrb[4].mxu1 %vm798_vm3, %v13217_v24  ;;  %v14713_v24 = vld [vmem:[#allocation71_spill] sm:$0xff] }
 0x56a   : > { %9883 = vmatprep.mubr.msk.f32.mxu1 %vm798_vm3, %v14684_v34 }
 0x56d   : > { %9884 = vmatmul.mubr.msk.f32.gmra.mrb[6].mxu1 %vm798_vm3, %v13230_v58  ;;  %v14715_v58 = vld [vmem:[#allocation73_spill] sm:$0xff] }
 0x56e   : > { %9886 = vmatprep.mubr.msk.f32.mxu1 %vm798_vm3, %v14685_v63 }
 0x571   : > { %9887 = vmatmul.mubr.msk.f32.gmra.mrb[8].mxu1 %vm798_vm3, %v13243_v7  ;;  %v14714_v7 = vld [vmem:[#allocation72_spill] sm:$0xff] }
 0x572   : > { %9889 = vmatprep.mubr.msk.f32.mxu1 %vm798_vm3, %v14686_v9 }
 0x575   : > { %9890 = vmatmul.mubr.msk.f32.gmra.mrb[10].mxu1 %vm798_vm3, %v13256_v47  ;;  %v14716_v47 = vld [vmem:[#allocation74_spill] sm:$0xff] }
 0x576   : > { %9892 = vmatprep.mubr.msk.f32.mxu1 %vm798_vm3, %v14687_v10 }
 0x579   : > { %9893 = vmatmul.mubr.msk.f32.gmra.mrb[12].mxu1 %vm798_vm3, %v13269_v8  ;;  %v14717_v8 = vld [vmem:[#allocation75_spill] sm:$0xff] }
 0x57a   : > { %9895 = vmatprep.mubr.msk.f32.mxu1 %vm798_vm3, %v14708_v6 }
 0x57d   : > { %9896 = vmatmul.mubr.msk.f32.gmra.mrb[14].mxu1 %vm798_vm3, %v13282_v30  ;;  %v6483_v30 = vrot.slane %v13667_v20, 2 }
 0x57e   : > { %9898 = vmatprep.mubr.msk.f32.mxu1 %vm798_vm3, %v14689_v39  ;;  %v3920_v39 = vld [vmem:[%s11007_s10 + $0x28] sm:$0xff] }
 0x581   : > { %9899 = vmatmul.mubr.msk.f32.gmra.mrb[16].mxu1 %vm798_vm3, %v14709_v2 }
 0x582   : > { %9901 = vmatprep.mubr.msk.f32.mxu1 %vm798_vm3, %v14710_v25 }
 0x585   : > { %9902 = vmatmul.mubr.msk.f32.gmra.mrb[18].mxu1 %vm798_vm3, %v13308_v3  ;;  %v6484_v3 = vrot.slane %v13673_v17, 2 }
 0x586   : > { %9904 = vmatprep.mubr.msk.f32.mxu1 %vm798_vm3, %v14711_v41 }
 0x587   : > { %v6485_v15 = vsel %vm1575_vm4, %v6483_v30, %v6484_v3  ;;  %v6487_v44 = vsel %vm1575_vm4, %v6484_v3, %v6486_v53 }
 0x589   : > { %9905 = vmatmul.mubr.msk.f32.gmra.mrb[20].mxu1 %vm798_vm3, %v14712_v37  ;;  %v3930_v37 = vld [vmem:[%s11007_s10 + $0x78] sm:$0xff] }
 0x58a   : > { %9907 = vmatprep.mubr.msk.f32.mxu1 %vm798_vm3, %v14713_v24  ;;  %v3929_v24 = vld [vmem:[%s11007_s10 + $0x70] sm:$0xff] }
 0x58d   : > { %9908 = vmatmul.mubr.msk.f32.gmra.mrb[22].mxu1 %vm798_vm3, %v14714_v7 }
 0x58e   : > { %9910 = vmatprep.mubr.msk.f32.mxu1 %vm798_vm3, %v14715_v58 }
 0x591   : > { %9911 = vmatmul.mubr.msk.f32.gmra.mrb[24].mxu1 %vm798_vm3, %v14716_v47 }
 0x592   : > { %9913 = vmatprep.mubr.msk.f32.mxu1 %vm798_vm3, %v14717_v8 }
 0x595   : > { %9914 = vmatmul.mubr.msk.f32.gmra.mrb[26].mxu1 %vm798_vm3, %v14718_v46  ;;  %v3932_v46 = vld [vmem:[%s11007_s10 + $0x88] sm:$0xff] }
 0x596   : > { %9916 = vmatprep.mubr.msk.f32.mxu1 %vm798_vm3, %v14719_v35  ;;  %v3931_v35 = vld [vmem:[%s11007_s10 + $0x80] sm:$0xff] }
 0x599   : > { %9917 = vmatmul.mubr.msk.f32.gmra.mrb[28].mxu1 %vm798_vm3, %v14720_v31 }
 0x59a   : > { %9919 = vmatprep.mubr.msk.f32.mxu1 %vm798_vm3, %v6485_v15 }
 0x59d   : > { %9920 = vmatmul.mubr.msk.f32.gmra.mrb[30].mxu1 %vm798_vm3, %v6487_v44 }
 0x634   : > { %v9876_v22 = vpop.f32.mrb[0].mxu1 }
 0x635   : > { %v10098_v26 = vadd.f32 %v9876_v22, %v3916_v50  ;;  %v6563_v40 = vpop.f32.mrb[1].mxu1 }
 0x636   : > { %v10099_v45 = vadd.f32 %v6563_v40, %v3915_v19  ;;  %v13843_v19 = vpop.permute.xlu1 %6854  ;;  %v3933_v40 = vld [vmem:[%s11007_s10 + $0x90] sm:$0xff] }
 0x637   : > { %10815 = vtanh.f32 %v10098_v26  ;;  %v3934_v26 = vld [vmem:[%s11007_s10 + $0x98] sm:$0xff] }
 0x638   : > { %10817 = vtanh.f32 %v10099_v45  ;;  %v9879_v34 = vpop.f32.mrb[2].mxu1 }
 0x639   : > { %v10100_v63 = vadd.f32 %v9879_v34, %v3918_v18  ;;  %v6573_v9 = vpop.f32.mrb[3].mxu1 }
 0x63a   : > { %v10101_v10 = vadd.f32 %v6573_v9, %v3917_v27  ;;  %v13849_v27 = vpop.permute.xlu0 %6850 }
 0x63b   : > { %10819 = vtanh.f32 %v10100_v63 }
 0x63c   : > { %10821 = vtanh.f32 %v10101_v10  ;;  %v9882_v38 = vpop.f32.mrb[4].mxu1 }
 0x63d   : > { %v10102_v36 = vadd.f32 %v9882_v38, %v3920_v39  ;;  %v6583_v14 = vpop.f32.mrb[5].mxu1  ;;  %v3936_v39 = vld [vmem:[%s11007_s10 + $0xa8] sm:$0xff]  ;;  %v13855_v38 = vpop.permute.xlu1 %6856 }
 0x63e   : > { %v10103_v59 = vadd.f32 %v6583_v14, %v3919_v32  ;;  %v3935_v32 = vld [vmem:[%s11007_s10 + $0xa0] sm:$0xff] }
 0x63f   : > { %10823 = vtanh.f32 %v10102_v36 }
 0x640   : > { %10825 = vtanh.f32 %v10103_v59  ;;  %v9885_v61 = vpop.f32.mrb[6].mxu1 }
 0x641   : > { %v10816_v55 = vpop.eup %10815  ;;  %v10104_v60 = vadd.f32 %v9885_v61, %v3922_v13  ;;  %v6593_v20 = vpop.f32.mrb[7].mxu1 }
 0x642   : > { %v10818_v17 = vpop.eup %10817  ;;  %v10105_v12 = vadd.f32 %v6593_v20, %v3921_v21  ;;  %7012 = vrot.lane.b32.xlu1 %v10816_v55, %s10934_s26  ;;  %v3938_v55 = vld [vmem:[%s11007_s10 + $0xb8] sm:$0xff]  ;;  %v3937_v20 = vld [vmem:[%s11007_s10 + $0xb0] sm:$0xff] }
 0x643   : > { %10827 = vtanh.f32 %v10104_v60  ;;  %7010 = vrot.lane.b32.xlu0 %v10818_v17, %s10934_s26  ;;  %v13859_v60 = vpop.permute.xlu0 %6852 }
 0x644   : > { %10829 = vtanh.f32 %v10105_v12  ;;  %v9888_v52 = vpop.f32.mrb[8].mxu1 }
 0x645   : > { %v10820_v51 = vpop.eup %10819  ;;  %v10106_v49 = vadd.f32 %v9888_v52, %v3924_v57  ;;  %v6603_v1 = vpop.f32.mrb[9].mxu1 }
 0x646   : > { %v10822_v16 = vpop.eup %10821  ;;  %v10107_v56 = vadd.f32 %v6603_v1, %v3923_v29  ;;  %7016 = vrot.lane.b32.xlu1 %v10820_v51, %s10934_s26  ;;  %v13863_v51 = vpop.permute.xlu1 %6860  ;;  %v3940_v1 = vld [vmem:[%s11007_s10 + $0xc8] sm:$0xff] }
 0x647   : > { %10831 = vtanh.f32 %v10106_v49  ;;  %7014 = vrot.lane.b32.xlu0 %v10822_v16, %s10934_s26  ;;  %v13867_v16 = vpop.permute.xlu0 %6858 }
 0x648   : > { %10833 = vtanh.f32 %v10107_v56  ;;  %v9891_v54 = vpop.f32.mrb[10].mxu1  ;;  %v3939_v56 = vld [vmem:[%s11007_s10 + $0xc0] sm:$0xff] }
 0x649   : > { %v10824_v28 = vpop.eup %10823  ;;  %v10108_v62 = vadd.f32 %v9891_v54, %v3926_v48  ;;  %v6613_v4 = vpop.f32.mrb[11].mxu1 }
 0x64a   : > { %v10826_v11 = vpop.eup %10825  ;;  %v10109_v42 = vadd.f32 %v6613_v4, %v3925_v33  ;;  %7020 = vrot.lane.b32.xlu1 %v10824_v28, %s10934_s26 }
 0x64b   : > { %10835 = vtanh.f32 %v10108_v62  ;;  %7018 = vrot.lane.b32.xlu0 %v10826_v11, %s10934_s26  ;;  %v3942_v11 = vld [vmem:[%s11007_s10 + $0xd8] sm:$0xff] }
 0x64c   : > { %10837 = vtanh.f32 %v10109_v42  ;;  %v9894_v0 = vpop.f32.mrb[12].mxu1  ;;  %v3941_v42 = vld [vmem:[%s11007_s10 + $0xd0] sm:$0xff] }
 0x64d   : > { %v10828_v5 = vpop.eup %10827  ;;  %v10110_v6 = vadd.f32 %v9894_v0, %v3928_v43  ;;  %v6623_v2 = vpop.f32.mrb[13].mxu1 }
 0x64e   : > { %v10830_v25 = vpop.eup %10829  ;;  %v10111_v41 = vadd.f32 %v6623_v2, %v3927_v23  ;;  %7024 = vrot.lane.b32.xlu1 %v10828_v5, %s10934_s26  ;;  %v13875_v43 = vpop.permute.xlu1 %6864 }
 0x64f   : > { %10839 = vtanh.f32 %v10110_v6  ;;  %7022 = vrot.lane.b32.xlu0 %v10830_v25, %s10934_s26  ;;  %v13877_v5 = vpop.permute.xlu0 %6862 }
 0x650   : > { %10841 = vtanh.f32 %v10111_v41  ;;  %v9897_v7 = vpop.f32.mrb[14].mxu1 }
 0x651   : > { %v10832_v58 = vpop.eup %10831  ;;  %v10112_v47 = vadd.f32 %v9897_v7, %v3930_v37  ;;  %v6633_v8 = vpop.f32.mrb[15].mxu1  ;;  %v3944_v37 = vld [vmem:[%s11007_s10 + $0xe8] sm:$0xff] }
 0x652   : > { %v10834_v30 = vpop.eup %10833  ;;  %v10113_v3 = vadd.f32 %v6633_v8, %v3929_v24  ;;  %7028 = vrot.lane.b32.xlu1 %v10832_v58, %s10934_s26  ;;  %v3943_v24 = vld [vmem:[%s11007_s10 + $0xe0] sm:$0xff] }
 0x653   : > { %10843 = vtanh.f32 %v10112_v47  ;;  %7026 = vrot.lane.b32.xlu0 %v10834_v30, %s10934_s26 }
 0x654   : > { %10845 = vtanh.f32 %v10113_v3  ;;  %v9900_v53 = vpop.f32.mrb[16].mxu1  ;;  %v13883_v3 = vpop.permute.xlu1 %6868 }
 0x655   : > { %v10836_v15 = vpop.eup %10835  ;;  %v10114_v31 = vadd.f32 %v9900_v53, %v3932_v46  ;;  %v6643_v44 = vpop.f32.mrb[17].mxu1 }
 0x656   : > { %v10838_v50 = vpop.eup %10837  ;;  %v10115_v22 = vadd.f32 %v6643_v44, %v3931_v35  ;;  %7032 = vrot.lane.b32.xlu1 %v10836_v15, %s10934_s26  ;;  %v3946_v35 = vld [vmem:[%s11007_s10 + $0xf8] sm:$0xff]  ;;  %v13887_v53 = vpop.permute.xlu0 %6866  ;;  %v3945_v15 = vld [vmem:[%s11007_s10 + $0xf0] sm:$0xff]  ;;  %s10935_s10 = smov 96  }
 0x657   : > { %10847 = vtanh.f32 %v10114_v31  ;;  %7030 = vrot.lane.b32.xlu0 %v10838_v50, %s10934_s26 }
 0x658   : > { %10849 = vtanh.f32 %v10115_v22  ;;  %v9903_v45 = vpop.f32.mrb[18].mxu1 }
 0x659   : > { %v10840_v18 = vpop.eup %10839  ;;  %v10116_v34 = vadd.f32 %v9903_v45, %v3934_v26  ;;  %v6653_v63 = vpop.f32.mrb[19].mxu1 }
 0x65a   : > { %v10842_v9 = vpop.eup %10841  ;;  %v10117_v10 = vadd.f32 %v6653_v63, %v3933_v40  ;;  %7036 = vrot.lane.b32.xlu1 %v10840_v18, %s10934_s26  ;;  %v13893_v45 = vpop.permute.xlu1 %6872 }
 0x65b   : > { %10851 = vtanh.f32 %v10116_v34  ;;  %7034 = vrot.lane.b32.xlu0 %v10842_v9, %s10934_s26  ;;  %v13895_v34 = vpop.permute.xlu0 %6870  ;;  %v7365_v9 = vld [vmem:[#allocation2 + $0x10] sm:$0x3] }
 0x65c   : > { %10853 = vtanh.f32 %v10117_v10  ;;  %v9906_v36 = vpop.f32.mrb[20].mxu1  ;;  %v7416_v10 = vld [vmem:[#allocation2 + $0x1a8] sm:$0x3]  ;;  %7420 = vst.msk [vmem:[%s11017_s16 + $0x10] sm:$0x3] %vm7419_vm6, %v7365_v9 }
 0x65d   : > { %v10844_v14 = vpop.eup %10843  ;;  %v10118_v59 = vadd.f32 %v9906_v36, %v3936_v39  ;;  %v6663_v13 = vpop.f32.mrb[21].mxu1  ;;  %7471 = vst.msk [vmem:[%s11017_s16 + $0x1a8] sm:$0x3] %vm7419_vm6, %v7416_v10  ;;  %v14727_v10 = vld [vmem:[#allocation5_spill] sm:$0xff] }
 0x65e   : > { %v10846_v21 = vpop.eup %10845  ;;  %v10119_v61 = vadd.f32 %v6663_v13, %v3935_v32  ;;  %7040 = vrot.lane.b32.xlu1 %v10844_v14, %s10934_s26  ;;  %v13903_v36 = vpop.permute.xlu1 %6876 }
 0x65f   : > { %10855 = vtanh.f32 %v10118_v59  ;;  %7038 = vrot.lane.b32.xlu0 %v10846_v21, %s10934_s26  ;;  %v13906_v14 = vpop.permute.xlu0 %6874 }
 0x660   : > { %10857 = vtanh.f32 %v10119_v61  ;;  %v9909_v17 = vpop.f32.mrb[22].mxu1 }
 0x661   : > { %v10848_v12 = vpop.eup %10847  ;;  %v10120_v57 = vadd.f32 %v9909_v17, %v3938_v55  ;;  %v6673_v29 = vpop.f32.mrb[23].mxu1 }
 0x662   : > { %v10850_v52 = vpop.eup %10849  ;;  %v10121_v49 = vadd.f32 %v6673_v29, %v3937_v20  ;;  %7044 = vrot.lane.b32.xlu1 %v10848_v12, %s10934_s26  ;;  %v13911_v21 = vpop.permute.xlu1 %6880 }
 0x663   : > { %10859 = vtanh.f32 %v10120_v57  ;;  %7042 = vrot.lane.b32.xlu0 %v10850_v52, %s10934_s26  ;;  %v13913_v61 = vpop.permute.xlu0 %6878 }
 0x664   : > { %10861 = vtanh.f32 %v10121_v49  ;;  %v9912_v48 = vpop.f32.mrb[24].mxu1 }
 0x665   : > { %v10852_v33 = vpop.eup %10851  ;;  %v10122_v54 = vadd.f32 %v9912_v48, %v3940_v1  ;;  %v6683_v28 = vpop.f32.mrb[25].mxu1 }
 0x666   : > { %v10854_v62 = vpop.eup %10853  ;;  %v10123_v4 = vadd.f32 %v6683_v28, %v3939_v56  ;;  %7048 = vrot.lane.b32.xlu1 %v10852_v33, %s10934_s26  ;;  %v13915_v55 = vpop.permute.xlu1 %6884 }
 0x667   : > { %10863 = vtanh.f32 %v10122_v54  ;;  %7046 = vrot.lane.b32.xlu0 %v10854_v62, %s10934_s26  ;;  %v13917_v20 = vpop.permute.xlu0 %6882 }
 0x668   : > { %10865 = vtanh.f32 %v10123_v4  ;;  %v9915_v23 = vpop.f32.mrb[26].mxu1  ;;  %v14721_v4 = vld [vmem:[#allocation32_spill] sm:$0xff] }
 0x669   : > { %v10856_v0 = vpop.eup %10855  ;;  %v10124_v6 = vadd.f32 %v9915_v23, %v3942_v11  ;;  %v6693_v2 = vpop.f32.mrb[27].mxu1  ;;  %v6787_v11 = vsub.f32 1.0, %v14721_v4  ;;  %v14722_v23 = vld [vmem:[#allocation33_spill] sm:$0xff] }
 0x66a   : > { %v10858_v25 = vpop.eup %10857  ;;  %v10125_v41 = vadd.f32 %v6693_v2, %v3941_v42  ;;  %7052 = vrot.lane.b32.xlu1 %v10856_v0, %s10934_s26  ;;  %v13919_v17 = vpop.permute.xlu1 %6888  ;;  %v6786_v0 = vsub.f32 1.0, %v14722_v23 }
 0x66b   : > { %10867 = vtanh.f32 %v10124_v6  ;;  %7050 = vrot.lane.b32.xlu0 %v10858_v25, %s10934_s26  ;;  %v13921_v12 = vpop.permute.xlu0 %6886  ;;  %v6947_v2 = vmul.f32 %v13859_v60, %v6787_v11  ;;  %v14723_v25 = vld [vmem:[#allocation34_spill] sm:$0xff] }
 0x66c   : > { %10869 = vtanh.f32 %v10125_v41  ;;  %v9918_v7 = vpop.f32.mrb[28].mxu1  ;;  %v6789_v41 = vsub.f32 1.0, %v14723_v25 }
 0x66d   : > { %v10860_v58 = vpop.eup %10859  ;;  %v10126_v47 = vadd.f32 %v9918_v7, %v3944_v37  ;;  %v6703_v8 = vpop.f32.mrb[29].mxu1  ;;  %v6946_v7 = vmul.f32 %v13849_v27, %v6786_v0  ;;  %v14726_v27 = vld [vmem:[#allocation41_spill] sm:$0xff] }
 0x66e   : > { %v10862_v30 = vpop.eup %10861  ;;  %v10127_v46 = vadd.f32 %v6703_v8, %v3943_v24  ;;  %7056 = vrot.lane.b32.xlu1 %v10860_v58, %s10934_s26  ;;  %v13923_v57 = vpop.permute.xlu1 %6892  ;;  %v14724_v58 = vld [vmem:[#allocation35_spill] sm:$0xff] }
 0x66f   : > { %10871 = vtanh.f32 %v10126_v47  ;;  %7054 = vrot.lane.b32.xlu0 %v10862_v30, %s10934_s26  ;;  %v13925_v29 = vpop.permute.xlu0 %6890  ;;  %v6788_v47 = vsub.f32 1.0, %v14724_v58 }
 0x670   : > { %10873 = vtanh.f32 %v10127_v46  ;;  %v9921_v31 = vpop.f32.mrb[30].mxu1 }
 0x671   : > { %v10864_v44 = vpop.eup %10863  ;;  %v10128_v50 = vadd.f32 %v9921_v31, %v3946_v35  ;;  %v6713_v22 = vpop.f32.mrb[31].mxu1  ;;  %v14725_v31 = vld [vmem:[#allocation36_spill] sm:$0xff] }
 0x672   : > { %v10866_v26 = vpop.eup %10865  ;;  %v10129_v40 = vadd.f32 %v6713_v22, %v3945_v15  ;;  %7060 = vrot.lane.b32.xlu1 %v10864_v44, %s10934_s26  ;;  %v13927_v52 = vpop.permute.xlu1 %6896  ;;  %v6949_v15 = vmul.f32 %v13855_v38, %v6789_v41  ;;  %v6791_v44 = vsub.f32 1.0, %v14725_v31  ;;  %v6948_v22 = vmul.f32 %v13843_v19, %v6788_v47 }
 0x673   : > { %10875 = vtanh.f32 %v10128_v50  ;;  %7058 = vrot.lane.b32.xlu0 %v10866_v26, %s10934_s26  ;;  %v13929_v49 = vpop.permute.xlu0 %6894  ;;  %v6790_v26 = vsub.f32 1.0, %v14726_v27 }
 0x674   : > { %10877 = vtanh.f32 %v10129_v40  ;;  %v6951_v38 = vmul.f32 %v13863_v51, %v6791_v44  ;;  %v14732_v44 = vld [vmem:[#allocation10_spill] sm:$0xff] }
 0x675   : > { %v10868_v18 = vpop.eup %10867  ;;  %v6950_v19 = vmul.f32 %v13867_v16, %v6790_v26 }
 0x676   : > { %v10870_v63 = vpop.eup %10869  ;;  %7064 = vrot.lane.b32.xlu1 %v10868_v18, %s10934_s26  ;;  %v13931_v1 = vpop.permute.xlu1 %6900 }
 0x677   : > { %7062 = vrot.lane.b32.xlu0 %v10870_v63, %s10934_s26  ;;  %v13933_v56 = vpop.permute.xlu0 %6898 }
 0x679   : > { %v10872_v39 = vpop.eup %10871 }
 0x67a   : > { %v10874_v32 = vpop.eup %10873  ;;  %7068 = vrot.lane.b32.xlu1 %v10872_v39, %s10934_s26  ;;  %v13935_v48 = vpop.permute.xlu1 %6904  ;;  %v6793_v39 = vsub.f32 1.0, %v14727_v10 }
 0x67b   : > { %7066 = vrot.lane.b32.xlu0 %v10874_v32, %s10934_s26  ;;  %v13937_v33 = vpop.permute.xlu0 %6902 }
 0x67c   : > { %v6953_v51 = vmul.f32 %v13875_v43, %v6793_v39 }
 0x67d   : > { %v10876_v59 = vpop.eup %10875 }
 0x67e   : > { %v10878_v13 = vpop.eup %10877  ;;  %7072 = vrot.lane.b32.xlu1 %v10876_v59, %s10934_s26  ;;  %v13939_v54 = vpop.permute.xlu1 %6908 }
 0x67f   : > { %7070 = vrot.lane.b32.xlu0 %v10878_v13, %s10934_s26  ;;  %v13941_v28 = vpop.permute.xlu0 %6906  ;;  %v14728_v13 = vld [vmem:[#allocation6_spill] sm:$0xff] }
 0x682   : > { %v13943_v62 = vpop.permute.xlu1 %6912 }
 0x683   : > { %v13946_v42 = vpop.permute.xlu0 %6910 }
 0x6b4   : > { %v7013_v6 = vpop.permute.xlu1 %7012 }
 0x6b5   : > { %v7107_v37 = vmul.f32 %v14721_v4, %v7013_v6  ;;  %v7011_v24 = vpop.permute.xlu0 %7010  ;;  %v6792_v4 = vsub.f32 1.0, %v14728_v13 }
 0x6b6   : > { %v7106_v8 = vmul.f32 %v14722_v23, %v7011_v24  ;;  %v14730_v24 = vld [vmem:[#allocation8_spill] sm:$0xff] }
 0x6b7   : > { %v7139_v30 = vadd.f32 %v7107_v37, %v6947_v2  ;;  %v14729_v2 = vld [vmem:[#allocation7_spill] sm:$0xff]  ;;  %v6952_v16 = vmul.f32 %v13877_v5, %v6792_v4 }
 0x6b8   : > { %v7138_v46 = vadd.f32 %v7106_v8, %v6946_v7  ;;  %v7017_v35 = vpop.permute.xlu1 %7016  ;;  %v6794_v7 = vsub.f32 1.0, %v14730_v24 }
 0x6b9   : > { %v7109_v60 = vmul.f32 %v14723_v25, %v7017_v35  ;;  %v7015_v50 = vpop.permute.xlu0 %7014  ;;  %7204 = vrot.lane.b32.xlu1 %v7139_v30, %s10935_s10  ;;  %v6795_v25 = vsub.f32 1.0, %v14729_v2 }
 0x6ba   : > { %v7108_v40 = vmul.f32 %v14724_v58, %v7015_v50  ;;  %7202 = vrot.lane.b32.xlu0 %v7138_v46, %s10935_s10  ;;  %v14731_v46 = vld [vmem:[#allocation9_spill] sm:$0xff]  ;;  %v6954_v5 = vmul.f32 %v13887_v53, %v6794_v7 }
 0x6bb   : > { %v7141_v18 = vadd.f32 %v7109_v60, %v6949_v15  ;;  %v6955_v43 = vmul.f32 %v13883_v3, %v6795_v25  ;;  %v6797_v35 = vsub.f32 1.0, %v14731_v46  ;;  %v6796_v60 = vsub.f32 1.0, %v14732_v44 }
 0x6bc   : > { %v7140_v63 = vadd.f32 %v7108_v40, %v6948_v22  ;;  %v7021_v9 = vpop.permute.xlu1 %7020  ;;  %v14733_v40 = vld [vmem:[#allocation11_spill] sm:$0xff] }
 0x6bd   : > { %v7111_v32 = vmul.f32 %v14725_v31, %v7021_v9  ;;  %v7019_v59 = vpop.permute.xlu0 %7018  ;;  %7208 = vrot.lane.b32.xlu1 %v7141_v18, %s10935_s10  ;;  %v6957_v3 = vmul.f32 %v13893_v45, %v6797_v35  ;;  %v6799_v18 = vsub.f32 1.0, %v14733_v40  ;;  %v6956_v53 = vmul.f32 %v13895_v34, %v6796_v60  ;;  %v14739_v35 = vld [vmem:[#allocation17_spill] sm:$0xff] }
 0x6be   : > { %v7110_v11 = vmul.f32 %v14726_v27, %v7019_v59  ;;  %7206 = vrot.lane.b32.xlu0 %v7140_v63, %s10935_s10 }
 0x6bf   : > { %v7143_v23 = vadd.f32 %v7111_v32, %v6951_v38  ;;  %v14734_v38 = vld [vmem:[#allocation12_spill] sm:$0xff]  ;;  %v6959_v45 = vmul.f32 %v13903_v36, %v6799_v18 }
 0x6c0   : > { %v7142_v0 = vadd.f32 %v7110_v11, %v6950_v19  ;;  %v7025_v6 = vpop.permute.xlu1 %7024 }
 0x6c1   : > { %v7113_v41 = vmul.f32 %v14727_v10, %v7025_v6  ;;  %v7023_v37 = vpop.permute.xlu0 %7022  ;;  %7212 = vrot.lane.b32.xlu1 %v7143_v23, %s10935_s10  ;;  %v6798_v10 = vsub.f32 1.0, %v14734_v38 }
 0x6c2   : > { %v7112_v58 = vmul.f32 %v14728_v13, %v7023_v37  ;;  %7210 = vrot.lane.b32.xlu0 %v7142_v0, %s10935_s10  ;;  %v14735_v13 = vld [vmem:[#allocation13_spill] sm:$0xff]  ;;  %v14736_v0 = vld [vmem:[#allocation14_spill] sm:$0xff]  ;;  %v14737_v37 = vld [vmem:[#allocation15_spill] sm:$0xff] }
 0x6c3   : > { %v7145_v47 = vadd.f32 %v7113_v41, %v6953_v51  ;;  %v6801_v4 = vsub.f32 1.0, %v14735_v13  ;;  %v6958_v34 = vmul.f32 %v13906_v14, %v6798_v10  ;;  %v6800_v6 = vsub.f32 1.0, %v14736_v0 }
 0x6c4   : > { %v7144_v8 = vadd.f32 %v7112_v58, %v6952_v16  ;;  %v7029_v30 = vpop.permute.xlu1 %7028  ;;  %v6803_v16 = vsub.f32 1.0, %v14737_v37  ;;  %v14738_v58 = vld [vmem:[#allocation16_spill] sm:$0xff] }
 0x6c5   : > { %v7115_v15 = vmul.f32 %v14729_v2, %v7029_v30  ;;  %v7027_v31 = vpop.permute.xlu0 %7026  ;;  %7216 = vrot.lane.b32.xlu1 %v7145_v47, %s10935_s10  ;;  %v6961_v36 = vmul.f32 %v13911_v21, %v6801_v4  ;;  %v6960_v14 = vmul.f32 %v13913_v61, %v6800_v6  ;;  %v6802_v47 = vsub.f32 1.0, %v14738_v58  ;;  %v14744_v4 = vld [vmem:[#allocation22_spill] sm:$0xff] }
 0x6c6   : > { %v7114_v50 = vmul.f32 %v14730_v24, %v7027_v31  ;;  %7214 = vrot.lane.b32.xlu0 %v7144_v8, %s10935_s10  ;;  %v6963_v21 = vmul.f32 %v13915_v55, %v6803_v16 }
 0x6c7   : > { %v7147_v22 = vadd.f32 %v7115_v15, %v6955_v43  ;;  %v6805_v15 = vsub.f32 1.0, %v14739_v35  ;;  %v6962_v61 = vmul.f32 %v13917_v20, %v6802_v47 }
 0x6c8   : > { %v7146_v27 = vadd.f32 %v7114_v50, %v6954_v5  ;;  %v7033_v26 = vpop.permute.xlu1 %7032 }
 0x6c9   : > { %v7117_v63 = vmul.f32 %v14731_v46, %v7033_v26  ;;  %v7031_v9 = vpop.permute.xlu0 %7030  ;;  %7220 = vrot.lane.b32.xlu1 %v7147_v22, %s10935_s10  ;;  %v6965_v55 = vmul.f32 %v13919_v17, %v6805_v15 }
 0x6ca   : > { %v7116_v39 = vmul.f32 %v14732_v44, %v7031_v9  ;;  %7218 = vrot.lane.b32.xlu0 %v7146_v27, %s10935_s10  ;;  %v14740_v44 = vld [vmem:[#allocation18_spill] sm:$0xff]  ;;  %v14742_v9 = vld [vmem:[#allocation20_spill] sm:$0xff] }
 0x6cb   : > { %v7149_v32 = vadd.f32 %v7117_v63, %v6957_v3  ;;  %v6804_v60 = vsub.f32 1.0, %v14740_v44  ;;  %v14741_v3 = vld [vmem:[#allocation19_spill] sm:$0xff] }
 0x6cc   : > { %v7148_v59 = vadd.f32 %v7116_v39, %v6956_v53  ;;  %v7037_v19 = vpop.permute.xlu1 %7036  ;;  %v6806_v53 = vsub.f32 1.0, %v14742_v9 }
 0x6cd   : > { %v7119_v11 = vmul.f32 %v14733_v40, %v7037_v19  ;;  %v7035_v23 = vpop.permute.xlu0 %7034  ;;  %7224 = vrot.lane.b32.xlu1 %v7149_v32, %s10935_s10  ;;  %v6807_v40 = vsub.f32 1.0, %v14741_v3  ;;  %v6964_v20 = vmul.f32 %v13921_v12, %v6804_v60 }
 0x6ce   : > { %v7118_v51 = vmul.f32 %v14734_v38, %v7035_v23  ;;  %7222 = vrot.lane.b32.xlu0 %v7148_v59, %s10935_s10  ;;  %v14743_v59 = vld [vmem:[#allocation21_spill] sm:$0xff]  ;;  %v6966_v12 = vmul.f32 %v13925_v29, %v6806_v53 }
 0x6cf   : > { %v7151_v2 = vadd.f32 %v7119_v11, %v6959_v45  ;;  %v6967_v17 = vmul.f32 %v13923_v57, %v6807_v40  ;;  %v6809_v19 = vsub.f32 1.0, %v14743_v59  ;;  %v6808_v11 = vsub.f32 1.0, %v14744_v4  ;;  %v14751_v40 = vld [vmem:[#allocation30_spill] sm:$0xff] }
 0x6d0   : > { %v7150_v25 = vadd.f32 %v7118_v51, %v6958_v34  ;;  %v7041_v41 = vpop.permute.xlu1 %7040  ;;  %v14745_v51 = vld [vmem:[#allocation23_spill] sm:$0xff] }
 0x6d1   : > { %v7121_v24 = vmul.f32 %v14735_v13, %v7041_v41  ;;  %v7039_v7 = vpop.permute.xlu0 %7038  ;;  %7228 = vrot.lane.b32.xlu1 %v7151_v2, %s10935_s10  ;;  %v6969_v57 = vmul.f32 %v13927_v52, %v6809_v19  ;;  %v6811_v2 = vsub.f32 1.0, %v14745_v51  ;;  %v6968_v29 = vmul.f32 %v13929_v49, %v6808_v11  ;;  %v7364_v19 = vld [vmem:[#allocation2 + $0x8] sm:$0xff] }
 0x6d2   : > { %v7120_v8 = vmul.f32 %v14736_v0, %v7039_v7  ;;  %7226 = vrot.lane.b32.xlu0 %v7150_v25, %s10935_s10  ;;  %7418 = vst.msk [vmem:[%s11017_s16 + $0x8] sm:$0xff] %vm798_vm3, %v7364_v19 }
 0x6d3   : > { %v7153_v30 = vadd.f32 %v7121_v24, %v6961_v36  ;;  %v14746_v36 = vld [vmem:[#allocation24_spill] sm:$0xff]  ;;  %v6971_v52 = vmul.f32 %v13931_v1, %v6811_v2 }
 0x6d4   : > { %v7152_v43 = vadd.f32 %v7120_v8, %v6960_v14  ;;  %v7045_v46 = vpop.permute.xlu1 %7044 }
 0x6d5   : > { %v7123_v31 = vmul.f32 %v14737_v37, %v7045_v46  ;;  %v7043_v5 = vpop.permute.xlu0 %7042  ;;  %7232 = vrot.lane.b32.xlu1 %v7153_v30, %s10935_s10  ;;  %v6810_v37 = vsub.f32 1.0, %v14746_v36 }
 0x6d6   : > { %v7122_v50 = vmul.f32 %v14738_v58, %v7043_v5  ;;  %7230 = vrot.lane.b32.xlu0 %v7152_v43, %s10935_s10  ;;  %v14747_v58 = vld [vmem:[#allocation25_spill] sm:$0xff]  ;;  %v14748_v43 = vld [vmem:[#allocation26_spill] sm:$0xff]  ;;  %v14749_v5 = vld [vmem:[#allocation28_spill] sm:$0xff] }
 0x6d7   : > { %v7155_v22 = vadd.f32 %v7123_v31, %v6963_v21  ;;  %v6813_v47 = vsub.f32 1.0, %v14747_v58  ;;  %v6970_v49 = vmul.f32 %v13933_v56, %v6810_v37  ;;  %v6812_v46 = vsub.f32 1.0, %v14748_v43 }
 0x6d8   : > { %v7154_v27 = vadd.f32 %v7122_v50, %v6962_v61  ;;  %v7049_v26 = vpop.permute.xlu1 %7048  ;;  %v6815_v61 = vsub.f32 1.0, %v14749_v5  ;;  %v14750_v50 = vld [vmem:[#allocation29_spill] sm:$0xff] }
 0x6d9   : > { %v7125_v18 = vmul.f32 %v14739_v35, %v7049_v26  ;;  %v7047_v63 = vpop.permute.xlu0 %7046  ;;  %7236 = vrot.lane.b32.xlu1 %v7155_v22, %s10935_s10  ;;  %v6973_v1 = vmul.f32 %v13935_v48, %v6813_v47  ;;  %v6972_v56 = vmul.f32 %v13937_v33, %v6812_v46  ;;  %v6814_v22 = vsub.f32 1.0, %v14750_v50 }
 0x6da   : > { %v7124_v38 = vmul.f32 %v14740_v44, %v7047_v63  ;;  %7234 = vrot.lane.b32.xlu0 %v7154_v27, %s10935_s10  ;;  %v6975_v48 = vmul.f32 %v13939_v54, %v6815_v61 }
 0x6db   : > { %v7157_v10 = vadd.f32 %v7125_v18, %v6965_v55  ;;  %v6817_v18 = vsub.f32 1.0, %v14751_v40  ;;  %v6974_v33 = vmul.f32 %v13941_v28, %v6814_v22 }
 0x6dc   : > { %v7156_v39 = vadd.f32 %v7124_v38, %v6964_v20  ;;  %v7053_v32 = vpop.permute.xlu1 %7052 }
 0x6dd   : > { %v7127_v45 = vmul.f32 %v14741_v3, %v7053_v32  ;;  %v7051_v13 = vpop.permute.xlu0 %7050  ;;  %7240 = vrot.lane.b32.xlu1 %v7157_v10, %s10935_s10  ;;  %v6977_v32 = vmul.f32 %v13943_v62, %v6817_v18 }
 0x6de   : > { %v7126_v23 = vmul.f32 %v14742_v9, %v7051_v13  ;;  %7238 = vrot.lane.b32.xlu0 %v7156_v39, %s10935_s10  ;;  %v14752_v9 = vld [vmem:[#allocation27_spill] sm:$0xff] }
 0x6df   : > { %v7159_v34 = vadd.f32 %v7127_v45, %v6967_v17  ;;  %v6816_v53 = vsub.f32 1.0, %v14752_v9  ;;  %v7414_v45 = vld [vmem:[#allocation2 + $0x198] sm:$0xff] }
 0x6e0   : > { %v7158_v0 = vadd.f32 %v7126_v23, %v6966_v12  ;;  %v7057_v6 = vpop.permute.xlu1 %7056  ;;  %7469 = vst.msk [vmem:[%s11017_s16 + $0x198] sm:$0xff] %vm798_vm3, %v7414_v45 }
 0x6e1   : > { %v7129_v25 = vmul.f32 %v14743_v59, %v7057_v6  ;;  %v7055_v41 = vpop.permute.xlu0 %7054  ;;  %7244 = vrot.lane.b32.xlu1 %v7159_v34, %s10935_s10  ;;  %v7363_v59 = vld [vmem:[#allocation2] sm:$0xff]  ;;  %v6976_v13 = vmul.f32 %v13946_v42, %v6816_v53 }
 0x6e2   : > { %v7128_v16 = vmul.f32 %v14744_v4, %v7055_v41  ;;  %7242 = vrot.lane.b32.xlu0 %v7158_v0, %s10935_s10  ;;  %v7415_v4 = vld [vmem:[#allocation2 + $0x1a0] sm:$0xff]  ;;  %7417 = vst.msk [vmem:[%s11017_s16] sm:$0xff] %vm798_vm3, %v7363_v59 }
 0x6e3   : > { %v7161_v24 = vadd.f32 %v7129_v25, %v6969_v57  ;;  %7470 = vst.msk [vmem:[%s11017_s16 + $0x1a0] sm:$0xff] %vm798_vm3, %v7415_v4 }
 0x6e4   : > { %v7160_v7 = vadd.f32 %v7128_v16, %v6968_v29  ;;  %v7061_v14 = vpop.permute.xlu1 %7060 }
 0x6e5   : > { %v7131_v8 = vmul.f32 %v14745_v51, %v7061_v14  ;;  %v7059_v30 = vpop.permute.xlu0 %7058  ;;  %7248 = vrot.lane.b32.xlu1 %v7161_v24, %s10935_s10 }
 0x6e6   : > { %v7130_v21 = vmul.f32 %v14746_v36, %v7059_v30  ;;  %7246 = vrot.lane.b32.xlu0 %v7160_v7, %s10935_s10 }
 0x6e7   : > { %v7163_v35 = vadd.f32 %v7131_v8, %v6971_v52 }
 0x6e8   : > { %v7162_v15 = vadd.f32 %v7130_v21, %v6970_v49  ;;  %v7065_v31 = vpop.permute.xlu1 %7064 }
 0x6e9   : > { %v7133_v44 = vmul.f32 %v14747_v58, %v7065_v31  ;;  %v7063_v60 = vpop.permute.xlu0 %7062  ;;  %7252 = vrot.lane.b32.xlu1 %v7163_v35, %s10935_s10 }
 0x6ea   : > { %v7132_v27 = vmul.f32 %v14748_v43, %v7063_v60  ;;  %7250 = vrot.lane.b32.xlu0 %v7162_v15, %s10935_s10 }
 0x6eb   : > { %v7165_v26 = vadd.f32 %v7133_v44, %v6973_v1 }
 0x6ec   : > { %v7164_v55 = vadd.f32 %v7132_v27, %v6972_v56  ;;  %v7069_v3 = vpop.permute.xlu1 %7068 }
 0x6ed   : > { %v7135_v63 = vmul.f32 %v14749_v5, %v7069_v3  ;;  %v7067_v20 = vpop.permute.xlu0 %7066  ;;  %7256 = vrot.lane.b32.xlu1 %v7165_v26, %s10935_s10 }
 0x6ee   : > { %v7134_v38 = vmul.f32 %v14750_v50, %v7067_v20  ;;  %7254 = vrot.lane.b32.xlu0 %v7164_v55, %s10935_s10 }
 0x6ef   : > { %v7167_v10 = vadd.f32 %v7135_v63, %v6975_v48 }
 0x6f0   : > { %v7166_v54 = vadd.f32 %v7134_v38, %v6974_v33  ;;  %v7073_v39 = vpop.permute.xlu1 %7072 }
 0x6f1   : > { %v7137_v17 = vmul.f32 %v14751_v40, %v7073_v39  ;;  %7260 = vrot.lane.b32.xlu1 %v7167_v10, %s10935_s10  ;;  %v7071_v28 = vpop.permute.xlu0 %7070 }
 0x6f2   : > { %v7136_v12 = vmul.f32 %v14752_v9, %v7071_v28  ;;  %7258 = vrot.lane.b32.xlu0 %v7166_v54, %s10935_s10 }
 0x6f3   : > { %v7169_v62 = vadd.f32 %v7137_v17, %v6977_v32 }
 0x6f4   : > { %v7168_v11 = vadd.f32 %v7136_v12, %v6976_v13 }
 0x6f5   : > { %7264 = vrot.lane.b32.xlu1 %v7169_v62, %s10935_s10 }
 0x6f6   : > { %7262 = vrot.lane.b32.xlu0 %v7168_v11, %s10935_s10 }
 0x72b   : > { %v7205_v42 = vpop.permute.xlu1 %7204 }
 0x72c   : > { %7299 = vst.msk [vmem:[#allocation4 + $0x8] sm:$0xff] %vm798_vm3, %v7205_v42  ;;  %7332 = vst.msk [vmem:[#allocation2 + $0x21] sm:$0xff] %vm798_vm3, %v7205_v42  ;;  %v7203_v23 = vpop.permute.xlu0 %7202 }
 0x72d   : > { %7298 = vst.msk [vmem:[#allocation4] sm:$0xff] %vm798_vm3, %v7203_v23  ;;  %7331 = vst.msk [vmem:[#allocation2 + $0x19] sm:$0xff] %vm798_vm3, %v7203_v23 }
 0x72f   : > { %v7209_v34 = vpop.permute.xlu1 %7208 }
 0x730   : > { %7301 = vst.msk [vmem:[#allocation4 + $0x18] sm:$0xff] %vm798_vm3, %v7209_v34  ;;  %7334 = vst.msk [vmem:[#allocation2 + $0x39] sm:$0xff] %vm798_vm3, %v7209_v34  ;;  %v7207_v0 = vpop.permute.xlu0 %7206 }
 0x731   : > { %7300 = vst.msk [vmem:[#allocation4 + $0x10] sm:$0xff] %vm798_vm3, %v7207_v0  ;;  %7333 = vst.msk [vmem:[#allocation2 + $0x31] sm:$0xff] %vm798_vm3, %v7207_v0 }
 0x733   : > { %v7368_v6 = vld [vmem:[#allocation2 + $0x28] sm:$0x3]  ;;  %v7213_v57 = vpop.permute.xlu1 %7212 }
 0x734   : > { %7423 = vst.msk [vmem:[%s11017_s16 + $0x28] sm:$0x3] %vm7419_vm6, %v7368_v6  ;;  %v7366_v51 = vld [vmem:[#allocation2 + $0x18] sm:$0xff]  ;;  %v7367_v2 = vld [vmem:[#allocation2 + $0x20] sm:$0xff]  ;;  %v7211_v25 = vpop.permute.xlu0 %7210 }
 0x735   : > { %7303 = vst.msk [vmem:[#allocation4 + $0x28] sm:$0xff] %vm798_vm3, %v7213_v57  ;;  %7336 = vst.msk [vmem:[#allocation2 + $0x51] sm:$0xff] %vm798_vm3, %v7213_v57 }
 0x736   : > { %7421 = vst.msk [vmem:[%s11017_s16 + $0x18] sm:$0xff] %vm798_vm3, %v7366_v51  ;;  %7422 = vst.msk [vmem:[%s11017_s16 + $0x20] sm:$0xff] %vm798_vm3, %v7367_v2 }
 0x737   : > { %7302 = vst.msk [vmem:[#allocation4 + $0x20] sm:$0xff] %vm798_vm3, %v7211_v25  ;;  %7335 = vst.msk [vmem:[#allocation2 + $0x49] sm:$0xff] %vm798_vm3, %v7211_v25  ;;  %v7371_v41 = vld [vmem:[#allocation2 + $0x40] sm:$0x3]  ;;  %v7217_v29 = vpop.permute.xlu1 %7216 }
 0x738   : > { %7426 = vst.msk [vmem:[%s11017_s16 + $0x40] sm:$0x3] %vm7419_vm6, %v7371_v41  ;;  %v7369_v36 = vld [vmem:[#allocation2 + $0x30] sm:$0xff]  ;;  %v7370_v37 = vld [vmem:[#allocation2 + $0x38] sm:$0xff]  ;;  %v7215_v16 = vpop.permute.xlu0 %7214 }
 0x739   : > { %7305 = vst.msk [vmem:[#allocation4 + $0x38] sm:$0xff] %vm798_vm3, %v7217_v29  ;;  %7338 = vst.msk [vmem:[#allocation2 + $0x69] sm:$0xff] %vm798_vm3, %v7217_v29 }
 0x73a   : > { %7424 = vst.msk [vmem:[%s11017_s16 + $0x30] sm:$0xff] %vm798_vm3, %v7369_v36  ;;  %7425 = vst.msk [vmem:[%s11017_s16 + $0x38] sm:$0xff] %vm798_vm3, %v7370_v37 }
 0x73b   : > { %7304 = vst.msk [vmem:[#allocation4 + $0x30] sm:$0xff] %vm798_vm3, %v7215_v16  ;;  %7337 = vst.msk [vmem:[#allocation2 + $0x61] sm:$0xff] %vm798_vm3, %v7215_v16  ;;  %v7221_v7 = vpop.permute.xlu1 %7220 }
 0x73c   : > { %v7374_v24 = vld [vmem:[#allocation2 + $0x58] sm:$0x3]  ;;  %7307 = vst.msk [vmem:[#allocation4 + $0x48] sm:$0xff] %vm798_vm3, %v7221_v7  ;;  %7340 = vst.msk [vmem:[#allocation2 + $0x81] sm:$0xff] %vm798_vm3, %v7221_v7  ;;  %v7219_v58 = vpop.permute.xlu0 %7218 }
 0x73d   : > { %7429 = vst.msk [vmem:[%s11017_s16 + $0x58] sm:$0x3] %vm7419_vm6, %v7374_v24 }
 0x73e   : > { %v7372_v14 = vld [vmem:[#allocation2 + $0x48] sm:$0xff]  ;;  %v7373_v52 = vld [vmem:[#allocation2 + $0x50] sm:$0xff]  ;;  %7306 = vst.msk [vmem:[#allocation4 + $0x40] sm:$0xff] %vm798_vm3, %v7219_v58  ;;  %7339 = vst.msk [vmem:[#allocation2 + $0x79] sm:$0xff] %vm798_vm3, %v7219_v58 }
 0x73f   : > { %7427 = vst.msk [vmem:[%s11017_s16 + $0x48] sm:$0xff] %vm798_vm3, %v7372_v14  ;;  %7428 = vst.msk [vmem:[%s11017_s16 + $0x50] sm:$0xff] %vm798_vm3, %v7373_v52  ;;  %v7225_v8 = vpop.permute.xlu1 %7224 }
 0x740   : > { %v7377_v47 = vld [vmem:[#allocation2 + $0x70] sm:$0x3]  ;;  %7309 = vst.msk [vmem:[#allocation4 + $0x58] sm:$0xff] %vm798_vm3, %v7225_v8  ;;  %7342 = vst.msk [vmem:[#allocation2 + $0x99] sm:$0xff] %vm798_vm3, %v7225_v8  ;;  %v7223_v43 = vpop.permute.xlu0 %7222 }
 0x741   : > { %7432 = vst.msk [vmem:[%s11017_s16 + $0x70] sm:$0x3] %vm7419_vm6, %v7377_v47 }
 0x742   : > { %v7375_v30 = vld [vmem:[#allocation2 + $0x60] sm:$0xff]  ;;  %v7376_v49 = vld [vmem:[#allocation2 + $0x68] sm:$0xff]  ;;  %7308 = vst.msk [vmem:[#allocation4 + $0x50] sm:$0xff] %vm798_vm3, %v7223_v43  ;;  %7341 = vst.msk [vmem:[#allocation2 + $0x91] sm:$0xff] %vm798_vm3, %v7223_v43 }
 0x743   : > { %7430 = vst.msk [vmem:[%s11017_s16 + $0x60] sm:$0xff] %vm798_vm3, %v7375_v30  ;;  %7431 = vst.msk [vmem:[%s11017_s16 + $0x68] sm:$0xff] %vm798_vm3, %v7376_v49  ;;  %v7380_v46 = vld [vmem:[#allocation2 + $0x88] sm:$0x3]  ;;  %v7229_v21 = vpop.permute.xlu1 %7228 }
 0x744   : > { %7435 = vst.msk [vmem:[%s11017_s16 + $0x88] sm:$0x3] %vm7419_vm6, %v7380_v46  ;;  %v7227_v31 = vpop.permute.xlu0 %7226 }
 0x745   : > { %v7378_v35 = vld [vmem:[#allocation2 + $0x78] sm:$0xff]  ;;  %v7379_v15 = vld [vmem:[#allocation2 + $0x80] sm:$0xff]  ;;  %7311 = vst.msk [vmem:[#allocation4 + $0x68] sm:$0xff] %vm798_vm3, %v7229_v21  ;;  %7344 = vst.msk [vmem:[#allocation2 + $0xb1] sm:$0xff] %vm798_vm3, %v7229_v21 }
 0x746   : > { %7433 = vst.msk [vmem:[%s11017_s16 + $0x78] sm:$0xff] %vm798_vm3, %v7378_v35  ;;  %7434 = vst.msk [vmem:[%s11017_s16 + $0x80] sm:$0xff] %vm798_vm3, %v7379_v15 }
 0x747   : > { %7310 = vst.msk [vmem:[#allocation4 + $0x60] sm:$0xff] %vm798_vm3, %v7227_v31  ;;  %7343 = vst.msk [vmem:[#allocation2 + $0xa9] sm:$0xff] %vm798_vm3, %v7227_v31  ;;  %v7383_v1 = vld [vmem:[#allocation2 + $0xa0] sm:$0x3]  ;;  %v7233_v5 = vpop.permute.xlu1 %7232 }
 0x748   : > { %7438 = vst.msk [vmem:[%s11017_s16 + $0xa0] sm:$0x3] %vm7419_vm6, %v7383_v1  ;;  %v7231_v60 = vpop.permute.xlu0 %7230 }
 0x749   : > { %v7381_v61 = vld [vmem:[#allocation2 + $0x90] sm:$0xff]  ;;  %v7382_v44 = vld [vmem:[#allocation2 + $0x98] sm:$0xff]  ;;  %7313 = vst.msk [vmem:[#allocation4 + $0x78] sm:$0xff] %vm798_vm3, %v7233_v5  ;;  %7346 = vst.msk [vmem:[#allocation2 + $0xc9] sm:$0xff] %vm798_vm3, %v7233_v5 }
 0x74a   : > { %7436 = vst.msk [vmem:[%s11017_s16 + $0x90] sm:$0xff] %vm798_vm3, %v7381_v61  ;;  %7437 = vst.msk [vmem:[%s11017_s16 + $0x98] sm:$0xff] %vm798_vm3, %v7382_v44 }
 0x74b   : > { %7312 = vst.msk [vmem:[#allocation4 + $0x70] sm:$0xff] %vm798_vm3, %v7231_v60  ;;  %7345 = vst.msk [vmem:[#allocation2 + $0xc1] sm:$0xff] %vm798_vm3, %v7231_v60  ;;  %v7237_v50 = vpop.permute.xlu1 %7236 }
 0x74c   : > { %v7386_v56 = vld [vmem:[#allocation2 + $0xb8] sm:$0x3]  ;;  %7315 = vst.msk [vmem:[#allocation4 + $0x88] sm:$0xff] %vm798_vm3, %v7237_v50  ;;  %7348 = vst.msk [vmem:[#allocation2 + $0xe1] sm:$0xff] %vm798_vm3, %v7237_v50  ;;  %v7235_v26 = vpop.permute.xlu0 %7234 }
 0x74d   : > { %7441 = vst.msk [vmem:[%s11017_s16 + $0xb8] sm:$0x3] %vm7419_vm6, %v7386_v56 }
 0x74e   : > { %v7384_v22 = vld [vmem:[#allocation2 + $0xa8] sm:$0xff]  ;;  %v7385_v27 = vld [vmem:[#allocation2 + $0xb0] sm:$0xff]  ;;  %7314 = vst.msk [vmem:[#allocation4 + $0x80] sm:$0xff] %vm798_vm3, %v7235_v26  ;;  %7347 = vst.msk [vmem:[#allocation2 + $0xd9] sm:$0xff] %vm798_vm3, %v7235_v26 }
 0x74f   : > { %7439 = vst.msk [vmem:[%s11017_s16 + $0xa8] sm:$0xff] %vm798_vm3, %v7384_v22  ;;  %7440 = vst.msk [vmem:[%s11017_s16 + $0xb0] sm:$0xff] %vm798_vm3, %v7385_v27  ;;  %v7241_v3 = vpop.permute.xlu1 %7240 }
 0x750   : > { %v7389_v55 = vld [vmem:[#allocation2 + $0xd0] sm:$0x3]  ;;  %7317 = vst.msk [vmem:[#allocation4 + $0x98] sm:$0xff] %vm798_vm3, %v7241_v3  ;;  %7350 = vst.msk [vmem:[#allocation2 + $0xf9] sm:$0xff] %vm798_vm3, %v7241_v3  ;;  %v7239_v18 = vpop.permute.xlu0 %7238 }
 0x751   : > { %7444 = vst.msk [vmem:[%s11017_s16 + $0xd0] sm:$0x3] %vm7419_vm6, %v7389_v55 }
 0x752   : > { %v7387_v48 = vld [vmem:[#allocation2 + $0xc0] sm:$0xff]  ;;  %v7388_v40 = vld [vmem:[#allocation2 + $0xc8] sm:$0xff]  ;;  %7316 = vst.msk [vmem:[#allocation4 + $0x90] sm:$0xff] %vm798_vm3, %v7239_v18  ;;  %7349 = vst.msk [vmem:[#allocation2 + $0xf1] sm:$0xff] %vm798_vm3, %v7239_v18 }
 0x753   : > { %7442 = vst.msk [vmem:[%s11017_s16 + $0xc0] sm:$0xff] %vm798_vm3, %v7387_v48  ;;  %7443 = vst.msk [vmem:[%s11017_s16 + $0xc8] sm:$0xff] %vm798_vm3, %v7388_v40  ;;  %v7392_v63 = vld [vmem:[#allocation2 + $0xe8] sm:$0x3]  ;;  %v7245_v20 = vpop.permute.xlu1 %7244 }
 0x754   : > { %7447 = vst.msk [vmem:[%s11017_s16 + $0xe8] sm:$0x3] %vm7419_vm6, %v7392_v63  ;;  %v7243_v53 = vpop.permute.xlu0 %7242 }
 0x755   : > { %v7390_v33 = vld [vmem:[#allocation2 + $0xd8] sm:$0xff]  ;;  %v7391_v9 = vld [vmem:[#allocation2 + $0xe0] sm:$0xff]  ;;  %7319 = vst.msk [vmem:[#allocation4 + $0xa8] sm:$0xff] %vm798_vm3, %v7245_v20  ;;  %7352 = vst.msk [vmem:[#allocation2 + $0x111] sm:$0xff] %vm798_vm3, %v7245_v20 }
 0x756   : > { %7445 = vst.msk [vmem:[%s11017_s16 + $0xd8] sm:$0xff] %vm798_vm3, %v7390_v33  ;;  %7446 = vst.msk [vmem:[%s11017_s16 + $0xe0] sm:$0xff] %vm798_vm3, %v7391_v9 }
 0x757   : > { %7318 = vst.msk [vmem:[#allocation4 + $0xa0] sm:$0xff] %vm798_vm3, %v7243_v53  ;;  %7351 = vst.msk [vmem:[#allocation2 + $0x109] sm:$0xff] %vm798_vm3, %v7243_v53  ;;  %v7395_v38 = vld [vmem:[#allocation2 + $0x100] sm:$0x3]  ;;  %v7249_v10 = vpop.permute.xlu1 %7248 }
 0x758   : > { %7450 = vst.msk [vmem:[%s11017_s16 + $0x100] sm:$0x3] %vm7419_vm6, %v7395_v38  ;;  %v7247_v32 = vpop.permute.xlu0 %7246 }
 0x759   : > { %v7393_v54 = vld [vmem:[#allocation2 + $0xf0] sm:$0xff]  ;;  %v7394_v39 = vld [vmem:[#allocation2 + $0xf8] sm:$0xff]  ;;  %7321 = vst.msk [vmem:[#allocation4 + $0xb8] sm:$0xff] %vm798_vm3, %v7249_v10  ;;  %7354 = vst.msk [vmem:[#allocation2 + $0x129] sm:$0xff] %vm798_vm3, %v7249_v10 }
 0x75a   : > { %7448 = vst.msk [vmem:[%s11017_s16 + $0xf0] sm:$0xff] %vm798_vm3, %v7393_v54  ;;  %7449 = vst.msk [vmem:[%s11017_s16 + $0xf8] sm:$0xff] %vm798_vm3, %v7394_v39 }
 0x75b   : > { %7320 = vst.msk [vmem:[#allocation4 + $0xb0] sm:$0xff] %vm798_vm3, %v7247_v32  ;;  %7353 = vst.msk [vmem:[#allocation2 + $0x121] sm:$0xff] %vm798_vm3, %v7247_v32  ;;  %v7253_v28 = vpop.permute.xlu1 %7252 }
 0x75c   : > { %v7398_v17 = vld [vmem:[#allocation2 + $0x118] sm:$0x3]  ;;  %7323 = vst.msk [vmem:[#allocation4 + $0xc8] sm:$0xff] %vm798_vm3, %v7253_v28  ;;  %7356 = vst.msk [vmem:[#allocation2 + $0x141] sm:$0xff] %vm798_vm3, %v7253_v28  ;;  %v7251_v45 = vpop.permute.xlu0 %7250 }
 0x75d   : > { %7453 = vst.msk [vmem:[%s11017_s16 + $0x118] sm:$0x3] %vm7419_vm6, %v7398_v17 }
 0x75e   : > { %v7396_v59 = vld [vmem:[#allocation2 + $0x108] sm:$0xff]  ;;  %v7397_v19 = vld [vmem:[#allocation2 + $0x110] sm:$0xff]  ;;  %7322 = vst.msk [vmem:[#allocation4 + $0xc0] sm:$0xff] %vm798_vm3, %v7251_v45  ;;  %7355 = vst.msk [vmem:[#allocation2 + $0x139] sm:$0xff] %vm798_vm3, %v7251_v45 }
 0x75f   : > { %7451 = vst.msk [vmem:[%s11017_s16 + $0x108] sm:$0xff] %vm798_vm3, %v7396_v59  ;;  %7452 = vst.msk [vmem:[%s11017_s16 + $0x110] sm:$0xff] %vm798_vm3, %v7397_v19  ;;  %v7257_v12 = vpop.permute.xlu1 %7256 }
 0x760   : > { %v7401_v13 = vld [vmem:[#allocation2 + $0x130] sm:$0x3]  ;;  %7325 = vst.msk [vmem:[#allocation4 + $0xd8] sm:$0xff] %vm798_vm3, %v7257_v12  ;;  %7358 = vst.msk [vmem:[#allocation2 + $0x159] sm:$0xff] %vm798_vm3, %v7257_v12  ;;  %v7255_v11 = vpop.permute.xlu0 %7254 }
 0x761   : > { %7456 = vst.msk [vmem:[%s11017_s16 + $0x130] sm:$0x3] %vm7419_vm6, %v7401_v13 }
 0x762   : > { %v7399_v4 = vld [vmem:[#allocation2 + $0x120] sm:$0xff]  ;;  %v7400_v62 = vld [vmem:[#allocation2 + $0x128] sm:$0xff]  ;;  %7324 = vst.msk [vmem:[#allocation4 + $0xd0] sm:$0xff] %vm798_vm3, %v7255_v11  ;;  %7357 = vst.msk [vmem:[#allocation2 + $0x151] sm:$0xff] %vm798_vm3, %v7255_v11 }
 0x763   : > { %7454 = vst.msk [vmem:[%s11017_s16 + $0x120] sm:$0xff] %vm798_vm3, %v7399_v4  ;;  %7455 = vst.msk [vmem:[%s11017_s16 + $0x128] sm:$0xff] %vm798_vm3, %v7400_v62  ;;  %v7404_v42 = vld [vmem:[#allocation2 + $0x148] sm:$0x3]  ;;  %v7261_v23 = vpop.permute.xlu1 %7260 }
 0x764   : > { %7459 = vst.msk [vmem:[%s11017_s16 + $0x148] sm:$0x3] %vm7419_vm6, %v7404_v42  ;;  %v7259_v6 = vpop.permute.xlu0 %7258 }
 0x765   : > { %v7402_v34 = vld [vmem:[#allocation2 + $0x138] sm:$0xff]  ;;  %v7403_v0 = vld [vmem:[#allocation2 + $0x140] sm:$0xff]  ;;  %7327 = vst.msk [vmem:[#allocation4 + $0xe8] sm:$0xff] %vm798_vm3, %v7261_v23  ;;  %7360 = vst.msk [vmem:[#allocation2 + $0x171] sm:$0xff] %vm798_vm3, %v7261_v23 }
 0x766   : > { %7457 = vst.msk [vmem:[%s11017_s16 + $0x138] sm:$0xff] %vm798_vm3, %v7402_v34  ;;  %7458 = vst.msk [vmem:[%s11017_s16 + $0x140] sm:$0xff] %vm798_vm3, %v7403_v0 }
 0x767   : > { %7326 = vst.msk [vmem:[#allocation4 + $0xe0] sm:$0xff] %vm798_vm3, %v7259_v6  ;;  %7359 = vst.msk [vmem:[#allocation2 + $0x169] sm:$0xff] %vm798_vm3, %v7259_v6  ;;  %v7407_v57 = vld [vmem:[#allocation2 + $0x160] sm:$0x3]  ;;  %v7265_v51 = vpop.permute.xlu1 %7264 }
 0x768   : > { %7462 = vst.msk [vmem:[%s11017_s16 + $0x160] sm:$0x3] %vm7419_vm6, %v7407_v57  ;;  %v7263_v41 = vpop.permute.xlu0 %7262 }
 0x769   : > { %v7405_v2 = vld [vmem:[#allocation2 + $0x150] sm:$0xff]  ;;  %v7406_v25 = vld [vmem:[#allocation2 + $0x158] sm:$0xff]  ;;  %7329 = vst.msk [vmem:[#allocation4 + $0xf8] sm:$0xff] %vm798_vm3, %v7265_v51  ;;  %7362 = vst.msk [vmem:[#allocation2 + $0x189] sm:$0xff] %vm798_vm3, %v7265_v51 }
 0x76a   : > { %7460 = vst.msk [vmem:[%s11017_s16 + $0x150] sm:$0xff] %vm798_vm3, %v7405_v2  ;;  %7461 = vst.msk [vmem:[%s11017_s16 + $0x158] sm:$0xff] %vm798_vm3, %v7406_v25 }
 0x76b   : > { %7328 = vst.msk [vmem:[#allocation4 + $0xf0] sm:$0xff] %vm798_vm3, %v7263_v41  ;;  %7361 = vst.msk [vmem:[#allocation2 + $0x181] sm:$0xff] %vm798_vm3, %v7263_v41 }
 0x76c   : > { %v7410_v29 = vld [vmem:[#allocation2 + $0x178] sm:$0x3] }
 0x76d   : > { %7465 = vst.msk [vmem:[%s11017_s16 + $0x178] sm:$0x3] %vm7419_vm6, %v7410_v29 }
 0x76e   : > { %v7408_v36 = vld [vmem:[#allocation2 + $0x168] sm:$0xff]  ;;  %v7409_v37 = vld [vmem:[#allocation2 + $0x170] sm:$0xff] }
 0x76f   : > { %7463 = vst.msk [vmem:[%s11017_s16 + $0x168] sm:$0xff] %vm798_vm3, %v7408_v36  ;;  %7464 = vst.msk [vmem:[%s11017_s16 + $0x170] sm:$0xff] %vm798_vm3, %v7409_v37 }
 0x770   : > { %v7413_v16 = vld [vmem:[#allocation2 + $0x190] sm:$0x3] }
 0x771   : > { %7468 = vst.msk [vmem:[%s11017_s16 + $0x190] sm:$0x3] %vm7419_vm6, %v7413_v16 }
 0x772   : > { %v7411_v24 = vld [vmem:[#allocation2 + $0x180] sm:$0xff]  ;;  %v7412_v7 = vld [vmem:[#allocation2 + $0x188] sm:$0xff] }
 0x773   : > { %7466 = vst.msk [vmem:[%s11017_s16 + $0x180] sm:$0xff] %vm798_vm3, %v7411_v24  ;;  %7467 = vst.msk [vmem:[%s11017_s16 + $0x188] sm:$0xff] %vm798_vm3, %v7412_v7 }
 0x774 PF: > { %s15_s22 = sadd.s32 1, %s10931_s22   ;;  %s14753_s18 = smov %s10923_s20 }
 0x775   : > { %p12_p8 = scmp.ge.s32.totalorder %s15_s22, 10   ;;  %s14754_s19 = smov %s10927_s21 }
 0x776   : > { %s14755_s20 = smov %s14758_s23  ;;  %s14756_s21 = smov %s14762_s24 }
 0x777   :  { %14 = sbr.rel (!%p12_p8) target bundleno = 3 (0x3), region = 98 }

</bundles_post_ra>
